<compile_context>
chip_gen: v7x
topology: tpu7x:2x2x1
jax: 0.10.0
libtpu: 0.0.40
codegen_flags: <defaults>
</compile_context>

<pallas_src>
import numpy as np
import jax
import jax.numpy as jnp
from jax.experimental import pallas as pl
from jax.experimental.pallas import tpu as pltpu

# ---- "opt" hyperparameters (small, deterministic) ----
N_CLASSES = 8
LATENT_DIM = 24
CHANNELS, IMG_H, IMG_W = 2, 8, 8
IMG_PROD = CHANNELS * IMG_H * IMG_W            # 128
LRELU_SLOPE = 0.2
BN_EPS = 0.8                                   # nn.BatchNorm1d(out_feat, 0.8) -> eps=0.8
HIDDEN = (128, 256, 512, 1024)
IN_DIM = LATENT_DIM + N_CLASSES                # 32 real input features
MAX_BATCH = 1024                               # full-batch-BN tile must fit v7x 64 MiB VMEM

# Packed layout of all small per-feature vectors -> one (1, VEC_LEN) f32 DMA.
# All sizes and therefore offsets are multiples of 128 (lane-aligned slices).
_VEC_LAYOUT = (("b1", HIDDEN[0]),
               ("g2", HIDDEN[1]), ("be2", HIDDEN[1]),
               ("g3", HIDDEN[2]), ("be3", HIDDEN[2]),
               ("g4", HIDDEN[3]), ("be4", HIDDEN[3]),
               ("b5", IMG_PROD))
_VEC_SIZE = dict(_VEC_LAYOUT)
_VEC_OFF = {}
_off = 0
for _name, _n in _VEC_LAYOUT:
    _VEC_OFF[_name] = _off
    _off += _n
VEC_LEN = _off                                 # 3840 = 30 * 128


def _vec(ref, name):
    """Static lane-slice of the packed (1, VEC_LEN) vector operand."""
    off = _VEC_OFF[name]
    return ref[:, off:off + _VEC_SIZE[name]]


def _leaky(x):
    # max(x, 0.2x) == LeakyReLU(0.2) since 0 < slope < 1 (mul + max, no select).
    return jnp.maximum(x, LRELU_SLOPE * x)


def _bn_leaky(x_f32, gamma, beta):
    """Folded training-mode BatchNorm1d + LeakyReLU.

    Stats (mean, E[x^2]) and the folded scale/shift are computed in f32 from
    the f32 MXU accumulator; the per-element scale/shift + LeakyReLU run in
    bf16 and feed the next dot directly (halves VALU work on v6e/v7x and
    removes a separate cast pass).  On v5e (no bf16 VALU) this path is merely
    suboptimal, not incorrect.
    """
    m = jnp.mean(x_f32, axis=0, keepdims=True)
    m2 = jnp.mean(x_f32 * x_f32, axis=0, keepdims=True)
    inv = jax.lax.rsqrt(m2 - m * m + BN_EPS)
    scale = gamma * inv
    shift = beta - m * scale
    y = (x_f32.astype(jnp.bfloat16) * scale.astype(jnp.bfloat16)
         + shift.astype(jnp.bfloat16))
    return _leaky(y)


def generator_kernel(labels_ref, noise_ref, emb_ref,
                     w1e_ref, w1n_ref, w2_ref, w3_ref,
                     w4_hbm, w5_hbm, vec_ref,
                     out_ref,
                     w4_buf, w5_buf, dma_sem):
    # Kick off the big layer-4/5 weight DMAs immediately; they are hidden
    # behind the layer-1..3 compute and waited on right before their dots.
    w4_cp = pltpu.make_async_copy(w4_hbm, w4_buf, dma_sem.at[0])
    w5_cp = pltpu.make_async_copy(w5_hbm, w5_buf, dma_sem.at[1])
    w4_cp.start()
    w5_cp.start()

    b = noise_ref.shape[0]

    # Fused embedding gather: one_hot(labels) @ emb selects rows exactly
    # (one-hot entries are exact in bf16; the f32 accumulator reproduces the
    # bf16-rounded embedding row bit-for-bit, same as the previous version's
    # gen_input cast).
    lab = labels_ref[...]                                        # (B, 1) int32
    cls = jax.lax.broadcasted_iota(jnp.int32, (b, N_CLASSES), 1)
    one_hot = (lab == cls).astype(jnp.bfloat16)                  # (B, 8)
    emb_rows = jnp.dot(one_hot, emb_ref[...].astype(jnp.bfloat16),
                       preferred_element_type=jnp.float32)       # (B, 8) f32

    # Layer 1: Linear(32, 128) split into emb-rows part + noise-rows part
    # (no concatenated / lane-padded input ever materialized).
    h = (jnp.dot(emb_rows.astype(jnp.bfloat16), w1e_ref[...],
                 preferred_element_type=jnp.float32)
         + jnp.dot(noise_ref[...].astype(jnp.bfloat16), w1n_ref[...],
                   preferred_element_type=jnp.float32)
         + _vec(vec_ref, "b1"))
    hb = _leaky(h.astype(jnp.bfloat16))

    # Layer 2: Linear(128,256) -> BN -> LeakyReLU (pre-BN bias cancels exactly).
    h = jnp.dot(hb, w2_ref[...], preferred_element_type=jnp.float32)
    hb = _bn_leaky(h, _vec(vec_ref, "g2"), _vec(vec_ref, "be2"))

    # Layer 3: Linear(256,512) -> BN -> LeakyReLU.
    h = jnp.dot(hb, w3_ref[...], preferred_element_type=jnp.float32)
    hb = _bn_leaky(h, _vec(vec_ref, "g3"), _vec(vec_ref, "be3"))

    # Layer 4: Linear(512,1024) -> BN -> LeakyReLU (weights from async DMA).
    w4_cp.wait()
    h = jnp.dot(hb, w4_buf[...], preferred_element_type=jnp.float32)
    hb = _bn_leaky(h, _vec(vec_ref, "g4"), _vec(vec_ref, "be4"))

    # Layer 5: Linear(1024, prod(img_shape)) -> Tanh (f32 output).
    w5_cp.wait()
    h = (jnp.dot(hb, w5_buf[...], preferred_element_type=jnp.float32)
         + _vec(vec_ref, "b5"))
    out_ref[...] = jnp.tanh(h)


def init_params(key):
    """Deterministic parameter init (shapes follow the PyTorch module).

    Linear weights stored (in, out) in bf16; biases / BN affine / embedding
    stay f32.  Layer-1 weight is split into embedding rows (w1e) and noise
    rows (w1n).  b2/b3/b4 are dropped (exactly cancelled by training-mode BN).
    All small per-feature vectors are packed into one (1, VEC_LEN) array.
    """
    dims = [IN_DIM, *HIDDEN, IMG_PROD]
    keys = jax.random.split(key, 2 * (len(dims) - 1) + 1)
    p = {}
    # Embedding(n_classes, n_classes) ~ N(0, 1)
    p["emb"] = jax.random.normal(keys[0], (N_CLASSES, N_CLASSES), jnp.float32)

    w_f32, b_f32 = {}, {}
    for i in range(len(dims) - 1):
        fan_in, fan_out = dims[i], dims[i + 1]
        bound = 1.0 / np.sqrt(fan_in)
        w_f32[i + 1] = jax.random.uniform(keys[2 * i + 1], (fan_in, fan_out),
                                          jnp.float32, -bound, bound)
        b_f32[i + 1] = jax.random.uniform(keys[2 * i + 2], (1, fan_out),
                                          jnp.float32, -bound, bound)

    p["w1e"] = w_f32[1][:N_CLASSES].astype(jnp.bfloat16)   # (8, 128)
    p["w1n"] = w_f32[1][N_CLASSES:].astype(jnp.bfloat16)   # (24, 128)
    for i in (2, 3, 4, 5):
        p[f"w{i}"] = w_f32[i].astype(jnp.bfloat16)

    gamma = {d: jnp.ones((1, d), jnp.float32) for d in HIDDEN[1:]}
    beta = {d: jnp.zeros((1, d), jnp.float32) for d in HIDDEN[1:]}
    pieces = {"b1": b_f32[1], "b5": b_f32[5],
              "g2": gamma[256], "be2": beta[256],
              "g3": gamma[512], "be3": beta[512],
              "g4": gamma[1024], "be4": beta[1024]}
    p["vec"] = jnp.concatenate([pieces[name] for name, _ in _VEC_LAYOUT],
                               axis=1)                      # (1, 3840) f32
    return p


def _generator_forward(params, noise, labels):
    b = noise.shape[0]
    assert b % 8 == 0 and b <= MAX_BATCH, \
        "batch must be 8-aligned and fit the single full-batch-BN VMEM tile"

    operands = (
        labels.reshape(b, 1).astype(jnp.int32),   # (B,1) — replaces (B,128) gen_input
        noise.astype(jnp.float32),                # (B,24)
        params["emb"],
        params["w1e"], params["w1n"], params["w2"], params["w3"],
        params["w4"], params["w5"],               # stay in HBM; async DMA in kernel
        params["vec"],
    )

    vmem = pl.BlockSpec(memory_space=pltpu.MemorySpace.VMEM)
    hbm = pl.BlockSpec(memory_space=pl.ANY)
    in_specs = [vmem] * 7 + [hbm, hbm, vmem]

    # Advisory cost estimate for XLA scheduling (real K=8/24 for layer 1).
    flops = 2 * b * (N_CLASSES * N_CLASSES
                     + N_CLASSES * HIDDEN[0] + LATENT_DIM * HIDDEN[0]
                     + HIDDEN[0] * HIDDEN[1] + HIDDEN[1] * HIDDEN[2]
                     + HIDDEN[2] * HIDDEN[3] + HIDDEN[3] * IMG_PROD)
    transcendentals = b * IMG_PROD + sum(HIDDEN[1:])          # tanh + BN rsqrt
    bytes_accessed = int(sum(o.size * o.dtype.itemsize for o in operands)
                         + b * IMG_PROD * 4)

    # VMEM budget: operands + w4/w5 scratch + f32/bf16 live activations, with
    # 2x headroom, capped at 56 MiB (< v7x's 64 MiB physical VMEM per TC).
    act_bytes = 6 * b * (sum(HIDDEN) + IMG_PROD)              # f32 acc + bf16 copies
    vmem_limit = int(min(56 << 20, max(16 << 20, 2 * (bytes_accessed + act_bytes))))

    img_flat = pl.pallas_call(
        generator_kernel,
        out_shape=jax.ShapeDtypeStruct((b, IMG_PROD), jnp.float32),
        in_specs=in_specs,
        out_specs=vmem,
        scratch_shapes=[
            pltpu.VMEM((HIDDEN[2], HIDDEN[3]), jnp.bfloat16),   # w4 buffer (512,1024)
            pltpu.VMEM((HIDDEN[3], IMG_PROD), jnp.bfloat16),    # w5 buffer (1024,128)
            pltpu.SemaphoreType.DMA((2,)),
        ],
        cost_estimate=pl.CostEstimate(flops=flops,
                                      transcendentals=transcendentals,
                                      bytes_accessed=bytes_accessed),
        compiler_params=pltpu.CompilerParams(vmem_limit_bytes=vmem_limit),
    )(*operands)
    # img.view(img.size(0), *img_shape) -> NCHW
    return img_flat.reshape(b, CHANNELS, IMG_H, IMG_W)


# Jit the whole forward so the tiny reshape/cast ops fuse with the kernel launch.
generator_forward = jax.jit(_generator_forward)


if __name__ == "__main__":
    key = jax.random.PRNGKey(0)
    k_param, k_noise, k_label = jax.random.split(key, 3)

    batch = 256   # fills MXU rows (>=128 v5e / 256 v6e,v7x); BN stays full-batch
    params = init_params(k_param)
    noise = jax.random.normal(k_noise, (batch, LATENT_DIM), jnp.float32)
    labels = jax.random.randint(k_label, (batch,), 0, N_CLASSES, jnp.int32)

    img = generator_forward(params, noise, labels)
    jax.block_until_ready(img)
    assert img.shape == (batch, CHANNELS, IMG_H, IMG_W)
    assert img.dtype == jnp.float32
    print("KERNEL_OK")
</pallas_src>

<mosaic_0001>
module attributes {stable_mosaic.version = 11 : i64} {
  func.func @generator_kernel(%arg0: memref<256x1xi32, #tpu.memory_space<vmem>>, %arg1: memref<256x24xf32, #tpu.memory_space<vmem>>, %arg2: memref<8x8xf32, #tpu.memory_space<vmem>>, %arg3: memref<8x128xbf16, #tpu.memory_space<vmem>>, %arg4: memref<24x128xbf16, #tpu.memory_space<vmem>>, %arg5: memref<128x256xbf16, #tpu.memory_space<vmem>>, %arg6: memref<256x512xbf16, #tpu.memory_space<vmem>>, %arg7: memref<512x1024xbf16, #tpu.memory_space<any>>, %arg8: memref<1024x128xbf16, #tpu.memory_space<any>>, %arg9: memref<1x3840xf32, #tpu.memory_space<vmem>>, %arg10: memref<256x128xf32, #tpu.memory_space<vmem>>, %arg11: memref<512x1024xbf16, #tpu.memory_space<vmem>>, %arg12: memref<1024x128xbf16, #tpu.memory_space<vmem>>, %arg13: memref<2x!tpu.dma_semaphore, #tpu.memory_space<semaphore_mem>>) attributes {dimension_semantics = [], scalar_prefetch = 0 : i64, scratch_operands = 3 : i64, tpu.core_type = #tpu.core_type<tc>} {
    %c0_i32 = arith.constant 0 : i32
    %0 = tpu.memref_slice %arg13[%c0_i32] : memref<2x!tpu.dma_semaphore, #tpu.memory_space<semaphore_mem>> -> memref<1x!tpu.dma_semaphore, #tpu.memory_space<semaphore_mem>>
    %1 = tpu.memref_squeeze %0 : memref<1x!tpu.dma_semaphore, #tpu.memory_space<semaphore_mem>> -> memref<!tpu.dma_semaphore, #tpu.memory_space<semaphore_mem>>
    tpu.enqueue_dma source(%arg7 : memref<512x1024xbf16, #tpu.memory_space<any>>) target(%arg11 : memref<512x1024xbf16, #tpu.memory_space<vmem>>) target_semaphore(%1 : memref<!tpu.dma_semaphore, #tpu.memory_space<semaphore_mem>>)
    %c1_i32 = arith.constant 1 : i32
    %2 = tpu.memref_slice %arg13[%c1_i32] : memref<2x!tpu.dma_semaphore, #tpu.memory_space<semaphore_mem>> -> memref<1x!tpu.dma_semaphore, #tpu.memory_space<semaphore_mem>>
    %3 = tpu.memref_squeeze %2 : memref<1x!tpu.dma_semaphore, #tpu.memory_space<semaphore_mem>> -> memref<!tpu.dma_semaphore, #tpu.memory_space<semaphore_mem>>
    tpu.enqueue_dma source(%arg8 : memref<1024x128xbf16, #tpu.memory_space<any>>) target(%arg12 : memref<1024x128xbf16, #tpu.memory_space<vmem>>) target_semaphore(%3 : memref<!tpu.dma_semaphore, #tpu.memory_space<semaphore_mem>>)
    %c0 = arith.constant 0 : index
    %c0_0 = arith.constant 0 : index
    %4 = vector.load %arg0[%c0, %c0_0] : memref<256x1xi32, #tpu.memory_space<vmem>>, vector<256x1xi32>
    %5 = tpu.iota {dimensions = array<i32: 1>} : vector<256x8xi32>
    %6 = vector.broadcast %4 : vector<256x1xi32> to vector<256x8xi32>
    %7 = arith.cmpi eq, %6, %5 : vector<256x8xi32>
    %8 = arith.extui %7 : vector<256x8xi1> to vector<256x8xi32>
    %9 = arith.sitofp %8 : vector<256x8xi32> to vector<256x8xf32>
    %10 = arith.truncf %9 : vector<256x8xf32> to vector<256x8xbf16>
    %c0_1 = arith.constant 0 : index
    %c0_2 = arith.constant 0 : index
    %11 = vector.load %arg2[%c0_1, %c0_2] : memref<8x8xf32, #tpu.memory_space<vmem>>, vector<8x8xf32>
    %12 = arith.truncf %11 : vector<8x8xf32> to vector<8x8xbf16>
    %cst = arith.constant dense<0.000000e+00> : vector<256x8xf32>
    %13 = tpu.matmul %10, %12, %cst {dimension_numbers = #tpu.dot_dimension_numbers<[1], [0], [0], [1], [0, 0, 1, 1], [], []>} : vector<256x8xbf16>, vector<8x8xbf16>, vector<256x8xf32> -> vector<256x8xf32>
    %14 = arith.truncf %13 : vector<256x8xf32> to vector<256x8xbf16>
    %c0_3 = arith.constant 0 : index
    %c0_4 = arith.constant 0 : index
    %15 = vector.load %arg3[%c0_3, %c0_4] : memref<8x128xbf16, #tpu.memory_space<vmem>>, vector<8x128xbf16>
    %cst_5 = arith.constant dense<0.000000e+00> : vector<256x128xf32>
    %16 = tpu.matmul %14, %15, %cst_5 {dimension_numbers = #tpu.dot_dimension_numbers<[1], [0], [0], [1], [0, 0, 1, 1], [], []>} : vector<256x8xbf16>, vector<8x128xbf16>, vector<256x128xf32> -> vector<256x128xf32>
    %c0_6 = arith.constant 0 : index
    %c0_7 = arith.constant 0 : index
    %17 = vector.load %arg1[%c0_6, %c0_7] : memref<256x24xf32, #tpu.memory_space<vmem>>, vector<256x24xf32>
    %18 = arith.truncf %17 : vector<256x24xf32> to vector<256x24xbf16>
    %c0_8 = arith.constant 0 : index
    %c0_9 = arith.constant 0 : index
    %19 = vector.load %arg4[%c0_8, %c0_9] : memref<24x128xbf16, #tpu.memory_space<vmem>>, vector<24x128xbf16>
    %cst_10 = arith.constant dense<0.000000e+00> : vector<256x128xf32>
    %20 = tpu.matmul %18, %19, %cst_10 {dimension_numbers = #tpu.dot_dimension_numbers<[1], [0], [0], [1], [0, 0, 1, 1], [], []>} : vector<256x24xbf16>, vector<24x128xbf16>, vector<256x128xf32> -> vector<256x128xf32>
    %21 = arith.addf %16, %20 : vector<256x128xf32>
    %c0_11 = arith.constant 0 : index
    %c0_12 = arith.constant 0 : index
    %22 = vector.load %arg9[%c0_11, %c0_12] : memref<1x3840xf32, #tpu.memory_space<vmem>>, vector<1x128xf32>
    %23 = vector.broadcast %22 : vector<1x128xf32> to vector<256x128xf32>
    %24 = arith.addf %21, %23 : vector<256x128xf32>
    %25 = arith.truncf %24 : vector<256x128xf32> to vector<256x128xbf16>
    %cst_13 = arith.constant 2.001950e-01 : bf16
    %26 = vector.broadcast %cst_13 : bf16 to vector<256x128xbf16>
    %27 = arith.mulf %26, %25 : vector<256x128xbf16>
    %28 = arith.maximumf %25, %27 : vector<256x128xbf16>
    %c0_14 = arith.constant 0 : index
    %c0_15 = arith.constant 0 : index
    %29 = vector.load %arg5[%c0_14, %c0_15] : memref<128x256xbf16, #tpu.memory_space<vmem>>, vector<128x256xbf16>
    %cst_16 = arith.constant dense<0.000000e+00> : vector<256x256xf32>
    %30 = tpu.matmul %28, %29, %cst_16 {dimension_numbers = #tpu.dot_dimension_numbers<[1], [0], [0], [1], [0, 0, 1, 1], [], []>} : vector<256x128xbf16>, vector<128x256xbf16>, vector<256x256xf32> -> vector<256x256xf32>
    %c0_17 = arith.constant 0 : index
    %c128 = arith.constant 128 : index
    %31 = vector.load %arg9[%c0_17, %c128] : memref<1x3840xf32, #tpu.memory_space<vmem>>, vector<1x256xf32>
    %c0_18 = arith.constant 0 : index
    %c384 = arith.constant 384 : index
    %32 = vector.load %arg9[%c0_18, %c384] : memref<1x3840xf32, #tpu.memory_space<vmem>>, vector<1x256xf32>
    %cst_19 = arith.constant dense<0.000000e+00> : vector<256xf32>
    %33 = vector.multi_reduction <add>, %30, %cst_19 [0] : vector<256x256xf32> to vector<256xf32>
    %34 = vector.shape_cast %33 : vector<256xf32> to vector<1x256xf32>
    %cst_20 = arith.constant 2.560000e+02 : f32
    %35 = vector.broadcast %cst_20 : f32 to vector<1x256xf32>
    %36 = arith.divf %34, %35 : vector<1x256xf32>
    %37 = arith.mulf %30, %30 : vector<256x256xf32>
    %cst_21 = arith.constant dense<0.000000e+00> : vector<256xf32>
    %38 = vector.multi_reduction <add>, %37, %cst_21 [0] : vector<256x256xf32> to vector<256xf32>
    %39 = vector.shape_cast %38 : vector<256xf32> to vector<1x256xf32>
    %cst_22 = arith.constant 2.560000e+02 : f32
    %40 = vector.broadcast %cst_22 : f32 to vector<1x256xf32>
    %41 = arith.divf %39, %40 : vector<1x256xf32>
    %42 = arith.mulf %36, %36 : vector<1x256xf32>
    %43 = arith.subf %41, %42 : vector<1x256xf32>
    %cst_23 = arith.constant 8.000000e-01 : f32
    %44 = vector.broadcast %cst_23 : f32 to vector<1x256xf32>
    %45 = arith.addf %43, %44 : vector<1x256xf32>
    %46 = math.rsqrt %45 : vector<1x256xf32>
    %47 = arith.mulf %31, %46 : vector<1x256xf32>
    %48 = arith.mulf %36, %47 : vector<1x256xf32>
    %49 = arith.subf %32, %48 : vector<1x256xf32>
    %50 = arith.truncf %30 : vector<256x256xf32> to vector<256x256xbf16>
    %51 = arith.truncf %47 : vector<1x256xf32> to vector<1x256xbf16>
    %52 = vector.broadcast %51 : vector<1x256xbf16> to vector<256x256xbf16>
    %53 = arith.mulf %50, %52 : vector<256x256xbf16>
    %54 = arith.truncf %49 : vector<1x256xf32> to vector<1x256xbf16>
    %55 = vector.broadcast %54 : vector<1x256xbf16> to vector<256x256xbf16>
    %56 = arith.addf %53, %55 : vector<256x256xbf16>
    %cst_24 = arith.constant 2.001950e-01 : bf16
    %57 = vector.broadcast %cst_24 : bf16 to vector<256x256xbf16>
    %58 = arith.mulf %57, %56 : vector<256x256xbf16>
    %59 = arith.maximumf %56, %58 : vector<256x256xbf16>
    %c0_25 = arith.constant 0 : index
    %c0_26 = arith.constant 0 : index
    %60 = vector.load %arg6[%c0_25, %c0_26] : memref<256x512xbf16, #tpu.memory_space<vmem>>, vector<256x512xbf16>
    %cst_27 = arith.constant dense<0.000000e+00> : vector<256x512xf32>
    %61 = tpu.matmul %59, %60, %cst_27 {dimension_numbers = #tpu.dot_dimension_numbers<[1], [0], [0], [1], [0, 0, 1, 1], [], []>} : vector<256x256xbf16>, vector<256x512xbf16>, vector<256x512xf32> -> vector<256x512xf32>
    %c0_28 = arith.constant 0 : index
    %c640 = arith.constant 640 : index
    %62 = vector.load %arg9[%c0_28, %c640] : memref<1x3840xf32, #tpu.memory_space<vmem>>, vector<1x512xf32>
    %c0_29 = arith.constant 0 : index
    %c1152 = arith.constant 1152 : index
    %63 = vector.load %arg9[%c0_29, %c1152] : memref<1x3840xf32, #tpu.memory_space<vmem>>, vector<1x512xf32>
    %cst_30 = arith.constant dense<0.000000e+00> : vector<512xf32>
    %64 = vector.multi_reduction <add>, %61, %cst_30 [0] : vector<256x512xf32> to vector<512xf32>
    %65 = vector.shape_cast %64 : vector<512xf32> to vector<1x512xf32>
    %cst_31 = arith.constant 2.560000e+02 : f32
    %66 = vector.broadcast %cst_31 : f32 to vector<1x512xf32>
    %67 = arith.divf %65, %66 : vector<1x512xf32>
    %68 = arith.mulf %61, %61 : vector<256x512xf32>
    %cst_32 = arith.constant dense<0.000000e+00> : vector<512xf32>
    %69 = vector.multi_reduction <add>, %68, %cst_32 [0] : vector<256x512xf32> to vector<512xf32>
    %70 = vector.shape_cast %69 : vector<512xf32> to vector<1x512xf32>
    %cst_33 = arith.constant 2.560000e+02 : f32
    %71 = vector.broadcast %cst_33 : f32 to vector<1x512xf32>
    %72 = arith.divf %70, %71 : vector<1x512xf32>
    %73 = arith.mulf %67, %67 : vector<1x512xf32>
    %74 = arith.subf %72, %73 : vector<1x512xf32>
    %cst_34 = arith.constant 8.000000e-01 : f32
    %75 = vector.broadcast %cst_34 : f32 to vector<1x512xf32>
    %76 = arith.addf %74, %75 : vector<1x512xf32>
    %77 = math.rsqrt %76 : vector<1x512xf32>
    %78 = arith.mulf %62, %77 : vector<1x512xf32>
    %79 = arith.mulf %67, %78 : vector<1x512xf32>
    %80 = arith.subf %63, %79 : vector<1x512xf32>
    %81 = arith.truncf %61 : vector<256x512xf32> to vector<256x512xbf16>
    %82 = arith.truncf %78 : vector<1x512xf32> to vector<1x512xbf16>
    %83 = vector.broadcast %82 : vector<1x512xbf16> to vector<256x512xbf16>
    %84 = arith.mulf %81, %83 : vector<256x512xbf16>
    %85 = arith.truncf %80 : vector<1x512xf32> to vector<1x512xbf16>
    %86 = vector.broadcast %85 : vector<1x512xbf16> to vector<256x512xbf16>
    %87 = arith.addf %84, %86 : vector<256x512xbf16>
    %cst_35 = arith.constant 2.001950e-01 : bf16
    %88 = vector.broadcast %cst_35 : bf16 to vector<256x512xbf16>
    %89 = arith.mulf %88, %87 : vector<256x512xbf16>
    %90 = arith.maximumf %87, %89 : vector<256x512xbf16>
    %c0_i32_36 = arith.constant 0 : i32
    %91 = tpu.memref_slice %arg13[%c0_i32_36] : memref<2x!tpu.dma_semaphore, #tpu.memory_space<semaphore_mem>> -> memref<1x!tpu.dma_semaphore, #tpu.memory_space<semaphore_mem>>
    %92 = tpu.memref_squeeze %91 : memref<1x!tpu.dma_semaphore, #tpu.memory_space<semaphore_mem>> -> memref<!tpu.dma_semaphore, #tpu.memory_space<semaphore_mem>>
    tpu.wait_dma2 semaphore(%92 : memref<!tpu.dma_semaphore, #tpu.memory_space<semaphore_mem>>) src(%arg7 : memref<512x1024xbf16, #tpu.memory_space<any>>) dst(%arg11 : memref<512x1024xbf16, #tpu.memory_space<vmem>>)
    %c0_37 = arith.constant 0 : index
    %c0_38 = arith.constant 0 : index
    %93 = vector.load %arg11[%c0_37, %c0_38] : memref<512x1024xbf16, #tpu.memory_space<vmem>>, vector<512x1024xbf16>
    %cst_39 = arith.constant dense<0.000000e+00> : vector<256x1024xf32>
    %94 = tpu.matmul %90, %93, %cst_39 {dimension_numbers = #tpu.dot_dimension_numbers<[1], [0], [0], [1], [0, 0, 1, 1], [], []>} : vector<256x512xbf16>, vector<512x1024xbf16>, vector<256x1024xf32> -> vector<256x1024xf32>
    %c0_40 = arith.constant 0 : index
    %c1664 = arith.constant 1664 : index
    %95 = vector.load %arg9[%c0_40, %c1664] : memref<1x3840xf32, #tpu.memory_space<vmem>>, vector<1x1024xf32>
    %c0_41 = arith.constant 0 : index
    %c2688 = arith.constant 2688 : index
    %96 = vector.load %arg9[%c0_41, %c2688] : memref<1x3840xf32, #tpu.memory_space<vmem>>, vector<1x1024xf32>
    %cst_42 = arith.constant dense<0.000000e+00> : vector<1024xf32>
    %97 = vector.multi_reduction <add>, %94, %cst_42 [0] : vector<256x1024xf32> to vector<1024xf32>
    %98 = vector.shape_cast %97 : vector<1024xf32> to vector<1x1024xf32>
    %cst_43 = arith.constant 2.560000e+02 : f32
    %99 = vector.broadcast %cst_43 : f32 to vector<1x1024xf32>
    %100 = arith.divf %98, %99 : vector<1x1024xf32>
    %101 = arith.mulf %94, %94 : vector<256x1024xf32>
    %cst_44 = arith.constant dense<0.000000e+00> : vector<1024xf32>
    %102 = vector.multi_reduction <add>, %101, %cst_44 [0] : vector<256x1024xf32> to vector<1024xf32>
    %103 = vector.shape_cast %102 : vector<1024xf32> to vector<1x1024xf32>
    %cst_45 = arith.constant 2.560000e+02 : f32
    %104 = vector.broadcast %cst_45 : f32 to vector<1x1024xf32>
    %105 = arith.divf %103, %104 : vector<1x1024xf32>
    %106 = arith.mulf %100, %100 : vector<1x1024xf32>
    %107 = arith.subf %105, %106 : vector<1x1024xf32>
    %cst_46 = arith.constant 8.000000e-01 : f32
    %108 = vector.broadcast %cst_46 : f32 to vector<1x1024xf32>
    %109 = arith.addf %107, %108 : vector<1x1024xf32>
    %110 = math.rsqrt %109 : vector<1x1024xf32>
    %111 = arith.mulf %95, %110 : vector<1x1024xf32>
    %112 = arith.mulf %100, %111 : vector<1x1024xf32>
    %113 = arith.subf %96, %112 : vector<1x1024xf32>
    %114 = arith.truncf %94 : vector<256x1024xf32> to vector<256x1024xbf16>
    %115 = arith.truncf %111 : vector<1x1024xf32> to vector<1x1024xbf16>
    %116 = vector.broadcast %115 : vector<1x1024xbf16> to vector<256x1024xbf16>
    %117 = arith.mulf %114, %116 : vector<256x1024xbf16>
    %118 = arith.truncf %113 : vector<1x1024xf32> to vector<1x1024xbf16>
    %119 = vector.broadcast %118 : vector<1x1024xbf16> to vector<256x1024xbf16>
    %120 = arith.addf %117, %119 : vector<256x1024xbf16>
    %cst_47 = arith.constant 2.001950e-01 : bf16
    %121 = vector.broadcast %cst_47 : bf16 to vector<256x1024xbf16>
    %122 = arith.mulf %121, %120 : vector<256x1024xbf16>
    %123 = arith.maximumf %120, %122 : vector<256x1024xbf16>
    %c1_i32_48 = arith.constant 1 : i32
    %124 = tpu.memref_slice %arg13[%c1_i32_48] : memref<2x!tpu.dma_semaphore, #tpu.memory_space<semaphore_mem>> -> memref<1x!tpu.dma_semaphore, #tpu.memory_space<semaphore_mem>>
    %125 = tpu.memref_squeeze %124 : memref<1x!tpu.dma_semaphore, #tpu.memory_space<semaphore_mem>> -> memref<!tpu.dma_semaphore, #tpu.memory_space<semaphore_mem>>
    tpu.wait_dma2 semaphore(%125 : memref<!tpu.dma_semaphore, #tpu.memory_space<semaphore_mem>>) src(%arg8 : memref<1024x128xbf16, #tpu.memory_space<any>>) dst(%arg12 : memref<1024x128xbf16, #tpu.memory_space<vmem>>)
    %c0_49 = arith.constant 0 : index
    %c0_50 = arith.constant 0 : index
    %126 = vector.load %arg12[%c0_49, %c0_50] : memref<1024x128xbf16, #tpu.memory_space<vmem>>, vector<1024x128xbf16>
    %cst_51 = arith.constant dense<0.000000e+00> : vector<256x128xf32>
    %127 = tpu.matmul %123, %126, %cst_51 {dimension_numbers = #tpu.dot_dimension_numbers<[1], [0], [0], [1], [0, 0, 1, 1], [], []>} : vector<256x1024xbf16>, vector<1024x128xbf16>, vector<256x128xf32> -> vector<256x128xf32>
    %c0_52 = arith.constant 0 : index
    %c3712 = arith.constant 3712 : index
    %128 = vector.load %arg9[%c0_52, %c3712] : memref<1x3840xf32, #tpu.memory_space<vmem>>, vector<1x128xf32>
    %129 = vector.broadcast %128 : vector<1x128xf32> to vector<256x128xf32>
    %130 = arith.addf %127, %129 : vector<256x128xf32>
    %131 = math.tanh %130 : vector<256x128xf32>
    %c0_53 = arith.constant 0 : index
    %c0_54 = arith.constant 0 : index
    %132 = vector.load %arg10[%c0_53, %c0_54] : memref<256x128xf32, #tpu.memory_space<vmem>>, vector<256x128xf32>
    tpu.vector_store %arg10[%c0_53, %c0_54], %131 {strides = array<i32>} : memref<256x128xf32, #tpu.memory_space<vmem>>, vector<256x128xf32>,
    return
  }
}

</mosaic_0001>

<bundles_post_ra>
// kernel: _generator_forward.1
= control target key start
LH: loop header
LB: loop body
LE: loop exit
PB: predicated region body
PF: predicated region fallthrough
CT: control target
= control target key end

     0   :  { %15 = vsyncpa [#allocation6], 0  ;;  %s9447_s13 = smov [#allocation5]   ;;  %s16711_s0 = inlined_call_operand.vmem [shape: s32[256,1], index: 0, kind: input, shape index: {}]   ;;  %s16712_s1 = inlined_call_operand.vmem [shape: f32[256,24], index: 1, kind: input, shape index: {}]   ;;  %s16713_s2 = inlined_call_operand.vmem [shape: f32[8,8], index: 2, kind: input, shape index: {}]   ;;  %s16714_s3 = inlined_call_operand.vmem [shape: bf16[8,128], index: 3, kind: input, shape index: {}]   ;;  %s16715_s4 = inlined_call_operand.vmem [shape: bf16[24,128], index: 4, kind: input, shape index: {}]   ;;  %s16716_s5 = inlined_call_operand.hbm [shape: bf16[128,256], index: 5, kind: input, shape index: {}]   ;;  %s16717_s6 = inlined_call_operand.vmem [shape: bf16[256,512], index: 6, kind: input, shape index: {}]   ;;  %s16718_s7 = inlined_call_operand.hbm [shape: bf16[512,1024], index: 7, kind: input, shape index: {}]   ;;  %s16719_s8 = inlined_call_operand.hbm [shape: bf16[1024,128], index: 8, kind: input, shape index: {}]   ;;  %s16720_s9 = inlined_call_operand.vmem [shape: f32[1,3840], index: 9, kind: input, shape index: {}]   ;;  %s16721_s10 = inlined_call_operand.vmem [shape: f32[256,128], index: 10, kind: output, shape index: {}]  }
   0x1   :  { %s31_s14 = sshll.u32 %s9447_s13, 4  ;;  %s9397_s17 = scalar_lea.hbm %s16716_s5, 2048  ;;  %s32_s14 = int_to_ptr.vmem [resolvable:$true] %s31_s14 }
   0x2   :  { %p9398_p0 = scmp.ne.s32.totalorder %s16716_s5, %s9397_s17  ;;  %p9401_p1 = scmp.lt.u32.totalorder %s9397_s17, %s16716_s5 }
   0x4   :  { %p9403_p2 = pnand %p9401_p1, %p9398_p0 }
   0x6   :  { %9406 = shalt.err (!%p9403_p2)
}
   0x7   :  { %s9407_s22 = scalar_lea.vmem %s32_s14, 2048  ;;  %p9412_p4 = scmp.lt.s32.totalorder %s32_s14, %s32_s14 }
   0x8   :  { %p9408_p3 = scmp.ne.s32.totalorder %s32_s14, %s9407_s22  ;;  %p9413_p5 = scmp.lt.s32.totalorder %s9407_s22, %s9407_s22 }
   0xa   :  { %p9414_p6 = por %p9413_p5, %p9412_p4 }
   0xc   :  { %p9415_p7 = pnand %p9414_p6, %p9408_p3 }
   0xe   :  { %9418 = shalt.err (!%p9415_p7)
}
   0xf   :  { %s9448_s23 = smov 128   ;;  %s9449_s24 = smov 8  }
  0x10   :  { %37 = dma.hbm_to_vmem [thread:$0]  %s16716_s5, 2048, %s32_s14, [#allocation6], %s9448_s23, %s9448_s23, %s9449_s24  }
  0x11   :  { %9441 = dma.done.wait [#allocation6], 2048  }
  0x12   :  { %9442 = vsyncadd [#allocation6], 4294965248  ;;  %s51_s27 = sld [smem:[#allocation0]]   ;;  %s9450_s28 = smov 1024   ;;  %v9451_v0 = vmov 0   ;;  %vm387_vm0 = vcmask 1043456   ;;  %v16722_v37 = vlaneseq }
  0x13   :  { %63 = sst [smem:[#allocation8]] %s9450_s28  ;;  %9182 = vset.pattern.permute.xlu1 %v9451_v0  ;;  %9181 = vset.pattern.permute.xlu0 %v9451_v0  ;;  %s9452_s29 = smov 64   ;;  %vm338_vm5 = vcmask 64512   ;;  %v9459_v43 = vmov 0.0  }
  0x14   :  { %65 = sst [smem:[#allocation8 + $0x1]] %s9450_s28  ;;  %s9453_s30 = smov 2   ;;  %v9643_v38 = vand.u32 127, %v16722_v37 }
  0x15   :  { %67 = sst [smem:[#allocation8 + $0x2]] %s9449_s24  ;;  %s9454_s11 = smov [#allocation2]  }
  0x16   :  { %69 = sst [smem:[#allocation8 + $0x3]] %s9452_s29  ;;  %s59_s12 = sshll.u32 %s9454_s11, 4  ;;  %s60_s12 = int_to_ptr.vmem [resolvable:$true] %s59_s12 }
  0x17   :  { %71 = sst [smem:[#allocation8 + $0x4]] %s9448_s23  ;;  %s9455_s13 = smov 512  }
  0x18   :  { %73 = sst [smem:[#allocation8 + $0x5]] %s9453_s30  ;;  %s8100_s5 = sshll.u32 %s51_s27, 26 }
  0x19   :  { %75 = sst [smem:[#allocation8 + $0x6]] %s9455_s13  ;;  %s8101_s14 = sadd.s32 134217728, %s8100_s5 }
  0x1a   :  { %77 = sst [smem:[#allocation8 + $0x7]] %s9452_s29  ;;  %s9456_s15 = smov 4  }
  0x1b   :  { %79 = sst [smem:[#allocation8 + $0x8]] %s9456_s15  ;;  %s9457_s16 = smov [#allocation4]  }
  0x1c   :  { %s9458_s17 = smov [#allocation7]   ;;  %s9461_s29 = smov [#allocation3]  }
  0x1d   :  { %81 = dma.general %s16718_s7, 32768, %s60_s12, %s9457_s16, %s9458_s17, [#allocation8], %s8101_s14, 0  }
  0x1e   :  { %v96_v1 = vld [vmem:[%s16711_s0 + $0x10] sm:$0xff]  ;;  %v94_v2 = vld [vmem:[%s16711_s0] sm:$0xff]  ;;  %v97_v3 = vld [vmem:[%s16711_s0 + $0x18] sm:$0xff]  ;;  %s90_s30 = sshll.u32 %s9461_s29, 4  ;;  %s9419_s12 = scalar_lea.hbm %s16719_s8, 8192  ;;  %s91_s30 = int_to_ptr.vmem [resolvable:$true] %s90_s30 }
  0x1f   :  { %135 = vperm.xlu1 %9182, %v96_v1   ;;  %129 = vperm.xlu0 %9181, %v94_v2   ;;  %v95_v4 = vld [vmem:[%s16711_s0 + $0x8] sm:$0xff]  ;;  %v98_v6 = vld [vmem:[%s16711_s0 + $0x20] sm:$0xff]  ;;  %v101_v7 = vld [vmem:[%s16711_s0 + $0x38] sm:$0xff]  ;;  %p9420_p8 = scmp.ne.s32.totalorder %s16719_s8, %s9419_s12  ;;  %p9423_p9 = scmp.lt.u32.totalorder %s9419_s12, %s16719_s8 }
  0x20   :  { %v99_v5 = vld [vmem:[%s16711_s0 + $0x28] sm:$0xff]  ;;  %v100_v8 = vld [vmem:[%s16711_s0 + $0x30] sm:$0xff]  ;;  %v336_v9 = vld [vmem:[%s16713_s2] sm:$0xff] }
  0x21   :  { %v337_v10 = vpack.c.bf16 %v336_v9, %v336_v9  ;;  %v103_v11 = vld [vmem:[%s16711_s0 + $0x48] sm:$0xff]  ;;  %v102_v12 = vld [vmem:[%s16711_s0 + $0x40] sm:$0xff]  ;;  %v105_v14 = vld [vmem:[%s16711_s0 + $0x58] sm:$0xff]  ;;  %p9425_p10 = pnand %p9423_p9, %p9420_p8 }
  0x22   :  { %v104_v15 = vld [vmem:[%s16711_s0 + $0x50] sm:$0xff]  ;;  %v107_v16 = vld [vmem:[%s16711_s0 + $0x68] sm:$0xff]  ;;  %v106_v17 = vld [vmem:[%s16711_s0 + $0x60] sm:$0xff] }
  0x23   :  { %138 = vperm.xlu1 %9182, %v97_v3   ;;  %132 = vperm.xlu0 %9181, %v95_v4   ;;  %v389_v13 = vsel %vm387_vm0, %v337_v10, 0  ;;  %v109_v18 = vld [vmem:[%s16711_s0 + $0x78] sm:$0xff]  ;;  %v108_v19 = vld [vmem:[%s16711_s0 + $0x70] sm:$0xff]  ;;  %v111_v20 = vld [vmem:[%s16711_s0 + $0x88] sm:$0xff] }
  0x24   :  { %9162 = vmatprep.subr.msk.bf16.mxu0 %vm387_vm0, %v337_v10  ;;  %9163 = vmatprep.subr.msk.bf16.mxu1 %vm387_vm0, %v337_v10  ;;  %v110_v21 = vld [vmem:[%s16711_s0 + $0x80] sm:$0xff]  ;;  %v113_v22 = vld [vmem:[%s16711_s0 + $0x98] sm:$0xff]  ;;  %v112_v23 = vld [vmem:[%s16711_s0 + $0x90] sm:$0xff] }
  0x25   :  { %8769 = vmatpush3.bf16.msra.mxu0 %v389_v13  ;;  %8873 = vmatpush3.bf16.msra.mxu1 %v389_v13  ;;  %v115_v24 = vld [vmem:[%s16711_s0 + $0xa8] sm:$0xff]  ;;  %v114_v25 = vld [vmem:[%s16711_s0 + $0xa0] sm:$0xff]  ;;  %v117_v26 = vld [vmem:[%s16711_s0 + $0xb8] sm:$0xff] }
  0x26   :  { %v116_v27 = vld [vmem:[%s16711_s0 + $0xb0] sm:$0xff]  ;;  %v119_v28 = vld [vmem:[%s16711_s0 + $0xc8] sm:$0xff]  ;;  %v118_v29 = vld [vmem:[%s16711_s0 + $0xc0] sm:$0xff] }
  0x27   :  { %144 = vperm.xlu1 %9182, %v99_v5   ;;  %141 = vperm.xlu0 %9181, %v98_v6   ;;  %v121_v30 = vld [vmem:[%s16711_s0 + $0xd8] sm:$0xff]  ;;  %v120_v31 = vld [vmem:[%s16711_s0 + $0xd0] sm:$0xff]  ;;  %v123_v32 = vld [vmem:[%s16711_s0 + $0xe8] sm:$0xff] }
  0x28   :  { %v122_v33 = vld [vmem:[%s16711_s0 + $0xe0] sm:$0xff]  ;;  %v125_v34 = vld [vmem:[%s16711_s0 + $0xf8] sm:$0xff]  ;;  %v124_v35 = vld [vmem:[%s16711_s0 + $0xf0] sm:$0xff] }
  0x29   :  { %v9639_v36 = vld [vmem:[%s16715_s4] sm:$0xff]  }
  0x2a   :  { %8802 = vmatprep.subr.bf16.mxu1 %v9639_v36 }
  0x2b   :  { %150 = vperm.xlu1 %9182, %v101_v7   ;;  %147 = vperm.xlu0 %9181, %v100_v8  }
  0x2f   :  { %156 = vperm.xlu1 %9182, %v103_v11   ;;  %153 = vperm.xlu0 %9181, %v102_v12  }
  0x33   :  { %162 = vperm.xlu1 %9182, %v105_v14   ;;  %159 = vperm.xlu0 %9181, %v104_v15  }
  0x37   :  { %168 = vperm.xlu1 %9182, %v107_v16   ;;  %165 = vperm.xlu0 %9181, %v106_v17  }
  0x3b   :  { %174 = vperm.xlu1 %9182, %v109_v18   ;;  %171 = vperm.xlu0 %9181, %v108_v19  }
  0x3f   :  { %180 = vperm.xlu1 %9182, %v111_v20   ;;  %177 = vperm.xlu0 %9181, %v110_v21  }
  0x43   :  { %186 = vperm.xlu1 %9182, %v113_v22   ;;  %183 = vperm.xlu0 %9181, %v112_v23  }
  0x47   :  { %192 = vperm.xlu1 %9182, %v115_v24   ;;  %189 = vperm.xlu0 %9181, %v114_v25  }
  0x4b   :  { %198 = vperm.xlu1 %9182, %v117_v26   ;;  %195 = vperm.xlu0 %9181, %v116_v27   ;;  %v9184_v27 = vld [vmem:[%s16715_s4 + $0x8] ss:$0 sps:$4 sm:$0xff]  }
  0x4f   :  { %204 = vperm.xlu1 %9182, %v119_v28   ;;  %201 = vperm.xlu0 %9181, %v118_v29  }
  0x53   :  { %210 = vperm.xlu1 %9182, %v121_v30   ;;  %207 = vperm.xlu0 %9181, %v120_v31  }
  0x57   :  { %216 = vperm.xlu1 %9182, %v123_v32   ;;  %213 = vperm.xlu0 %9181, %v122_v33   ;;  %v679_v33 = vsel %vm387_vm0, %v9184_v27, 0 }
  0x5b   :  { %222 = vperm.xlu1 %9182, %v125_v34   ;;  %219 = vperm.xlu0 %9181, %v124_v35  }
  0x9e   :  { %v136_v39 = vpop.permute.xlu1 %135  ;;  %v130_v40 = vpop.permute.xlu0 %129 }
  0x9f   :  { %vm226_vm1 = vcmp.eq.s32.totalorder %v136_v39, %v9643_v38  ;;  %vm224_vm2 = vcmp.eq.s32.totalorder %v130_v40, %v9643_v38  ;;  %v568_v39 = vld [vmem:[%s16714_s3] sm:$0xf] }
  0xa0   :  { %v8104_v44 = vsel %vm226_vm1, 1.0, %v9459_v43  ;;  %v8102_v45 = vsel %vm224_vm2, 1.0, %v9459_v43 }
  0xa2   :  { %v139_v41 = vpop.permute.xlu1 %138  ;;  %v133_v42 = vpop.permute.xlu0 %132 }
  0xa3   :  { %vm227_vm3 = vcmp.eq.s32.totalorder %v139_v41, %v9643_v38  ;;  %vm225_vm4 = vcmp.eq.s32.totalorder %v133_v42, %v9643_v38 }
  0xa4   :  { %v8105_v46 = vsel %vm227_vm3, 1.0, %v9459_v43  ;;  %v8103_v47 = vsel %vm225_vm4, 1.0, %v9459_v43 }
  0xa5   :  { %v321_v48 = vpack.c.bf16 %v8105_v46, %v8104_v44  ;;  %v320_v49 = vpack.c.bf16 %v8103_v47, %v8102_v45 }
  0xa6   :  { %v145_v50 = vpop.permute.xlu1 %144  ;;  %v142_v51 = vpop.permute.xlu0 %141 }
  0xa7   :  { %vm229_vm6 = vcmp.eq.s32.totalorder %v145_v50, %v9643_v38  ;;  %vm228_vm7 = vcmp.eq.s32.totalorder %v142_v51, %v9643_v38  ;;  %8770 = vmatprep.mubr.msk.bf16.mxu0 %vm338_vm5, %v320_v49 }
  0xa8   :  { %v8107_v52 = vsel %vm229_vm6, 1.0, %v9459_v43  ;;  %v8106_v53 = vsel %vm228_vm7, 1.0, %v9459_v43  ;;  %8771 = vmatmul.mubr.msk.bf16.vlgmr.msra.gmra.mrb[0].mxu0 %vm338_vm5, %v321_v48 }
  0xa9   :  { %v322_v54 = vpack.c.bf16 %v8107_v52, %v8106_v53 }
  0xaa   :  { %v151_v55 = vpop.permute.xlu1 %150  ;;  %v148_v56 = vpop.permute.xlu0 %147 }
  0xab   :  { %vm231_vm8 = vcmp.eq.s32.totalorder %v151_v55, %v9643_v38  ;;  %vm230_vm9 = vcmp.eq.s32.totalorder %v148_v56, %v9643_v38  ;;  %8774 = vmatprep.mubr.msk.bf16.mxu0 %vm338_vm5, %v322_v54 }
  0xac   :  { %v8109_v57 = vsel %vm231_vm8, 1.0, %v9459_v43  ;;  %v8108_v58 = vsel %vm230_vm9, 1.0, %v9459_v43 }
  0xad   :  { %v323_v59 = vpack.c.bf16 %v8109_v57, %v8108_v58  ;;  %v569_v58 = vld [vmem:[%s16712_s1] sm:$0xff] }
  0xae   :  { %v157_v60 = vpop.permute.xlu1 %156  ;;  %v154_v61 = vpop.permute.xlu0 %153 }
  0xaf   :  { %vm233_vm10 = vcmp.eq.s32.totalorder %v157_v60, %v9643_v38  ;;  %vm232_vm11 = vcmp.eq.s32.totalorder %v154_v61, %v9643_v38 }
  0xb0   :  { %v8111_v62 = vsel %vm233_vm10, 1.0, %v9459_v43  ;;  %v8110_v63 = vsel %vm232_vm11, 1.0, %v9459_v43  ;;  %8775 = vmatmul.mubr.msk.bf16.gmra.mrb[4].mxu0 %vm338_vm5, %v323_v59  ;;  %v570_v59 = vld [vmem:[%s16712_s1 + $0x8] sm:$0xff] }
  0xb1   :  { %v324_v1 = vpack.c.bf16 %v8111_v62, %v8110_v63 }
  0xb2   :  { %v163_v2 = vpop.permute.xlu1 %162  ;;  %v160_v3 = vpop.permute.xlu0 %159 }
  0xb3   :  { %vm235_vm12 = vcmp.eq.s32.totalorder %v163_v2, %v9643_v38  ;;  %vm234_vm13 = vcmp.eq.s32.totalorder %v160_v3, %v9643_v38  ;;  %8778 = vmatprep.mubr.msk.bf16.mxu0 %vm338_vm5, %v324_v1  ;;  %v601_v1 = vpack.c.bf16 %v570_v59, %v569_v58  ;;  %v571_v3 = vld [vmem:[%s16712_s1 + $0x10] sm:$0xff]  ;;  %v9199_v58 = vld [vmem:[#allocation5 + $0x44] ss:$8 sps:$4 sm:$0xff]   ;;  %v9197_v59 = vld [vmem:[#allocation5 + $0x40] ss:$8 sps:$4 sm:$0xff]  }
  0xb4   :  { %v8113_v4 = vsel %vm235_vm12, 1.0, %v9459_v43  ;;  %v8112_v5 = vsel %vm234_vm13, 1.0, %v9459_v43 }
  0xb5   :  { %v325_v6 = vpack.c.bf16 %v8113_v4, %v8112_v5  ;;  %v573_v4 = vld [vmem:[%s16712_s1 + $0x20] sm:$0xff] }
  0xb6   :  { %v169_v7 = vpop.permute.xlu1 %168  ;;  %v166_v8 = vpop.permute.xlu0 %165 }
  0xb7   :  { %vm237_vm14 = vcmp.eq.s32.totalorder %v169_v7, %v9643_v38  ;;  %vm236_vm15 = vcmp.eq.s32.totalorder %v166_v8, %v9643_v38  ;;  %v891_v7 = vsel %vm387_vm0, %v568_v39, 0  ;;  %v575_v8 = vld [vmem:[%s16712_s1 + $0x30] sm:$0xff] }
  0xb8   :  { %v8115_v9 = vsel %vm237_vm14, 1.0, %v9459_v43  ;;  %v8114_v10 = vsel %vm236_vm15, 1.0, %v9459_v43  ;;  %8779 = vmatmul.mubr.msk.bf16.gmra.mrb[8].mxu0 %vm338_vm5, %v325_v6 }
  0xb9   :  { %v326_v11 = vpack.c.bf16 %v8115_v9, %v8114_v10  ;;  %v576_v9 = vld [vmem:[%s16712_s1 + $0x38] sm:$0xff]  ;;  %v577_v10 = vld [vmem:[%s16712_s1 + $0x40] sm:$0xff] }
  0xba   :  { %v175_v12 = vpop.permute.xlu1 %174  ;;  %v172_v13 = vpop.permute.xlu0 %171 }
  0xbb   :  { %vm239_vm1 = vcmp.eq.s32.totalorder %v175_v12, %v9643_v38  ;;  %vm238_vm2 = vcmp.eq.s32.totalorder %v172_v13, %v9643_v38  ;;  %8782 = vmatprep.mubr.msk.bf16.mxu0 %vm338_vm5, %v326_v11  ;;  %v578_v11 = vld [vmem:[%s16712_s1 + $0x48] sm:$0xff]  ;;  %v604_v12 = vpack.c.bf16 %v576_v9, %v575_v8 }
  0xbc   :  { %v8117_v14 = vsel %vm239_vm1, 1.0, %v9459_v43  ;;  %v8116_v15 = vsel %vm238_vm2, 1.0, %v9459_v43  ;;  %v605_v13 = vpack.c.bf16 %v578_v11, %v577_v10 }
  0xbd   :  { %v327_v16 = vpack.c.bf16 %v8117_v14, %v8116_v15  ;;  %v579_v14 = vld [vmem:[%s16712_s1 + $0x50] sm:$0xff]  ;;  %v580_v15 = vld [vmem:[%s16712_s1 + $0x58] sm:$0xff] }
  0xbe   :  { %v181_v17 = vpop.permute.xlu1 %180  ;;  %v178_v18 = vpop.permute.xlu0 %177 }
  0xbf   :  { %vm241_vm3 = vcmp.eq.s32.totalorder %v181_v17, %v9643_v38  ;;  %vm240_vm4 = vcmp.eq.s32.totalorder %v178_v18, %v9643_v38  ;;  %v582_v17 = vld [vmem:[%s16712_s1 + $0x68] sm:$0xff]  ;;  %v606_v18 = vpack.c.bf16 %v580_v15, %v579_v14 }
  0xc0   :  { %v8119_v19 = vsel %vm241_vm3, 1.0, %v9459_v43  ;;  %v8118_v20 = vsel %vm240_vm4, 1.0, %v9459_v43  ;;  %8783 = vmatmul.mubr.msk.bf16.gmra.mrb[12].mxu0 %vm338_vm5, %v327_v16  ;;  %v581_v16 = vld [vmem:[%s16712_s1 + $0x60] sm:$0xff] }
  0xc1   :  { %v328_v21 = vpack.c.bf16 %v8119_v19, %v8118_v20  ;;  %1269 = vmatprep.mubr.bf16.mxu0 %v9451_v0  ;;  %v607_v19 = vpack.c.bf16 %v582_v17, %v581_v16  ;;  %v583_v20 = vld [vmem:[%s16712_s1 + $0x70] sm:$0xff] }
  0xc2   :  { %v187_v22 = vpop.permute.xlu1 %186  ;;  %v184_v23 = vpop.permute.xlu0 %183 }
  0xc3   :  { %vm243_vm6 = vcmp.eq.s32.totalorder %v187_v22, %v9643_v38  ;;  %vm242_vm7 = vcmp.eq.s32.totalorder %v184_v23, %v9643_v38  ;;  %8786 = vmatprep.mubr.msk.bf16.mxu1 %vm338_vm5, %v328_v21  ;;  %v584_v21 = vld [vmem:[%s16712_s1 + $0x78] sm:$0xff]  ;;  %v585_v22 = vld [vmem:[%s16712_s1 + $0x80] sm:$0xff]  ;;  %v586_v23 = vld [vmem:[%s16712_s1 + $0x88] sm:$0xff] }
  0xc4   :  { %v8121_v24 = vsel %vm243_vm6, 1.0, %v9459_v43  ;;  %v8120_v25 = vsel %vm242_vm7, 1.0, %v9459_v43  ;;  %vm629_vm6 = vcmask 195584  }
  0xc5   :  { %v329_v26 = vpack.c.bf16 %v8121_v24, %v8120_v25  ;;  %v608_v24 = vpack.c.bf16 %v584_v21, %v583_v20  ;;  %v609_v25 = vpack.c.bf16 %v586_v23, %v585_v22 }
  0xc6   :  { %v193_v28 = vpop.permute.xlu1 %192  ;;  %v190_v29 = vpop.permute.xlu0 %189 }
  0xc7   :  { %vm245_vm8 = vcmp.eq.s32.totalorder %v193_v28, %v9643_v38  ;;  %vm244_vm9 = vcmp.eq.s32.totalorder %v190_v29, %v9643_v38  ;;  %8787 = vmatmul.mubr.msk.bf16.vlgmr.msra.gmra.mrb[0].mxu1 %vm338_vm5, %v329_v26  ;;  %v587_v26 = vld [vmem:[%s16712_s1 + $0x90] sm:$0xff]  ;;  %v589_v28 = vld [vmem:[%s16712_s1 + $0xa0] sm:$0xff]  ;;  %v590_v29 = vld [vmem:[%s16712_s1 + $0xa8] sm:$0xff] }
  0xc8   :  { %v8123_v30 = vsel %vm245_vm8, 1.0, %v9459_v43  ;;  %v8122_v31 = vsel %vm244_vm9, 1.0, %v9459_v43  ;;  %8803 = vmatpush3.bf16.msra.mxu1 %v9639_v36 }
  0xc9   :  { %v330_v32 = vpack.c.bf16 %v8123_v30, %v8122_v31  ;;  %9164 = vmatprep.subr.msk.bf16.mxu1 %vm387_vm0, %v9184_v27  ;;  %v588_v27 = vld [vmem:[%s16712_s1 + $0x98] sm:$0xff]  ;;  %v611_v31 = vpack.c.bf16 %v590_v29, %v589_v28 }
  0xca   :  { %v199_v34 = vpop.permute.xlu1 %198  ;;  %v196_v35 = vpop.permute.xlu0 %195  ;;  %v610_v30 = vpack.c.bf16 %v588_v27, %v587_v26 }
  0xcb   :  { %vm247_vm10 = vcmp.eq.s32.totalorder %v199_v34, %v9643_v38  ;;  %vm246_vm11 = vcmp.eq.s32.totalorder %v196_v35, %v9643_v38  ;;  %8790 = vmatprep.mubr.msk.bf16.mxu1 %vm338_vm5, %v330_v32  ;;  %v591_v32 = vld [vmem:[%s16712_s1 + $0xb0] sm:$0xff]  ;;  %v593_v34 = vld [vmem:[%s16712_s1 + $0xc0] sm:$0xff]  ;;  %v594_v35 = vld [vmem:[%s16712_s1 + $0xc8] sm:$0xff] }
  0xcc   :  { %v8125_v40 = vsel %vm247_vm10, 1.0, %v9459_v43  ;;  %v8124_v36 = vsel %vm246_vm11, 1.0, %v9459_v43  ;;  %8805 = vmatpush3.bf16.msra.mxu1 %v679_v33  ;;  %v592_v33 = vld [vmem:[%s16712_s1 + $0xb8] sm:$0xff] }
  0xcd   :  { %v331_v41 = vpack.c.bf16 %v8125_v40, %v8124_v36  ;;  %9165 = vmatprep.subr.msk.bf16.mxu1 %vm387_vm0, %v568_v39  ;;  %v612_v39 = vpack.c.bf16 %v592_v33, %v591_v32  ;;  %v613_v40 = vpack.c.bf16 %v594_v35, %v593_v34  ;;  %v595_v36 = vld [vmem:[%s16712_s1 + $0xd0] sm:$0xff] }
  0xce   :  { %v205_v42 = vpop.permute.xlu1 %204  ;;  %v202_v44 = vpop.permute.xlu0 %201 }
  0xcf   :  { %vm249_vm12 = vcmp.eq.s32.totalorder %v205_v42, %v9643_v38  ;;  %vm248_vm13 = vcmp.eq.s32.totalorder %v202_v44, %v9643_v38  ;;  %8791 = vmatmul.mubr.msk.bf16.gmra.mrb[4].mxu1 %vm338_vm5, %v331_v41  ;;  %v596_v41 = vld [vmem:[%s16712_s1 + $0xd8] sm:$0xff]  ;;  %v597_v42 = vld [vmem:[%s16712_s1 + $0xe0] sm:$0xff]  ;;  %v598_v44 = vld [vmem:[%s16712_s1 + $0xe8] sm:$0xff] }
  0xd0   :  { %v8127_v45 = vsel %vm249_vm12, 1.0, %v9459_v43  ;;  %v8126_v46 = vsel %vm248_vm13, 1.0, %v9459_v43 }
  0xd1   :  { %v332_v47 = vpack.c.bf16 %v8127_v45, %v8126_v46  ;;  %v614_v45 = vpack.c.bf16 %v596_v41, %v595_v36  ;;  %v615_v46 = vpack.c.bf16 %v598_v44, %v597_v42 }
  0xd2   :  { %v211_v48 = vpop.permute.xlu1 %210  ;;  %v208_v49 = vpop.permute.xlu0 %207 }
  0xd3   :  { %vm251_vm14 = vcmp.eq.s32.totalorder %v211_v48, %v9643_v38  ;;  %vm250_vm15 = vcmp.eq.s32.totalorder %v208_v49, %v9643_v38  ;;  %8794 = vmatprep.mubr.msk.bf16.mxu1 %vm338_vm5, %v332_v47  ;;  %v599_v47 = vld [vmem:[%s16712_s1 + $0xf0] sm:$0xff]  ;;  %v600_v48 = vld [vmem:[%s16712_s1 + $0xf8] sm:$0xff] }
  0xd4   :  { %v8129_v50 = vsel %vm251_vm14, 1.0, %v9459_v43  ;;  %v8128_v51 = vsel %vm250_vm15, 1.0, %v9459_v43  ;;  %v616_v49 = vpack.c.bf16 %v600_v48, %v599_v47  ;;  %v9205_v48 = vld [vmem:[#allocation5 + $0x64] ss:$8 sps:$4 sm:$0xff]  }
  0xd5   :  { %v333_v52 = vpack.c.bf16 %v8129_v50, %v8128_v51  ;;  %v9185_v50 = vld [vmem:[#allocation5] ss:$8 sps:$4 sm:$0xff]   ;;  %v9187_v51 = vld [vmem:[#allocation5 + $0x4] ss:$8 sps:$4 sm:$0xff]  }
  0xd6   :  { %v217_v53 = vpop.permute.xlu1 %216  ;;  %v214_v54 = vpop.permute.xlu0 %213  ;;  %1237 = vmatprep.subr.bf16.mxu0 %v9187_v51  ;;  %v9206_v51 = vld [vmem:[#allocation5 + $0x70] ss:$8 sps:$4 sm:$0xff]  }
  0xd7   :  { %vm253_vm1 = vcmp.eq.s32.totalorder %v217_v53, %v9643_v38  ;;  %vm252_vm2 = vcmp.eq.s32.totalorder %v214_v54, %v9643_v38  ;;  %8795 = vmatmul.mubr.msk.bf16.gmra.mrb[8].mxu1 %vm338_vm5, %v333_v52  ;;  %v9190_v52 = vld [vmem:[#allocation5 + $0x14] ss:$8 sps:$4 sm:$0xff]   ;;  %1238 = vmatpush1.bf16.msra.mxu0 %v9185_v50  ;;  %v9188_v53 = vld [vmem:[#allocation5 + $0x10] ss:$8 sps:$4 sm:$0xff]   ;;  %v9193_v54 = vld [vmem:[#allocation5 + $0x24] ss:$8 sps:$4 sm:$0xff]  }
  0xd8   :  { %v8131_v55 = vsel %vm253_vm1, 1.0, %v9459_v43  ;;  %v8130_v56 = vsel %vm252_vm2, 1.0, %v9459_v43  ;;  %1239 = vmatprep.subr.bf16.mxu0 %v9190_v52  ;;  %v9208_v50 = vld [vmem:[#allocation5 + $0x74] ss:$8 sps:$4 sm:$0xff]  }
  0xd9   :  { %v334_v57 = vpack.c.bf16 %v8131_v55, %v8130_v56  ;;  %v9191_v55 = vld [vmem:[#allocation5 + $0x20] ss:$8 sps:$4 sm:$0xff]   ;;  %v9196_v56 = vld [vmem:[#allocation5 + $0x34] ss:$8 sps:$4 sm:$0xff]  }
  0xda   :  { %v223_v60 = vpop.permute.xlu1 %222  ;;  %v220_v61 = vpop.permute.xlu0 %219 }
  0xdb   :  { %vm255_vm3 = vcmp.eq.s32.totalorder %v223_v60, %v9643_v38  ;;  %vm254_vm4 = vcmp.eq.s32.totalorder %v220_v61, %v9643_v38  ;;  %8798 = vmatprep.mubr.msk.bf16.mxu1 %vm338_vm5, %v334_v57  ;;  %v572_v38 = vld [vmem:[%s16712_s1 + $0x18] sm:$0xff]  ;;  %1240 = vmatpush1.bf16.msra.mxu0 %v9188_v53  ;;  %v9868_v53 = vld [vmem:[%s16720_s9] ss:$0 sm:$0xff] }
  0xdc   :  { %v8133_v62 = vsel %vm255_vm3, 1.0, %v9459_v43  ;;  %v8132_v63 = vsel %vm254_vm4, 1.0, %v9459_v43  ;;  %v574_v43 = vld [vmem:[%s16712_s1 + $0x28] sm:$0xff]  ;;  %v602_v5 = vpack.c.bf16 %v572_v38, %v571_v3  ;;  %1241 = vmatprep.subr.bf16.mxu0 %v9193_v54  ;;  %v9194_v57 = vld [vmem:[#allocation5 + $0x30] ss:$8 sps:$4 sm:$0xff]  }
  0xdd   :  { %v335_v2 = vpack.c.bf16 %v8133_v62, %v8132_v63  ;;  %v603_v6 = vpack.c.bf16 %v574_v43, %v573_v4  ;;  %v9202_v60 = vld [vmem:[#allocation5 + $0x54] ss:$8 sps:$4 sm:$0xff]   ;;  %v9200_v61 = vld [vmem:[#allocation5 + $0x50] ss:$8 sps:$4 sm:$0xff]  }
  0xdf   :  { %8799 = vmatmul.mubr.msk.bf16.gmra.mrb[12].mxu1 %vm338_vm5, %v335_v2  ;;  %1242 = vmatpush1.bf16.msra.mxu0 %v9191_v55 }
  0xe0   :  { %8806 = vmatprep.mubr.msk.bf16.mxu1 %vm629_vm6, %v601_v1  ;;  %1243 = vmatprep.subr.bf16.mxu0 %v9196_v56 }
  0xe3   :  { %1244 = vmatpush1.bf16.msra.mxu0 %v9194_v57 }
  0xe4   :  { %1245 = vmatprep.subr.bf16.mxu0 %v9199_v58 }
  0xe7   :  { %8807 = vmatmul.mubr.msk.bf16.vlgmr.msra.gmra.mrb[16].mxu1 %vm629_vm6, %v602_v5  ;;  %1246 = vmatpush1.bf16.msra.mxu0 %v9197_v59 }
  0xe8   :  { %8839 = vmatpush3.bf16.msra.mxu1 %v891_v7  ;;  %8810 = vmatprep.mubr.msk.bf16.mxu1 %vm629_vm6, %v603_v6 }
  0xe9   :  { %1247 = vmatprep.subr.bf16.mxu0 %v9202_v60 }
  0xeb   :  { %1248 = vmatpush1.bf16.msra.mxu0 %v9200_v61 }
  0xec   :  { %1249 = vmatprep.subr.bf16.mxu0 %v9205_v48 }
  0xef   :  { %8811 = vmatmul.mubr.msk.bf16.gmra.mrb[20].mxu1 %vm629_vm6, %v604_v12 }
  0xf0   :  { %8814 = vmatprep.mubr.msk.bf16.mxu1 %vm629_vm6, %v605_v13 }
  0xf7   :  { %8815 = vmatmul.mubr.msk.bf16.gmra.mrb[24].mxu1 %vm629_vm6, %v606_v18 }
  0xf8   :  { %8818 = vmatprep.mubr.msk.bf16.mxu1 %vm629_vm6, %v607_v19 }
  0xff   :  { %8819 = vmatmul.mubr.msk.bf16.gmra.mrb[28].mxu1 %vm629_vm6, %v608_v24 }
 0x100   :  { %8822 = vmatprep.mubr.msk.bf16.mxu1 %vm629_vm6, %v609_v25 }
 0x107   :  { %8823 = vmatmul.mubr.msk.bf16.gmra.mrb[32].mxu1 %vm629_vm6, %v610_v30 }
 0x108   :  { %8826 = vmatprep.mubr.msk.bf16.mxu1 %vm629_vm6, %v611_v31 }
 0x10f   :  { %8827 = vmatmul.mubr.msk.bf16.gmra.mrb[36].mxu1 %vm629_vm6, %v612_v39 }
 0x110   :  { %8830 = vmatprep.mubr.msk.bf16.mxu1 %vm629_vm6, %v613_v40 }
 0x117   :  { %8831 = vmatmul.mubr.msk.bf16.gmra.mrb[40].mxu1 %vm629_vm6, %v614_v45 }
 0x118   :  { %8834 = vmatprep.mubr.msk.bf16.mxu1 %vm629_vm6, %v615_v46 }
 0x11f   :  { %8835 = vmatmul.mubr.msk.bf16.gmra.mrb[44].mxu1 %vm629_vm6, %v616_v49  ;;  %v9203_v49 = vld [vmem:[#allocation5 + $0x60] ss:$8 sps:$4 sm:$0xff]  }
 0x120   :  { %1250 = vmatpush1.bf16.msra.mxu0 %v9203_v49 }
 0x121   :  { %1251 = vmatprep.subr.bf16.mxu0 %v9208_v50 }
 0x124   :  { %1252 = vmatpush1.bf16.msra.mxu0 %v9206_v51 }
 0x17b   :  { %v8772_v62 = vpop.f32.mrb[0].mxu0 }
 0x17c   :  { %v425_v63 = vpop.f32.mrb[1].mxu0 }
 0x17d   :  { %v8773_v1 = vpop.f32.mrb[2].mxu0 }
 0x17e   :  { %v553_v2 = vpack.c.bf16 %v8773_v1, %v8772_v62  ;;  %v428_v3 = vpop.f32.mrb[3].mxu0 }
 0x17f   :  { %v552_v38 = vpack.c.bf16 %v428_v3, %v425_v63 }
 0x181   :  { %8840 = vmatprep.mubr.msk.bf16.mxu1 %vm338_vm5, %v552_v38 }
 0x182   :  { %8841 = vmatmul.mubr.msk.bf16.vlgmr.msra.gmra.mrb[16].mxu1 %vm338_vm5, %v553_v2 }
 0x183   :  { %v8776_v4 = vpop.f32.mrb[4].mxu0 }
 0x184   :  { %v441_v43 = vpop.f32.mrb[5].mxu0 }
 0x185   :  { %v8777_v5 = vpop.f32.mrb[6].mxu0 }
 0x186   :  { %v555_v6 = vpack.c.bf16 %v8777_v5, %v8776_v4  ;;  %v444_v7 = vpop.f32.mrb[7].mxu0 }
 0x187   :  { %v554_v8 = vpack.c.bf16 %v444_v7, %v441_v43 }
 0x189   :  { %8844 = vmatprep.mubr.msk.bf16.mxu1 %vm338_vm5, %v554_v8 }
 0x18a   :  { %8845 = vmatmul.mubr.msk.bf16.gmra.mrb[20].mxu1 %vm338_vm5, %v555_v6 }
 0x18b   :  { %v8780_v9 = vpop.f32.mrb[8].mxu0 }
 0x18c   :  { %v457_v10 = vpop.f32.mrb[9].mxu0 }
 0x18d   :  { %v8781_v11 = vpop.f32.mrb[10].mxu0 }
 0x18e   :  { %v557_v12 = vpack.c.bf16 %v8781_v11, %v8780_v9  ;;  %v460_v13 = vpop.f32.mrb[11].mxu0 }
 0x18f   :  { %v556_v14 = vpack.c.bf16 %v460_v13, %v457_v10 }
 0x191   :  { %8848 = vmatprep.mubr.msk.bf16.mxu1 %vm338_vm5, %v556_v14 }
 0x192   :  { %8849 = vmatmul.mubr.msk.bf16.gmra.mrb[24].mxu1 %vm338_vm5, %v557_v12 }
 0x193   :  { %v8784_v15 = vpop.f32.mrb[12].mxu0 }
 0x194   :  { %v473_v16 = vpop.f32.mrb[13].mxu0 }
 0x195   :  { %v8785_v17 = vpop.f32.mrb[14].mxu0 }
 0x196   :  { %v559_v18 = vpack.c.bf16 %v8785_v17, %v8784_v15  ;;  %v476_v19 = vpop.f32.mrb[15].mxu0 }
 0x197   :  { %v558_v20 = vpack.c.bf16 %v476_v19, %v473_v16 }
 0x199   :  { %8852 = vmatprep.mubr.msk.bf16.mxu1 %vm338_vm5, %v558_v20 }
 0x19a   :  { %v8788_v21 = vpop.f32.mrb[0].mxu1  ;;  %8853 = vmatmul.mubr.msk.bf16.gmra.mrb[28].mxu1 %vm338_vm5, %v559_v18 }
 0x19b   :  { %v489_v22 = vpop.f32.mrb[1].mxu1 }
 0x19c   :  { %v8789_v23 = vpop.f32.mrb[2].mxu1 }
 0x19d   :  { %v561_v24 = vpack.c.bf16 %v8789_v23, %v8788_v21  ;;  %v492_v25 = vpop.f32.mrb[3].mxu1 }
 0x19e   :  { %v560_v26 = vpack.c.bf16 %v492_v25, %v489_v22 }
 0x1a0   :  { %8856 = vmatprep.mubr.msk.bf16.mxu1 %vm338_vm5, %v560_v26 }
 0x1a2   :  { %v8792_v27 = vpop.f32.mrb[4].mxu1  ;;  %8857 = vmatmul.mubr.msk.bf16.gmra.mrb[32].mxu1 %vm338_vm5, %v561_v24 }
 0x1a3   :  { %v505_v28 = vpop.f32.mrb[5].mxu1 }
 0x1a4   :  { %v8793_v29 = vpop.f32.mrb[6].mxu1 }
 0x1a5   :  { %v563_v30 = vpack.c.bf16 %v8793_v29, %v8792_v27  ;;  %v508_v31 = vpop.f32.mrb[7].mxu1 }
 0x1a6   :  { %v562_v32 = vpack.c.bf16 %v508_v31, %v505_v28 }
 0x1a8   :  { %8860 = vmatprep.mubr.msk.bf16.mxu1 %vm338_vm5, %v562_v32 }
 0x1aa   :  { %v8796_v33 = vpop.f32.mrb[8].mxu1  ;;  %8861 = vmatmul.mubr.msk.bf16.gmra.mrb[36].mxu1 %vm338_vm5, %v563_v30 }
 0x1ab   :  { %v521_v34 = vpop.f32.mrb[9].mxu1 }
 0x1ac   :  { %v8797_v35 = vpop.f32.mrb[10].mxu1 }
 0x1ad   :  { %v565_v39 = vpack.c.bf16 %v8797_v35, %v8796_v33  ;;  %v524_v40 = vpop.f32.mrb[11].mxu1 }
 0x1ae   :  { %v564_v36 = vpack.c.bf16 %v524_v40, %v521_v34 }
 0x1b0   :  { %8864 = vmatprep.mubr.msk.bf16.mxu1 %vm338_vm5, %v564_v36 }
 0x1b2   :  { %v8800_v41 = vpop.f32.mrb[12].mxu1  ;;  %8865 = vmatmul.mubr.msk.bf16.gmra.mrb[40].mxu1 %vm338_vm5, %v565_v39 }
 0x1b3   :  { %v537_v42 = vpop.f32.mrb[13].mxu1 }
 0x1b4   :  { %v8801_v44 = vpop.f32.mrb[14].mxu1 }
 0x1b5   :  { %v567_v45 = vpack.c.bf16 %v8801_v44, %v8800_v41  ;;  %v540_v46 = vpop.f32.mrb[15].mxu1 }
 0x1b6   :  { %v566_v47 = vpack.c.bf16 %v540_v46, %v537_v42 }
 0x1b8   :  { %8868 = vmatprep.mubr.msk.bf16.mxu1 %vm338_vm5, %v566_v47 }
 0x1ba   :  { %8869 = vmatmul.mubr.msk.bf16.gmra.mrb[44].mxu1 %vm338_vm5, %v567_v45 }
 0x255   :  { %v8842_v52 = vpop.f32.mrb[16].mxu1 }
 0x256   :  { %v927_v54 = vpop.f32.mrb[17].mxu1  ;;  %v1063_v56 = vadd.f32 %v8842_v52, %v9868_v53 }
 0x257   :  { %v8843_v55 = vpop.f32.mrb[18].mxu1  ;;  %v1061_v59 = vadd.f32 %v9868_v53, %v927_v54 }
 0x258   :  { %v1064_v57 = vadd.f32 %v8843_v55, %v9868_v53  ;;  %v930_v58 = vpop.f32.mrb[19].mxu1 }
 0x259   :  { %v1062_v60 = vadd.f32 %v9868_v53, %v930_v58 }
 0x25a   :  { %v1094_v61 = vpack.c.bf16 %v1064_v57, %v1063_v56 }
 0x25b   :  { %v1093_v62 = vpack.c.bf16 %v1062_v60, %v1061_v59 }
 0x25c   :  { %v1110_v9 = vmul.bf16 1045249613, %v1094_v61 }
 0x25d   :  { %v1109_v63 = vmul.bf16 1045249613, %v1093_v62  ;;  %v8846_v1 = vpop.f32.mrb[20].mxu1 }
 0x25e   :  { %v943_v2 = vpop.f32.mrb[21].mxu1  ;;  %v1067_v4 = vadd.f32 %v8846_v1, %v9868_v53  ;;  %v1126_v14 = vmax.bf16 %v1110_v9, %v1094_v61 }
 0x25f   :  { %v1125_v3 = vmax.bf16 %v1109_v63, %v1093_v62  ;;  %v8847_v38 = vpop.f32.mrb[22].mxu1  ;;  %v1065_v6 = vadd.f32 %v9868_v53, %v943_v2 }
 0x260   :  { %v1068_v43 = vadd.f32 %v8847_v38, %v9868_v53  ;;  %v946_v5 = vpop.f32.mrb[23].mxu1 }
 0x261   :  { %v1066_v7 = vadd.f32 %v9868_v53, %v946_v5  ;;  %1270 = vmatmul.mubr.bf16.vlgmr.msra.gmra.mrb[16].mxu0 %v1125_v3 }
 0x262   :  { %v1096_v8 = vpack.c.bf16 %v1068_v43, %v1067_v4  ;;  %1279 = vmatprep.mubr.bf16.mxu0 %v9451_v0 }
 0x263   :  { %v1095_v10 = vpack.c.bf16 %v1066_v7, %v1065_v6 }
 0x264   :  { %v1112_v33 = vmul.bf16 1045249613, %v1096_v8 }
 0x265   :  { %v8850_v11 = vpop.f32.mrb[24].mxu1  ;;  %v1111_v21 = vmul.bf16 1045249613, %v1095_v10 }
 0x266   :  { %v959_v12 = vpop.f32.mrb[25].mxu1  ;;  %v1071_v15 = vadd.f32 %v8850_v11, %v9868_v53  ;;  %v1128_v42 = vmax.bf16 %v1112_v33, %v1096_v8 }
 0x267   :  { %v8851_v13 = vpop.f32.mrb[26].mxu1  ;;  %v1069_v18 = vadd.f32 %v9868_v53, %v959_v12  ;;  %v1127_v26 = vmax.bf16 %v1111_v21, %v1095_v10 }
 0x268   :  { %v1072_v16 = vadd.f32 %v8851_v13, %v9868_v53  ;;  %v962_v17 = vpop.f32.mrb[27].mxu1 }
 0x269   :  { %v1070_v19 = vadd.f32 %v9868_v53, %v962_v17  ;;  %1280 = vmatmul.mubr.bf16.gmra.mrb[20].mxu0 %v1126_v14 }
 0x26a   :  { %v1098_v20 = vpack.c.bf16 %v1072_v16, %v1071_v15  ;;  %1289 = vmatprep.mubr.bf16.mxu0 %v9451_v0 }
 0x26b   :  { %v1097_v22 = vpack.c.bf16 %v1070_v19, %v1069_v18 }
 0x26c   :  { %v1114_v61 = vmul.bf16 1045249613, %v1098_v20 }
 0x26d   :  { %v8854_v23 = vpop.f32.mrb[28].mxu1  ;;  %v1113_v48 = vmul.bf16 1045249613, %v1097_v22 }
 0x26e   :  { %v975_v24 = vpop.f32.mrb[29].mxu1  ;;  %v1075_v27 = vadd.f32 %v8854_v23, %v9868_v53  ;;  %v1130_v4 = vmax.bf16 %v1114_v61, %v1098_v20 }
 0x26f   :  { %v8855_v25 = vpop.f32.mrb[30].mxu1  ;;  %v1073_v30 = vadd.f32 %v9868_v53, %v975_v24  ;;  %v1129_v56 = vmax.bf16 %v1113_v48, %v1097_v22  ;;  %v9221_v48 = vld [vmem:[%s16717_s6 + $0x88] ss:$16 sps:$4 sm:$0xff]  }
 0x270   :  { %v1076_v28 = vadd.f32 %v8855_v25, %v9868_v53  ;;  %v978_v29 = vpop.f32.mrb[31].mxu1 }
 0x271   :  { %v1074_v31 = vadd.f32 %v9868_v53, %v978_v29  ;;  %1290 = vmatmul.mubr.bf16.gmra.mrb[24].mxu0 %v1127_v26 }
 0x272   :  { %v1100_v32 = vpack.c.bf16 %v1076_v28, %v1075_v27  ;;  %1299 = vmatprep.mubr.bf16.mxu0 %v9451_v0 }
 0x273   :  { %v1099_v34 = vpack.c.bf16 %v1074_v31, %v1073_v30 }
 0x274   :  { %v1116_v20 = vmul.bf16 1045249613, %v1100_v32 }
 0x275   :  { %v8858_v35 = vpop.f32.mrb[32].mxu1  ;;  %v1115_v8 = vmul.bf16 1045249613, %v1099_v34 }
 0x276   :  { %v1079_v39 = vadd.f32 %v8858_v35, %v9868_v53  ;;  %v991_v40 = vpop.f32.mrb[33].mxu1  ;;  %v1132_v22 = vmax.bf16 %v1116_v20, %v1100_v32 }
 0x277   :  { %v1077_v36 = vadd.f32 %v9868_v53, %v991_v40  ;;  %v8859_v41 = vpop.f32.mrb[34].mxu1  ;;  %v1131_v15 = vmax.bf16 %v1115_v8, %v1099_v34 }
 0x278   :  { %v1080_v44 = vadd.f32 %v8859_v41, %v9868_v53  ;;  %v994_v45 = vpop.f32.mrb[35].mxu1  ;;  %v9211_v41 = vld [vmem:[%s16717_s6 + $0xc] ss:$16 sps:$4 sm:$0xff]  }
 0x279   :  { %v1078_v46 = vadd.f32 %v9868_v53, %v994_v45  ;;  %1300 = vmatmul.mubr.bf16.gmra.mrb[28].mxu0 %v1128_v42  ;;  %2488 = vmatprep.subr.bf16.mxu0 %v9211_v41  ;;  %v9212_v42 = vld [vmem:[%s16717_s6 + $0x28] ss:$16 sps:$4 sm:$0xff]   ;;  %v9217_v45 = vld [vmem:[%s16717_s6 + $0x4c] ss:$16 sps:$4 sm:$0xff]  }
 0x27a   :  { %v1102_v47 = vpack.c.bf16 %v1080_v44, %v1079_v39  ;;  %1309 = vmatprep.mubr.bf16.mxu0 %v9451_v0  ;;  %v9215_v44 = vld [vmem:[%s16717_s6 + $0x48] ss:$16 sps:$4 sm:$0xff]  }
 0x27b   :  { %v1101_v49 = vpack.c.bf16 %v1078_v46, %v1077_v36  ;;  %v9209_v36 = vld [vmem:[%s16717_s6 + $0x8] ss:$16 sps:$4 sm:$0xff]  }
 0x27c   :  { %v1118_v25 = vmul.bf16 1045249613, %v1102_v47  ;;  %2489 = vmatpush1.bf16.msra.mxu0 %v9209_v36  ;;  %v9218_v46 = vld [vmem:[%s16717_s6 + $0x68] ss:$16 sps:$4 sm:$0xff]  }
 0x27d   :  { %v8862_v50 = vpop.f32.mrb[36].mxu1  ;;  %v1117_v23 = vmul.bf16 1045249613, %v1101_v49 }
 0x27e   :  { %v1083_v51 = vadd.f32 %v8862_v50, %v9868_v53  ;;  %v1007_v52 = vpop.f32.mrb[37].mxu1  ;;  %v1134_v26 = vmax.bf16 %v1118_v25, %v1102_v47  ;;  %v9220_v47 = vld [vmem:[%s16717_s6 + $0x6c] ss:$16 sps:$4 sm:$0xff]   ;;  %v9224_v50 = vld [vmem:[%s16717_s6 + $0xa8] ss:$16 sps:$4 sm:$0xff]  }
 0x27f   :  { %v1081_v54 = vadd.f32 %v9868_v53, %v1007_v52  ;;  %v8863_v55 = vpop.f32.mrb[38].mxu1  ;;  %v1133_v24 = vmax.bf16 %v1117_v23, %v1101_v49  ;;  %v9223_v49 = vld [vmem:[%s16717_s6 + $0x8c] ss:$16 sps:$4 sm:$0xff]   ;;  %v9227_v52 = vld [vmem:[%s16717_s6 + $0xc8] ss:$16 sps:$4 sm:$0xff]  }
 0x280   :  { %v1084_v57 = vadd.f32 %v8863_v55, %v9868_v53  ;;  %v1010_v58 = vpop.f32.mrb[39].mxu1  ;;  %v9230_v55 = vld [vmem:[%s16717_s6 + $0xe8] ss:$16 sps:$4 sm:$0xff]   ;;  %v9248_v25 = vld [vmem:[%s16717_s6 + $0x60] ss:$16 sps:$4 sm:$0xff]  }
 0x281   :  { %v1082_v59 = vadd.f32 %v9868_v53, %v1010_v58  ;;  %1310 = vmatmul.mubr.bf16.gmra.mrb[32].mxu0 %v1129_v56  ;;  %v9232_v56 = vld [vmem:[%s16717_s6 + $0xec] ss:$16 sps:$4 sm:$0xff]   ;;  %v9233_v58 = vld [vmem:[%s16717_s6] ss:$16 sps:$4 sm:$0xff]  }
 0x282   :  { %v1104_v60 = vpack.c.bf16 %v1084_v57, %v1083_v51  ;;  %1319 = vmatprep.mubr.bf16.mxu0 %v9451_v0  ;;  %v9226_v51 = vld [vmem:[%s16717_s6 + $0xac] ss:$16 sps:$4 sm:$0xff]   ;;  %v9235_v57 = vld [vmem:[%s16717_s6 + $0x4] ss:$16 sps:$4 sm:$0xff]  }
 0x283   :  { %v1103_v62 = vpack.c.bf16 %v1082_v59, %v1081_v54  ;;  %v9229_v54 = vld [vmem:[%s16717_s6 + $0xcc] ss:$16 sps:$4 sm:$0xff]   ;;  %2295 = vmatprep.subr.bf16.mxu1 %v9235_v57  ;;  %v9260_v57 = vld [vmem:[%s16717_s6 + $0xc0] ss:$16 sps:$4 sm:$0xff]  }
 0x284   :  { %v1120_v28 = vmul.bf16 1045249613, %v1104_v60  ;;  %2296 = vmatpush1.bf16.msra.mxu1 %v9233_v58 }
 0x285   :  { %v8866_v63 = vpop.f32.mrb[40].mxu1 }
 0x286   :  { %v1087_v1 = vadd.f32 %v8866_v63, %v9868_v53  ;;  %v1023_v2 = vpop.f32.mrb[41].mxu1  ;;  %v1136_v29 = vmax.bf16 %v1120_v28, %v1104_v60 }
 0x287   :  { %v1085_v3 = vadd.f32 %v9868_v53, %v1023_v2  ;;  %v8867_v38 = vpop.f32.mrb[42].mxu1 }
 0x288   :  { %v1088_v43 = vadd.f32 %v8867_v38, %v9868_v53  ;;  %v1026_v5 = vpop.f32.mrb[43].mxu1 }
 0x289   :  { %v1086_v6 = vadd.f32 %v9868_v53, %v1026_v5  ;;  %1320 = vmatmul.mubr.bf16.gmra.mrb[36].mxu0 %v1130_v4  ;;  %v9239_v4 = vld [vmem:[%s16717_s6 + $0x20] ss:$16 sps:$4 sm:$0xff]  }
 0x28a   :  { %v1106_v7 = vpack.c.bf16 %v1088_v43, %v1087_v1  ;;  %1329 = vmatprep.mubr.bf16.mxu0 %v9451_v0 }
 0x28b   :  { %v1105_v9 = vpack.c.bf16 %v1086_v6, %v1085_v3 }
 0x28c   :  { %v1122_v32 = vmul.bf16 1045249613, %v1106_v7 }
 0x28d   :  { %v8870_v10 = vpop.f32.mrb[44].mxu1  ;;  %v1121_v30 = vmul.bf16 1045249613, %v1105_v9 }
 0x28e   :  { %v1091_v11 = vadd.f32 %v8870_v10, %v9868_v53  ;;  %v1039_v12 = vpop.f32.mrb[45].mxu1  ;;  %v1138_v33 = vmax.bf16 %v1122_v32, %v1106_v7  ;;  %v9244_v10 = vld [vmem:[%s16717_s6 + $0x44] ss:$16 sps:$4 sm:$0xff]   ;;  %v9251_v32 = vld [vmem:[%s16717_s6 + $0x80] ss:$16 sps:$4 sm:$0xff]  }
 0x28f   :  { %v1089_v13 = vadd.f32 %v9868_v53, %v1039_v12  ;;  %v8871_v14 = vpop.f32.mrb[46].mxu1  ;;  %v1137_v31 = vmax.bf16 %v1121_v30, %v1105_v9 }
 0x290   :  { %v1092_v16 = vadd.f32 %v8871_v14, %v9868_v53  ;;  %v1042_v17 = vpop.f32.mrb[47].mxu1 }
 0x291   :  { %v1090_v18 = vadd.f32 %v9868_v53, %v1042_v17  ;;  %1330 = vmatmul.mubr.bf16.gmra.mrb[40].mxu0 %v1131_v15  ;;  %v1119_v53 = vmul.bf16 1045249613, %v1103_v62 }
 0x292   :  { %v1108_v19 = vpack.c.bf16 %v1092_v16, %v1091_v11  ;;  %1339 = vmatprep.mubr.bf16.mxu0 %v9451_v0  ;;  %v9242_v11 = vld [vmem:[%s16717_s6 + $0x40] ss:$16 sps:$4 sm:$0xff]  }
 0x293   :  { %v1107_v21 = vpack.c.bf16 %v1090_v18, %v1089_v13  ;;  %v1135_v27 = vmax.bf16 %v1119_v53, %v1103_v62  ;;  %v9241_v62 = vld [vmem:[%s16717_s6 + $0x24] ss:$16 sps:$4 sm:$0xff]  }
 0x294   :  { %v1124_v39 = vmul.bf16 1045249613, %v1108_v19  ;;  %2297 = vmatprep.subr.bf16.mxu1 %v9241_v62 }
 0x295   :  { %v1123_v34 = vmul.bf16 1045249613, %v1107_v21  ;;  %2298 = vmatpush1.bf16.msra.mxu1 %v9239_v4 }
 0x296   :  { %v1140_v40 = vmax.bf16 %v1124_v39, %v1108_v19  ;;  %2299 = vmatprep.subr.bf16.mxu1 %v9244_v10  ;;  %v9250_v19 = vld [vmem:[%s16717_s6 + $0x64] ss:$16 sps:$4 sm:$0xff]  }
 0x297   :  { %v1139_v35 = vmax.bf16 %v1123_v34, %v1107_v21 }
 0x299   :  { %1340 = vmatmul.mubr.bf16.gmra.mrb[44].mxu0 %v1132_v22  ;;  %2300 = vmatpush1.bf16.msra.mxu1 %v9242_v11 }
 0x29a   :  { %1349 = vmatprep.mubr.bf16.mxu0 %v9451_v0  ;;  %2301 = vmatprep.subr.bf16.mxu1 %v9250_v19 }
 0x29d   :  { %2302 = vmatpush1.bf16.msra.mxu1 %v9248_v25  ;;  %v9271_v25 = vld [vmem:[%s16717_s6 + $0x104] ss:$16 sps:$4 sm:$0xff]  }
 0x2a1   :  { %1350 = vmatmul.mubr.bf16.gmra.mrb[48].mxu0 %v1133_v24 }
 0x2a2   :  { %1359 = vmatprep.mubr.bf16.mxu0 %v9451_v0 }
 0x2a9   :  { %1360 = vmatmul.mubr.bf16.gmra.mrb[52].mxu0 %v1134_v26 }
 0x2aa   :  { %1369 = vmatprep.mubr.bf16.mxu0 %v9451_v0 }
 0x2b1   :  { %1370 = vmatmul.mubr.bf16.gmra.mrb[56].mxu0 %v1135_v27 }
 0x2b2   :  { %1379 = vmatprep.mubr.bf16.mxu0 %v9451_v0 }
 0x2b9   :  { %1380 = vmatmul.mubr.bf16.gmra.mrb[60].mxu0 %v1136_v29 }
 0x2ba   :  { %1389 = vmatprep.mubr.bf16.mxu0 %v9451_v0 }
 0x2c1   :  { %1390 = vmatmul.mubr.bf16.gmra.mrb[64].mxu0 %v1137_v31  ;;  %v9253_v31 = vld [vmem:[%s16717_s6 + $0x84] ss:$16 sps:$4 sm:$0xff]  }
 0x2c2   :  { %1399 = vmatprep.mubr.bf16.mxu0 %v9451_v0  ;;  %2303 = vmatprep.subr.bf16.mxu1 %v9253_v31 }
 0x2c3   :  { %2304 = vmatpush1.bf16.msra.mxu1 %v9251_v32 }
 0x2c9   :  { %1400 = vmatmul.mubr.bf16.gmra.mrb[68].mxu0 %v1138_v33 }
 0x2ca   :  { %1409 = vmatprep.mubr.bf16.mxu0 %v9451_v0 }
 0x2d1   :  { %1410 = vmatmul.mubr.bf16.gmra.mrb[72].mxu0 %v1139_v35 }
 0x2d2   :  { %1419 = vmatprep.mubr.bf16.mxu0 %v9451_v0  ;;  %v9214_v0 = vld [vmem:[%s16717_s6 + $0x2c] ss:$16 sps:$4 sm:$0xff]  }
 0x2d3   :  { %2490 = vmatprep.subr.bf16.mxu0 %v9214_v0 }
 0x2d4   :  { %2491 = vmatpush1.bf16.msra.mxu0 %v9212_v42  ;;  %v9259_v42 = vld [vmem:[%s16717_s6 + $0xa4] ss:$16 sps:$4 sm:$0xff]  }
 0x2d5   :  { %2492 = vmatprep.subr.bf16.mxu0 %v9217_v45  ;;  %2305 = vmatprep.subr.bf16.mxu1 %v9259_v42 }
 0x2d8   :  { %2493 = vmatpush1.bf16.msra.mxu0 %v9215_v44 }
 0x2d9   :  { %1420 = vmatmul.mubr.bf16.gmra.mrb[76].mxu0 %v1140_v40  ;;  %2494 = vmatprep.subr.bf16.mxu0 %v9220_v47 }
 0x2dc   :  { %2495 = vmatpush1.bf16.msra.mxu0 %v9218_v46 }
 0x2dd   :  { %2496 = vmatprep.subr.bf16.mxu0 %v9223_v49 }
 0x2e0   :  { %2497 = vmatpush1.bf16.msra.mxu0 %v9221_v48  ;;  %v9257_v48 = vld [vmem:[%s16717_s6 + $0xa0] ss:$16 sps:$4 sm:$0xff]  }
 0x2e1   :  { %2498 = vmatprep.subr.bf16.mxu0 %v9226_v51  ;;  %2306 = vmatpush1.bf16.msra.mxu1 %v9257_v48 }
 0x2e4   :  { %2499 = vmatpush1.bf16.msra.mxu0 %v9224_v50 }
 0x2e5   :  { %2500 = vmatprep.subr.bf16.mxu0 %v9229_v54 }
 0x2e8   :  { %2501 = vmatpush1.bf16.msra.mxu0 %v9227_v52 }
 0x2e9   :  { %2502 = vmatprep.subr.bf16.mxu0 %v9232_v56  ;;  %v9262_v56 = vld [vmem:[%s16717_s6 + $0xc4] ss:$16 sps:$4 sm:$0xff]  }
 0x2ea   :  { %2307 = vmatprep.subr.bf16.mxu1 %v9262_v56 }
 0x2eb   :  { %2308 = vmatpush1.bf16.msra.mxu1 %v9260_v57 }
 0x2ec   :  { %2503 = vmatpush1.bf16.msra.mxu0 %v9230_v55 }
 0x334   :  { %v9971_v59 = vpop.f32.mrb[16].mxu0 }
 0x335   :  { %v9973_v60 = vpop.f32.mrb[17].mxu0  ;;  %v1509_v63 = vmul.f32 %v9971_v59, %v9971_v59 }
 0x336   :  { %v9975_v61 = vpop.f32.mrb[18].mxu0  ;;  %v1510_v43 = vmul.f32 %v9973_v60, %v9973_v60 }
 0x337   :  { %v1432_v1 = vadd.f32 %v9975_v61, %v9971_v59  ;;  %v1511_v2 = vmul.f32 %v9975_v61, %v9975_v61  ;;  %v9988_v38 = vpop.f32.mrb[19].mxu0 }
 0x338   :  { %v1469_v5 = vadd.f32 %v9988_v38, %v9973_v60  ;;  %v1512_v6 = vmul.f32 %v9988_v38, %v9988_v38 }
 0x339   :  { %v1573_v8 = vadd.f32 %v1511_v2, %v1509_v63 }
 0x33a   :  { %v1610_v9 = vadd.f32 %v1512_v6, %v1510_v43 }
 0x33c   :  { %v10007_v12 = vpop.f32.mrb[20].mxu0 }
 0x33d   :  { %v1433_v13 = vadd.f32 %v1432_v1, %v10007_v12  ;;  %v1513_v14 = vmul.f32 %v10007_v12, %v10007_v12  ;;  %v10012_v15 = vpop.f32.mrb[21].mxu0 }
 0x33e   :  { %v1470_v16 = vadd.f32 %v1469_v5, %v10012_v15  ;;  %v1514_v17 = vmul.f32 %v10012_v15, %v10012_v15  ;;  %v10017_v18 = vpop.f32.mrb[22].mxu0  ;;  %v9268_v5 = vld [vmem:[%s16717_s6 + $0xe4] ss:$16 sps:$4 sm:$0xff]  }
 0x33f   :  { %v1574_v20 = vadd.f32 %v1573_v8, %v1513_v14  ;;  %v1434_v21 = vadd.f32 %v1433_v13, %v10017_v18  ;;  %v1515_v22 = vmul.f32 %v10017_v18, %v10017_v18  ;;  %v10027_v24 = vpop.f32.mrb[23].mxu0  ;;  %v9266_v13 = vld [vmem:[%s16717_s6 + $0xe0] ss:$16 sps:$4 sm:$0xff]   ;;  %2309 = vmatprep.subr.bf16.mxu1 %v9268_v5 }
 0x340   :  { %v1611_v26 = vadd.f32 %v1610_v9, %v1514_v17  ;;  %v1471_v53 = vadd.f32 %v1470_v16, %v10027_v24  ;;  %v1516_v27 = vmul.f32 %v10027_v24, %v10027_v24  ;;  %2310 = vmatpush1.bf16.msra.mxu1 %v9266_v13  ;;  %v9278_v5 = vld [vmem:[%s16717_s6 + $0x140] ss:$16 sps:$4 sm:$0xff]  }
 0x341   :  { %v1575_v29 = vadd.f32 %v1574_v20, %v1515_v22  ;;  %v9238_v22 = vld [vmem:[%s16717_s6 + $0x10c] ss:$16 sps:$4 sm:$0xff]   ;;  %2311 = vmatprep.subr.bf16.mxu1 %v9271_v25 }
 0x342   :  { %v1612_v30 = vadd.f32 %v1611_v26, %v1516_v27  ;;  %v9236_v26 = vld [vmem:[%s16717_s6 + $0x108] ss:$16 sps:$4 sm:$0xff]   ;;  %2504 = vmatprep.subr.bf16.mxu0 %v9238_v22 }
 0x343   :  { %2505 = vmatpush1.bf16.msra.mxu0 %v9236_v26 }
 0x344   :  { %v10043_v33 = vpop.f32.mrb[24].mxu0 }
 0x345   :  { %v1435_v34 = vadd.f32 %v1434_v21, %v10043_v33  ;;  %v1517_v35 = vmul.f32 %v10043_v33, %v10043_v33  ;;  %v10048_v39 = vpop.f32.mrb[25].mxu0 }
 0x346   :  { %v1472_v40 = vadd.f32 %v1471_v53, %v10048_v39  ;;  %v1518_v36 = vmul.f32 %v10048_v39, %v10048_v39  ;;  %v10053_v41 = vpop.f32.mrb[26].mxu0  ;;  %v9269_v53 = vld [vmem:[%s16717_s6 + $0x100] ss:$16 sps:$4 sm:$0xff]  }
 0x347   :  { %v1576_v0 = vadd.f32 %v1575_v29, %v1517_v35  ;;  %v1436_v44 = vadd.f32 %v1435_v34, %v10053_v41  ;;  %v1519_v45 = vmul.f32 %v10053_v41, %v10053_v41  ;;  %v10063_v47 = vpop.f32.mrb[27].mxu0  ;;  %2312 = vmatpush1.bf16.msra.mxu1 %v9269_v53 }
 0x348   :  { %v1613_v49 = vadd.f32 %v1612_v30, %v1518_v36  ;;  %v1473_v50 = vadd.f32 %v1472_v40, %v10063_v47  ;;  %v1520_v51 = vmul.f32 %v10063_v47, %v10063_v47  ;;  %v9247_v40 = vld [vmem:[%s16717_s6 + $0x12c] ss:$16 sps:$4 sm:$0xff]   ;;  %v9277_v36 = vld [vmem:[%s16717_s6 + $0x124] ss:$16 sps:$4 sm:$0xff]  }
 0x349   :  { %v1577_v54 = vadd.f32 %v1576_v0, %v1519_v45  ;;  %2506 = vmatprep.subr.bf16.mxu0 %v9247_v40  ;;  %2313 = vmatprep.subr.bf16.mxu1 %v9277_v36 }
 0x34a   :  { %v1614_v55 = vadd.f32 %v1613_v49, %v1520_v51  ;;  %v9245_v49 = vld [vmem:[%s16717_s6 + $0x128] ss:$16 sps:$4 sm:$0xff]  }
 0x34b   :  { %2507 = vmatpush1.bf16.msra.mxu0 %v9245_v49  ;;  %v9274_v49 = vld [vmem:[%s16717_s6 + $0x18c] ss:$16 sps:$4 sm:$0xff]  }
 0x34c   :  { %v10079_v58 = vpop.f32.mrb[28].mxu0 }
 0x34d   :  { %v1437_v62 = vadd.f32 %v1436_v44, %v10079_v58  ;;  %v1521_v63 = vmul.f32 %v10079_v58, %v10079_v58  ;;  %v10084_v1 = vpop.f32.mrb[29].mxu0 }
 0x34e   :  { %v1474_v2 = vadd.f32 %v1473_v50, %v10084_v1  ;;  %v1522_v4 = vmul.f32 %v10084_v1, %v10084_v1  ;;  %v10089_v43 = vpop.f32.mrb[30].mxu0  ;;  %v9275_v50 = vld [vmem:[%s16717_s6 + $0x120] ss:$16 sps:$4 sm:$0xff]  }
 0x34f   :  { %v1578_v6 = vadd.f32 %v1577_v54, %v1521_v63  ;;  %v1438_v8 = vadd.f32 %v1437_v62, %v10089_v43  ;;  %v1523_v9 = vmul.f32 %v10089_v43, %v10089_v43  ;;  %v10099_v11 = vpop.f32.mrb[31].mxu0  ;;  %v9256_v63 = vld [vmem:[%s16717_s6 + $0x14c] ss:$16 sps:$4 sm:$0xff]   ;;  %2314 = vmatpush1.bf16.msra.mxu1 %v9275_v50  ;;  %v9289_v50 = vld [vmem:[%s16717_s6 + $0x184] ss:$16 sps:$4 sm:$0xff]  }
 0x350   :  { %v1615_v14 = vadd.f32 %v1614_v55, %v1522_v4  ;;  %v1475_v16 = vadd.f32 %v1474_v2, %v10099_v11  ;;  %v1524_v17 = vmul.f32 %v10099_v11, %v10099_v11  ;;  %v9280_v2 = vld [vmem:[%s16717_s6 + $0x144] ss:$16 sps:$4 sm:$0xff]   ;;  %v9254_v4 = vld [vmem:[%s16717_s6 + $0x148] ss:$16 sps:$4 sm:$0xff]   ;;  %2508 = vmatprep.subr.bf16.mxu0 %v9256_v63 }
 0x351   :  { %v1579_v20 = vadd.f32 %v1578_v6, %v1523_v9  ;;  %2315 = vmatprep.subr.bf16.mxu1 %v9280_v2  ;;  %2509 = vmatpush1.bf16.msra.mxu0 %v9254_v4 }
 0x352   :  { %v1616_v21 = vadd.f32 %v1615_v14, %v1524_v17 }
 0x353   :  { %2316 = vmatpush1.bf16.msra.mxu1 %v9278_v5 }
 0x354   :  { %v10121_v27 = vpop.f32.mrb[32].mxu0 }
 0x355   :  { %v1439_v29 = vadd.f32 %v1438_v8, %v10121_v27  ;;  %v1525_v30 = vmul.f32 %v10121_v27, %v10121_v27  ;;  %v10126_v31 = vpop.f32.mrb[33].mxu0 }
 0x356   :  { %v1476_v32 = vadd.f32 %v1475_v16, %v10126_v31  ;;  %v1526_v34 = vmul.f32 %v10126_v31, %v10126_v31  ;;  %v10131_v35 = vpop.f32.mrb[34].mxu0 }
 0x357   :  { %v1580_v42 = vadd.f32 %v1579_v20, %v1525_v30  ;;  %v1440_v0 = vadd.f32 %v1439_v29, %v10131_v35  ;;  %v1527_v44 = vmul.f32 %v10131_v35, %v10131_v35  ;;  %v10144_v48 = vpop.f32.mrb[35].mxu0  ;;  %v9265_v20 = vld [vmem:[%s16717_s6 + $0x16c] ss:$16 sps:$4 sm:$0xff]   ;;  %v9263_v30 = vld [vmem:[%s16717_s6 + $0x168] ss:$16 sps:$4 sm:$0xff]  }
 0x358   :  { %v1617_v51 = vadd.f32 %v1616_v21, %v1526_v34  ;;  %v1477_v54 = vadd.f32 %v1476_v32, %v10144_v48  ;;  %v1528_v55 = vmul.f32 %v10144_v48, %v10144_v48  ;;  %v9286_v21 = vld [vmem:[%s16717_s6 + $0x164] ss:$16 sps:$4 sm:$0xff]   ;;  %v9284_v32 = vld [vmem:[%s16717_s6 + $0x160] ss:$16 sps:$4 sm:$0xff]   ;;  %2510 = vmatprep.subr.bf16.mxu0 %v9265_v20 }
 0x359   :  { %v1581_v57 = vadd.f32 %v1580_v42, %v1527_v44  ;;  %2511 = vmatpush1.bf16.msra.mxu0 %v9263_v30  ;;  %2317 = vmatprep.subr.bf16.mxu1 %v9286_v21 }
 0x35a   :  { %v1618_v62 = vadd.f32 %v1617_v51, %v1528_v55  ;;  %2318 = vmatpush1.bf16.msra.mxu1 %v9284_v32  ;;  %v9272_v51 = vld [vmem:[%s16717_s6 + $0x188] ss:$16 sps:$4 sm:$0xff]   ;;  %2512 = vmatprep.subr.bf16.mxu0 %v9274_v49  ;;  %v9292_v49 = vld [vmem:[%s16717_s6 + $0x1cc] ss:$16 sps:$4 sm:$0xff]  }
 0x35b   :  { %2319 = vmatprep.subr.bf16.mxu1 %v9289_v50  ;;  %v9290_v50 = vld [vmem:[%s16717_s6 + $0x1c8] ss:$16 sps:$4 sm:$0xff]  }
 0x35c   :  { %v10169_v6 = vpop.f32.mrb[36].mxu0 }
 0x35d   :  { %v1441_v8 = vadd.f32 %v1440_v0, %v10169_v6  ;;  %v1529_v9 = vmul.f32 %v10169_v6, %v10169_v6  ;;  %v10174_v13 = vpop.f32.mrb[37].mxu0  ;;  %2513 = vmatpush1.bf16.msra.mxu0 %v9272_v51  ;;  %v9296_v51 = vld [vmem:[%s16717_s6 + $0x1c0] ss:$16 sps:$4 sm:$0xff]  }
 0x35e   :  { %v1478_v14 = vadd.f32 %v1477_v54, %v10174_v13  ;;  %v1530_v16 = vmul.f32 %v10174_v13, %v10174_v13  ;;  %v10179_v17 = vpop.f32.mrb[38].mxu0  ;;  %v9287_v54 = vld [vmem:[%s16717_s6 + $0x180] ss:$16 sps:$4 sm:$0xff]  }
 0x35f   :  { %v1582_v22 = vadd.f32 %v1581_v57, %v1529_v9  ;;  %v1442_v25 = vadd.f32 %v1441_v8, %v10179_v17  ;;  %v1531_v26 = vmul.f32 %v10179_v17, %v10179_v17  ;;  %v10192_v29 = vpop.f32.mrb[39].mxu0  ;;  %v9283_v8 = vld [vmem:[%s16717_s6 + $0x1ac] ss:$16 sps:$4 sm:$0xff]   ;;  %2320 = vmatpush1.bf16.msra.mxu1 %v9287_v54  ;;  %v9295_v9 = vld [vmem:[%s16717_s6 + $0x1a4] ss:$16 sps:$4 sm:$0xff]  }
 0x360   :  { %v1619_v34 = vadd.f32 %v1618_v62, %v1530_v16  ;;  %v1479_v40 = vadd.f32 %v1478_v14, %v10192_v29  ;;  %v1532_v36 = vmul.f32 %v10192_v29, %v10192_v29  ;;  %2514 = vmatprep.subr.bf16.mxu0 %v9283_v8  ;;  %2321 = vmatprep.subr.bf16.mxu1 %v9295_v9  ;;  %v9299_v8 = vld [vmem:[%s16717_s6 + $0x1e8] ss:$16 sps:$4 sm:$0xff]   ;;  %v9304_v9 = vld [vmem:[%s16717_s6 + $0x1e4] ss:$16 sps:$4 sm:$0xff]  }
 0x361   :  { %v1583_v0 = vadd.f32 %v1582_v22, %v1531_v26  ;;  %v9293_v26 = vld [vmem:[%s16717_s6 + $0x1a0] ss:$16 sps:$4 sm:$0xff]  }
 0x362   :  { %v1620_v44 = vadd.f32 %v1619_v34, %v1532_v36 }
 0x363   :  { %2322 = vmatpush1.bf16.msra.mxu1 %v9293_v26 }
 0x364   :  { %v10217_v55 = vpop.f32.mrb[40].mxu0 }
 0x365   :  { %v1443_v57 = vadd.f32 %v1442_v25, %v10217_v55  ;;  %v1533_v62 = vmul.f32 %v10217_v55, %v10217_v55  ;;  %v10222_v63 = vpop.f32.mrb[41].mxu0  ;;  %v9281_v25 = vld [vmem:[%s16717_s6 + $0x1a8] ss:$16 sps:$4 sm:$0xff]  }
 0x366   :  { %v1480_v2 = vadd.f32 %v1479_v40, %v10222_v63  ;;  %v1534_v4 = vmul.f32 %v10222_v63, %v10222_v63  ;;  %v10227_v5 = vpop.f32.mrb[42].mxu0  ;;  %2515 = vmatpush1.bf16.msra.mxu0 %v9281_v25  ;;  %v9302_v25 = vld [vmem:[%s16717_s6 + $0x1e0] ss:$16 sps:$4 sm:$0xff]  }
 0x367   :  { %v1584_v14 = vadd.f32 %v1583_v0, %v1533_v62  ;;  %v1444_v16 = vadd.f32 %v1443_v57, %v10227_v5  ;;  %v1535_v20 = vmul.f32 %v10227_v5, %v10227_v5  ;;  %v10240_v22 = vpop.f32.mrb[43].mxu0  ;;  %2516 = vmatprep.subr.bf16.mxu0 %v9292_v49  ;;  %v9301_v57 = vld [vmem:[%s16717_s6 + $0x1ec] ss:$16 sps:$4 sm:$0xff]  }
 0x368   :  { %v1621_v30 = vadd.f32 %v1620_v44, %v1534_v4  ;;  %v1481_v32 = vadd.f32 %v1480_v2, %v10240_v22  ;;  %v1536_v34 = vmul.f32 %v10240_v22, %v10240_v22  ;;  %v9298_v44 = vld [vmem:[%s16717_s6 + $0x1c4] ss:$16 sps:$4 sm:$0xff]  }
 0x369   :  { %v1585_v36 = vadd.f32 %v1584_v14, %v1535_v20  ;;  %2323 = vmatprep.subr.bf16.mxu1 %v9298_v44 }
 0x36a   :  { %v1622_v0 = vadd.f32 %v1621_v30, %v1536_v34  ;;  %2517 = vmatpush1.bf16.msra.mxu0 %v9290_v50  ;;  %2324 = vmatpush1.bf16.msra.mxu1 %v9296_v51 }
 0x36b   :  { %2518 = vmatprep.subr.bf16.mxu0 %v9301_v57  ;;  %2325 = vmatprep.subr.bf16.mxu1 %v9304_v9 }
 0x36c   :  { %v10265_v54 = vpop.f32.mrb[44].mxu0 }
 0x36d   :  { %v1445_v62 = vadd.f32 %v1444_v16, %v10265_v54  ;;  %v1537_v2 = vmul.f32 %v10265_v54, %v10265_v54  ;;  %v10273_v4 = vpop.f32.mrb[45].mxu0 }
 0x36e   :  { %v1482_v14 = vadd.f32 %v1481_v32, %v10273_v4  ;;  %v1538_v20 = vmul.f32 %v10273_v4, %v10273_v4  ;;  %v10284_v16 = vpop.f32.mrb[46].mxu0  ;;  %2519 = vmatpush1.bf16.msra.mxu0 %v9299_v8  ;;  %2326 = vmatpush1.bf16.msra.mxu1 %v9302_v25 }
 0x36f   :  { %v1586_v26 = vadd.f32 %v1585_v36, %v1537_v2  ;;  %v1446_v30 = vadd.f32 %v1445_v62, %v10284_v16  ;;  %v1539_v34 = vmul.f32 %v10284_v16, %v10284_v16  ;;  %v10294_v49 = vpop.f32.mrb[47].mxu0 }
 0x370   :  { %v1623_v44 = vadd.f32 %v1622_v0, %v1538_v20  ;;  %v1483_v50 = vadd.f32 %v1482_v14, %v10294_v49  ;;  %v1540_v51 = vmul.f32 %v10294_v49, %v10294_v49 }
 0x371   :  { %v1587_v57 = vadd.f32 %v1586_v26, %v1539_v34 }
 0x372   :  { %v1624_v62 = vadd.f32 %v1623_v44, %v1540_v51 }
 0x374   :  { %v10301_v2 = vpop.f32.mrb[48].mxu0 }
 0x375   :  { %17261 = vst [vmem:[#allocation16_spill] sm:$0xff] %v10301_v2  ;;  %v1447_v32 = vadd.f32 %v1446_v30, %v10301_v2  ;;  %v1541_v9 = vmul.f32 %v10301_v2, %v10301_v2  ;;  %v10306_v0 = vpop.f32.mrb[49].mxu0 }
 0x376   :  { %v1484_v14 = vadd.f32 %v1483_v50, %v10306_v0  ;;  %v1542_v20 = vmul.f32 %v10306_v0, %v10306_v0  ;;  %v10311_v21 = vpop.f32.mrb[50].mxu0 }
 0x377   :  { %v1588_v26 = vadd.f32 %v1587_v57, %v1541_v9  ;;  %v1448_v8 = vadd.f32 %v1447_v32, %v10311_v21  ;;  %v1543_v25 = vmul.f32 %v10311_v21, %v10311_v21  ;;  %v10318_v34 = vpop.f32.mrb[51].mxu0 }
 0x378   :  { %v1625_v44 = vadd.f32 %v1624_v62, %v1542_v20  ;;  %v1485_v51 = vadd.f32 %v1484_v14, %v10318_v34  ;;  %v1544_v50 = vmul.f32 %v10318_v34, %v10318_v34 }
 0x379   :  { %v1589_v57 = vadd.f32 %v1588_v26, %v1543_v25 }
 0x37a   :  { %v1626_v9 = vadd.f32 %v1625_v44, %v1544_v50 }
 0x37c   :  { %v10325_v32 = vpop.f32.mrb[52].mxu0 }
 0x37d   :  { %17262 = vst [vmem:[#allocation17_spill] sm:$0xff] %v10325_v32  ;;  %v1449_v40 = vadd.f32 %v1448_v8, %v10325_v32  ;;  %v1545_v30 = vmul.f32 %v10325_v32, %v10325_v32  ;;  %v10330_v53 = vpop.f32.mrb[53].mxu0 }
 0x37e   :  { %17263 = vst [vmem:[#allocation18_spill] sm:$0xff] %v10330_v53  ;;  %v1486_v62 = vadd.f32 %v1485_v51, %v10330_v53  ;;  %v1546_v14 = vmul.f32 %v10330_v53, %v10330_v53  ;;  %v10335_v20 = vpop.f32.mrb[54].mxu0 }
 0x37f   :  { %17264 = vst [vmem:[#allocation19_spill] sm:$0xff] %v10335_v20  ;;  %v1590_v42 = vadd.f32 %v1589_v57, %v1545_v30  ;;  %v1450_v26 = vadd.f32 %v1449_v40, %v10335_v20  ;;  %v1547_v25 = vmul.f32 %v10335_v20, %v10335_v20  ;;  %v10342_v44 = vpop.f32.mrb[55].mxu0 }
 0x380   :  { %17265 = vst [vmem:[#allocation20_spill] sm:$0xff] %v10342_v44  ;;  %v1627_v50 = vadd.f32 %v1626_v9, %v1546_v14  ;;  %v1487_v36 = vadd.f32 %v1486_v62, %v10342_v44  ;;  %v1548_v51 = vmul.f32 %v10342_v44, %v10342_v44 }
 0x381   :  { %v1591_v30 = vadd.f32 %v1590_v42, %v1547_v25 }
 0x382   :  { %v1628_v57 = vadd.f32 %v1627_v50, %v1548_v51 }
 0x384   :  { %v10349_v40 = vpop.f32.mrb[56].mxu0 }
 0x385   :  { %17266 = vst [vmem:[#allocation21_spill] sm:$0xff] %v10349_v40  ;;  %v1451_v56 = vadd.f32 %v1450_v26, %v10349_v40  ;;  %v1549_v8 = vmul.f32 %v10349_v40, %v10349_v40  ;;  %v10354_v10 = vpop.f32.mrb[57].mxu0 }
 0x386   :  { %17267 = vst [vmem:[#allocation22_spill] sm:$0xff] %v10354_v10  ;;  %v1488_v9 = vadd.f32 %v1487_v36, %v10354_v10  ;;  %v1550_v62 = vmul.f32 %v10354_v10, %v10354_v10  ;;  %v10359_v14 = vpop.f32.mrb[58].mxu0 }
 0x387   :  { %17268 = vst [vmem:[#allocation23_spill] sm:$0xff] %v10359_v14  ;;  %v1592_v19 = vadd.f32 %v1591_v30, %v1549_v8  ;;  %v1452_v42 = vadd.f32 %v1451_v56, %v10359_v14  ;;  %v1551_v25 = vmul.f32 %v10359_v14, %v10359_v14  ;;  %v10366_v50 = vpop.f32.mrb[59].mxu0 }
 0x388   :  { %17269 = vst [vmem:[#allocation24_spill] sm:$0xff] %v10366_v50  ;;  %v1629_v51 = vadd.f32 %v1628_v57, %v1550_v62  ;;  %v1489_v45 = vadd.f32 %v1488_v9, %v10366_v50  ;;  %v1552_v36 = vmul.f32 %v10366_v50, %v10366_v50 }
 0x389   :  { %v1593_v8 = vadd.f32 %v1592_v19, %v1551_v25 }
 0x38a   :  { %v1630_v30 = vadd.f32 %v1629_v51, %v1552_v36 }
 0x38c   :  { %v10373_v56 = vpop.f32.mrb[60].mxu0 }
 0x38d   :  { %17270 = vst [vmem:[#allocation25_spill] sm:$0xff] %v10373_v56  ;;  %v1453_v52 = vadd.f32 %v1452_v42, %v10373_v56  ;;  %v1553_v26 = vmul.f32 %v10373_v56, %v10373_v56  ;;  %v10378_v23 = vpop.f32.mrb[61].mxu0 }
 0x38e   :  { %17271 = vst [vmem:[#allocation26_spill] sm:$0xff] %v10378_v23  ;;  %v1490_v57 = vadd.f32 %v1489_v45, %v10378_v23  ;;  %v1554_v9 = vmul.f32 %v10378_v23, %v10378_v23  ;;  %v10383_v62 = vpop.f32.mrb[62].mxu0 }
 0x38f   :  { %17272 = vst [vmem:[#allocation27_spill] sm:$0xff] %v10383_v62  ;;  %v1594_v28 = vadd.f32 %v1593_v8, %v1553_v26  ;;  %v1454_v19 = vadd.f32 %v1453_v52, %v10383_v62  ;;  %v1555_v25 = vmul.f32 %v10383_v62, %v10383_v62  ;;  %v10390_v51 = vpop.f32.mrb[63].mxu0 }
 0x390   :  { %17273 = vst [vmem:[#allocation28_spill] sm:$0xff] %v10390_v51  ;;  %v1631_v36 = vadd.f32 %v1630_v30, %v1554_v9  ;;  %v1491_v46 = vadd.f32 %v1490_v57, %v10390_v51  ;;  %v1556_v45 = vmul.f32 %v10390_v51, %v10390_v51 }
 0x391   :  { %v1595_v26 = vadd.f32 %v1594_v28, %v1555_v25 }
 0x392   :  { %v1632_v8 = vadd.f32 %v1631_v36, %v1556_v45 }
 0x394   :  { %v10397_v52 = vpop.f32.mrb[64].mxu0 }
 0x395   :  { %17274 = vst [vmem:[#allocation29_spill] sm:$0xff] %v10397_v52  ;;  %v1455_v7 = vadd.f32 %v1454_v19, %v10397_v52  ;;  %v1557_v42 = vmul.f32 %v10397_v52, %v10397_v52  ;;  %v10402_v37 = vpop.f32.mrb[65].mxu0 }
 0x396   :  { %17275 = vst [vmem:[#allocation30_spill] sm:$0xff] %v10402_v37  ;;  %v1492_v30 = vadd.f32 %v1491_v46, %v10402_v37  ;;  %v1558_v57 = vmul.f32 %v10402_v37, %v10402_v37  ;;  %v10407_v9 = vpop.f32.mrb[66].mxu0 }
 0x397   :  { %17276 = vst [vmem:[#allocation31_spill] sm:$0xff] %v10407_v9  ;;  %v1596_v56 = vadd.f32 %v1595_v26, %v1557_v42  ;;  %v1456_v28 = vadd.f32 %v1455_v7, %v10407_v9  ;;  %v1559_v25 = vmul.f32 %v10407_v9, %v10407_v9  ;;  %v10414_v36 = vpop.f32.mrb[67].mxu0 }
 0x398   :  { %17277 = vst [vmem:[#allocation32_spill] sm:$0xff] %v10414_v36  ;;  %v1633_v45 = vadd.f32 %v1632_v8, %v1558_v57  ;;  %v1493_v3 = vadd.f32 %v1492_v30, %v10414_v36  ;;  %v1560_v46 = vmul.f32 %v10414_v36, %v10414_v36 }
 0x399   :  { %v1597_v42 = vadd.f32 %v1596_v56, %v1559_v25 }
 0x39a   :  { %v1634_v26 = vadd.f32 %v1633_v45, %v1560_v46 }
 0x39c   :  { %v10421_v7 = vpop.f32.mrb[68].mxu0 }
 0x39d   :  { %17278 = vst [vmem:[#allocation33_spill] sm:$0xff] %v10421_v7  ;;  %v1457_v23 = vadd.f32 %v1456_v28, %v10421_v7  ;;  %v1561_v19 = vmul.f32 %v10421_v7, %v10421_v7  ;;  %v10426_v52 = vpop.f32.mrb[69].mxu0 }
 0x39e   :  { %17279 = vst [vmem:[#allocation34_spill] sm:$0xff] %v10426_v52  ;;  %v1494_v8 = vadd.f32 %v1493_v3, %v10426_v52  ;;  %v1562_v30 = vmul.f32 %v10426_v52, %v10426_v52  ;;  %v10431_v57 = vpop.f32.mrb[70].mxu0 }
 0x39f   :  { %17280 = vst [vmem:[#allocation35_spill] sm:$0xff] %v10431_v57  ;;  %v1598_v9 = vadd.f32 %v1597_v42, %v1561_v19  ;;  %v1458_v56 = vadd.f32 %v1457_v23, %v10431_v57  ;;  %v1563_v25 = vmul.f32 %v10431_v57, %v10431_v57  ;;  %v10438_v45 = vpop.f32.mrb[71].mxu0 }
 0x3a0   :  { %17281 = vst [vmem:[#allocation36_spill] sm:$0xff] %v10438_v45  ;;  %v1635_v46 = vadd.f32 %v1634_v26, %v1562_v30  ;;  %v1495_v62 = vadd.f32 %v1494_v8, %v10438_v45  ;;  %v1564_v3 = vmul.f32 %v10438_v45, %v10438_v45 }
 0x3a1   :  { %v1599_v19 = vadd.f32 %v1598_v9, %v1563_v25 }
 0x3a2   :  { %v1636_v42 = vadd.f32 %v1635_v46, %v1564_v3 }
 0x3a4   :  { %v10445_v23 = vpop.f32.mrb[72].mxu0 }
 0x3a5   :  { %17282 = vst [vmem:[#allocation37_spill] sm:$0xff] %v10445_v23  ;;  %v1459_v36 = vadd.f32 %v1458_v56, %v10445_v23  ;;  %v1565_v28 = vmul.f32 %v10445_v23, %v10445_v23  ;;  %v10450_v7 = vpop.f32.mrb[73].mxu0 }
 0x3a6   :  { %17283 = vst [vmem:[#allocation38_spill] sm:$0xff] %v10450_v7  ;;  %v1496_v26 = vadd.f32 %v1495_v62, %v10450_v7  ;;  %v1566_v8 = vmul.f32 %v10450_v7, %v10450_v7  ;;  %v10455_v30 = vpop.f32.mrb[74].mxu0 }
 0x3a7   :  { %17284 = vst [vmem:[#allocation39_spill] sm:$0xff] %v10455_v30  ;;  %v1600_v57 = vadd.f32 %v1599_v19, %v1565_v28  ;;  %v1460_v9 = vadd.f32 %v1459_v36, %v10455_v30  ;;  %v1567_v25 = vmul.f32 %v10455_v30, %v10455_v30  ;;  %v10462_v46 = vpop.f32.mrb[75].mxu0 }
 0x3a8   :  { %17285 = vst [vmem:[#allocation40_spill] sm:$0xff] %v10462_v46  ;;  %v1637_v3 = vadd.f32 %v1636_v42, %v1566_v8  ;;  %v1497_v37 = vadd.f32 %v1496_v26, %v10462_v46  ;;  %v1568_v62 = vmul.f32 %v10462_v46, %v10462_v46 }
 0x3a9   :  { %v1601_v28 = vadd.f32 %v1600_v57, %v1567_v25 }
 0x3aa   :  { %v1638_v19 = vadd.f32 %v1637_v3, %v1568_v62 }
 0x3ac   :  { %v10469_v36 = vpop.f32.mrb[76].mxu0 }
 0x3ad   :  { %17286 = vst [vmem:[#allocation41_spill] sm:$0xff] %v10469_v36  ;;  %v1461_v45 = vadd.f32 %v1460_v9, %v10469_v36  ;;  %v1569_v56 = vmul.f32 %v10469_v36, %v10469_v36  ;;  %v10474_v23 = vpop.f32.mrb[77].mxu0 }
 0x3ae   :  { %v1498_v42 = vadd.f32 %v1497_v37, %v10474_v23  ;;  %v1570_v26 = vmul.f32 %v10474_v23, %v10474_v23  ;;  %v10479_v8 = vpop.f32.mrb[78].mxu0 }
 0x3af   :  { %17287 = vst [vmem:[#allocation42_spill] sm:$0xff] %v10479_v8  ;;  %v1602_v30 = vadd.f32 %v1601_v28, %v1569_v56  ;;  %v1462_v57 = vadd.f32 %v1461_v45, %v10479_v8  ;;  %v1571_v25 = vmul.f32 %v10479_v8, %v10479_v8  ;;  %v10486_v3 = vpop.f32.mrb[79].mxu0 }
 0x3b0   :  { %v1639_v62 = vadd.f32 %v1638_v19, %v1570_v26  ;;  %v1499_v52 = vadd.f32 %v1498_v42, %v10486_v3  ;;  %v1572_v37 = vmul.f32 %v10486_v3, %v10486_v3 }
 0x3b1   :  { %v1463_v56 = vrot.slane %v1462_v57, 4  ;;  %v1603_v28 = vadd.f32 %v1602_v30, %v1571_v25 }
 0x3b2   :  { %v1500_v45 = vrot.slane %v1499_v52, 4  ;;  %v1640_v46 = vadd.f32 %v1639_v62, %v1572_v37 }
 0x3b3   :  { %v1464_v51 = vadd.f32 %v1463_v56, %v1462_v57  ;;  %v1604_v40 = vrot.slane %v1603_v28, 4 }
 0x3b4   :  { %v1501_v14 = vadd.f32 %v1500_v45, %v1499_v52  ;;  %v1641_v10 = vrot.slane %v1640_v46, 4 }
 0x3b5   :  { %v1465_v9 = vrot.slane %v1464_v51, 2  ;;  %v1605_v36 = vadd.f32 %v1604_v40, %v1603_v28 }
 0x3b6   :  { %v1502_v8 = vrot.slane %v1501_v14, 2  ;;  %v1642_v19 = vadd.f32 %v1641_v10, %v1640_v46 }
 0x3b7   :  { %v1466_v26 = vadd.f32 %v1465_v9, %v1464_v51  ;;  %v1606_v42 = vrot.slane %v1605_v36, 2  ;;  %v17288_v9 = vlaneseq }
 0x3b8   :  { %v1503_v50 = vadd.f32 %v1502_v8, %v1501_v14  ;;  %v1643_v32 = vrot.slane %v1642_v19, 2 }
 0x3b9   :  { %v1467_v20 = vrot.slane %v1466_v26, 1  ;;  %v1607_v53 = vadd.f32 %v1606_v42, %v1605_v36  ;;  %v9460_v36 = vmov 1966171168  }
 0x3ba   :  { %v1504_v44 = vrot.slane %v1503_v50, 1  ;;  %v1644_v7 = vadd.f32 %v1643_v32, %v1642_v19  ;;  %v1661_v32 = vunpack.c.l.s4 %v9460_v36 }
 0x3bb   :  { %v1468_v2 = vadd.f32 %v1467_v20, %v1466_v26  ;;  %v1608_v30 = vrot.slane %v1607_v53, 1  ;;  %v1430_v26 = vld [vmem:[%s16720_s9 + $0x1] sm:$0x3] }
 0x3bc   :  { %v1505_v25 = vadd.f32 %v1504_v44, %v1503_v50  ;;  %v1645_v62 = vrot.slane %v1644_v7, 1  ;;  %v1662_v20 = vunpack.c.0.s8 %v1661_v32  ;;  %v10494_v44 = vshrl.u32 %v17288_v9, 7 }
 0x3bd   :  { %v1507_v57 = vmul.f32 0.00390625, %v1468_v2  ;;  %v1609_v37 = vadd.f32 %v1608_v30, %v1607_v53 }
 0x3be   :  { %v1508_v52 = vmul.f32 0.00390625, %v1505_v25  ;;  %v1646_v56 = vadd.f32 %v1645_v62, %v1644_v7  ;;  %17289 = vst [vmem:[#allocation43_spill] sm:$0xff] %v10494_v44  ;;  %v10497_v53 = vsub.s32 %v1662_v20, %v10494_v44  ;;  %v10505_v30 = vsub.s32 0, %v10494_v44  ;;  %v1431_v20 = vld [vmem:[%s16720_s9 + $0x3] sm:$0x3] }
 0x3bf   :  { %v1647_v45 = vmul.f32 0.00390625, %v1609_v37  ;;  %v1649_v40 = vmul.f32 %v1507_v57, %v1507_v57  ;;  %v10508_v25 = vsub.s32 1, %v10494_v44 }
 0x3c0   :  { %v1648_v28 = vmul.f32 0.00390625, %v1646_v56  ;;  %v1650_v10 = vmul.f32 %v1508_v52, %v1508_v52  ;;  %17290 = vst [vmem:[#allocation44_spill] sm:$0xff] %v10497_v53  ;;  %17291 = vst [vmem:[#allocation45_spill] sm:$0xff] %v10505_v30 }
 0x3c1   :  { %v1651_v51 = vsub.f32 %v1647_v45, %v1649_v40  ;;  %17292 = vst [vmem:[#allocation46_spill] sm:$0xff] %v10508_v25 }
 0x3c2   :  { %v1652_v46 = vsub.f32 %v1648_v28, %v1650_v10 }
 0x3c3   :  { %v1653_v14 = vadd.f32 0.8, %v1651_v51 }
 0x3c4   :  { %v1654_v8 = vadd.f32 0.8, %v1652_v46 }
 0x3c5   :  { %9305 = vrsqrt.f32 %v1653_v14 }
 0x3c6   :  { %9307 = vrsqrt.f32 %v1654_v8 }
 0x3cf   :  { %v9306_v2 = vpop.eup %9305 }
 0x3d0   :  { %v9308_v50 = vpop.eup %9307 }
 0x3d1   :  { %v1659_v7 = vcombine.low %v9306_v2, %v9308_v50  ;;  %v17294_v2 = vpack.c.bf16 %v9988_v38, %v9973_v60  ;;  %v17299_v60 = vpack.c.bf16 %v10053_v41, %v10043_v33  ;;  %v17304_v33 = vpack.c.bf16 %v10192_v29, %v10174_v13 }
 0x3d2   :  { %v17310_v29 = vpack.c.bf16 %v10318_v34, %v10306_v0  ;;  %v17322_v0 = vld [vmem:[#allocation23_spill] sm:$0xff]  ;;  %v17323_v34 = vld [vmem:[#allocation21_spill] sm:$0xff] }
 0x3d3   :  { %v1666_v19 = vrot.slane %v1659_v7, %v10497_v53  ;;  %v17295_v7 = vpack.c.bf16 %v9975_v61, %v9971_v59  ;;  %v17300_v59 = vpack.c.bf16 %v10099_v11, %v10084_v1  ;;  %v17305_v1 = vpack.c.bf16 %v10179_v17, %v10169_v6 }
 0x3d4   :  { %v17309_v6 = vpack.c.bf16 %v10284_v16, %v10265_v54  ;;  %v17319_v54 = vld [vmem:[#allocation24_spill] sm:$0xff]  ;;  %v17320_v16 = vld [vmem:[#allocation22_spill] sm:$0xff] }
 0x3d5   :  { %v1673_v42 = vrot.slane %v1666_v19, %v10497_v53 }
 0x3d7   :  { %v1675_v62 = vmul.f32 %v1673_v42, %v1430_v26  ;;  %v17296_v26 = vpack.c.bf16 %v10027_v24, %v10012_v15  ;;  %v17301_v15 = vpack.c.bf16 %v10089_v43, %v10079_v58  ;;  %v17306_v58 = vpack.c.bf16 %v10240_v22, %v10222_v63  ;;  %v17311_v22 = vld [vmem:[#allocation16_spill] sm:$0xff] }
 0x3d9   :  { %v1680_v37 = vrot.slane %v1675_v62, %v10505_v30  ;;  %v1684_v56 = vrot.slane %v1675_v62, %v10508_v25  ;;  %v17297_v62 = vpack.c.bf16 %v10017_v18, %v10007_v12  ;;  %v17302_v12 = vpack.c.bf16 %v10144_v48, %v10126_v31 }
 0x3da   :  { %v17308_v48 = vpack.c.bf16 %v10294_v49, %v10273_v4  ;;  %v17316_v4 = vld [vmem:[#allocation19_spill] sm:$0xff]  ;;  %v17317_v49 = vld [vmem:[#allocation17_spill] sm:$0xff] }
 0x3db   :  { %v1687_v45 = vmul.f32 %v1680_v37, %v1507_v57  ;;  %v1688_v40 = vmul.f32 %v1684_v56, %v1508_v52  ;;  %v1740_v28 = vpack.c.bf16 %v1680_v37, %v1680_v37  ;;  %v1741_v10 = vpack.c.bf16 %v1684_v56, %v1684_v56 }
 0x3dc   :  { %v17293_v57 = vpack.c.bf16 %v10486_v3, %v10474_v23  ;;  %v17298_v23 = vpack.c.bf16 %v10063_v47, %v10048_v39  ;;  %v17303_v39 = vpack.c.bf16 %v10131_v35, %v10121_v27  ;;  %v17307_v27 = vpack.c.bf16 %v10227_v5, %v10217_v55 }
 0x3dd   :  { %v1691_v51 = vcombine.low %v1687_v45, %v1688_v40  ;;  %v1743_v46 = vpack.i.b16 %v1740_v28, %v1740_v28  ;;  %v1750_v14 = vpack.i.b16 %v1741_v10, %v1741_v10  ;;  %v17312_v40 = vpack.c.bf16 %v10311_v21, %v17311_v22  ;;  %v17313_v10 = vld [vmem:[#allocation20_spill] sm:$0xff]  ;;  %v17338_v22 = vld [vmem:[#allocation34_spill] sm:$0xff] }
 0x3de   :  { %v17325_v21 = vld [vmem:[#allocation28_spill] sm:$0xff] }
 0x3df   :  { %v1698_v8 = vrot.slane %v1691_v51, %v10497_v53  ;;  %v1748_v36 = vrot.slane %v1743_v46, %v10505_v30  ;;  %v1755_v32 = vrot.slane %v1750_v14, %v10505_v30  ;;  %v17314_v51 = vld [vmem:[#allocation18_spill] sm:$0xff] }
 0x3e0   :  { %v17315_v55 = vpack.c.bf16 %v17313_v10, %v17314_v51  ;;  %v17340_v51 = vld [vmem:[#allocation35_spill] sm:$0xff] }
 0x3e1   :  { %v1705_v9 = vrot.slane %v1698_v8, %v10497_v53  ;;  %v10522_v52 = vmul.bf16 %v1755_v32, %v17293_v57  ;;  %v1757_v50 = vmul.bf16 %v1755_v32, %v17294_v2  ;;  %v1756_v19 = vmul.bf16 %v1748_v36, %v17295_v7 }
 0x3e2   :  { %v1759_v42 = vmul.bf16 %v1755_v32, %v17296_v26  ;;  %v1758_v37 = vmul.bf16 %v1748_v36, %v17297_v62  ;;  %v1761_v3 = vmul.bf16 %v1755_v32, %v17298_v23  ;;  %v1760_v38 = vmul.bf16 %v1748_v36, %v17299_v60  ;;  %v17326_v26 = vld [vmem:[#allocation26_spill] sm:$0xff]  ;;  %v17328_v60 = vld [vmem:[#allocation27_spill] sm:$0xff] }
 0x3e3   :  { %v1707_v56 = vsub.f32 %v1431_v20, %v1705_v9  ;;  %v1763_v61 = vmul.bf16 %v1755_v32, %v17300_v59  ;;  %v1762_v24 = vmul.bf16 %v1748_v36, %v17301_v15  ;;  %v1765_v18 = vmul.bf16 %v1755_v32, %v17302_v12  ;;  %v17331_v12 = vld [vmem:[#allocation32_spill] sm:$0xff] }
 0x3e4   :  { %v1764_v47 = vmul.bf16 %v1748_v36, %v17303_v39  ;;  %v1767_v41 = vmul.bf16 %v1755_v32, %v17304_v33  ;;  %v1766_v11 = vmul.bf16 %v1748_v36, %v17305_v1  ;;  %v1769_v43 = vmul.bf16 %v1755_v32, %v17306_v58  ;;  %v17332_v39 = vld [vmem:[#allocation30_spill] sm:$0xff] }
 0x3e5   :  { %v1792_v45 = vrot.slane %v1707_v56, %v10505_v30  ;;  %v1796_v31 = vrot.slane %v1707_v56, %v10508_v25  ;;  %v1768_v35 = vmul.bf16 %v1748_v36, %v17307_v27  ;;  %v1771_v13 = vmul.bf16 %v1755_v32, %v17308_v48  ;;  %v17329_v56 = vld [vmem:[#allocation25_spill] sm:$0xff] }
 0x3e6   :  { %v1770_v17 = vmul.bf16 %v1748_v36, %v17309_v6  ;;  %v1773_v63 = vmul.bf16 %v1755_v32, %v17310_v29  ;;  %v1772_v28 = vmul.bf16 %v1748_v36, %v17312_v40  ;;  %v1775_v5 = vmul.bf16 %v1755_v32, %v17315_v55  ;;  %v17335_v27 = vld [vmem:[#allocation29_spill] sm:$0xff]  ;;  %v17337_v29 = vld [vmem:[#allocation36_spill] sm:$0xff] }
 0x3e7   :  { %v1799_v46 = vpack.c.bf16 %v1792_v45, %v1792_v45  ;;  %v1800_v14 = vpack.c.bf16 %v1796_v31, %v1796_v31  ;;  %v17318_v8 = vpack.c.bf16 %v17316_v4, %v17317_v49  ;;  %v17321_v9 = vpack.c.bf16 %v17319_v54, %v17320_v16  ;;  %v17334_v31 = vld [vmem:[#allocation31_spill] sm:$0xff]  ;;  %v17341_v55 = vld [vmem:[#allocation33_spill] sm:$0xff]  ;;  %v17344_v54 = vld [vmem:[#allocation38_spill] sm:$0xff] }
 0x3e8   :  { %v17324_v2 = vpack.c.bf16 %v17322_v0, %v17323_v34  ;;  %v17327_v62 = vpack.c.bf16 %v17325_v21, %v17326_v26  ;;  %v17330_v59 = vpack.c.bf16 %v17328_v60, %v17329_v56  ;;  %v17333_v33 = vpack.c.bf16 %v17331_v12, %v17332_v39  ;;  %v17346_v0 = vld [vmem:[#allocation39_spill] sm:$0xff]  ;;  %v17347_v34 = vld [vmem:[#allocation37_spill] sm:$0xff] }
 0x3e9   :  { %v1774_v20 = vmul.bf16 %v1748_v36, %v17318_v8  ;;  %v1777_v57 = vmul.bf16 %v1755_v32, %v17321_v9  ;;  %v1802_v58 = vpack.i.b16 %v1799_v46, %v1799_v46  ;;  %v1809_v45 = vpack.i.b16 %v1800_v14, %v1800_v14  ;;  %v17343_v8 = vld [vmem:[#allocation40_spill] sm:$0xff]  ;;  %v17350_v21 = vld [vmem:[#allocation41_spill] sm:$0xff] }
 0x3ea   :  { %v1776_v7 = vmul.bf16 %v1748_v36, %v17324_v2  ;;  %v1779_v23 = vmul.bf16 %v1755_v32, %v17327_v62  ;;  %v1778_v15 = vmul.bf16 %v1748_v36, %v17330_v59  ;;  %v1781_v1 = vmul.bf16 %v1755_v32, %v17333_v33  ;;  %v17349_v2 = vld [vmem:[#allocation42_spill] sm:$0xff] }
 0x3eb   :  { %v17336_v48 = vpack.c.bf16 %v17334_v31, %v17335_v27  ;;  %v17339_v40 = vpack.c.bf16 %v17337_v29, %v17338_v22  ;;  %v17342_v4 = vpack.c.bf16 %v17340_v51, %v17341_v55  ;;  %v17345_v16 = vpack.c.bf16 %v17343_v8, %v17344_v54 }
 0x3ec   :  { %v17348_v46 = vpack.c.bf16 %v17346_v0, %v17347_v34  ;;  %v17351_v26 = vpack.c.bf16 %v17349_v2, %v17350_v21  ;;  %v1807_v60 = vrot.slane %v1802_v58, %v10505_v30  ;;  %v1814_v56 = vrot.slane %v1809_v45, %v10505_v30 }
 0x3ed   :  { %v1780_v6 = vmul.bf16 %v1748_v36, %v17336_v48  ;;  %v1783_v10 = vmul.bf16 %v1755_v32, %v17339_v40  ;;  %v1782_v49 = vmul.bf16 %v1748_v36, %v17342_v4  ;;  %v1785_v9 = vmul.bf16 %v1755_v32, %v17345_v16 }
 0x3ee   :  { %v1784_v14 = vmul.bf16 %v1748_v36, %v17348_v46  ;;  %v1786_v62 = vmul.bf16 %v1748_v36, %v17351_v26  ;;  %v1816_v59 = vadd.bf16 %v1814_v56, %v1757_v50  ;;  %v1815_v12 = vadd.bf16 %v1807_v60, %v1756_v19 }
 0x3ef   :  { %v1818_v39 = vadd.bf16 %v1814_v56, %v1759_v42  ;;  %v1817_v33 = vadd.bf16 %v1807_v60, %v1758_v37  ;;  %v1820_v31 = vadd.bf16 %v1814_v56, %v1761_v3  ;;  %v1819_v27 = vadd.bf16 %v1807_v60, %v1760_v38 }
 0x3f0   :  { %v1822_v48 = vadd.bf16 %v1814_v56, %v1763_v61  ;;  %v1821_v32 = vadd.bf16 %v1807_v60, %v1762_v24  ;;  %v1848_v29 = vmul.bf16 1045249613, %v1816_v59  ;;  %v1847_v22 = vmul.bf16 1045249613, %v1815_v12 }
 0x3f1   :  { %v1850_v40 = vmul.bf16 1045249613, %v1818_v39  ;;  %v1824_v51 = vadd.bf16 %v1814_v56, %v1765_v18  ;;  %v1823_v55 = vadd.bf16 %v1807_v60, %v1764_v47  ;;  %v1826_v58 = vadd.bf16 %v1814_v56, %v1767_v41 }
 0x3f2   :  { %v1880_v4 = vmax.bf16 %v1848_v29, %v1816_v59  ;;  %v1879_v8 = vmax.bf16 %v1847_v22, %v1815_v12  ;;  %v1825_v50 = vadd.bf16 %v1807_v60, %v1766_v11  ;;  %v1828_v19 = vadd.bf16 %v1814_v56, %v1769_v43 }
 0x3f3   :  { %v1882_v36 = vmax.bf16 %v1850_v40, %v1818_v39  ;;  %v1827_v42 = vadd.bf16 %v1807_v60, %v1768_v35  ;;  %v1849_v37 = vmul.bf16 1045249613, %v1817_v33  ;;  %v1830_v3 = vadd.bf16 %v1814_v56, %v1771_v13 }
 0x3f4   :  { %2327 = vmatprep.mubr.bf16.mxu1 %v1880_v4  ;;  %2520 = vmatprep.mubr.bf16.mxu0 %v1880_v4  ;;  %v10621_v38 = vadd.bf16 %v1807_v60, %v1770_v17  ;;  %v1852_v61 = vmul.bf16 1045249613, %v1820_v31  ;;  %v10623_v24 = vadd.bf16 %v1814_v56, %v1773_v63  ;;  %v10625_v18 = vadd.bf16 %v1807_v60, %v1772_v28 }
 0x3f5   :  { %2328 = vmatmul.mubr.bf16.vlgmr.msra.gmra.mrb[48].mxu1 %v1879_v8  ;;  %2521 = vmatmul.mubr.bf16.vlgmr.msra.gmra.mrb[80].mxu0 %v1879_v8  ;;  %v10627_v47 = vadd.bf16 %v1814_v56, %v1775_v5  ;;  %v1881_v45 = vmax.bf16 %v1849_v37, %v1817_v33  ;;  %v10629_v41 = vadd.bf16 %v1807_v60, %v1774_v20  ;;  %v1851_v28 = vmul.bf16 1045249613, %v1819_v27 }
 0x3f6   :  { %2337 = vmatprep.mubr.bf16.mxu1 %v1882_v36  ;;  %2530 = vmatprep.mubr.bf16.mxu0 %v1882_v36  ;;  %v10631_v54 = vadd.bf16 %v1814_v56, %v1777_v57  ;;  %v1884_v11 = vmax.bf16 %v1852_v61, %v1820_v31  ;;  %v10633_v43 = vadd.bf16 %v1807_v60, %v1776_v7  ;;  %v1854_v5 = vmul.bf16 1045249613, %v1822_v48 }
 0x3f7   :  { %v10635_v35 = vadd.bf16 %v1814_v56, %v1779_v23  ;;  %v10637_v13 = vadd.bf16 %v1807_v60, %v1778_v15  ;;  %v10639_v17 = vadd.bf16 %v1814_v56, %v1781_v1  ;;  %v10641_v63 = vadd.bf16 %v1807_v60, %v1780_v6 }
 0x3f8   :  { %v10643_v20 = vadd.bf16 %v1814_v56, %v1783_v10  ;;  %v10645_v57 = vadd.bf16 %v1807_v60, %v1782_v49  ;;  %v10647_v7 = vadd.bf16 %v1814_v56, %v1785_v9  ;;  %v10649_v16 = vadd.bf16 %v1807_v60, %v1784_v14 }
 0x3f9   :  { %v1883_v23 = vmax.bf16 %v1851_v28, %v1819_v27  ;;  %v10652_v15 = vadd.bf16 %v1814_v56, %v10522_v52  ;;  %v10654_v0 = vadd.bf16 %v1807_v60, %v1786_v62  ;;  %v1886_v1 = vmax.bf16 %v1854_v5, %v1822_v48 }
 0x3fa   :  { %v1853_v6 = vmul.bf16 1045249613, %v1821_v32  ;;  %v1856_v10 = vmul.bf16 1045249613, %v1824_v51  ;;  %v1855_v9 = vmul.bf16 1045249613, %v1823_v55 }
 0x3fb   :  { %v1858_v46 = vmul.bf16 1045249613, %v1826_v58  ;;  %v1857_v2 = vmul.bf16 1045249613, %v1825_v50  ;;  %v1860_v21 = vmul.bf16 1045249613, %v1828_v19 }
 0x3fc   :  { %v1885_v34 = vmax.bf16 %v1853_v6, %v1821_v32  ;;  %v1888_v49 = vmax.bf16 %v1856_v10, %v1824_v51  ;;  %v1887_v14 = vmax.bf16 %v1855_v9, %v1823_v55  ;;  %v1859_v60 = vmul.bf16 1045249613, %v1827_v42 }
 0x3fd   :  { %2338 = vmatmul.mubr.bf16.gmra.mrb[52].mxu1 %v1881_v45  ;;  %2531 = vmatmul.mubr.bf16.gmra.mrb[84].mxu0 %v1881_v45  ;;  %v1890_v52 = vmax.bf16 %v1858_v46, %v1826_v58  ;;  %v1889_v26 = vmax.bf16 %v1857_v2, %v1825_v50  ;;  %v1892_v62 = vmax.bf16 %v1860_v21, %v1828_v19  ;;  %v1862_v56 = vmul.bf16 1045249613, %v1830_v3 }
 0x3fe   :  { %2347 = vmatprep.mubr.bf16.mxu1 %v1884_v11  ;;  %2540 = vmatprep.mubr.bf16.mxu0 %v1884_v11  ;;  %v1891_v59 = vmax.bf16 %v1859_v60, %v1827_v42  ;;  %v1861_v39 = vmul.bf16 1045249613, %v10621_v38  ;;  %v1864_v33 = vmul.bf16 1045249613, %v10623_v24  ;;  %v1863_v48 = vmul.bf16 1045249613, %v10625_v18 }
 0x3ff   :  { %v1894_v12 = vmax.bf16 %v1862_v56, %v1830_v3  ;;  %v1866_v32 = vmul.bf16 1045249613, %v10627_v47  ;;  %v1865_v40 = vmul.bf16 1045249613, %v10629_v41  ;;  %v1868_v51 = vmul.bf16 1045249613, %v10631_v54 }
 0x400   :  { %v1893_v31 = vmax.bf16 %v1861_v39, %v10621_v38  ;;  %v1896_v27 = vmax.bf16 %v1864_v33, %v10623_v24  ;;  %v1895_v29 = vmax.bf16 %v1863_v48, %v10625_v18  ;;  %v1867_v8 = vmul.bf16 1045249613, %v10633_v43 }
 0x401   :  { %v1898_v22 = vmax.bf16 %v1866_v32, %v10627_v47  ;;  %v1897_v55 = vmax.bf16 %v1865_v40, %v10629_v41  ;;  %v1900_v4 = vmax.bf16 %v1868_v51, %v10631_v54  ;;  %v1870_v36 = vmul.bf16 1045249613, %v10635_v35 }
 0x402   :  { %v1899_v58 = vmax.bf16 %v1867_v8, %v10633_v43  ;;  %v1869_v19 = vmul.bf16 1045249613, %v10637_v13  ;;  %v1872_v42 = vmul.bf16 1045249613, %v10639_v17  ;;  %v1871_v38 = vmul.bf16 1045249613, %v10641_v63 }
 0x403   :  { %v1902_v50 = vmax.bf16 %v1870_v36, %v10635_v35  ;;  %v1874_v61 = vmul.bf16 1045249613, %v10643_v20  ;;  %v1873_v47 = vmul.bf16 1045249613, %v10645_v57  ;;  %v1876_v45 = vmul.bf16 1045249613, %v10647_v7 }
 0x404   :  { %v1901_v37 = vmax.bf16 %v1869_v19, %v10637_v13  ;;  %v1904_v3 = vmax.bf16 %v1872_v42, %v10639_v17  ;;  %v1903_v24 = vmax.bf16 %v1871_v38, %v10641_v63  ;;  %v1875_v11 = vmul.bf16 1045249613, %v10649_v16 }
 0x405   :  { %2348 = vmatmul.mubr.bf16.gmra.mrb[56].mxu1 %v1883_v23  ;;  %2541 = vmatmul.mubr.bf16.gmra.mrb[88].mxu0 %v1883_v23  ;;  %v1906_v18 = vmax.bf16 %v1874_v61, %v10643_v20  ;;  %v1905_v41 = vmax.bf16 %v1873_v47, %v10645_v57  ;;  %v1908_v54 = vmax.bf16 %v1876_v45, %v10647_v7  ;;  %v1878_v43 = vmul.bf16 1045249613, %v10652_v15 }
 0x406   :  { %2357 = vmatprep.mubr.bf16.mxu1 %v1886_v1  ;;  %2550 = vmatprep.mubr.bf16.mxu0 %v1886_v1  ;;  %v1907_v35 = vmax.bf16 %v1875_v11, %v10649_v16  ;;  %v1877_v17 = vmul.bf16 1045249613, %v10654_v0 }
 0x407   :  { %v1910_v13 = vmax.bf16 %v1878_v43, %v10652_v15 }
 0x408   :  { %v1909_v63 = vmax.bf16 %v1877_v17, %v10654_v0 }
 0x40d   :  { %2358 = vmatmul.mubr.bf16.gmra.mrb[60].mxu1 %v1885_v34  ;;  %2551 = vmatmul.mubr.bf16.gmra.mrb[92].mxu0 %v1885_v34 }
 0x40e   :  { %2367 = vmatprep.mubr.bf16.mxu1 %v1888_v49  ;;  %2560 = vmatprep.mubr.bf16.mxu0 %v1888_v49 }
 0x415   :  { %2368 = vmatmul.mubr.bf16.gmra.mrb[64].mxu1 %v1887_v14  ;;  %2561 = vmatmul.mubr.bf16.gmra.mrb[96].mxu0 %v1887_v14 }
 0x416   :  { %2377 = vmatprep.mubr.bf16.mxu1 %v1890_v52  ;;  %2570 = vmatprep.mubr.bf16.mxu0 %v1890_v52 }
 0x41d   :  { %2378 = vmatmul.mubr.bf16.gmra.mrb[68].mxu1 %v1889_v26  ;;  %2571 = vmatmul.mubr.bf16.gmra.mrb[100].mxu0 %v1889_v26 }
 0x41e   :  { %2387 = vmatprep.mubr.bf16.mxu1 %v1892_v62  ;;  %2580 = vmatprep.mubr.bf16.mxu0 %v1892_v62 }
 0x425   :  { %2388 = vmatmul.mubr.bf16.gmra.mrb[72].mxu1 %v1891_v59  ;;  %2581 = vmatmul.mubr.bf16.gmra.mrb[104].mxu0 %v1891_v59 }
 0x426   :  { %2397 = vmatprep.mubr.bf16.mxu1 %v1894_v12  ;;  %2590 = vmatprep.mubr.bf16.mxu0 %v1894_v12 }
 0x42d   :  { %2398 = vmatmul.mubr.bf16.gmra.mrb[76].mxu1 %v1893_v31  ;;  %2591 = vmatmul.mubr.bf16.gmra.mrb[108].mxu0 %v1893_v31 }
 0x42e   :  { %2407 = vmatprep.mubr.bf16.mxu1 %v1896_v27  ;;  %2600 = vmatprep.mubr.bf16.mxu0 %v1896_v27 }
 0x435   :  { %2408 = vmatmul.mubr.bf16.gmra.mrb[80].mxu1 %v1895_v29  ;;  %2601 = vmatmul.mubr.bf16.gmra.mrb[112].mxu0 %v1895_v29 }
 0x436   :  { %2417 = vmatprep.mubr.bf16.mxu1 %v1898_v22  ;;  %2610 = vmatprep.mubr.bf16.mxu0 %v1898_v22 }
 0x43d   :  { %2418 = vmatmul.mubr.bf16.gmra.mrb[84].mxu1 %v1897_v55  ;;  %2611 = vmatmul.mubr.bf16.gmra.mrb[116].mxu0 %v1897_v55 }
 0x43e   :  { %2427 = vmatprep.mubr.bf16.mxu1 %v1900_v4  ;;  %2620 = vmatprep.mubr.bf16.mxu0 %v1900_v4 }
 0x445   :  { %2428 = vmatmul.mubr.bf16.gmra.mrb[88].mxu1 %v1899_v58  ;;  %2621 = vmatmul.mubr.bf16.gmra.mrb[120].mxu0 %v1899_v58 }
 0x446   :  { %2437 = vmatprep.mubr.bf16.mxu1 %v1902_v50  ;;  %2630 = vmatprep.mubr.bf16.mxu0 %v1902_v50 }
 0x44d   :  { %2438 = vmatmul.mubr.bf16.gmra.mrb[92].mxu1 %v1901_v37  ;;  %2631 = vmatmul.mubr.bf16.gmra.mrb[124].mxu0 %v1901_v37 }
 0x44e   :  { %2447 = vmatprep.mubr.bf16.mxu1 %v1904_v3  ;;  %2640 = vmatprep.mubr.bf16.mxu0 %v1904_v3 }
 0x455   :  { %2448 = vmatmul.mubr.bf16.gmra.mrb[96].mxu1 %v1903_v24  ;;  %2641 = vmatmul.mubr.bf16.gmra.mrb[128].mxu0 %v1903_v24 }
 0x456   :  { %2457 = vmatprep.mubr.bf16.mxu1 %v1906_v18  ;;  %2650 = vmatprep.mubr.bf16.mxu0 %v1906_v18 }
 0x45d   :  { %2458 = vmatmul.mubr.bf16.gmra.mrb[100].mxu1 %v1905_v41  ;;  %2651 = vmatmul.mubr.bf16.gmra.mrb[132].mxu0 %v1905_v41 }
 0x45e   :  { %2467 = vmatprep.mubr.bf16.mxu1 %v1908_v54  ;;  %2660 = vmatprep.mubr.bf16.mxu0 %v1908_v54 }
 0x465   :  { %2468 = vmatmul.mubr.bf16.gmra.mrb[104].mxu1 %v1907_v35  ;;  %2661 = vmatmul.mubr.bf16.gmra.mrb[136].mxu0 %v1907_v35 }
 0x466   :  { %2477 = vmatprep.mubr.bf16.mxu1 %v1910_v13  ;;  %2670 = vmatprep.mubr.bf16.mxu0 %v1910_v13 }
 0x46d   :  { %2478 = vmatmul.mubr.bf16.gmra.mrb[108].mxu1 %v1909_v63  ;;  %2671 = vmatmul.mubr.bf16.gmra.mrb[140].mxu0 %v1909_v63 }
 0x4c8   :  { %v10690_v28 = vpop.f32.mrb[48].mxu1  ;;  %v10692_v5 = vpop.f32.mrb[80].mxu0 }
 0x4c9   :  { %v10694_v20 = vpop.f32.mrb[49].mxu1  ;;  %v10696_v57 = vpop.f32.mrb[81].mxu0  ;;  %v2835_v7 = vmul.f32 %v10690_v28, %v10690_v28  ;;  %v2837_v16 = vmul.f32 %v10692_v5, %v10692_v5 }
 0x4ca   :  { %v2836_v23 = vmul.f32 %v10694_v20, %v10694_v20  ;;  %v2838_v15 = vmul.f32 %v10696_v57, %v10696_v57  ;;  %v10706_v0 = vpop.f32.mrb[50].mxu1  ;;  %v10708_v1 = vpop.f32.mrb[82].mxu0 }
 0x4cb   :  { %v2683_v6 = vadd.f32 %v10706_v0, %v10690_v28  ;;  %v2839_v10 = vmul.f32 %v10706_v0, %v10706_v0  ;;  %v2757_v49 = vadd.f32 %v10708_v1, %v10692_v5  ;;  %v10718_v9 = vpop.f32.mrb[51].mxu1  ;;  %v10720_v46 = vpop.f32.mrb[83].mxu0  ;;  %v2841_v14 = vmul.f32 %v10708_v1, %v10708_v1 }
 0x4cc   :  { %v2720_v2 = vadd.f32 %v10718_v9, %v10694_v20  ;;  %v2840_v21 = vmul.f32 %v10718_v9, %v10718_v9  ;;  %v2794_v60 = vadd.f32 %v10720_v46, %v10696_v57  ;;  %v2842_v56 = vmul.f32 %v10720_v46, %v10720_v46 }
 0x4cd   :  { %v2963_v26 = vadd.f32 %v2839_v10, %v2835_v7  ;;  %v3037_v59 = vadd.f32 %v2841_v14, %v2837_v16 }
 0x4ce   :  { %v3000_v12 = vadd.f32 %v2840_v21, %v2836_v23  ;;  %v3074_v33 = vadd.f32 %v2842_v56, %v2838_v15 }
 0x4d0   :  { %v10738_v31 = vpop.f32.mrb[52].mxu1  ;;  %v10740_v27 = vpop.f32.mrb[84].mxu0 }
 0x4d1   :  { %v2684_v48 = vadd.f32 %v2683_v6, %v10738_v31  ;;  %v2843_v32 = vmul.f32 %v10738_v31, %v10738_v31  ;;  %v2758_v29 = vadd.f32 %v2757_v49, %v10740_v27  ;;  %v2845_v22 = vmul.f32 %v10740_v27, %v10740_v27  ;;  %v10748_v40 = vpop.f32.mrb[53].mxu1  ;;  %v10750_v51 = vpop.f32.mrb[85].mxu0 }
 0x4d2   :  { %v2721_v55 = vadd.f32 %v2720_v2, %v10748_v40  ;;  %v2844_v4 = vmul.f32 %v10748_v40, %v10748_v40  ;;  %v2795_v8 = vadd.f32 %v2794_v60, %v10750_v51  ;;  %v2846_v36 = vmul.f32 %v10750_v51, %v10750_v51  ;;  %v10758_v58 = vpop.f32.mrb[54].mxu1  ;;  %v10760_v50 = vpop.f32.mrb[86].mxu0 }
 0x4d3   :  { %v2964_v19 = vadd.f32 %v2963_v26, %v2843_v32  ;;  %v3038_v42 = vadd.f32 %v3037_v59, %v2845_v22  ;;  %v2685_v37 = vadd.f32 %v2684_v48, %v10758_v58  ;;  %v2847_v3 = vmul.f32 %v10758_v58, %v10758_v58  ;;  %v10765_v38 = vpop.f32.mrb[55].mxu1  ;;  %v10767_v61 = vpop.f32.mrb[87].mxu0 }
 0x4d4   :  { %v3001_v24 = vadd.f32 %v3000_v12, %v2844_v4  ;;  %v3075_v18 = vadd.f32 %v3074_v33, %v2846_v36  ;;  %v2759_v45 = vadd.f32 %v2758_v29, %v10760_v50  ;;  %v2849_v54 = vmul.f32 %v10760_v50, %v10760_v50 }
 0x4d5   :  { %v2965_v41 = vadd.f32 %v2964_v19, %v2847_v3  ;;  %v2722_v43 = vadd.f32 %v2721_v55, %v10765_v38  ;;  %v2848_v35 = vmul.f32 %v10765_v38, %v10765_v38  ;;  %v2796_v17 = vadd.f32 %v2795_v8, %v10767_v61 }
 0x4d6   :  { %v2850_v63 = vmul.f32 %v10767_v61, %v10767_v61  ;;  %v3039_v7 = vadd.f32 %v3038_v42, %v2849_v54 }
 0x4d7   :  { %v3002_v23 = vadd.f32 %v3001_v24, %v2848_v35 }
 0x4d8   :  { %v3076_v15 = vadd.f32 %v3075_v18, %v2850_v63  ;;  %v10786_v6 = vpop.f32.mrb[56].mxu1  ;;  %v10788_v10 = vpop.f32.mrb[88].mxu0 }
 0x4d9   :  { %v2686_v49 = vadd.f32 %v2685_v37, %v10786_v6  ;;  %v2851_v14 = vmul.f32 %v10786_v6, %v10786_v6  ;;  %v2760_v2 = vadd.f32 %v2759_v45, %v10788_v10  ;;  %v2853_v21 = vmul.f32 %v10788_v10, %v10788_v10  ;;  %v10796_v26 = vpop.f32.mrb[57].mxu1  ;;  %v10798_v60 = vpop.f32.mrb[89].mxu0 }
 0x4da   :  { %v2723_v56 = vadd.f32 %v2722_v43, %v10796_v26  ;;  %v2852_v59 = vmul.f32 %v10796_v26, %v10796_v26  ;;  %v2797_v12 = vadd.f32 %v2796_v17, %v10798_v60  ;;  %v2854_v33 = vmul.f32 %v10798_v60, %v10798_v60  ;;  %v10806_v48 = vpop.f32.mrb[58].mxu1  ;;  %v10808_v32 = vpop.f32.mrb[90].mxu0 }
 0x4db   :  { %v2966_v29 = vadd.f32 %v2965_v41, %v2851_v14  ;;  %v3040_v22 = vadd.f32 %v3039_v7, %v2853_v21  ;;  %v2687_v55 = vadd.f32 %v2686_v49, %v10806_v48  ;;  %v2855_v4 = vmul.f32 %v10806_v48, %v10806_v48  ;;  %v10813_v8 = vpop.f32.mrb[59].mxu1  ;;  %v10815_v36 = vpop.f32.mrb[91].mxu0 }
 0x4dc   :  { %v3003_v19 = vadd.f32 %v3002_v23, %v2852_v59  ;;  %v3077_v42 = vadd.f32 %v3076_v15, %v2854_v33  ;;  %v2761_v3 = vadd.f32 %v2760_v2, %v10808_v32  ;;  %v2857_v18 = vmul.f32 %v10808_v32, %v10808_v32 }
 0x4dd   :  { %v2967_v24 = vadd.f32 %v2966_v29, %v2855_v4  ;;  %v2724_v41 = vadd.f32 %v2723_v56, %v10813_v8  ;;  %v2856_v54 = vmul.f32 %v10813_v8, %v10813_v8  ;;  %v2798_v35 = vadd.f32 %v2797_v12, %v10815_v36 }
 0x4de   :  { %v2858_v17 = vmul.f32 %v10815_v36, %v10815_v36  ;;  %v3041_v63 = vadd.f32 %v3040_v22, %v2857_v18 }
 0x4df   :  { %v3004_v23 = vadd.f32 %v3003_v19, %v2856_v54 }
 0x4e0   :  { %v3078_v15 = vadd.f32 %v3077_v42, %v2858_v17  ;;  %v10834_v49 = vpop.f32.mrb[60].mxu1  ;;  %v10836_v14 = vpop.f32.mrb[92].mxu0 }
 0x4e1   :  { %17352 = vst [vmem:[#allocation16_spill] sm:$0xff] %v10834_v49  ;;  %17353 = vst [vmem:[#allocation20_spill] sm:$0xff] %v10836_v14  ;;  %v2688_v2 = vadd.f32 %v2687_v55, %v10834_v49  ;;  %v2859_v21 = vmul.f32 %v10834_v49, %v10834_v49  ;;  %v2762_v56 = vadd.f32 %v2761_v3, %v10836_v14  ;;  %v10844_v12 = vpop.f32.mrb[61].mxu1  ;;  %v10846_v33 = vpop.f32.mrb[93].mxu0 }
 0x4e2   :  { %v2861_v59 = vmul.f32 %v10836_v14, %v10836_v14  ;;  %17354 = vst [vmem:[#allocation18_spill] sm:$0xff] %v10844_v12  ;;  %17355 = vst [vmem:[#allocation19_spill] sm:$0xff] %v10846_v33  ;;  %v2725_v29 = vadd.f32 %v2724_v41, %v10844_v12  ;;  %v2860_v22 = vmul.f32 %v10844_v12, %v10844_v12  ;;  %v10854_v19 = vpop.f32.mrb[62].mxu1  ;;  %v10856_v42 = vpop.f32.mrb[94].mxu0 }
 0x4e3   :  { %v2799_v4 = vadd.f32 %v2798_v35, %v10846_v33  ;;  %v2862_v55 = vmul.f32 %v10846_v33, %v10846_v33  ;;  %17356 = vst [vmem:[#allocation17_spill] sm:$0xff] %v10854_v19  ;;  %17357 = vst [vmem:[#allocation24_spill] sm:$0xff] %v10856_v42  ;;  %v2968_v3 = vadd.f32 %v2967_v24, %v2859_v21  ;;  %v10861_v41 = vpop.f32.mrb[63].mxu1  ;;  %v10863_v7 = vpop.f32.mrb[95].mxu0 }
 0x4e4   :  { %v3042_v18 = vadd.f32 %v3041_v63, %v2861_v59  ;;  %v2689_v54 = vadd.f32 %v2688_v2, %v10854_v19  ;;  %v2863_v17 = vmul.f32 %v10854_v19, %v10854_v19  ;;  %17358 = vst [vmem:[#allocation22_spill] sm:$0xff] %v10861_v41  ;;  %17359 = vst [vmem:[#allocation23_spill] sm:$0xff] %v10863_v7 }
 0x4e5   :  { %v3005_v45 = vadd.f32 %v3004_v23, %v2860_v22  ;;  %v3079_v35 = vadd.f32 %v3078_v15, %v2862_v55  ;;  %v2763_v37 = vadd.f32 %v2762_v56, %v10856_v42  ;;  %v2865_v24 = vmul.f32 %v10856_v42, %v10856_v42 }
 0x4e6   :  { %v2969_v16 = vadd.f32 %v2968_v3, %v2863_v17  ;;  %v2726_v2 = vadd.f32 %v2725_v29, %v10861_v41  ;;  %v2864_v21 = vmul.f32 %v10861_v41, %v10861_v41  ;;  %v2800_v15 = vadd.f32 %v2799_v4, %v10863_v7 }
 0x4e7   :  { %v2866_v56 = vmul.f32 %v10863_v7, %v10863_v7  ;;  %v3043_v59 = vadd.f32 %v3042_v18, %v2865_v24 }
 0x4e8   :  { %v3006_v55 = vadd.f32 %v3005_v45, %v2864_v21  ;;  %v10882_v17 = vpop.f32.mrb[64].mxu1  ;;  %v10884_v29 = vpop.f32.mrb[96].mxu0 }
 0x4e9   :  { %v3080_v3 = vadd.f32 %v3079_v35, %v2866_v56  ;;  %17360 = vst [vmem:[#allocation21_spill] sm:$0xff] %v10882_v17  ;;  %17361 = vst [vmem:[#allocation28_spill] sm:$0xff] %v10884_v29  ;;  %v2690_v63 = vadd.f32 %v2689_v54, %v10882_v17  ;;  %v2867_v23 = vmul.f32 %v10882_v17, %v10882_v17  ;;  %v10892_v18 = vpop.f32.mrb[65].mxu1  ;;  %v10894_v24 = vpop.f32.mrb[97].mxu0 }
 0x4ea   :  { %v2764_v4 = vadd.f32 %v2763_v37, %v10884_v29  ;;  %v2869_v43 = vmul.f32 %v10884_v29, %v10884_v29  ;;  %17362 = vst [vmem:[#allocation26_spill] sm:$0xff] %v10892_v18  ;;  %17363 = vst [vmem:[#allocation27_spill] sm:$0xff] %v10894_v24  ;;  %v2727_v45 = vadd.f32 %v2726_v2, %v10892_v18  ;;  %v10902_v56 = vpop.f32.mrb[66].mxu1  ;;  %v10904_v37 = vpop.f32.mrb[98].mxu0 }
 0x4eb   :  { %v2868_v35 = vmul.f32 %v10892_v18, %v10892_v18  ;;  %v2801_v21 = vadd.f32 %v2800_v15, %v10894_v24  ;;  %v2870_v54 = vmul.f32 %v10894_v24, %v10894_v24  ;;  %17364 = vst [vmem:[#allocation25_spill] sm:$0xff] %v10902_v56  ;;  %17365 = vst [vmem:[#allocation32_spill] sm:$0xff] %v10904_v37  ;;  %v10909_v2 = vpop.f32.mrb[67].mxu1  ;;  %v10911_v39 = vpop.f32.mrb[99].mxu0 }
 0x4ec   :  { %v2970_v22 = vadd.f32 %v2969_v16, %v2867_v23  ;;  %v3044_v11 = vadd.f32 %v3043_v59, %v2869_v43  ;;  %v2691_v13 = vadd.f32 %v2690_v63, %v10902_v56  ;;  %v2871_v47 = vmul.f32 %v10902_v56, %v10902_v56  ;;  %17366 = vst [vmem:[#allocation30_spill] sm:$0xff] %v10909_v2 }
 0x4ed   :  { %17367 = vst [vmem:[#allocation31_spill] sm:$0xff] %v10911_v39  ;;  %v3007_v52 = vadd.f32 %v3006_v55, %v2868_v35  ;;  %v3081_v15 = vadd.f32 %v3080_v3, %v2870_v54  ;;  %v2765_v34 = vadd.f32 %v2764_v4, %v10904_v37  ;;  %v2873_v16 = vmul.f32 %v10904_v37, %v10904_v37 }
 0x4ee   :  { %v2971_v33 = vadd.f32 %v2970_v22, %v2871_v47  ;;  %v2728_v63 = vadd.f32 %v2727_v45, %v10909_v2  ;;  %v2872_v23 = vmul.f32 %v10909_v2, %v10909_v2  ;;  %v2802_v55 = vadd.f32 %v2801_v21, %v10911_v39 }
 0x4ef   :  { %v2874_v3 = vmul.f32 %v10911_v39, %v10911_v39  ;;  %v3045_v47 = vadd.f32 %v3044_v11, %v2873_v16 }
 0x4f0   :  { %v3008_v4 = vadd.f32 %v3007_v52, %v2872_v23  ;;  %v10930_v54 = vpop.f32.mrb[68].mxu1  ;;  %v10932_v45 = vpop.f32.mrb[100].mxu0 }
 0x4f1   :  { %v3082_v35 = vadd.f32 %v3081_v15, %v2874_v3  ;;  %17368 = vst [vmem:[#allocation29_spill] sm:$0xff] %v10930_v54  ;;  %17369 = vst [vmem:[#allocation36_spill] sm:$0xff] %v10932_v45  ;;  %v2692_v43 = vadd.f32 %v2691_v13, %v10930_v54  ;;  %v2875_v59 = vmul.f32 %v10930_v54, %v10930_v54  ;;  %v10940_v11 = vpop.f32.mrb[69].mxu1  ;;  %v10942_v16 = vpop.f32.mrb[101].mxu0 }
 0x4f2   :  { %v2766_v21 = vadd.f32 %v2765_v34, %v10932_v45  ;;  %v2877_v62 = vmul.f32 %v10932_v45, %v10932_v45  ;;  %17370 = vst [vmem:[#allocation34_spill] sm:$0xff] %v10940_v11  ;;  %17371 = vst [vmem:[#allocation35_spill] sm:$0xff] %v10942_v16  ;;  %v2729_v52 = vadd.f32 %v2728_v63, %v10940_v11  ;;  %v10950_v3 = vpop.f32.mrb[70].mxu1  ;;  %v10952_v34 = vpop.f32.mrb[102].mxu0 }
 0x4f3   :  { %v2876_v15 = vmul.f32 %v10940_v11, %v10940_v11  ;;  %v2803_v23 = vadd.f32 %v2802_v55, %v10942_v16  ;;  %v2878_v13 = vmul.f32 %v10942_v16, %v10942_v16  ;;  %17372 = vst [vmem:[#allocation33_spill] sm:$0xff] %v10950_v3  ;;  %17373 = vst [vmem:[#allocation40_spill] sm:$0xff] %v10952_v34  ;;  %v10957_v63 = vpop.f32.mrb[71].mxu1  ;;  %v10959_v37 = vpop.f32.mrb[103].mxu0 }
 0x4f4   :  { %v2972_v22 = vadd.f32 %v2971_v33, %v2875_v59  ;;  %v3046_v24 = vadd.f32 %v3045_v47, %v2877_v62  ;;  %v2693_v39 = vadd.f32 %v2692_v43, %v10950_v3  ;;  %v2879_v29 = vmul.f32 %v10950_v3, %v10950_v3  ;;  %17374 = vst [vmem:[#allocation38_spill] sm:$0xff] %v10957_v63 }
 0x4f5   :  { %17375 = vst [vmem:[#allocation39_spill] sm:$0xff] %v10959_v37  ;;  %v3009_v18 = vadd.f32 %v3008_v4, %v2876_v15  ;;  %v3083_v55 = vadd.f32 %v3082_v35, %v2878_v13  ;;  %v2767_v17 = vadd.f32 %v2766_v21, %v10952_v34  ;;  %v2881_v62 = vmul.f32 %v10952_v34, %v10952_v34 }
 0x4f6   :  { %v2973_v56 = vadd.f32 %v2972_v22, %v2879_v29  ;;  %v2730_v43 = vadd.f32 %v2729_v52, %v10957_v63  ;;  %v2880_v59 = vmul.f32 %v10957_v63, %v10957_v63  ;;  %v2804_v4 = vadd.f32 %v2803_v23, %v10959_v37 }
 0x4f7   :  { %v2882_v35 = vmul.f32 %v10959_v37, %v10959_v37  ;;  %v3047_v29 = vadd.f32 %v3046_v24, %v2881_v62 }
 0x4f8   :  { %v3010_v21 = vadd.f32 %v3009_v18, %v2880_v59  ;;  %v10978_v13 = vpop.f32.mrb[72].mxu1  ;;  %v10980_v52 = vpop.f32.mrb[104].mxu0 }
 0x4f9   :  { %v3084_v15 = vadd.f32 %v3083_v55, %v2882_v35  ;;  %17376 = vst [vmem:[#allocation37_spill] sm:$0xff] %v10978_v13  ;;  %17377 = vst [vmem:[#allocation42_spill] sm:$0xff] %v10980_v52  ;;  %v2694_v33 = vadd.f32 %v2693_v39, %v10978_v13  ;;  %v2883_v47 = vmul.f32 %v10978_v13, %v10978_v13  ;;  %v10988_v24 = vpop.f32.mrb[73].mxu1  ;;  %v10990_v62 = vpop.f32.mrb[105].mxu0 }
 0x4fa   :  { %v2768_v23 = vadd.f32 %v2767_v17, %v10980_v52  ;;  %v2885_v2 = vmul.f32 %v10980_v52, %v10980_v52  ;;  %17378 = vst [vmem:[#allocation41_spill] sm:$0xff] %v10988_v24  ;;  %17379 = vst [vmem:[#allocation47_spill] sm:$0xff] %v10990_v62  ;;  %v2731_v18 = vadd.f32 %v2730_v43, %v10988_v24  ;;  %v10998_v35 = vpop.f32.mrb[74].mxu1  ;;  %v11000_v17 = vpop.f32.mrb[106].mxu0 }
 0x4fb   :  { %v2884_v55 = vmul.f32 %v10988_v24, %v10988_v24  ;;  %v2805_v59 = vadd.f32 %v2804_v4, %v10990_v62  ;;  %v2886_v39 = vmul.f32 %v10990_v62, %v10990_v62  ;;  %17380 = vst [vmem:[#allocation48_spill] sm:$0xff] %v10998_v35  ;;  %17381 = vst [vmem:[#allocation49_spill] sm:$0xff] %v11000_v17  ;;  %v11005_v43 = vpop.f32.mrb[75].mxu1  ;;  %v11007_v34 = vpop.f32.mrb[107].mxu0 }
 0x4fc   :  { %v2974_v22 = vadd.f32 %v2973_v56, %v2883_v47  ;;  %v3048_v16 = vadd.f32 %v3047_v29, %v2885_v2  ;;  %v2695_v37 = vadd.f32 %v2694_v33, %v10998_v35  ;;  %v2887_v45 = vmul.f32 %v10998_v35, %v10998_v35  ;;  %17382 = vst [vmem:[#allocation50_spill] sm:$0xff] %v11005_v43 }
 0x4fd   :  { %17383 = vst [vmem:[#allocation51_spill] sm:$0xff] %v11007_v34  ;;  %v3011_v11 = vadd.f32 %v3010_v21, %v2884_v55  ;;  %v3085_v4 = vadd.f32 %v3084_v15, %v2886_v39  ;;  %v2769_v54 = vadd.f32 %v2768_v23, %v11000_v17  ;;  %v2889_v56 = vmul.f32 %v11000_v17, %v11000_v17 }
 0x4fe   :  { %v2975_v3 = vadd.f32 %v2974_v22, %v2887_v45  ;;  %v2732_v33 = vadd.f32 %v2731_v18, %v11005_v43  ;;  %v2888_v47 = vmul.f32 %v11005_v43, %v11005_v43  ;;  %v2806_v21 = vadd.f32 %v2805_v59, %v11007_v34 }
 0x4ff   :  { %v2890_v15 = vmul.f32 %v11007_v34, %v11007_v34  ;;  %v3049_v45 = vadd.f32 %v3048_v16, %v2889_v56 }
 0x500   :  { %v3012_v23 = vadd.f32 %v3011_v11, %v2888_v47  ;;  %v11026_v39 = vpop.f32.mrb[76].mxu1  ;;  %v11028_v18 = vpop.f32.mrb[108].mxu0 }
 0x501   :  { %v3086_v55 = vadd.f32 %v3085_v4, %v2890_v15  ;;  %17384 = vst [vmem:[#allocation52_spill] sm:$0xff] %v11026_v39  ;;  %17385 = vst [vmem:[#allocation53_spill] sm:$0xff] %v11028_v18  ;;  %v2696_v2 = vadd.f32 %v2695_v37, %v11026_v39  ;;  %v2891_v29 = vmul.f32 %v11026_v39, %v11026_v39  ;;  %v11036_v16 = vpop.f32.mrb[77].mxu1  ;;  %v11038_v56 = vpop.f32.mrb[109].mxu0 }
 0x502   :  { %v2770_v59 = vadd.f32 %v2769_v54, %v11028_v18  ;;  %v2893_v63 = vmul.f32 %v11028_v18, %v11028_v18  ;;  %17386 = vst [vmem:[#allocation54_spill] sm:$0xff] %v11036_v16  ;;  %17387 = vst [vmem:[#allocation55_spill] sm:$0xff] %v11038_v56  ;;  %v2733_v11 = vadd.f32 %v2732_v33, %v11036_v16  ;;  %v11046_v15 = vpop.f32.mrb[78].mxu1  ;;  %v11048_v54 = vpop.f32.mrb[110].mxu0 }
 0x503   :  { %v2892_v4 = vmul.f32 %v11036_v16, %v11036_v16  ;;  %v2807_v47 = vadd.f32 %v2806_v21, %v11038_v56  ;;  %v2894_v37 = vmul.f32 %v11038_v56, %v11038_v56  ;;  %17388 = vst [vmem:[#allocation56_spill] sm:$0xff] %v11046_v15  ;;  %17389 = vst [vmem:[#allocation57_spill] sm:$0xff] %v11048_v54  ;;  %v11053_v33 = vpop.f32.mrb[79].mxu1  ;;  %v11055_v17 = vpop.f32.mrb[111].mxu0 }
 0x504   :  { %v2976_v22 = vadd.f32 %v2975_v3, %v2891_v29  ;;  %v3050_v62 = vadd.f32 %v3049_v45, %v2893_v63  ;;  %v2697_v34 = vadd.f32 %v2696_v2, %v11046_v15  ;;  %v2895_v52 = vmul.f32 %v11046_v15, %v11046_v15  ;;  %17390 = vst [vmem:[#allocation58_spill] sm:$0xff] %v11053_v33 }
 0x505   :  { %17391 = vst [vmem:[#allocation59_spill] sm:$0xff] %v11055_v17  ;;  %v3013_v24 = vadd.f32 %v3012_v23, %v2892_v4  ;;  %v3087_v21 = vadd.f32 %v3086_v55, %v2894_v37  ;;  %v2771_v13 = vadd.f32 %v2770_v59, %v11048_v54  ;;  %v2897_v3 = vmul.f32 %v11048_v54, %v11048_v54 }
 0x506   :  { %v2977_v35 = vadd.f32 %v2976_v22, %v2895_v52  ;;  %v2734_v2 = vadd.f32 %v2733_v11, %v11053_v33  ;;  %v2896_v29 = vmul.f32 %v11053_v33, %v11053_v33  ;;  %v2808_v23 = vadd.f32 %v2807_v47, %v11055_v17 }
 0x507   :  { %v2898_v55 = vmul.f32 %v11055_v17, %v11055_v17  ;;  %v3051_v52 = vadd.f32 %v3050_v62, %v2897_v3 }
 0x508   :  { %v3014_v59 = vadd.f32 %v3013_v24, %v2896_v29  ;;  %v11074_v37 = vpop.f32.mrb[80].mxu1  ;;  %v11076_v11 = vpop.f32.mrb[112].mxu0 }
 0x509   :  { %v3088_v4 = vadd.f32 %v3087_v21, %v2898_v55  ;;  %17392 = vst [vmem:[#allocation60_spill] sm:$0xff] %v11074_v37  ;;  %17393 = vst [vmem:[#allocation61_spill] sm:$0xff] %v11076_v11  ;;  %v2698_v63 = vadd.f32 %v2697_v34, %v11074_v37  ;;  %v2899_v45 = vmul.f32 %v11074_v37, %v11074_v37  ;;  %v11084_v62 = vpop.f32.mrb[81].mxu1  ;;  %v11086_v3 = vpop.f32.mrb[113].mxu0 }
 0x50a   :  { %v2772_v47 = vadd.f32 %v2771_v13, %v11076_v11  ;;  %v2901_v43 = vmul.f32 %v11076_v11, %v11076_v11  ;;  %17394 = vst [vmem:[#allocation62_spill] sm:$0xff] %v11084_v62  ;;  %17395 = vst [vmem:[#allocation63_spill] sm:$0xff] %v11086_v3  ;;  %v2735_v24 = vadd.f32 %v2734_v2, %v11084_v62  ;;  %v11094_v55 = vpop.f32.mrb[82].mxu1  ;;  %v11096_v13 = vpop.f32.mrb[114].mxu0 }
 0x50b   :  { %v2900_v21 = vmul.f32 %v11084_v62, %v11084_v62  ;;  %v2809_v29 = vadd.f32 %v2808_v23, %v11086_v3  ;;  %v2902_v34 = vmul.f32 %v11086_v3, %v11086_v3  ;;  %17396 = vst [vmem:[#allocation64_spill] sm:$0xff] %v11094_v55  ;;  %17397 = vst [vmem:[#allocation65_spill] sm:$0xff] %v11096_v13  ;;  %v11101_v2 = vpop.f32.mrb[83].mxu1  ;;  %v11103_v54 = vpop.f32.mrb[115].mxu0 }
 0x50c   :  { %v2978_v22 = vadd.f32 %v2977_v35, %v2899_v45  ;;  %v3052_v56 = vadd.f32 %v3051_v52, %v2901_v43  ;;  %v2699_v17 = vadd.f32 %v2698_v63, %v11094_v55  ;;  %v2903_v18 = vmul.f32 %v11094_v55, %v11094_v55  ;;  %17398 = vst [vmem:[#allocation66_spill] sm:$0xff] %v11101_v2 }
 0x50d   :  { %17399 = vst [vmem:[#allocation67_spill] sm:$0xff] %v11103_v54  ;;  %v3015_v16 = vadd.f32 %v3014_v59, %v2900_v21  ;;  %v3089_v23 = vadd.f32 %v3088_v4, %v2902_v34  ;;  %v2773_v39 = vadd.f32 %v2772_v47, %v11096_v13  ;;  %v2905_v35 = vmul.f32 %v11096_v13, %v11096_v13 }
 0x50e   :  { %v2979_v15 = vadd.f32 %v2978_v22, %v2903_v18  ;;  %v2736_v63 = vadd.f32 %v2735_v24, %v11101_v2  ;;  %v2904_v45 = vmul.f32 %v11101_v2, %v11101_v2  ;;  %v2810_v59 = vadd.f32 %v2809_v29, %v11103_v54 }
 0x50f   :  { %v2906_v4 = vmul.f32 %v11103_v54, %v11103_v54  ;;  %v3053_v18 = vadd.f32 %v3052_v56, %v2905_v35 }
 0x510   :  { %v3016_v47 = vadd.f32 %v3015_v16, %v2904_v45  ;;  %v11122_v34 = vpop.f32.mrb[84].mxu1  ;;  %v11124_v24 = vpop.f32.mrb[116].mxu0 }
 0x511   :  { %v3090_v21 = vadd.f32 %v3089_v23, %v2906_v4  ;;  %17400 = vst [vmem:[#allocation68_spill] sm:$0xff] %v11122_v34  ;;  %17401 = vst [vmem:[#allocation69_spill] sm:$0xff] %v11124_v24  ;;  %v2700_v43 = vadd.f32 %v2699_v17, %v11122_v34  ;;  %v2907_v52 = vmul.f32 %v11122_v34, %v11122_v34  ;;  %v11132_v56 = vpop.f32.mrb[85].mxu1  ;;  %v11134_v35 = vpop.f32.mrb[117].mxu0 }
 0x512   :  { %v2774_v29 = vadd.f32 %v2773_v39, %v11124_v24  ;;  %v2909_v33 = vmul.f32 %v11124_v24, %v11124_v24  ;;  %17402 = vst [vmem:[#allocation70_spill] sm:$0xff] %v11132_v56  ;;  %17403 = vst [vmem:[#allocation71_spill] sm:$0xff] %v11134_v35  ;;  %v2737_v16 = vadd.f32 %v2736_v63, %v11132_v56  ;;  %v11142_v4 = vpop.f32.mrb[86].mxu1  ;;  %v11144_v39 = vpop.f32.mrb[118].mxu0 }
 0x513   :  { %v2908_v23 = vmul.f32 %v11132_v56, %v11132_v56  ;;  %v2811_v45 = vadd.f32 %v2810_v59, %v11134_v35  ;;  %v2910_v17 = vmul.f32 %v11134_v35, %v11134_v35  ;;  %17404 = vst [vmem:[#allocation72_spill] sm:$0xff] %v11142_v4  ;;  %17405 = vst [vmem:[#allocation73_spill] sm:$0xff] %v11144_v39  ;;  %v11149_v63 = vpop.f32.mrb[87].mxu1  ;;  %v11151_v13 = vpop.f32.mrb[119].mxu0 }
 0x514   :  { %v2980_v22 = vadd.f32 %v2979_v15, %v2907_v52  ;;  %v3054_v3 = vadd.f32 %v3053_v18, %v2909_v33  ;;  %v2701_v54 = vadd.f32 %v2700_v43, %v11142_v4  ;;  %v2911_v11 = vmul.f32 %v11142_v4, %v11142_v4  ;;  %17406 = vst [vmem:[#allocation74_spill] sm:$0xff] %v11149_v63 }
 0x515   :  { %17407 = vst [vmem:[#allocation75_spill] sm:$0xff] %v11151_v13  ;;  %v3017_v62 = vadd.f32 %v3016_v47, %v2908_v23  ;;  %v3091_v59 = vadd.f32 %v3090_v21, %v2910_v17  ;;  %v2775_v37 = vadd.f32 %v2774_v29, %v11144_v39  ;;  %v2913_v15 = vmul.f32 %v11144_v39, %v11144_v39 }
 0x516   :  { %v2981_v55 = vadd.f32 %v2980_v22, %v2911_v11  ;;  %v2738_v43 = vadd.f32 %v2737_v16, %v11149_v63  ;;  %v2912_v52 = vmul.f32 %v11149_v63, %v11149_v63  ;;  %v2812_v47 = vadd.f32 %v2811_v45, %v11151_v13 }
 0x517   :  { %v2914_v21 = vmul.f32 %v11151_v13, %v11151_v13  ;;  %v3055_v11 = vadd.f32 %v3054_v3, %v2913_v15 }
 0x518   :  { %v3018_v29 = vadd.f32 %v3017_v62, %v2912_v52  ;;  %v11170_v17 = vpop.f32.mrb[88].mxu1  ;;  %v11172_v16 = vpop.f32.mrb[120].mxu0 }
 0x519   :  { %v3092_v23 = vadd.f32 %v3091_v59, %v2914_v21  ;;  %17408 = vst [vmem:[#allocation76_spill] sm:$0xff] %v11170_v17  ;;  %17409 = vst [vmem:[#allocation77_spill] sm:$0xff] %v11172_v16  ;;  %v2702_v33 = vadd.f32 %v2701_v54, %v11170_v17  ;;  %v2915_v18 = vmul.f32 %v11170_v17, %v11170_v17  ;;  %v11180_v3 = vpop.f32.mrb[89].mxu1  ;;  %v11182_v15 = vpop.f32.mrb[121].mxu0 }
 0x51a   :  { %v2776_v45 = vadd.f32 %v2775_v37, %v11172_v16  ;;  %v2917_v2 = vmul.f32 %v11172_v16, %v11172_v16  ;;  %17410 = vst [vmem:[#allocation78_spill] sm:$0xff] %v11180_v3  ;;  %17411 = vst [vmem:[#allocation79_spill] sm:$0xff] %v11182_v15  ;;  %v2739_v62 = vadd.f32 %v2738_v43, %v11180_v3  ;;  %v11190_v21 = vpop.f32.mrb[90].mxu1  ;;  %v11192_v37 = vpop.f32.mrb[122].mxu0 }
 0x51b   :  { %v2916_v59 = vmul.f32 %v11180_v3, %v11180_v3  ;;  %v2813_v52 = vadd.f32 %v2812_v47, %v11182_v15  ;;  %v2918_v54 = vmul.f32 %v11182_v15, %v11182_v15  ;;  %17412 = vst [vmem:[#allocation80_spill] sm:$0xff] %v11190_v21  ;;  %17413 = vst [vmem:[#allocation81_spill] sm:$0xff] %v11192_v37  ;;  %v11197_v43 = vpop.f32.mrb[91].mxu1  ;;  %v11199_v39 = vpop.f32.mrb[123].mxu0 }
 0x51c   :  { %v2982_v22 = vadd.f32 %v2981_v55, %v2915_v18  ;;  %v3056_v35 = vadd.f32 %v3055_v11, %v2917_v2  ;;  %v2703_v13 = vadd.f32 %v2702_v33, %v11190_v21  ;;  %v2919_v24 = vmul.f32 %v11190_v21, %v11190_v21  ;;  %17414 = vst [vmem:[#allocation82_spill] sm:$0xff] %v11197_v43 }
 0x51d   :  { %17415 = vst [vmem:[#allocation83_spill] sm:$0xff] %v11199_v39  ;;  %v3019_v56 = vadd.f32 %v3018_v29, %v2916_v59  ;;  %v3093_v47 = vadd.f32 %v3092_v23, %v2918_v54  ;;  %v2777_v34 = vadd.f32 %v2776_v45, %v11192_v37  ;;  %v2921_v55 = vmul.f32 %v11192_v37, %v11192_v37 }
 0x51e   :  { %v2983_v4 = vadd.f32 %v2982_v22, %v2919_v24  ;;  %v2740_v33 = vadd.f32 %v2739_v62, %v11197_v43  ;;  %v2920_v18 = vmul.f32 %v11197_v43, %v11197_v43  ;;  %v2814_v29 = vadd.f32 %v2813_v52, %v11199_v39 }
 0x51f   :  { %v2922_v23 = vmul.f32 %v11199_v39, %v11199_v39  ;;  %v3057_v24 = vadd.f32 %v3056_v35, %v2921_v55 }
 0x520   :  { %v3020_v45 = vadd.f32 %v3019_v56, %v2920_v18  ;;  %v11218_v54 = vpop.f32.mrb[92].mxu1  ;;  %v11220_v62 = vpop.f32.mrb[124].mxu0 }
 0x521   :  { %v3094_v59 = vadd.f32 %v3093_v47, %v2922_v23  ;;  %17416 = vst [vmem:[#allocation84_spill] sm:$0xff] %v11218_v54  ;;  %17417 = vst [vmem:[#allocation85_spill] sm:$0xff] %v11220_v62  ;;  %v2704_v2 = vadd.f32 %v2703_v13, %v11218_v54  ;;  %v2923_v11 = vmul.f32 %v11218_v54, %v11218_v54  ;;  %v11228_v35 = vpop.f32.mrb[93].mxu1  ;;  %v11230_v55 = vpop.f32.mrb[125].mxu0 }
 0x522   :  { %v2778_v52 = vadd.f32 %v2777_v34, %v11220_v62  ;;  %v2925_v63 = vmul.f32 %v11220_v62, %v11220_v62  ;;  %17418 = vst [vmem:[#allocation86_spill] sm:$0xff] %v11228_v35  ;;  %17419 = vst [vmem:[#allocation87_spill] sm:$0xff] %v11230_v55  ;;  %v2741_v56 = vadd.f32 %v2740_v33, %v11228_v35  ;;  %v11238_v23 = vpop.f32.mrb[94].mxu1  ;;  %v11240_v34 = vpop.f32.mrb[126].mxu0 }
 0x523   :  { %v2924_v47 = vmul.f32 %v11228_v35, %v11228_v35  ;;  %v2815_v18 = vadd.f32 %v2814_v29, %v11230_v55  ;;  %v2926_v13 = vmul.f32 %v11230_v55, %v11230_v55  ;;  %17420 = vst [vmem:[#allocation88_spill] sm:$0xff] %v11238_v23  ;;  %17421 = vst [vmem:[#allocation89_spill] sm:$0xff] %v11240_v34  ;;  %v11245_v33 = vpop.f32.mrb[95].mxu1  ;;  %v11247_v37 = vpop.f32.mrb[127].mxu0 }
 0x524   :  { %v2984_v22 = vadd.f32 %v2983_v4, %v2923_v11  ;;  %v3058_v15 = vadd.f32 %v3057_v24, %v2925_v63  ;;  %v2705_v39 = vadd.f32 %v2704_v2, %v11238_v23  ;;  %v2927_v16 = vmul.f32 %v11238_v23, %v11238_v23  ;;  %17422 = vst [vmem:[#allocation90_spill] sm:$0xff] %v11245_v33 }
 0x525   :  { %17423 = vst [vmem:[#allocation91_spill] sm:$0xff] %v11247_v37  ;;  %v3021_v3 = vadd.f32 %v3020_v45, %v2924_v47  ;;  %v3095_v29 = vadd.f32 %v3094_v59, %v2926_v13  ;;  %v2779_v17 = vadd.f32 %v2778_v52, %v11240_v34  ;;  %v2929_v4 = vmul.f32 %v11240_v34, %v11240_v34 }
 0x526   :  { %v2985_v21 = vadd.f32 %v2984_v22, %v2927_v16  ;;  %v2742_v2 = vadd.f32 %v2741_v56, %v11245_v33  ;;  %v2928_v11 = vmul.f32 %v11245_v33, %v11245_v33  ;;  %v2816_v45 = vadd.f32 %v2815_v18, %v11247_v37 }
 0x527   :  { %v2930_v59 = vmul.f32 %v11247_v37, %v11247_v37  ;;  %v3059_v16 = vadd.f32 %v3058_v15, %v2929_v4 }
 0x528   :  { %v3022_v52 = vadd.f32 %v3021_v3, %v2928_v11  ;;  %v11266_v13 = vpop.f32.mrb[96].mxu1  ;;  %v11268_v56 = vpop.f32.mrb[128].mxu0 }
 0x529   :  { %v3096_v47 = vadd.f32 %v3095_v29, %v2930_v59  ;;  %17424 = vst [vmem:[#allocation92_spill] sm:$0xff] %v11266_v13  ;;  %17425 = vst [vmem:[#allocation93_spill] sm:$0xff] %v11268_v56  ;;  %v2706_v63 = vadd.f32 %v2705_v39, %v11266_v13  ;;  %v2931_v24 = vmul.f32 %v11266_v13, %v11266_v13  ;;  %v11276_v15 = vpop.f32.mrb[97].mxu1  ;;  %v11278_v4 = vpop.f32.mrb[129].mxu0 }
 0x52a   :  { %v2780_v18 = vadd.f32 %v2779_v17, %v11268_v56  ;;  %v2933_v43 = vmul.f32 %v11268_v56, %v11268_v56  ;;  %17426 = vst [vmem:[#allocation94_spill] sm:$0xff] %v11276_v15  ;;  %17427 = vst [vmem:[#allocation95_spill] sm:$0xff] %v11278_v4  ;;  %v2743_v3 = vadd.f32 %v2742_v2, %v11276_v15  ;;  %v11286_v59 = vpop.f32.mrb[98].mxu1  ;;  %v11288_v17 = vpop.f32.mrb[130].mxu0 }
 0x52b   :  { %v2932_v29 = vmul.f32 %v11276_v15, %v11276_v15  ;;  %v2817_v11 = vadd.f32 %v2816_v45, %v11278_v4  ;;  %v2934_v39 = vmul.f32 %v11278_v4, %v11278_v4  ;;  %17428 = vst [vmem:[#allocation96_spill] sm:$0xff] %v11286_v59  ;;  %17429 = vst [vmem:[#allocation97_spill] sm:$0xff] %v11288_v17  ;;  %v11293_v2 = vpop.f32.mrb[99].mxu1  ;;  %v11295_v34 = vpop.f32.mrb[131].mxu0 }
 0x52c   :  { %v2986_v22 = vadd.f32 %v2985_v21, %v2931_v24  ;;  %v3060_v55 = vadd.f32 %v3059_v16, %v2933_v43  ;;  %v2707_v37 = vadd.f32 %v2706_v63, %v11286_v59  ;;  %v2935_v62 = vmul.f32 %v11286_v59, %v11286_v59  ;;  %17430 = vst [vmem:[#allocation98_spill] sm:$0xff] %v11293_v2 }
 0x52d   :  { %17431 = vst [vmem:[#allocation99_spill] sm:$0xff] %v11295_v34  ;;  %v3023_v35 = vadd.f32 %v3022_v52, %v2932_v29  ;;  %v3097_v45 = vadd.f32 %v3096_v47, %v2934_v39  ;;  %v2781_v54 = vadd.f32 %v2780_v18, %v11288_v17  ;;  %v2937_v21 = vmul.f32 %v11288_v17, %v11288_v17 }
 0x52e   :  { %v2987_v23 = vadd.f32 %v2986_v22, %v2935_v62  ;;  %v2744_v63 = vadd.f32 %v2743_v3, %v11293_v2  ;;  %v2936_v24 = vmul.f32 %v11293_v2, %v11293_v2  ;;  %v2818_v52 = vadd.f32 %v2817_v11, %v11295_v34 }
 0x52f   :  { %v2938_v47 = vmul.f32 %v11295_v34, %v11295_v34  ;;  %v3061_v62 = vadd.f32 %v3060_v55, %v2937_v21 }
 0x530   :  { %v3024_v18 = vadd.f32 %v3023_v35, %v2936_v24  ;;  %v11314_v39 = vpop.f32.mrb[100].mxu1  ;;  %v11316_v3 = vpop.f32.mrb[132].mxu0 }
 0x531   :  { %v3098_v29 = vadd.f32 %v3097_v45, %v2938_v47  ;;  %17432 = vst [vmem:[#allocation100_spill] sm:$0xff] %v11314_v39  ;;  %17433 = vst [vmem:[#allocation101_spill] sm:$0xff] %v11316_v3  ;;  %v2708_v43 = vadd.f32 %v2707_v37, %v11314_v39  ;;  %v2939_v16 = vmul.f32 %v11314_v39, %v11314_v39  ;;  %v11324_v55 = vpop.f32.mrb[101].mxu1  ;;  %v11326_v21 = vpop.f32.mrb[133].mxu0 }
 0x532   :  { %v2782_v11 = vadd.f32 %v2781_v54, %v11316_v3  ;;  %v2941_v33 = vmul.f32 %v11316_v3, %v11316_v3  ;;  %17434 = vst [vmem:[#allocation102_spill] sm:$0xff] %v11324_v55  ;;  %17435 = vst [vmem:[#allocation103_spill] sm:$0xff] %v11326_v21  ;;  %v2745_v35 = vadd.f32 %v2744_v63, %v11324_v55  ;;  %v11334_v47 = vpop.f32.mrb[102].mxu1  ;;  %v11336_v54 = vpop.f32.mrb[134].mxu0 }
 0x533   :  { %v2940_v45 = vmul.f32 %v11324_v55, %v11324_v55  ;;  %v2819_v24 = vadd.f32 %v2818_v52, %v11326_v21  ;;  %v2942_v37 = vmul.f32 %v11326_v21, %v11326_v21  ;;  %17436 = vst [vmem:[#allocation104_spill] sm:$0xff] %v11334_v47  ;;  %17437 = vst [vmem:[#allocation105_spill] sm:$0xff] %v11336_v54  ;;  %v11341_v63 = vpop.f32.mrb[103].mxu1  ;;  %v11343_v17 = vpop.f32.mrb[135].mxu0 }
 0x534   :  { %v2988_v22 = vadd.f32 %v2987_v23, %v2939_v16  ;;  %v3062_v4 = vadd.f32 %v3061_v62, %v2941_v33  ;;  %v2709_v34 = vadd.f32 %v2708_v43, %v11334_v47  ;;  %v2943_v56 = vmul.f32 %v11334_v47, %v11334_v47  ;;  %17438 = vst [vmem:[#allocation106_spill] sm:$0xff] %v11341_v63 }
 0x535   :  { %17439 = vst [vmem:[#allocation107_spill] sm:$0xff] %v11343_v17  ;;  %v3025_v15 = vadd.f32 %v3024_v18, %v2940_v45  ;;  %v3099_v52 = vadd.f32 %v3098_v29, %v2942_v37  ;;  %v2783_v13 = vadd.f32 %v2782_v11, %v11336_v54  ;;  %v2945_v23 = vmul.f32 %v11336_v54, %v11336_v54 }
 0x536   :  { %v2989_v59 = vadd.f32 %v2988_v22, %v2943_v56  ;;  %v2746_v43 = vadd.f32 %v2745_v35, %v11341_v63  ;;  %v2944_v16 = vmul.f32 %v11341_v63, %v11341_v63  ;;  %v2820_v18 = vadd.f32 %v2819_v24, %v11343_v17 }
 0x537   :  { %v2946_v29 = vmul.f32 %v11343_v17, %v11343_v17  ;;  %v3063_v56 = vadd.f32 %v3062_v4, %v2945_v23 }
 0x538   :  { %v3026_v11 = vadd.f32 %v3025_v15, %v2944_v16  ;;  %v11362_v37 = vpop.f32.mrb[104].mxu1  ;;  %v11364_v35 = vpop.f32.mrb[136].mxu0 }
 0x539   :  { %v3100_v45 = vadd.f32 %v3099_v52, %v2946_v29  ;;  %17440 = vst [vmem:[#allocation108_spill] sm:$0xff] %v11362_v37  ;;  %17441 = vst [vmem:[#allocation109_spill] sm:$0xff] %v11364_v35  ;;  %v2710_v33 = vadd.f32 %v2709_v34, %v11362_v37  ;;  %v2947_v62 = vmul.f32 %v11362_v37, %v11362_v37  ;;  %v11372_v4 = vpop.f32.mrb[105].mxu1  ;;  %v11374_v23 = vpop.f32.mrb[137].mxu0 }
 0x53a   :  { %v2784_v24 = vadd.f32 %v2783_v13, %v11364_v35  ;;  %v2949_v2 = vmul.f32 %v11364_v35, %v11364_v35  ;;  %17442 = vst [vmem:[#allocation110_spill] sm:$0xff] %v11372_v4  ;;  %17443 = vst [vmem:[#allocation111_spill] sm:$0xff] %v11374_v23  ;;  %v2747_v15 = vadd.f32 %v2746_v43, %v11372_v4  ;;  %v11382_v29 = vpop.f32.mrb[106].mxu1  ;;  %v11384_v13 = vpop.f32.mrb[138].mxu0 }
 0x53b   :  { %v2948_v52 = vmul.f32 %v11372_v4, %v11372_v4  ;;  %v2821_v16 = vadd.f32 %v2820_v18, %v11374_v23  ;;  %v2950_v34 = vmul.f32 %v11374_v23, %v11374_v23  ;;  %17444 = vst [vmem:[#allocation112_spill] sm:$0xff] %v11382_v29  ;;  %17445 = vst [vmem:[#allocation113_spill] sm:$0xff] %v11384_v13  ;;  %v11389_v43 = vpop.f32.mrb[107].mxu1  ;;  %v11391_v54 = vpop.f32.mrb[139].mxu0 }
 0x53c   :  { %v2990_v22 = vadd.f32 %v2989_v59, %v2947_v62  ;;  %v3064_v21 = vadd.f32 %v3063_v56, %v2949_v2  ;;  %v2711_v17 = vadd.f32 %v2710_v33, %v11382_v29  ;;  %v2951_v3 = vmul.f32 %v11382_v29, %v11382_v29  ;;  %17446 = vst [vmem:[#allocation114_spill] sm:$0xff] %v11389_v43 }
 0x53d   :  { %17447 = vst [vmem:[#allocation115_spill] sm:$0xff] %v11391_v54  ;;  %v3027_v55 = vadd.f32 %v3026_v11, %v2948_v52  ;;  %v3101_v18 = vadd.f32 %v3100_v45, %v2950_v34  ;;  %v2785_v39 = vadd.f32 %v2784_v24, %v11384_v13  ;;  %v2953_v59 = vmul.f32 %v11384_v13, %v11384_v13 }
 0x53e   :  { %v2991_v47 = vadd.f32 %v2990_v22, %v2951_v3  ;;  %v2748_v33 = vadd.f32 %v2747_v15, %v11389_v43  ;;  %v2952_v62 = vmul.f32 %v11389_v43, %v11389_v43  ;;  %v2822_v11 = vadd.f32 %v2821_v16, %v11391_v54 }
 0x53f   :  { %v2954_v45 = vmul.f32 %v11391_v54, %v11391_v54  ;;  %v3065_v3 = vadd.f32 %v3064_v21, %v2953_v59 }
 0x540   :  { %v3028_v24 = vadd.f32 %v3027_v55, %v2952_v62  ;;  %v11410_v34 = vpop.f32.mrb[108].mxu1  ;;  %v11412_v15 = vpop.f32.mrb[140].mxu0 }
 0x541   :  { %v3102_v52 = vadd.f32 %v3101_v18, %v2954_v45  ;;  %17448 = vst [vmem:[#allocation116_spill] sm:$0xff] %v11410_v34  ;;  %17449 = vst [vmem:[#allocation117_spill] sm:$0xff] %v11412_v15  ;;  %v2712_v2 = vadd.f32 %v2711_v17, %v11410_v34  ;;  %v2955_v56 = vmul.f32 %v11410_v34, %v11410_v34  ;;  %v11420_v21 = vpop.f32.mrb[109].mxu1  ;;  %v11422_v59 = vpop.f32.mrb[141].mxu0 }
 0x542   :  { %v2786_v16 = vadd.f32 %v2785_v39, %v11412_v15  ;;  %v2957_v63 = vmul.f32 %v11412_v15, %v11412_v15  ;;  %17450 = vst [vmem:[#allocation118_spill] sm:$0xff] %v11420_v21  ;;  %v2749_v55 = vadd.f32 %v2748_v33, %v11420_v21  ;;  %v2956_v18 = vmul.f32 %v11420_v21, %v11420_v21  ;;  %v11430_v45 = vpop.f32.mrb[110].mxu1  ;;  %v11432_v39 = vpop.f32.mrb[142].mxu0 }
 0x543   :  { %v2823_v62 = vadd.f32 %v2822_v11, %v11422_v59  ;;  %v2958_v17 = vmul.f32 %v11422_v59, %v11422_v59  ;;  %17451 = vst [vmem:[#allocation119_spill] sm:$0xff] %v11430_v45  ;;  %17452 = vst [vmem:[#allocation120_spill] sm:$0xff] %v11432_v39  ;;  %v2992_v22 = vadd.f32 %v2991_v47, %v2955_v56  ;;  %v11437_v35 = vpop.f32.mrb[111].mxu1  ;;  %v11439_v13 = vpop.f32.mrb[143].mxu0 }
 0x544   :  { %v3066_v23 = vadd.f32 %v3065_v3, %v2957_v63  ;;  %v2713_v54 = vadd.f32 %v2712_v2, %v11430_v45  ;;  %v2959_v33 = vmul.f32 %v11430_v45, %v11430_v45  ;;  %17453 = vst [vmem:[#allocation121_spill] sm:$0xff] %v11437_v35  ;;  %v3029_v11 = vadd.f32 %v3028_v24, %v2956_v18 }
 0x545   :  { %v3103_v4 = vadd.f32 %v3102_v52, %v2958_v17  ;;  %v2787_v37 = vadd.f32 %v2786_v16, %v11432_v39 }
 0x546   :  { %9428 = shalt.err (!%p9425_p10)  }
 0x547   :  { %s9429_s16 = scalar_lea.vmem %s91_s30, 8192  ;;  %p9434_p12 = scmp.lt.s32.totalorder %s91_s30, %s91_s30 }
 0x548   :  { %p9430_p11 = scmp.ne.s32.totalorder %s91_s30, %s9429_s16  ;;  %p9435_p13 = scmp.lt.s32.totalorder %s9429_s16, %s9429_s16 }
 0x54a   :  { %p9436_p0 = por %p9435_p13, %p9434_p12 }
 0x54c   :  { %p9437_p1 = pnand %p9436_p0, %p9430_p11 }
 0x54e   :  { %9440 = shalt.err (!%p9437_p1)  }
 0x54f   :  { %93 = dma.hbm_to_vmem [thread:$0]  %s16719_s8, 8192, %s91_s30, [#allocation4 + $0x1]  ;;  %v2714_v47 = vrot.slane %v2713_v54, 4  ;;  %v2993_v63 = vadd.f32 %v2992_v22, %v2959_v33  ;;  %v2961_v2 = vmul.f32 %v11432_v39, %v11432_v39  ;;  %v2788_v3 = vrot.slane %v2787_v37, 4 }
 0x550   :  { %v2750_v24 = vadd.f32 %v2749_v55, %v11437_v35  ;;  %v2960_v52 = vmul.f32 %v11437_v35, %v11437_v35  ;;  %v2824_v22 = vadd.f32 %v2823_v62, %v11439_v13  ;;  %v2962_v56 = vmul.f32 %v11439_v13, %v11439_v13 }
 0x551   :  { %v2715_v18 = vadd.f32 %v2714_v47, %v2713_v54  ;;  %v2994_v17 = vrot.slane %v2993_v63, 4  ;;  %v3067_v43 = vadd.f32 %v3066_v23, %v2961_v2  ;;  %v2789_v33 = vadd.f32 %v2788_v3, %v2787_v37 }
 0x552   :  { %v2751_v34 = vrot.slane %v2750_v24, 4  ;;  %v3030_v45 = vadd.f32 %v3029_v11, %v2960_v52  ;;  %v2825_v29 = vrot.slane %v2824_v22, 4  ;;  %v3104_v12 = vadd.f32 %v3103_v4, %v2962_v56 }
 0x553   :  { %v2716_v15 = vrot.slane %v2715_v18, 2  ;;  %v2995_v39 = vadd.f32 %v2994_v17, %v2993_v63  ;;  %v3068_v55 = vrot.slane %v3067_v43, 4  ;;  %v2790_v7 = vrot.slane %v2789_v33, 2 }
 0x554   :  { %v2752_v14 = vadd.f32 %v2751_v34, %v2750_v24  ;;  %v3031_v42 = vrot.slane %v3030_v45, 4  ;;  %v2826_v23 = vadd.f32 %v2825_v29, %v2824_v22  ;;  %v3105_v3 = vrot.slane %v3104_v12, 4 }
 0x555   :  { %v2717_v16 = vadd.f32 %v2716_v15, %v2715_v18  ;;  %v2996_v54 = vrot.slane %v2995_v39, 2  ;;  %v3069_v47 = vadd.f32 %v3068_v55, %v3067_v43  ;;  %v2791_v2 = vadd.f32 %v2790_v7, %v2789_v33 }
 0x556   :  { %v2753_v62 = vrot.slane %v2752_v14, 2  ;;  %v3032_v37 = vadd.f32 %v3031_v42, %v3030_v45  ;;  %v2827_v35 = vrot.slane %v2826_v23, 2  ;;  %v3106_v49 = vadd.f32 %v3105_v3, %v3104_v12 }
 0x557   :  { %v2718_v11 = vrot.slane %v2717_v16, 1  ;;  %v2997_v52 = vadd.f32 %v2996_v54, %v2995_v39  ;;  %v3070_v21 = vrot.slane %v3069_v47, 2  ;;  %v2792_v41 = vrot.slane %v2791_v2, 1 }
 0x558   :  { %v2754_v63 = vadd.f32 %v2753_v62, %v2752_v14  ;;  %v3033_v17 = vrot.slane %v3032_v37, 2  ;;  %v2828_v4 = vadd.f32 %v2827_v35, %v2826_v23  ;;  %v3107_v29 = vrot.slane %v3106_v49, 2 }
 0x559   :  { %v2719_v19 = vadd.f32 %v2718_v11, %v2717_v16  ;;  %v2998_v34 = vrot.slane %v2997_v52, 1  ;;  %v3071_v24 = vadd.f32 %v3070_v21, %v3069_v47  ;;  %v2793_v15 = vadd.f32 %v2792_v41, %v2791_v2 }
 0x55a   :  { %v2755_v56 = vrot.slane %v2754_v63, 1  ;;  %v3034_v43 = vadd.f32 %v3033_v17, %v3032_v37  ;;  %v2829_v45 = vrot.slane %v2828_v4, 1  ;;  %v3108_v55 = vadd.f32 %v3107_v29, %v3106_v49 }
 0x55b   :  { %v2831_v7 = vmul.f32 0.00390625, %v2719_v19  ;;  %v2999_v18 = vadd.f32 %v2998_v34, %v2997_v52  ;;  %v3072_v42 = vrot.slane %v3071_v24, 1  ;;  %v2833_v22 = vmul.f32 0.00390625, %v2793_v15 }
 0x55c   :  { %v2756_v39 = vadd.f32 %v2755_v56, %v2754_v63  ;;  %v3035_v33 = vrot.slane %v3034_v43, 1  ;;  %v2830_v12 = vadd.f32 %v2829_v45, %v2828_v4  ;;  %v3109_v35 = vrot.slane %v3108_v55, 1 }
 0x55d   :  { %v3111_v54 = vmul.f32 0.00390625, %v2999_v18  ;;  %v3115_v14 = vmul.f32 %v2831_v7, %v2831_v7  ;;  %v3073_v62 = vadd.f32 %v3072_v42, %v3071_v24  ;;  %v3117_v16 = vmul.f32 %v2833_v22, %v2833_v22 }
 0x55e   :  { %v2832_v3 = vmul.f32 0.00390625, %v2756_v39  ;;  %v3036_v21 = vadd.f32 %v3035_v33, %v3034_v43  ;;  %v2834_v23 = vmul.f32 0.00390625, %v2830_v12  ;;  %v3110_v11 = vadd.f32 %v3109_v35, %v3108_v55 }
 0x55f   :  { %v3119_v41 = vsub.f32 %v3111_v54, %v3115_v14  ;;  %v3113_v47 = vmul.f32 0.00390625, %v3073_v62  ;;  %v2681_v14 = vld [vmem:[%s16720_s9 + $0x5] sm:$0xf]  ;;  %v11477_v12 = vsub.s32 2, %v10494_v44 }
 0x560   :  { %v3112_v2 = vmul.f32 0.00390625, %v3036_v21  ;;  %v3116_v37 = vmul.f32 %v2832_v3, %v2832_v3  ;;  %v3118_v49 = vmul.f32 %v2834_v23, %v2834_v23  ;;  %v3114_v34 = vmul.f32 0.00390625, %v3110_v11 }
 0x561   :  { %v3123_v52 = vadd.f32 0.8, %v3119_v41  ;;  %v3121_v63 = vsub.f32 %v3113_v47, %v3117_v16  ;;  %17454 = vst [vmem:[#allocation122_spill] sm:$0xff] %v11477_v12  ;;  %v11480_v16 = vsub.s32 3, %v10494_v44 }
 0x562   :  { %v3120_v17 = vsub.f32 %v3112_v2, %v3116_v37  ;;  %v3122_v15 = vsub.f32 %v3114_v34, %v3118_v49 }
 0x563   :  { %v3125_v24 = vadd.f32 0.8, %v3121_v63  ;;  %9309 = vrsqrt.f32 %v3123_v52  ;;  %17455 = vst [vmem:[#allocation123_spill] sm:$0xff] %v11480_v16 }
 0x564   :  { %v3124_v4 = vadd.f32 0.8, %v3120_v17  ;;  %v3126_v56 = vadd.f32 0.8, %v3122_v15 }
 0x565   :  { %9311 = vrsqrt.f32 %v3125_v24 }
 0x566   :  { %9313 = vrsqrt.f32 %v3124_v4 }
 0x567   :  { %9315 = vrsqrt.f32 %v3126_v56 }
 0x56d   :  { %v9310_v43 = vpop.eup %9309 }
 0x56f   :  { %v9312_v29 = vpop.eup %9311 }
 0x570   :  { %v9314_v18 = vpop.eup %9313 }
 0x571   :  { %v3135_v42 = vcombine.low %v9310_v43, %v9314_v18  ;;  %v9316_v45 = vpop.eup %9315 }
 0x572   :  { %v3136_v39 = vcombine.low %v9312_v29, %v9316_v45 }
 0x573   :  { %v3143_v33 = vrot.slane %v3135_v42, %v10497_v53 }
 0x574   :  { %v3150_v55 = vrot.slane %v3136_v39, %v10497_v53 }
 0x576   :  { %v3151_v54 = vcombine.low %v3143_v33, %v3150_v55  ;;  %v2682_v33 = vld [vmem:[%s16720_s9 + $0x9] sm:$0xf]  ;;  %v17456_v55 = vpack.c.bf16 %v10706_v0, %v10690_v28 }
 0x578   :  { %v3158_v62 = vrot.slane %v3151_v54, %v10497_v53 }
 0x57a   :  { %v3160_v21 = vmul.f32 %v3158_v62, %v2681_v14  ;;  %v17457_v14 = vpack.c.bf16 %v10718_v9, %v10694_v20  ;;  %v17460_v20 = vpack.c.bf16 %v10758_v58, %v10738_v31  ;;  %v17464_v58 = vpack.c.bf16 %v10806_v48, %v10786_v6  ;;  %v17468_v48 = vld [vmem:[#allocation17_spill] sm:$0xff] }
 0x57c   :  { %v3165_v35 = vrot.slane %v3160_v21, %v10505_v30  ;;  %v3169_v41 = vrot.slane %v3160_v21, %v10508_v25  ;;  %v3173_v47 = vrot.slane %v3160_v21, %v11477_v12  ;;  %v3177_v2 = vrot.slane %v3160_v21, %v11480_v16 }
 0x57d   :  { %v17458_v21 = vpack.c.bf16 %v10708_v1, %v10692_v5  ;;  %v17461_v5 = vpack.c.bf16 %v10765_v38, %v10748_v40  ;;  %v17465_v38 = vpack.c.bf16 %v10813_v8, %v10796_v26  ;;  %v17471_v8 = vld [vmem:[#allocation22_spill] sm:$0xff] }
 0x57e   :  { %v3182_v37 = vmul.f32 %v3165_v35, %v2831_v7  ;;  %v3183_v11 = vmul.f32 %v3169_v41, %v2832_v3  ;;  %v3184_v52 = vmul.f32 %v3173_v47, %v2833_v22  ;;  %v3185_v63 = vmul.f32 %v3177_v2, %v2834_v23 }
 0x57f   :  { %v3280_v49 = vpack.c.bf16 %v3165_v35, %v3165_v35  ;;  %v3281_v17 = vpack.c.bf16 %v3169_v41, %v3169_v41  ;;  %v3282_v34 = vpack.c.bf16 %v3173_v47, %v3173_v47  ;;  %v3283_v24 = vpack.c.bf16 %v3177_v2, %v3177_v2 }
 0x580   :  { %v3190_v4 = vcombine.low %v3182_v37, %v3183_v11  ;;  %v3191_v15 = vcombine.low %v3184_v52, %v3185_v63  ;;  %v17459_v41 = vpack.c.bf16 %v10720_v46, %v10696_v57  ;;  %v17462_v57 = vpack.c.bf16 %v10760_v50, %v10740_v27  ;;  %v17469_v37 = vld [vmem:[#allocation16_spill] sm:$0xff]  ;;  %v17472_v52 = vld [vmem:[#allocation18_spill] sm:$0xff] }
 0x581   :  { %v3285_v56 = vpack.i.b16 %v3280_v49, %v3280_v49  ;;  %v3292_v43 = vpack.i.b16 %v3281_v17, %v3281_v17  ;;  %v3299_v29 = vpack.i.b16 %v3282_v34, %v3282_v34  ;;  %v3306_v18 = vpack.i.b16 %v3283_v24, %v3283_v24  ;;  %v17475_v49 = vld [vmem:[#allocation20_spill] sm:$0xff]  ;;  %v17478_v34 = vld [vmem:[#allocation19_spill] sm:$0xff] }
 0x582   :  { %v3198_v42 = vrot.slane %v3190_v4, %v10497_v53  ;;  %v3205_v45 = vrot.slane %v3191_v15, %v10497_v53  ;;  %v17463_v47 = vpack.c.bf16 %v10767_v61, %v10750_v51  ;;  %v17466_v50 = vpack.c.bf16 %v10808_v32, %v10788_v10  ;;  %v17474_v32 = vld [vmem:[#allocation24_spill] sm:$0xff]  ;;  %v17480_v15 = vld [vmem:[#allocation25_spill] sm:$0xff] }
 0x583   :  { %v11489_v39 = vrot.slane %v3285_v56, %v10505_v30  ;;  %v11492_v7 = vrot.slane %v3292_v43, %v10505_v30  ;;  %v11495_v22 = vrot.slane %v3299_v29, %v10505_v30  ;;  %v11498_v3 = vrot.slane %v3306_v18, %v10505_v30  ;;  %v17481_v56 = vld [vmem:[#allocation21_spill] sm:$0xff]  ;;  %v17483_v18 = vld [vmem:[#allocation30_spill] sm:$0xff] }
 0x584   :  { %v3206_v23 = vcombine.low %v3198_v42, %v3205_v45  ;;  %v17467_v2 = vpack.c.bf16 %v10815_v36, %v10798_v60  ;;  %v17470_v11 = vpack.c.bf16 %v17468_v48, %v17469_v37  ;;  %v17473_v63 = vpack.c.bf16 %v17471_v8, %v17472_v52  ;;  %v17477_v36 = vld [vmem:[#allocation23_spill] sm:$0xff]  ;;  %v17484_v42 = vld [vmem:[#allocation26_spill] sm:$0xff]  ;;  %v17499_v8 = vld [vmem:[#allocation36_spill] sm:$0xff] }
 0x585   :  { %v11507_v54 = vmul.bf16 %v11489_v39, %v17456_v55  ;;  %v11513_v62 = vmul.bf16 %v11492_v7, %v17457_v14  ;;  %v11519_v35 = vmul.bf16 %v11495_v22, %v17458_v21  ;;  %v11525_v28 = vmul.bf16 %v11498_v3, %v17459_v41  ;;  %v17487_v55 = vld [vmem:[#allocation28_spill] sm:$0xff]  ;;  %v17489_v41 = vld [vmem:[#allocation31_spill] sm:$0xff] }
 0x586   :  { %v3213_v0 = vrot.slane %v3206_v23, %v10497_v53  ;;  %v11532_v9 = vmul.bf16 %v11489_v39, %v17460_v20  ;;  %v11538_v1 = vmul.bf16 %v11492_v7, %v17461_v5  ;;  %v11544_v46 = vmul.bf16 %v11495_v22, %v17462_v57  ;;  %v17492_v57 = vld [vmem:[#allocation33_spill] sm:$0xff] }
 0x587   :  { %v11550_v31 = vmul.bf16 %v11498_v3, %v17463_v47  ;;  %v11556_v40 = vmul.bf16 %v11489_v39, %v17464_v58  ;;  %v11562_v27 = vmul.bf16 %v11492_v7, %v17465_v38  ;;  %v11568_v51 = vmul.bf16 %v11495_v22, %v17466_v50  ;;  %v17493_v47 = vld [vmem:[#allocation29_spill] sm:$0xff]  ;;  %v17495_v50 = vld [vmem:[#allocation38_spill] sm:$0xff] }
 0x588   :  { %v3215_v61 = vsub.f32 %v2682_v33, %v3213_v0  ;;  %v11574_v6 = vmul.bf16 %v11498_v3, %v17467_v2  ;;  %v11580_v26 = vmul.bf16 %v11489_v39, %v17470_v11  ;;  %v11586_v10 = vmul.bf16 %v11492_v7, %v17473_v63  ;;  %v17486_v33 = vld [vmem:[#allocation32_spill] sm:$0xff]  ;;  %v17490_v0 = vld [vmem:[#allocation27_spill] sm:$0xff]  ;;  %v17496_v2 = vld [vmem:[#allocation34_spill] sm:$0xff] }
 0x589   :  { %v17476_v17 = vpack.c.bf16 %v17474_v32, %v17475_v49  ;;  %v17479_v24 = vpack.c.bf16 %v17477_v36, %v17478_v34  ;;  %v17482_v43 = vpack.c.bf16 %v17480_v15, %v17481_v56  ;;  %v17485_v45 = vpack.c.bf16 %v17483_v18, %v17484_v42  ;;  %v17498_v11 = vld [vmem:[#allocation40_spill] sm:$0xff]  ;;  %v17501_v32 = vld [vmem:[#allocation39_spill] sm:$0xff]  ;;  %v17508_v18 = vld [vmem:[#allocation41_spill] sm:$0xff] }
 0x58a   :  { %v17488_v14 = vpack.c.bf16 %v17486_v33, %v17487_v55  ;;  %v17491_v20 = vpack.c.bf16 %v17489_v41, %v17490_v0  ;;  %v17494_v58 = vpack.c.bf16 %v17492_v57, %v17493_v47  ;;  %v17497_v48 = vpack.c.bf16 %v17495_v50, %v17496_v2  ;;  %v17502_v49 = vld [vmem:[#allocation35_spill] sm:$0xff]  ;;  %v17504_v34 = vld [vmem:[#allocation48_spill] sm:$0xff]  ;;  %v17510_v33 = vld [vmem:[#allocation49_spill] sm:$0xff] }
 0x58b   :  { %v11592_v60 = vmul.bf16 %v11495_v22, %v17476_v17  ;;  %v11598_v4 = vmul.bf16 %v11498_v3, %v17479_v24  ;;  %v11604_v29 = vmul.bf16 %v11489_v39, %v17482_v43  ;;  %v11610_v23 = vmul.bf16 %v11492_v7, %v17485_v45  ;;  %v17505_v24 = vld [vmem:[#allocation37_spill] sm:$0xff]  ;;  %v17507_v43 = vld [vmem:[#allocation50_spill] sm:$0xff]  ;;  %v17513_v0 = vld [vmem:[#allocation51_spill] sm:$0xff] }
 0x58c   :  { %v11616_v21 = vmul.bf16 %v11495_v22, %v17488_v14  ;;  %v11622_v5 = vmul.bf16 %v11498_v3, %v17491_v20  ;;  %v11628_v38 = vmul.bf16 %v11489_v39, %v17494_v58  ;;  %v11634_v37 = vmul.bf16 %v11492_v7, %v17497_v48  ;;  %v17511_v55 = vld [vmem:[#allocation42_spill] sm:$0xff]  ;;  %v17514_v20 = vld [vmem:[#allocation47_spill] sm:$0xff]  ;;  %v17516_v58 = vld [vmem:[#allocation56_spill] sm:$0xff] }
 0x58d   :  { %v17500_v52 = vpack.c.bf16 %v17498_v11, %v17499_v8  ;;  %v17503_v17 = vpack.c.bf16 %v17501_v32, %v17502_v49  ;;  %v17506_v15 = vpack.c.bf16 %v17504_v34, %v17505_v24  ;;  %v17509_v42 = vpack.c.bf16 %v17507_v43, %v17508_v18  ;;  %v17517_v50 = vld [vmem:[#allocation52_spill] sm:$0xff]  ;;  %v17519_v11 = vld [vmem:[#allocation58_spill] sm:$0xff]  ;;  %v17522_v49 = vld [vmem:[#allocation57_spill] sm:$0xff] }
 0x58e   :  { %v17512_v14 = vpack.c.bf16 %v17510_v33, %v17511_v55  ;;  %v17515_v57 = vpack.c.bf16 %v17513_v0, %v17514_v20  ;;  %v17518_v2 = vpack.c.bf16 %v17516_v58, %v17517_v50  ;;  %v17520_v8 = vld [vmem:[#allocation54_spill] sm:$0xff]  ;;  %v17526_v43 = vld [vmem:[#allocation55_spill] sm:$0xff]  ;;  %v17528_v33 = vld [vmem:[#allocation64_spill] sm:$0xff] }
 0x58f   :  { %v11640_v63 = vmul.bf16 %v11495_v22, %v17500_v52  ;;  %v11646_v36 = vmul.bf16 %v11498_v3, %v17503_v17  ;;  %v11652_v56 = vmul.bf16 %v11489_v39, %v17506_v15  ;;  %v11658_v45 = vmul.bf16 %v11492_v7, %v17509_v42  ;;  %v17523_v17 = vld [vmem:[#allocation53_spill] sm:$0xff]  ;;  %v17525_v15 = vld [vmem:[#allocation59_spill] sm:$0xff]  ;;  %v17529_v55 = vld [vmem:[#allocation60_spill] sm:$0xff] }
 0x590   :  { %v11664_v41 = vmul.bf16 %v11495_v22, %v17512_v14  ;;  %v11670_v47 = vmul.bf16 %v11498_v3, %v17515_v57  ;;  %v11676_v48 = vmul.bf16 %v11489_v39, %v17518_v2  ;;  %v17521_v52 = vpack.c.bf16 %v17519_v11, %v17520_v8  ;;  %v17531_v20 = vld [vmem:[#allocation66_spill] sm:$0xff]  ;;  %v17534_v2 = vld [vmem:[#allocation65_spill] sm:$0xff] }
 0x591   :  { %v17524_v34 = vpack.c.bf16 %v17522_v49, %v17523_v17  ;;  %v17527_v18 = vpack.c.bf16 %v17525_v15, %v17526_v43  ;;  %v17530_v14 = vpack.c.bf16 %v17528_v33, %v17529_v55  ;;  %v17532_v57 = vld [vmem:[#allocation62_spill] sm:$0xff]  ;;  %v17535_v11 = vld [vmem:[#allocation61_spill] sm:$0xff]  ;;  %v17537_v49 = vld [vmem:[#allocation67_spill] sm:$0xff] }
 0x592   :  { %v11682_v32 = vmul.bf16 %v11492_v7, %v17521_v52  ;;  %v17533_v58 = vpack.c.bf16 %v17531_v20, %v17532_v57  ;;  %v17536_v8 = vpack.c.bf16 %v17534_v2, %v17535_v11  ;;  %v17538_v17 = vld [vmem:[#allocation63_spill] sm:$0xff]  ;;  %v17540_v43 = vld [vmem:[#allocation72_spill] sm:$0xff]  ;;  %v17544_v20 = vld [vmem:[#allocation70_spill] sm:$0xff] }
 0x593   :  { %v11688_v24 = vmul.bf16 %v11495_v22, %v17524_v34  ;;  %v11694_v42 = vmul.bf16 %v11498_v3, %v17527_v18  ;;  %v11700_v0 = vmul.bf16 %v11489_v39, %v17530_v14  ;;  %v17539_v34 = vpack.c.bf16 %v17537_v49, %v17538_v17  ;;  %v17541_v18 = vld [vmem:[#allocation68_spill] sm:$0xff]  ;;  %v17543_v14 = vld [vmem:[#allocation74_spill] sm:$0xff]  ;;  %v17546_v2 = vld [vmem:[#allocation73_spill] sm:$0xff] }
 0x594   :  { %v11706_v50 = vmul.bf16 %v11492_v7, %v17533_v58  ;;  %v11712_v52 = vmul.bf16 %v11495_v22, %v17536_v8  ;;  %v17542_v33 = vpack.c.bf16 %v17540_v43, %v17541_v18  ;;  %v17545_v57 = vpack.c.bf16 %v17543_v14, %v17544_v20  ;;  %v17547_v11 = vld [vmem:[#allocation69_spill] sm:$0xff]  ;;  %v17550_v17 = vld [vmem:[#allocation75_spill] sm:$0xff]  ;;  %v17554_v18 = vld [vmem:[#allocation80_spill] sm:$0xff] }
 0x595   :  { %v11718_v15 = vmul.bf16 %v11498_v3, %v17539_v34  ;;  %v17548_v8 = vpack.c.bf16 %v17546_v2, %v17547_v11  ;;  %v17551_v34 = vld [vmem:[#allocation71_spill] sm:$0xff]  ;;  %v17558_v20 = vld [vmem:[#allocation82_spill] sm:$0xff]  ;;  %v17562_v11 = vld [vmem:[#allocation81_spill] sm:$0xff] }
 0x596   :  { %v11724_v55 = vmul.bf16 %v11489_v39, %v17542_v33  ;;  %v11730_v58 = vmul.bf16 %v11492_v7, %v17545_v57  ;;  %v17552_v19 = vpack.c.bf16 %v17550_v17, %v17551_v34  ;;  %v17555_v33 = vld [vmem:[#allocation76_spill] sm:$0xff]  ;;  %v17559_v57 = vld [vmem:[#allocation78_spill] sm:$0xff]  ;;  %v17567_v34 = vld [vmem:[#allocation79_spill] sm:$0xff] }
 0x597   :  { %v11736_v49 = vmul.bf16 %v11495_v22, %v17548_v8  ;;  %v17556_v44 = vpack.c.bf16 %v17554_v18, %v17555_v33  ;;  %v17560_v53 = vpack.c.bf16 %v17558_v20, %v17559_v57  ;;  %v17563_v8 = vld [vmem:[#allocation77_spill] sm:$0xff]  ;;  %v17571_v33 = vld [vmem:[#allocation84_spill] sm:$0xff]  ;;  %v17575_v57 = vld [vmem:[#allocation86_spill] sm:$0xff] }
 0x598   :  { %v11742_v43 = vmul.bf16 %v11498_v3, %v17552_v19  ;;  %v17566_v19 = vld [vmem:[#allocation83_spill] sm:$0xff] }
 0x599   :  { %17549 = vst [vmem:[#allocation17_spill] sm:$0xff] %v11736_v49  ;;  %v11748_v14 = vmul.bf16 %v11489_v39, %v17556_v44  ;;  %v11754_v2 = vmul.bf16 %v11492_v7, %v17560_v53  ;;  %v17564_v49 = vpack.c.bf16 %v17562_v11, %v17563_v8  ;;  %v17570_v44 = vld [vmem:[#allocation88_spill] sm:$0xff]  ;;  %v17574_v53 = vld [vmem:[#allocation90_spill] sm:$0xff]  ;;  %v17579_v8 = vld [vmem:[#allocation85_spill] sm:$0xff] }
 0x59a   :  { %17553 = vst [vmem:[#allocation16_spill] sm:$0xff] %v11742_v43  ;;  %v17568_v43 = vpack.c.bf16 %v17566_v19, %v17567_v34  ;;  %v17583_v34 = vld [vmem:[#allocation87_spill] sm:$0xff] }
 0x59b   :  { %17557 = vst [vmem:[#allocation22_spill] sm:$0xff] %v11748_v14  ;;  %17561 = vst [vmem:[#allocation18_spill] sm:$0xff] %v11754_v2  ;;  %v11760_v17 = vmul.bf16 %v11495_v22, %v17564_v49  ;;  %v17572_v14 = vpack.c.bf16 %v17570_v44, %v17571_v33  ;;  %v17576_v2 = vpack.c.bf16 %v17574_v53, %v17575_v57  ;;  %v17578_v49 = vld [vmem:[#allocation89_spill] sm:$0xff]  ;;  %v17587_v33 = vld [vmem:[#allocation92_spill] sm:$0xff] }
 0x59c   :  { %v11766_v18 = vmul.bf16 %v11498_v3, %v17568_v43  ;;  %v17582_v43 = vld [vmem:[#allocation91_spill] sm:$0xff]  ;;  %v17591_v57 = vld [vmem:[#allocation94_spill] sm:$0xff] }
 0x59d   :  { %17565 = vst [vmem:[#allocation24_spill] sm:$0xff] %v11760_v17  ;;  %v11772_v20 = vmul.bf16 %v11489_v39, %v17572_v14  ;;  %v11778_v11 = vmul.bf16 %v11492_v7, %v17576_v2  ;;  %v17580_v17 = vpack.c.bf16 %v17578_v49, %v17579_v8  ;;  %v17586_v14 = vld [vmem:[#allocation96_spill] sm:$0xff]  ;;  %v17590_v2 = vld [vmem:[#allocation98_spill] sm:$0xff]  ;;  %v17595_v8 = vld [vmem:[#allocation93_spill] sm:$0xff] }
 0x59e   :  { %17569 = vst [vmem:[#allocation20_spill] sm:$0xff] %v11766_v18  ;;  %v17584_v18 = vpack.c.bf16 %v17582_v43, %v17583_v34  ;;  %v17599_v34 = vld [vmem:[#allocation95_spill] sm:$0xff] }
 0x59f   :  { %17573 = vst [vmem:[#allocation23_spill] sm:$0xff] %v11772_v20  ;;  %17577 = vst [vmem:[#allocation19_spill] sm:$0xff] %v11778_v11  ;;  %v11784_v19 = vmul.bf16 %v11495_v22, %v17580_v17  ;;  %v17588_v20 = vpack.c.bf16 %v17586_v14, %v17587_v33  ;;  %v17592_v11 = vpack.c.bf16 %v17590_v2, %v17591_v57  ;;  %v17594_v17 = vld [vmem:[#allocation97_spill] sm:$0xff]  ;;  %v17603_v33 = vld [vmem:[#allocation100_spill] sm:$0xff] }
 0x5a0   :  { %v11790_v44 = vmul.bf16 %v11498_v3, %v17584_v18  ;;  %v17598_v18 = vld [vmem:[#allocation99_spill] sm:$0xff]  ;;  %v17607_v57 = vld [vmem:[#allocation102_spill] sm:$0xff] }
 0x5a1   :  { %17581 = vst [vmem:[#allocation25_spill] sm:$0xff] %v11784_v19  ;;  %v11796_v53 = vmul.bf16 %v11489_v39, %v17588_v20  ;;  %v11802_v49 = vmul.bf16 %v11492_v7, %v17592_v11  ;;  %v17596_v19 = vpack.c.bf16 %v17594_v17, %v17595_v8  ;;  %v17602_v20 = vld [vmem:[#allocation104_spill] sm:$0xff]  ;;  %v17606_v11 = vld [vmem:[#allocation106_spill] sm:$0xff]  ;;  %v17611_v8 = vld [vmem:[#allocation101_spill] sm:$0xff] }
 0x5a2   :  { %17585 = vst [vmem:[#allocation21_spill] sm:$0xff] %v11790_v44  ;;  %v17600_v44 = vpack.c.bf16 %v17598_v18, %v17599_v34  ;;  %v17615_v34 = vld [vmem:[#allocation103_spill] sm:$0xff] }
 0x5a3   :  { %17589 = vst [vmem:[#allocation30_spill] sm:$0xff] %v11796_v53  ;;  %17593 = vst [vmem:[#allocation26_spill] sm:$0xff] %v11802_v49  ;;  %v11808_v43 = vmul.bf16 %v11495_v22, %v17596_v19  ;;  %v17604_v53 = vpack.c.bf16 %v17602_v20, %v17603_v33  ;;  %v17608_v49 = vpack.c.bf16 %v17606_v11, %v17607_v57  ;;  %v17610_v19 = vld [vmem:[#allocation105_spill] sm:$0xff]  ;;  %v17619_v33 = vld [vmem:[#allocation108_spill] sm:$0xff] }
 0x5a4   :  { %v11814_v14 = vmul.bf16 %v11498_v3, %v17600_v44  ;;  %v17614_v44 = vld [vmem:[#allocation107_spill] sm:$0xff]  ;;  %v17623_v57 = vld [vmem:[#allocation110_spill] sm:$0xff] }
 0x5a5   :  { %17597 = vst [vmem:[#allocation32_spill] sm:$0xff] %v11808_v43  ;;  %v11820_v2 = vmul.bf16 %v11489_v39, %v17604_v53  ;;  %v11826_v17 = vmul.bf16 %v11492_v7, %v17608_v49  ;;  %v17612_v43 = vpack.c.bf16 %v17610_v19, %v17611_v8  ;;  %v17618_v53 = vld [vmem:[#allocation112_spill] sm:$0xff]  ;;  %v17622_v49 = vld [vmem:[#allocation114_spill] sm:$0xff]  ;;  %v17627_v8 = vld [vmem:[#allocation109_spill] sm:$0xff] }
 0x5a6   :  { %17601 = vst [vmem:[#allocation28_spill] sm:$0xff] %v11814_v14  ;;  %v17616_v14 = vpack.c.bf16 %v17614_v44, %v17615_v34  ;;  %v17631_v34 = vld [vmem:[#allocation111_spill] sm:$0xff] }
 0x5a7   :  { %17605 = vst [vmem:[#allocation31_spill] sm:$0xff] %v11820_v2  ;;  %17609 = vst [vmem:[#allocation27_spill] sm:$0xff] %v11826_v17  ;;  %v11832_v18 = vmul.bf16 %v11495_v22, %v17612_v43  ;;  %v17620_v2 = vpack.c.bf16 %v17618_v53, %v17619_v33  ;;  %v17624_v17 = vpack.c.bf16 %v17622_v49, %v17623_v57  ;;  %v17626_v43 = vld [vmem:[#allocation113_spill] sm:$0xff]  ;;  %v17634_v33 = vld [vmem:[#allocation116_spill] sm:$0xff] }
 0x5a8   :  { %v11838_v20 = vmul.bf16 %v11498_v3, %v17616_v14  ;;  %v17630_v14 = vld [vmem:[#allocation115_spill] sm:$0xff]  ;;  %v17637_v57 = vld [vmem:[#allocation118_spill] sm:$0xff] }
 0x5a9   :  { %17613 = vst [vmem:[#allocation33_spill] sm:$0xff] %v11832_v18  ;;  %v11844_v11 = vmul.bf16 %v11489_v39, %v17620_v2  ;;  %v11850_v19 = vmul.bf16 %v11492_v7, %v17624_v17  ;;  %v17628_v18 = vpack.c.bf16 %v17626_v43, %v17627_v8  ;;  %v17633_v2 = vld [vmem:[#allocation119_spill] sm:$0xff]  ;;  %v17636_v17 = vld [vmem:[#allocation121_spill] sm:$0xff] }
 0x5aa   :  { %17617 = vst [vmem:[#allocation29_spill] sm:$0xff] %v11838_v20  ;;  %v17632_v20 = vpack.c.bf16 %v17630_v14, %v17631_v34  ;;  %v17640_v8 = vld [vmem:[#allocation117_spill] sm:$0xff] }
 0x5ab   :  { %17621 = vst [vmem:[#allocation38_spill] sm:$0xff] %v11844_v11  ;;  %17625 = vst [vmem:[#allocation34_spill] sm:$0xff] %v11850_v19  ;;  %v11856_v44 = vmul.bf16 %v11495_v22, %v17628_v18  ;;  %v17635_v11 = vpack.c.bf16 %v17633_v2, %v17634_v33  ;;  %v17638_v19 = vpack.c.bf16 %v17636_v17, %v17637_v57  ;;  %v17639_v18 = vld [vmem:[#allocation120_spill] sm:$0xff] }
 0x5ac   :  { %v11862_v53 = vmul.bf16 %v11498_v3, %v17632_v20  ;;  %v17642_v20 = vpack.c.bf16 %v11439_v13, %v11422_v59  ;;  %v3388_v2 = vrot.slane %v3215_v61, %v11477_v12  ;;  %v17676_v12 = vld [vmem:[#allocation21_spill] sm:$0xff] }
 0x5ad   :  { %17629 = vst [vmem:[#allocation40_spill] sm:$0xff] %v11856_v44  ;;  %v11868_v49 = vmul.bf16 %v11489_v39, %v17635_v11  ;;  %v11874_v43 = vmul.bf16 %v11492_v7, %v17638_v19  ;;  %v17641_v44 = vpack.c.bf16 %v17639_v18, %v17640_v8  ;;  %v3380_v39 = vrot.slane %v3215_v61, %v10505_v30 }
 0x5ae   :  { %v11886_v34 = vmul.bf16 %v11498_v3, %v17642_v20  ;;  %v3384_v11 = vrot.slane %v3215_v61, %v10508_v25  ;;  %v3392_v7 = vrot.slane %v3215_v61, %v11480_v16  ;;  %v3399_v17 = vpack.c.bf16 %v3388_v2, %v3388_v2  ;;  %v17674_v16 = vld [vmem:[#allocation25_spill] sm:$0xff]  ;;  %v17678_v25 = vld [vmem:[#allocation30_spill] sm:$0xff] }
 0x5af   :  { %v11880_v14 = vmul.bf16 %v11495_v22, %v17641_v44  ;;  %v3397_v19 = vpack.c.bf16 %v3380_v39, %v3380_v39 }
 0x5b0   :  { %v3398_v33 = vpack.c.bf16 %v3384_v11, %v3384_v11  ;;  %v3400_v57 = vpack.c.bf16 %v3392_v7, %v3392_v7  ;;  %v3416_v18 = vpack.i.b16 %v3399_v17, %v3399_v17  ;;  %v17662_v17 = vld [vmem:[#allocation22_spill] sm:$0xff] }
 0x5b1   :  { %v3402_v22 = vpack.i.b16 %v3397_v19, %v3397_v19  ;;  %v17658_v19 = vld [vmem:[#allocation17_spill] sm:$0xff] }
 0x5b2   :  { %v3409_v44 = vpack.i.b16 %v3398_v33, %v3398_v33  ;;  %v3423_v8 = vpack.i.b16 %v3400_v57, %v3400_v57  ;;  %v11899_v3 = vrot.slane %v3416_v18, %v10505_v30  ;;  %v17660_v33 = vld [vmem:[#allocation16_spill] sm:$0xff]  ;;  %v17664_v57 = vld [vmem:[#allocation18_spill] sm:$0xff] }
 0x5b3   :  { %v11893_v13 = vrot.slane %v3402_v22, %v10505_v30  ;;  %v17666_v22 = vld [vmem:[#allocation24_spill] sm:$0xff] }
 0x5b4   :  { %v11896_v59 = vrot.slane %v3409_v44, %v10505_v30  ;;  %v11902_v20 = vrot.slane %v3423_v8, %v10505_v30  ;;  %v11922_v7 = vadd.bf16 %v11899_v3, %v11519_v35  ;;  %v17668_v44 = vld [vmem:[#allocation20_spill] sm:$0xff]  ;;  %v17670_v8 = vld [vmem:[#allocation23_spill] sm:$0xff]  ;;  %v17680_v30 = vld [vmem:[#allocation26_spill] sm:$0xff] }
 0x5b5   :  { %v11906_v61 = vadd.bf16 %v11893_v13, %v11507_v54  ;;  %v11914_v11 = vadd.bf16 %v11893_v13, %v11532_v9 }
 0x5b6   :  { %v11910_v39 = vadd.bf16 %v11896_v59, %v11513_v62  ;;  %v11918_v2 = vadd.bf16 %v11896_v59, %v11538_v1  ;;  %v11926_v54 = vadd.bf16 %v11902_v20, %v11525_v28  ;;  %v11930_v62 = vadd.bf16 %v11899_v3, %v11544_v46 }
 0x5b7   :  { %v11934_v9 = vadd.bf16 %v11902_v20, %v11550_v31  ;;  %v11938_v1 = vadd.bf16 %v11893_v13, %v11556_v40  ;;  %v11942_v35 = vadd.bf16 %v11896_v59, %v11562_v27  ;;  %v11946_v28 = vadd.bf16 %v11899_v3, %v11568_v51 }
 0x5b8   :  { %v11950_v46 = vadd.bf16 %v11902_v20, %v11574_v6  ;;  %v11954_v31 = vadd.bf16 %v11893_v13, %v11580_v26  ;;  %v11958_v40 = vadd.bf16 %v11896_v59, %v11586_v10  ;;  %v11962_v27 = vadd.bf16 %v11899_v3, %v11592_v60 }
 0x5b9   :  { %v11966_v51 = vadd.bf16 %v11902_v20, %v11598_v4  ;;  %v11970_v6 = vadd.bf16 %v11893_v13, %v11604_v29  ;;  %v11974_v26 = vadd.bf16 %v11896_v59, %v11610_v23  ;;  %v11978_v10 = vadd.bf16 %v11899_v3, %v11616_v21 }
 0x5ba   :  { %v11982_v60 = vadd.bf16 %v11902_v20, %v11622_v5  ;;  %v11986_v4 = vadd.bf16 %v11893_v13, %v11628_v38  ;;  %v11990_v29 = vadd.bf16 %v11896_v59, %v11634_v37  ;;  %v11994_v23 = vadd.bf16 %v11899_v3, %v11640_v63 }
 0x5bb   :  { %17643 = vst [vmem:[#allocation36_spill] sm:$0xff] %v11974_v26  ;;  %v11998_v21 = vadd.bf16 %v11902_v20, %v11646_v36  ;;  %v12002_v5 = vadd.bf16 %v11893_v13, %v11652_v56  ;;  %v12006_v38 = vadd.bf16 %v11896_v59, %v11658_v45  ;;  %v12010_v37 = vadd.bf16 %v11899_v3, %v11664_v41 }
 0x5bc   :  { %17644 = vst [vmem:[#allocation39_spill] sm:$0xff] %v11986_v4  ;;  %v12014_v63 = vadd.bf16 %v11902_v20, %v11670_v47  ;;  %v12018_v36 = vadd.bf16 %v11893_v13, %v11676_v48  ;;  %v12022_v56 = vadd.bf16 %v11896_v59, %v11682_v32  ;;  %v12026_v45 = vadd.bf16 %v11899_v3, %v11688_v24 }
 0x5bd   :  { %17645 = vst [vmem:[#allocation35_spill] sm:$0xff] %v11998_v21  ;;  %17646 = vst [vmem:[#allocation48_spill] sm:$0xff] %v12010_v37  ;;  %v12030_v41 = vadd.bf16 %v11902_v20, %v11694_v42  ;;  %v12034_v47 = vadd.bf16 %v11893_v13, %v11700_v0  ;;  %v12038_v48 = vadd.bf16 %v11896_v59, %v11706_v50 }
 0x5be   :  { %17647 = vst [vmem:[#allocation37_spill] sm:$0xff] %v12014_v63  ;;  %17648 = vst [vmem:[#allocation50_spill] sm:$0xff] %v12018_v36  ;;  %v12042_v32 = vadd.bf16 %v11899_v3, %v11712_v52  ;;  %v12046_v24 = vadd.bf16 %v11902_v20, %v11718_v15  ;;  %v12050_v42 = vadd.bf16 %v11893_v13, %v11724_v55 }
 0x5bf   :  { %17649 = vst [vmem:[#allocation41_spill] sm:$0xff] %v12022_v56  ;;  %17650 = vst [vmem:[#allocation49_spill] sm:$0xff] %v12026_v45  ;;  %v12054_v0 = vadd.bf16 %v11896_v59, %v11730_v58  ;;  %v12058_v50 = vadd.bf16 %v11899_v3, %v17658_v19  ;;  %v12062_v52 = vadd.bf16 %v11902_v20, %v17660_v33  ;;  %v17672_v33 = vld [vmem:[#allocation19_spill] sm:$0xff] }
 0x5c0   :  { %17651 = vst [vmem:[#allocation42_spill] sm:$0xff] %v12030_v41  ;;  %17652 = vst [vmem:[#allocation51_spill] sm:$0xff] %v12034_v47  ;;  %v12066_v15 = vadd.bf16 %v11893_v13, %v17662_v17  ;;  %v12070_v55 = vadd.bf16 %v11896_v59, %v17664_v57  ;;  %v12074_v58 = vadd.bf16 %v11899_v3, %v17666_v22 }
 0x5c1   :  { %17653 = vst [vmem:[#allocation47_spill] sm:$0xff] %v12038_v48  ;;  %17654 = vst [vmem:[#allocation56_spill] sm:$0xff] %v12042_v32  ;;  %v12078_v18 = vadd.bf16 %v11902_v20, %v17668_v44  ;;  %v12082_v19 = vadd.bf16 %v11893_v13, %v17670_v8  ;;  %v12086_v17 = vadd.bf16 %v11896_v59, %v17672_v33 }
 0x5c2   :  { %17655 = vst [vmem:[#allocation52_spill] sm:$0xff] %v12046_v24  ;;  %17656 = vst [vmem:[#allocation58_spill] sm:$0xff] %v12050_v42  ;;  %v12090_v57 = vadd.bf16 %v11899_v3, %v17674_v16  ;;  %v12094_v22 = vadd.bf16 %v11902_v20, %v17676_v12  ;;  %v12098_v44 = vadd.bf16 %v11893_v13, %v17678_v25 }
 0x5c3   :  { %17657 = vst [vmem:[#allocation54_spill] sm:$0xff] %v12054_v0  ;;  %17659 = vst [vmem:[#allocation57_spill] sm:$0xff] %v12058_v50  ;;  %v12102_v8 = vadd.bf16 %v11896_v59, %v17680_v30 }
 0x5c4   :  { %17661 = vst [vmem:[#allocation53_spill] sm:$0xff] %v12062_v52  ;;  %17663 = vst [vmem:[#allocation59_spill] sm:$0xff] %v12066_v15 }
 0x5c5   :  { %17665 = vst [vmem:[#allocation55_spill] sm:$0xff] %v12070_v55  ;;  %17667 = vst [vmem:[#allocation64_spill] sm:$0xff] %v12074_v58 }
 0x5c6   :  { %17669 = vst [vmem:[#allocation60_spill] sm:$0xff] %v12078_v18  ;;  %17671 = vst [vmem:[#allocation66_spill] sm:$0xff] %v12082_v19  ;;  %v17682_v19 = vld [vmem:[#allocation32_spill] sm:$0xff] }
 0x5c7   :  { %17673 = vst [vmem:[#allocation62_spill] sm:$0xff] %v12086_v17  ;;  %17675 = vst [vmem:[#allocation65_spill] sm:$0xff] %v12090_v57  ;;  %v12106_v33 = vadd.bf16 %v11899_v3, %v17682_v19  ;;  %v17684_v17 = vld [vmem:[#allocation28_spill] sm:$0xff]  ;;  %v17686_v57 = vld [vmem:[#allocation31_spill] sm:$0xff] }
 0x5c8   :  { %17677 = vst [vmem:[#allocation61_spill] sm:$0xff] %v12094_v22  ;;  %17679 = vst [vmem:[#allocation67_spill] sm:$0xff] %v12098_v44  ;;  %v12110_v16 = vadd.bf16 %v11902_v20, %v17684_v17  ;;  %v12114_v12 = vadd.bf16 %v11893_v13, %v17686_v57  ;;  %v17688_v22 = vld [vmem:[#allocation27_spill] sm:$0xff]  ;;  %v17690_v44 = vld [vmem:[#allocation33_spill] sm:$0xff] }
 0x5c9   :  { %17681 = vst [vmem:[#allocation63_spill] sm:$0xff] %v12102_v8  ;;  %17683 = vst [vmem:[#allocation72_spill] sm:$0xff] %v12106_v33  ;;  %v12118_v25 = vadd.bf16 %v11896_v59, %v17688_v22  ;;  %v12122_v30 = vadd.bf16 %v11899_v3, %v17690_v44  ;;  %v17692_v8 = vld [vmem:[#allocation29_spill] sm:$0xff]  ;;  %v17694_v33 = vld [vmem:[#allocation38_spill] sm:$0xff]  ;;  %v12142_v44 = vadd.bf16 %v11902_v20, %v11862_v53  ;;  %v3494_v53 = vmul.bf16 1045249613, %v11910_v39 }
 0x5ca   :  { %17685 = vst [vmem:[#allocation68_spill] sm:$0xff] %v12110_v16  ;;  %17687 = vst [vmem:[#allocation74_spill] sm:$0xff] %v12114_v12  ;;  %v12126_v19 = vadd.bf16 %v11902_v20, %v17692_v8  ;;  %v12130_v17 = vadd.bf16 %v11893_v13, %v17694_v33  ;;  %v17696_v16 = vld [vmem:[#allocation34_spill] sm:$0xff]  ;;  %v17698_v12 = vld [vmem:[#allocation40_spill] sm:$0xff]  ;;  %v12146_v8 = vadd.bf16 %v11893_v13, %v11868_v49  ;;  %v3496_v49 = vmul.bf16 1045249613, %v11926_v54 }
 0x5cb   :  { %17689 = vst [vmem:[#allocation70_spill] sm:$0xff] %v12118_v25  ;;  %17691 = vst [vmem:[#allocation73_spill] sm:$0xff] %v12122_v30  ;;  %v12134_v57 = vadd.bf16 %v11896_v59, %v17696_v16  ;;  %v12138_v22 = vadd.bf16 %v11899_v3, %v17698_v12  ;;  %v12150_v33 = vadd.bf16 %v11896_v59, %v11874_v43  ;;  %v3497_v13 = vmul.bf16 1045249613, %v11914_v11 }
 0x5cc   :  { %17693 = vst [vmem:[#allocation69_spill] sm:$0xff] %v12126_v19  ;;  %17695 = vst [vmem:[#allocation75_spill] sm:$0xff] %v12130_v17  ;;  %v12154_v16 = vadd.bf16 %v11899_v3, %v11880_v14  ;;  %v12158_v12 = vadd.bf16 %v11902_v20, %v11886_v34  ;;  %v3498_v43 = vmul.bf16 1045249613, %v11918_v2  ;;  %v3499_v59 = vmul.bf16 1045249613, %v11930_v62 }
 0x5cd   :  { %17697 = vst [vmem:[#allocation71_spill] sm:$0xff] %v12134_v57  ;;  %17699 = vst [vmem:[#allocation80_spill] sm:$0xff] %v12138_v22  ;;  %v3493_v22 = vmul.bf16 1045249613, %v11906_v61  ;;  %v3500_v14 = vmul.bf16 1045249613, %v11934_v9  ;;  %v12188_v30 = vmax.bf16 %v3496_v49, %v11926_v54  ;;  %v12194_v25 = vmax.bf16 %v3497_v13, %v11914_v11 }
 0x5ce   :  { %17700 = vst [vmem:[#allocation76_spill] sm:$0xff] %v12142_v44  ;;  %17701 = vst [vmem:[#allocation82_spill] sm:$0xff] %v12146_v8  ;;  %v3495_v44 = vmul.bf16 1045249613, %v11922_v7  ;;  %v3501_v3 = vmul.bf16 1045249613, %v11938_v1 }
 0x5cf   :  { %17702 = vst [vmem:[#allocation78_spill] sm:$0xff] %v12150_v33  ;;  %17703 = vst [vmem:[#allocation81_spill] sm:$0xff] %v12154_v16  ;;  %v12170_v34 = vmax.bf16 %v3493_v22, %v11906_v61  ;;  %v3502_v20 = vmul.bf16 1045249613, %v11942_v35  ;;  %v3504_v16 = vmul.bf16 1045249613, %v11950_v46  ;;  %v12176_v33 = vmax.bf16 %v3494_v53, %v11910_v39 }
 0x5d0   :  { %17704 = vst [vmem:[#allocation77_spill] sm:$0xff] %v12158_v12  ;;  %v3503_v12 = vmul.bf16 1045249613, %v11946_v28  ;;  %v3505_v8 = vmul.bf16 1045249613, %v11954_v31  ;;  %v12182_v19 = vmax.bf16 %v3495_v44, %v11922_v7  ;;  %17708 = vst [vmem:[#allocation84_spill] sm:$0xff] %v12188_v30 }
 0x5d1   :  { %17705 = vst [vmem:[#allocation83_spill] sm:$0xff] %v12170_v34  ;;  %17706 = vst [vmem:[#allocation79_spill] sm:$0xff] %v12176_v33  ;;  %v3506_v57 = vmul.bf16 1045249613, %v11958_v40  ;;  %v3507_v17 = vmul.bf16 1045249613, %v11962_v27 }
 0x5d2   :  { %17707 = vst [vmem:[#allocation88_spill] sm:$0xff] %v12182_v19  ;;  %v3508_v61 = vmul.bf16 1045249613, %v11966_v51  ;;  %v3509_v22 = vmul.bf16 1045249613, %v11970_v6  ;;  %17709 = vst [vmem:[#allocation90_spill] sm:$0xff] %v12194_v25 }
 0x5d3   :  { %v3510_v34 = vmul.bf16 1045249613, %v11974_v26  ;;  %v3511_v39 = vmul.bf16 1045249613, %v11978_v10  ;;  %v3512_v53 = vmul.bf16 1045249613, %v11982_v60  ;;  %v12200_v26 = vmax.bf16 %v3498_v43, %v11918_v2 }
 0x5d4   :  { %v3513_v33 = vmul.bf16 1045249613, %v11986_v4  ;;  %v3514_v7 = vmul.bf16 1045249613, %v11990_v29  ;;  %v3515_v44 = vmul.bf16 1045249613, %v11994_v23  ;;  %v12206_v4 = vmax.bf16 %v3499_v59, %v11930_v62 }
 0x5d5   :  { %v3516_v19 = vmul.bf16 1045249613, %v11998_v21  ;;  %17710 = vst [vmem:[#allocation86_spill] sm:$0xff] %v12200_v26  ;;  %v3517_v54 = vmul.bf16 1045249613, %v12002_v5  ;;  %v12212_v21 = vmax.bf16 %v3500_v14, %v11934_v9 }
 0x5d6   :  { %v3518_v49 = vmul.bf16 1045249613, %v12006_v38  ;;  %v3519_v30 = vmul.bf16 1045249613, %v12010_v37  ;;  %17711 = vst [vmem:[#allocation89_spill] sm:$0xff] %v12206_v4  ;;  %v12218_v37 = vmax.bf16 %v3501_v3, %v11938_v1 }
 0x5d7   :  { %v3520_v11 = vmul.bf16 1045249613, %v12014_v63  ;;  %v3521_v13 = vmul.bf16 1045249613, %v12018_v36  ;;  %v3522_v25 = vmul.bf16 1045249613, %v12022_v56  ;;  %v12224_v56 = vmax.bf16 %v3502_v20, %v11942_v35 }
 0x5d8   :  { %17712 = vst [vmem:[#allocation85_spill] sm:$0xff] %v12212_v21  ;;  %v3523_v2 = vmul.bf16 1045249613, %v12026_v45  ;;  %v3524_v43 = vmul.bf16 1045249613, %v12030_v41  ;;  %17713 = vst [vmem:[#allocation91_spill] sm:$0xff] %v12218_v37 }
 0x5d9   :  { %v3525_v26 = vmul.bf16 1045249613, %v12034_v47  ;;  %v3526_v62 = vmul.bf16 1045249613, %v12038_v48  ;;  %v3527_v59 = vmul.bf16 1045249613, %v12042_v32  ;;  %v12230_v47 = vmax.bf16 %v3503_v12, %v11946_v28 }
 0x5da   :  { %v3528_v4 = vmul.bf16 1045249613, %v12046_v24  ;;  %17714 = vst [vmem:[#allocation87_spill] sm:$0xff] %v12224_v56  ;;  %v3529_v9 = vmul.bf16 1045249613, %v12050_v42  ;;  %v12236_v24 = vmax.bf16 %v3504_v16, %v11950_v46  ;;  %v17717_v56 = vld [vmem:[#allocation66_spill] sm:$0xff] }
 0x5db   :  { %v3530_v14 = vmul.bf16 1045249613, %v12054_v0  ;;  %v3531_v21 = vmul.bf16 1045249613, %v12058_v50  ;;  %17715 = vst [vmem:[#allocation96_spill] sm:$0xff] %v12230_v47  ;;  %v12242_v50 = vmax.bf16 %v3505_v8, %v11954_v31  ;;  %v17719_v28 = vld [vmem:[#allocation62_spill] sm:$0xff] }
 0x5dc   :  { %v3532_v1 = vmul.bf16 1045249613, %v12062_v52  ;;  %v3533_v3 = vmul.bf16 1045249613, %v12066_v15  ;;  %v3534_v37 = vmul.bf16 1045249613, %v12070_v55  ;;  %v12248_v55 = vmax.bf16 %v3506_v57, %v11958_v40 }
 0x5dd   :  { %17716 = vst [vmem:[#allocation92_spill] sm:$0xff] %v12236_v24  ;;  %v3535_v35 = vmul.bf16 1045249613, %v12074_v58  ;;  %v3536_v20 = vmul.bf16 1045249613, %v12078_v18  ;;  %17718 = vst [vmem:[#allocation98_spill] sm:$0xff] %v12242_v50 }
 0x5de   :  { %v3537_v0 = vmul.bf16 1045249613, %v17717_v56  ;;  %v3538_v12 = vmul.bf16 1045249613, %v17719_v28  ;;  %v17720_v47 = vld [vmem:[#allocation65_spill] sm:$0xff]  ;;  %17722 = vst [vmem:[#allocation94_spill] sm:$0xff] %v12248_v55  ;;  %v12254_v56 = vmax.bf16 %v3507_v17, %v11962_v27 }
 0x5df   :  { %v3539_v52 = vmul.bf16 1045249613, %v17720_v47  ;;  %v17721_v42 = vld [vmem:[#allocation61_spill] sm:$0xff]  ;;  %v17723_v46 = vld [vmem:[#allocation67_spill] sm:$0xff]  ;;  %v17725_v32 = vld [vmem:[#allocation72_spill] sm:$0xff] }
 0x5e0   :  { %v3540_v15 = vmul.bf16 1045249613, %v17721_v42  ;;  %v3541_v16 = vmul.bf16 1045249613, %v17723_v46  ;;  %v17724_v24 = vld [vmem:[#allocation63_spill] sm:$0xff]  ;;  %17726 = vst [vmem:[#allocation97_spill] sm:$0xff] %v12254_v56  ;;  %v12260_v42 = vmax.bf16 %v3508_v61, %v11966_v51 }
 0x5e1   :  { %v3542_v58 = vmul.bf16 1045249613, %v17724_v24  ;;  %v3543_v18 = vmul.bf16 1045249613, %v17725_v32  ;;  %v17727_v31 = vld [vmem:[#allocation68_spill] sm:$0xff]  ;;  %v17728_v50 = vld [vmem:[#allocation74_spill] sm:$0xff]  ;;  %v12266_v32 = vmax.bf16 %v3509_v22, %v11970_v6 }
 0x5e2   :  { %v3544_v8 = vmul.bf16 1045249613, %v17727_v31  ;;  %v3545_v28 = vmul.bf16 1045249613, %v17728_v50  ;;  %v17729_v48 = vld [vmem:[#allocation70_spill] sm:$0xff]  ;;  %17730 = vst [vmem:[#allocation93_spill] sm:$0xff] %v12260_v42 }
 0x5e3   :  { %v3546_v47 = vmul.bf16 1045249613, %v17729_v48  ;;  %v17731_v40 = vld [vmem:[#allocation73_spill] sm:$0xff]  ;;  %v17733_v41 = vld [vmem:[#allocation75_spill] sm:$0xff]  ;;  %17734 = vst [vmem:[#allocation99_spill] sm:$0xff] %v12266_v32  ;;  %v17736_v56 = vld [vmem:[#allocation80_spill] sm:$0xff]  ;;  %v12282_v32 = vmax.bf16 %v3512_v53, %v11982_v60 }
 0x5e4   :  { %v3547_v57 = vmul.bf16 1045249613, %v17731_v40  ;;  %v17732_v55 = vld [vmem:[#allocation69_spill] sm:$0xff]  ;;  %v3549_v24 = vmul.bf16 1045249613, %v17733_v41  ;;  %v17735_v27 = vld [vmem:[#allocation71_spill] sm:$0xff]  ;;  %v12278_v41 = vmax.bf16 %v3511_v39, %v11978_v10  ;;  %v12297_v10 = vmax.bf16 %v3517_v54, %v12002_v5 }
 0x5e5   :  { %v3548_v46 = vmul.bf16 1045249613, %v17732_v55  ;;  %v3550_v17 = vmul.bf16 1045249613, %v17735_v27  ;;  %v3551_v31 = vmul.bf16 1045249613, %v17736_v56  ;;  %v12300_v39 = vmax.bf16 %v3518_v49, %v12006_v38 }
 0x5e6   :  { %v17737_v45 = vld [vmem:[#allocation76_spill] sm:$0xff]  ;;  %v17740_v51 = vld [vmem:[#allocation82_spill] sm:$0xff]  ;;  %v17742_v63 = vld [vmem:[#allocation81_spill] sm:$0xff] }
 0x5e7   :  { %v3552_v50 = vmul.bf16 1045249613, %v17737_v45  ;;  %v17738_v36 = vld [vmem:[#allocation36_spill] sm:$0xff]  ;;  %v3553_v61 = vmul.bf16 1045249613, %v17740_v51  ;;  %v17741_v42 = vld [vmem:[#allocation78_spill] sm:$0xff] }
 0x5e8   :  { %v12272_v48 = vmax.bf16 %v3510_v34, %v17738_v36  ;;  %v3554_v40 = vmul.bf16 1045249613, %v17741_v42  ;;  %v3555_v55 = vmul.bf16 1045249613, %v17742_v63  ;;  %v17743_v6 = vld [vmem:[#allocation77_spill] sm:$0xff]  ;;  %v17744_v56 = vld [vmem:[#allocation39_spill] sm:$0xff]  ;;  %v12288_v36 = vmax.bf16 %v3514_v7, %v11990_v29 }
 0x5e9   :  { %v3556_v22 = vmul.bf16 1045249613, %v17743_v6  ;;  %v12285_v27 = vmax.bf16 %v3513_v33, %v17744_v56  ;;  %v12291_v34 = vmax.bf16 %v3515_v44, %v11994_v23  ;;  %v17746_v60 = vld [vmem:[#allocation48_spill] sm:$0xff]  ;;  %v17747_v56 = vld [vmem:[#allocation37_spill] sm:$0xff]  ;;  %v17748_v29 = vld [vmem:[#allocation50_spill] sm:$0xff] }
 0x5ea   :  { %17739 = vst [vmem:[#allocation95_spill] sm:$0xff] %v12272_v48  ;;  %v17745_v48 = vld [vmem:[#allocation35_spill] sm:$0xff]  ;;  %v12303_v53 = vmax.bf16 %v3519_v30, %v17746_v60  ;;  %v12306_v33 = vmax.bf16 %v3520_v11, %v17747_v56  ;;  %v12309_v7 = vmax.bf16 %v3521_v13, %v17748_v29  ;;  %v17749_v23 = vld [vmem:[#allocation41_spill] sm:$0xff]  ;;  %v17751_v5 = vld [vmem:[#allocation42_spill] sm:$0xff] }
 0x5eb   :  { %v12294_v42 = vmax.bf16 %v3516_v19, %v17745_v48  ;;  %v12312_v44 = vmax.bf16 %v3522_v25, %v17749_v23  ;;  %v17750_v48 = vld [vmem:[#allocation49_spill] sm:$0xff]  ;;  %v12318_v54 = vmax.bf16 %v3524_v43, %v17751_v5  ;;  %v17752_v38 = vld [vmem:[#allocation51_spill] sm:$0xff]  ;;  %v17754_v11 = vld [vmem:[#allocation56_spill] sm:$0xff] }
 0x5ec   :  { %v12315_v19 = vmax.bf16 %v3523_v2, %v17750_v48  ;;  %v12321_v49 = vmax.bf16 %v3525_v26, %v17752_v38  ;;  %v17753_v30 = vld [vmem:[#allocation47_spill] sm:$0xff]  ;;  %v12327_v56 = vmax.bf16 %v3527_v59, %v17754_v11  ;;  %v17755_v13 = vld [vmem:[#allocation52_spill] sm:$0xff]  ;;  %v17756_v25 = vld [vmem:[#allocation58_spill] sm:$0xff] }
 0x5ed   :  { %v12324_v60 = vmax.bf16 %v3526_v62, %v17753_v30  ;;  %v12330_v29 = vmax.bf16 %v3528_v4, %v17755_v13  ;;  %v12333_v23 = vmax.bf16 %v3529_v9, %v17756_v25  ;;  %v17757_v2 = vld [vmem:[#allocation54_spill] sm:$0xff]  ;;  %v17758_v43 = vld [vmem:[#allocation57_spill] sm:$0xff]  ;;  %v17760_v62 = vld [vmem:[#allocation59_spill] sm:$0xff] }
 0x5ee   :  { %v12336_v48 = vmax.bf16 %v3530_v14, %v17757_v2  ;;  %v12339_v5 = vmax.bf16 %v3531_v21, %v17758_v43  ;;  %v17759_v26 = vld [vmem:[#allocation53_spill] sm:$0xff]  ;;  %v12345_v30 = vmax.bf16 %v3533_v3, %v17760_v62  ;;  %v17761_v59 = vld [vmem:[#allocation55_spill] sm:$0xff]  ;;  %v17762_v4 = vld [vmem:[#allocation64_spill] sm:$0xff] }
 0x5ef   :  { %v12342_v38 = vmax.bf16 %v3532_v1, %v17759_v26  ;;  %v12348_v11 = vmax.bf16 %v3534_v37, %v17761_v59  ;;  %v12351_v13 = vmax.bf16 %v3535_v35, %v17762_v4  ;;  %v17763_v9 = vld [vmem:[#allocation60_spill] sm:$0xff]  ;;  %v17764_v14 = vld [vmem:[#allocation66_spill] sm:$0xff]  ;;  %v17766_v1 = vld [vmem:[#allocation65_spill] sm:$0xff] }
 0x5f0   :  { %v12354_v25 = vmax.bf16 %v3536_v20, %v17763_v9  ;;  %v12357_v2 = vmax.bf16 %v3537_v0, %v17764_v14  ;;  %v17765_v21 = vld [vmem:[#allocation62_spill] sm:$0xff]  ;;  %v12363_v26 = vmax.bf16 %v3539_v52, %v17766_v1  ;;  %v17767_v3 = vld [vmem:[#allocation61_spill] sm:$0xff]  ;;  %v17768_v37 = vld [vmem:[#allocation67_spill] sm:$0xff] }
 0x5f1   :  { %v12360_v43 = vmax.bf16 %v3538_v12, %v17765_v21  ;;  %v12366_v62 = vmax.bf16 %v3540_v15, %v17767_v3  ;;  %v12369_v59 = vmax.bf16 %v3541_v16, %v17768_v37  ;;  %v17769_v35 = vld [vmem:[#allocation63_spill] sm:$0xff]  ;;  %v17770_v20 = vld [vmem:[#allocation72_spill] sm:$0xff]  ;;  %v17772_v12 = vld [vmem:[#allocation74_spill] sm:$0xff] }
 0x5f2   :  { %v12372_v4 = vmax.bf16 %v3542_v58, %v17769_v35  ;;  %v12375_v9 = vmax.bf16 %v3543_v18, %v17770_v20  ;;  %v17771_v0 = vld [vmem:[#allocation68_spill] sm:$0xff]  ;;  %v12381_v21 = vmax.bf16 %v3545_v28, %v17772_v12  ;;  %v17773_v52 = vld [vmem:[#allocation70_spill] sm:$0xff]  ;;  %v17774_v15 = vld [vmem:[#allocation73_spill] sm:$0xff]  ;;  %v12402_v28 = vmax.bf16 %v3552_v50, %v17737_v45 }
 0x5f3   :  { %v12378_v14 = vmax.bf16 %v3544_v8, %v17771_v0  ;;  %v12384_v1 = vmax.bf16 %v3546_v47, %v17773_v52  ;;  %v12387_v3 = vmax.bf16 %v3547_v57, %v17774_v15  ;;  %v17775_v16 = vld [vmem:[#allocation69_spill] sm:$0xff]  ;;  %v17776_v58 = vld [vmem:[#allocation75_spill] sm:$0xff]  ;;  %v17778_v8 = vld [vmem:[#allocation80_spill] sm:$0xff]  ;;  %v12405_v47 = vmax.bf16 %v3553_v61, %v17740_v51 }
 0x5f4   :  { %v12390_v37 = vmax.bf16 %v3548_v46, %v17775_v16  ;;  %v12393_v35 = vmax.bf16 %v3549_v24, %v17776_v58  ;;  %v17777_v18 = vld [vmem:[#allocation71_spill] sm:$0xff]  ;;  %v12399_v0 = vmax.bf16 %v3551_v31, %v17778_v8  ;;  %v17780_v57 = vld [vmem:[#allocation78_spill] sm:$0xff]  ;;  %v12411_v46 = vmax.bf16 %v3555_v55, %v17742_v63 }
 0x5f5   :  { %v12396_v20 = vmax.bf16 %v3550_v17, %v17777_v18  ;;  %17779 = vst [vmem:[#allocation104_spill] sm:$0xff] %v12405_v47  ;;  %v12408_v12 = vmax.bf16 %v3554_v40, %v17780_v57  ;;  %v12414_v24 = vmax.bf16 %v3556_v22, %v17743_v6 }
 0x5f6   :  { %9443 = dma.done.wait [#allocation4], 32768 }
 0x5f7   :  { %9444 = vsyncadd [#allocation4], 4294934528  ;;  %v17781_v17 = vld [vmem:[#allocation79_spill] sm:$0xff]  ;;  %v3626_v45 = vld [vmem:[#allocation2 + $0x8] sm:$0xff] }
 0x5f8   :  { %3913 = vmatprep.mubr.bf16.mxu1 %v17781_v17  ;;  %4299 = vmatprep.mubr.bf16.mxu0 %v17781_v17  ;;  %v3628_v50 = vld [vmem:[#allocation2 + $0x18] sm:$0xff]  ;;  %v3625_v31 = vld [vmem:[#allocation2] sm:$0xff]  ;;  %v3627_v51 = vld [vmem:[#allocation2 + $0x10] sm:$0xff] }
 0x5f9   :  { %3881 = vmatprep.subr.bf16.mxu1 %v3626_v45  ;;  %4267 = vmatprep.subr.bf16.mxu0 %v3628_v50  ;;  %v3634_v40 = vld [vmem:[#allocation2 + $0x48] sm:$0xff]  ;;  %v3636_v61 = vld [vmem:[#allocation2 + $0x58] sm:$0xff]  ;;  %v3633_v63 = vld [vmem:[#allocation2 + $0x40] sm:$0xff] }
 0x5fa   :  { %3882 = vmatpush1.bf16.msra.mxu1 %v3625_v31  ;;  %4268 = vmatpush1.bf16.msra.mxu0 %v3627_v51  ;;  %v3635_v55 = vld [vmem:[#allocation2 + $0x50] sm:$0xff]  ;;  %v3642_v6 = vld [vmem:[#allocation2 + $0x88] sm:$0xff]  ;;  %v3644_v22 = vld [vmem:[#allocation2 + $0x98] sm:$0xff] }
 0x5fb   :  { %3883 = vmatprep.subr.bf16.mxu1 %v3634_v40  ;;  %4269 = vmatprep.subr.bf16.mxu0 %v3636_v61  ;;  %v3641_v52 = vld [vmem:[#allocation2 + $0x80] sm:$0xff]  ;;  %v3643_v15 = vld [vmem:[#allocation2 + $0x90] sm:$0xff]  ;;  %v3650_v16 = vld [vmem:[#allocation2 + $0xc8] sm:$0xff] }
 0x5fc   :  { %v3652_v58 = vld [vmem:[#allocation2 + $0xd8] sm:$0xff]  ;;  %v3649_v18 = vld [vmem:[#allocation2 + $0xc0] sm:$0xff]  ;;  %v3651_v8 = vld [vmem:[#allocation2 + $0xd0] sm:$0xff] }
 0x5fd   :  { %v3658_v57 = vld [vmem:[#allocation2 + $0x108] sm:$0xff]  ;;  %v3660_v45 = vld [vmem:[#allocation2 + $0x118] sm:$0xff]  ;;  %v3657_v50 = vld [vmem:[#allocation2 + $0x100] sm:$0xff] }
 0x5fe   :  { %3884 = vmatpush1.bf16.msra.mxu1 %v3633_v63  ;;  %4270 = vmatpush1.bf16.msra.mxu0 %v3635_v55  ;;  %v3659_v31 = vld [vmem:[#allocation2 + $0x110] sm:$0xff]  ;;  %v3666_v51 = vld [vmem:[#allocation2 + $0x148] sm:$0xff]  ;;  %v3668_v40 = vld [vmem:[#allocation2 + $0x158] sm:$0xff] }
 0x5ff   :  { %3885 = vmatprep.subr.bf16.mxu1 %v3642_v6  ;;  %4271 = vmatprep.subr.bf16.mxu0 %v3644_v22  ;;  %v3665_v61 = vld [vmem:[#allocation2 + $0x140] sm:$0xff]  ;;  %v3667_v63 = vld [vmem:[#allocation2 + $0x150] sm:$0xff]  ;;  %v3674_v55 = vld [vmem:[#allocation2 + $0x188] sm:$0xff] }
 0x600   :  { %v3676_v6 = vld [vmem:[#allocation2 + $0x198] sm:$0xff]  ;;  %v3673_v22 = vld [vmem:[#allocation2 + $0x180] sm:$0xff] }
 0x602   :  { %3886 = vmatpush1.bf16.msra.mxu1 %v3641_v52  ;;  %4272 = vmatpush1.bf16.msra.mxu0 %v3643_v15  ;;  %v3675_v52 = vld [vmem:[#allocation2 + $0x190] sm:$0xff]  ;;  %v3682_v15 = vld [vmem:[#allocation2 + $0x1c8] sm:$0xff] }
 0x603   :  { %3887 = vmatprep.subr.bf16.mxu1 %v3650_v16  ;;  %4273 = vmatprep.subr.bf16.mxu0 %v3652_v58  ;;  %v3684_v16 = vld [vmem:[#allocation2 + $0x1d8] sm:$0xff]  ;;  %v3681_v58 = vld [vmem:[#allocation2 + $0x1c0] sm:$0xff] }
 0x606   :  { %3888 = vmatpush1.bf16.msra.mxu1 %v3649_v18  ;;  %4274 = vmatpush1.bf16.msra.mxu0 %v3651_v8  ;;  %v3683_v18 = vld [vmem:[#allocation2 + $0x1d0] sm:$0xff]  ;;  %v3690_v8 = vld [vmem:[#allocation2 + $0x208] sm:$0xff] }
 0x607   :  { %3889 = vmatprep.subr.bf16.mxu1 %v3658_v57  ;;  %4275 = vmatprep.subr.bf16.mxu0 %v3660_v45  ;;  %v3692_v57 = vld [vmem:[#allocation2 + $0x218] sm:$0xff]  ;;  %v3689_v45 = vld [vmem:[#allocation2 + $0x200] sm:$0xff] }
 0x60a   :  { %3890 = vmatpush1.bf16.msra.mxu1 %v3657_v50  ;;  %4276 = vmatpush1.bf16.msra.mxu0 %v3659_v31  ;;  %v3691_v50 = vld [vmem:[#allocation2 + $0x210] sm:$0xff]  ;;  %v3698_v31 = vld [vmem:[#allocation2 + $0x248] sm:$0xff] }
 0x60b   :  { %3891 = vmatprep.subr.bf16.mxu1 %v3666_v51  ;;  %4277 = vmatprep.subr.bf16.mxu0 %v3668_v40  ;;  %v3700_v51 = vld [vmem:[#allocation2 + $0x258] sm:$0xff]  ;;  %v3697_v40 = vld [vmem:[#allocation2 + $0x240] sm:$0xff] }
 0x60e   :  { %3892 = vmatpush1.bf16.msra.mxu1 %v3665_v61  ;;  %4278 = vmatpush1.bf16.msra.mxu0 %v3667_v63  ;;  %v3699_v61 = vld [vmem:[#allocation2 + $0x250] sm:$0xff]  ;;  %v3706_v63 = vld [vmem:[#allocation2 + $0x288] sm:$0xff] }
 0x60f   :  { %3893 = vmatprep.subr.bf16.mxu1 %v3674_v55  ;;  %4279 = vmatprep.subr.bf16.mxu0 %v3676_v6  ;;  %v3708_v55 = vld [vmem:[#allocation2 + $0x298] sm:$0xff]  ;;  %v3705_v6 = vld [vmem:[#allocation2 + $0x280] sm:$0xff] }
 0x612   :  { %3894 = vmatpush1.bf16.msra.mxu1 %v3673_v22  ;;  %4280 = vmatpush1.bf16.msra.mxu0 %v3675_v52  ;;  %v3707_v22 = vld [vmem:[#allocation2 + $0x290] sm:$0xff]  ;;  %v3714_v52 = vld [vmem:[#allocation2 + $0x2c8] sm:$0xff] }
 0x613   :  { %3895 = vmatprep.subr.bf16.mxu1 %v3682_v15  ;;  %4281 = vmatprep.subr.bf16.mxu0 %v3684_v16  ;;  %v3716_v15 = vld [vmem:[#allocation2 + $0x2d8] sm:$0xff]  ;;  %v3713_v16 = vld [vmem:[#allocation2 + $0x2c0] sm:$0xff] }
 0x616   :  { %3896 = vmatpush1.bf16.msra.mxu1 %v3681_v58  ;;  %4282 = vmatpush1.bf16.msra.mxu0 %v3683_v18  ;;  %v3715_v58 = vld [vmem:[#allocation2 + $0x2d0] sm:$0xff]  ;;  %v3722_v18 = vld [vmem:[#allocation2 + $0x308] sm:$0xff] }
 0x617   :  { %3897 = vmatprep.subr.bf16.mxu1 %v3690_v8  ;;  %4283 = vmatprep.subr.bf16.mxu0 %v3692_v57  ;;  %v3724_v8 = vld [vmem:[#allocation2 + $0x318] sm:$0xff]  ;;  %v3721_v57 = vld [vmem:[#allocation2 + $0x300] sm:$0xff] }
 0x61a   :  { %3898 = vmatpush1.bf16.msra.mxu1 %v3689_v45  ;;  %4284 = vmatpush1.bf16.msra.mxu0 %v3691_v50  ;;  %v3723_v45 = vld [vmem:[#allocation2 + $0x310] sm:$0xff]  ;;  %v3730_v50 = vld [vmem:[#allocation2 + $0x348] sm:$0xff] }
 0x61b   :  { %3899 = vmatprep.subr.bf16.mxu1 %v3698_v31  ;;  %4285 = vmatprep.subr.bf16.mxu0 %v3700_v51  ;;  %v3732_v31 = vld [vmem:[#allocation2 + $0x358] sm:$0xff]  ;;  %v3729_v51 = vld [vmem:[#allocation2 + $0x340] sm:$0xff] }
 0x61e   :  { %3900 = vmatpush1.bf16.msra.mxu1 %v3697_v40  ;;  %4286 = vmatpush1.bf16.msra.mxu0 %v3699_v61  ;;  %v3731_v40 = vld [vmem:[#allocation2 + $0x350] sm:$0xff]  ;;  %v3738_v61 = vld [vmem:[#allocation2 + $0x388] sm:$0xff] }
 0x61f   :  { %3901 = vmatprep.subr.bf16.mxu1 %v3706_v63  ;;  %4287 = vmatprep.subr.bf16.mxu0 %v3708_v55  ;;  %v3740_v63 = vld [vmem:[#allocation2 + $0x398] sm:$0xff]  ;;  %v3737_v55 = vld [vmem:[#allocation2 + $0x380] sm:$0xff] }
 0x622   :  { %3902 = vmatpush1.bf16.msra.mxu1 %v3705_v6  ;;  %4288 = vmatpush1.bf16.msra.mxu0 %v3707_v22  ;;  %v3739_v6 = vld [vmem:[#allocation2 + $0x390] sm:$0xff]  ;;  %v3746_v22 = vld [vmem:[#allocation2 + $0x3c8] sm:$0xff] }
 0x623   :  { %3903 = vmatprep.subr.bf16.mxu1 %v3714_v52  ;;  %4289 = vmatprep.subr.bf16.mxu0 %v3716_v15  ;;  %v3748_v52 = vld [vmem:[#allocation2 + $0x3d8] sm:$0xff]  ;;  %v3745_v15 = vld [vmem:[#allocation2 + $0x3c0] sm:$0xff] }
 0x626   :  { %3904 = vmatpush1.bf16.msra.mxu1 %v3713_v16  ;;  %4290 = vmatpush1.bf16.msra.mxu0 %v3715_v58  ;;  %v3747_v16 = vld [vmem:[#allocation2 + $0x3d0] sm:$0xff]  ;;  %v3754_v58 = vld [vmem:[#allocation2 + $0x408] sm:$0xff] }
 0x627   :  { %3905 = vmatprep.subr.bf16.mxu1 %v3722_v18  ;;  %4291 = vmatprep.subr.bf16.mxu0 %v3724_v8  ;;  %v3756_v18 = vld [vmem:[#allocation2 + $0x418] sm:$0xff]  ;;  %v3753_v8 = vld [vmem:[#allocation2 + $0x400] sm:$0xff] }
 0x62a   :  { %3906 = vmatpush1.bf16.msra.mxu1 %v3721_v57  ;;  %4292 = vmatpush1.bf16.msra.mxu0 %v3723_v45  ;;  %v3755_v57 = vld [vmem:[#allocation2 + $0x410] sm:$0xff]  ;;  %v17782_v45 = vld [vmem:[#allocation83_spill] sm:$0xff] }
 0x62b   :  { %3907 = vmatprep.subr.bf16.mxu1 %v3730_v50  ;;  %4293 = vmatprep.subr.bf16.mxu0 %v3732_v31  ;;  %v3762_v50 = vld [vmem:[#allocation2 + $0x448] sm:$0xff]  ;;  %v3764_v31 = vld [vmem:[#allocation2 + $0x458] sm:$0xff] }
 0x62e   :  { %3908 = vmatpush1.bf16.msra.mxu1 %v3729_v51  ;;  %4294 = vmatpush1.bf16.msra.mxu0 %v3731_v40  ;;  %v17783_v51 = vld [vmem:[#allocation86_spill] sm:$0xff]  ;;  %v3761_v40 = vld [vmem:[#allocation2 + $0x440] sm:$0xff] }
 0x62f   :  { %3909 = vmatprep.subr.bf16.mxu1 %v3738_v61  ;;  %4295 = vmatprep.subr.bf16.mxu0 %v3740_v63  ;;  %v3763_v61 = vld [vmem:[#allocation2 + $0x450] sm:$0xff]  ;;  %v3770_v63 = vld [vmem:[#allocation2 + $0x488] sm:$0xff] }
 0x632   :  { %3910 = vmatpush1.bf16.msra.mxu1 %v3737_v55  ;;  %4296 = vmatpush1.bf16.msra.mxu0 %v3739_v6  ;;  %v3772_v55 = vld [vmem:[#allocation2 + $0x498] sm:$0xff]  ;;  %v3769_v6 = vld [vmem:[#allocation2 + $0x480] sm:$0xff] }
 0x633   :  { %3911 = vmatprep.subr.bf16.mxu1 %v3746_v22  ;;  %4297 = vmatprep.subr.bf16.mxu0 %v3748_v52  ;;  %v3771_v22 = vld [vmem:[#allocation2 + $0x490] sm:$0xff] }
 0x634   :  { %v17784_v52 = vld [vmem:[#allocation90_spill] sm:$0xff] }
 0x636   :  { %3912 = vmatpush1.bf16.msra.mxu1 %v3745_v15  ;;  %4298 = vmatpush1.bf16.msra.mxu0 %v3747_v16  ;;  %v3778_v15 = vld [vmem:[#allocation2 + $0x4c8] sm:$0xff]  ;;  %v3780_v16 = vld [vmem:[#allocation2 + $0x4d8] sm:$0xff] }
 0x637   :  { %4074 = vmatprep.subr.bf16.mxu1 %v3754_v58  ;;  %4460 = vmatprep.subr.bf16.mxu0 %v3756_v18  ;;  %v17785_v58 = vld [vmem:[#allocation87_spill] sm:$0xff]  ;;  %v3777_v18 = vld [vmem:[#allocation2 + $0x4c0] sm:$0xff] }
 0x639   :  { %3914 = vmatmul.mubr.bf16.vlgmr.msra.gmra.mrb[112].mxu1 %v17782_v45  ;;  %4300 = vmatmul.mubr.bf16.vlgmr.msra.gmra.mrb[144].mxu0 %v17782_v45 }
 0x63a   :  { %4075 = vmatpush1.bf16.msra.mxu1 %v3753_v8  ;;  %4461 = vmatpush1.bf16.msra.mxu0 %v3755_v57  ;;  %v3779_v8 = vld [vmem:[#allocation2 + $0x4d0] sm:$0xff]  ;;  %v3786_v57 = vld [vmem:[#allocation2 + $0x508] sm:$0xff] }
 0x63b   :  { %3923 = vmatprep.mubr.bf16.mxu1 %v17783_v51  ;;  %4309 = vmatprep.mubr.bf16.mxu0 %v17783_v51 }
 0x63c   :  { %4076 = vmatprep.subr.bf16.mxu1 %v3762_v50  ;;  %4462 = vmatprep.subr.bf16.mxu0 %v3764_v31  ;;  %v3788_v50 = vld [vmem:[#allocation2 + $0x518] sm:$0xff]  ;;  %v3785_v31 = vld [vmem:[#allocation2 + $0x500] sm:$0xff] }
 0x63e   :  { %4077 = vmatpush1.bf16.msra.mxu1 %v3761_v40  ;;  %4463 = vmatpush1.bf16.msra.mxu0 %v3763_v61  ;;  %v3787_v40 = vld [vmem:[#allocation2 + $0x510] sm:$0xff]  ;;  %v17786_v61 = vld [vmem:[#allocation91_spill] sm:$0xff] }
 0x63f   :  { %4078 = vmatprep.subr.bf16.mxu1 %v3770_v63  ;;  %4464 = vmatprep.subr.bf16.mxu0 %v3772_v55  ;;  %v3794_v63 = vld [vmem:[#allocation2 + $0x548] sm:$0xff]  ;;  %v3796_v55 = vld [vmem:[#allocation2 + $0x558] sm:$0xff] }
 0x641   :  { %3924 = vmatmul.mubr.bf16.gmra.mrb[116].mxu1 %v17784_v52  ;;  %4310 = vmatmul.mubr.bf16.gmra.mrb[148].mxu0 %v17784_v52 }
 0x642   :  { %3933 = vmatprep.mubr.bf16.mxu1 %v17785_v58  ;;  %4319 = vmatprep.mubr.bf16.mxu0 %v17785_v58 }
 0x643   :  { %4079 = vmatpush1.bf16.msra.mxu1 %v3769_v6  ;;  %4465 = vmatpush1.bf16.msra.mxu0 %v3771_v22  ;;  %v17787_v6 = vld [vmem:[#allocation94_spill] sm:$0xff]  ;;  %v3793_v22 = vld [vmem:[#allocation2 + $0x540] sm:$0xff] }
 0x644   :  { %4080 = vmatprep.subr.bf16.mxu1 %v3778_v15  ;;  %4466 = vmatprep.subr.bf16.mxu0 %v3780_v16  ;;  %v3795_v15 = vld [vmem:[#allocation2 + $0x550] sm:$0xff]  ;;  %v3802_v16 = vld [vmem:[#allocation2 + $0x588] sm:$0xff] }
 0x647   :  { %4081 = vmatpush1.bf16.msra.mxu1 %v3777_v18  ;;  %4467 = vmatpush1.bf16.msra.mxu0 %v3779_v8  ;;  %v3804_v18 = vld [vmem:[#allocation2 + $0x598] sm:$0xff]  ;;  %v3801_v8 = vld [vmem:[#allocation2 + $0x580] sm:$0xff] }
 0x648   :  { %4082 = vmatprep.subr.bf16.mxu1 %v3786_v57  ;;  %4468 = vmatprep.subr.bf16.mxu0 %v3788_v50  ;;  %v3803_v57 = vld [vmem:[#allocation2 + $0x590] sm:$0xff] }
 0x649   :  { %3934 = vmatmul.mubr.bf16.gmra.mrb[120].mxu1 %v17786_v61  ;;  %4320 = vmatmul.mubr.bf16.gmra.mrb[152].mxu0 %v17786_v61  ;;  %v17788_v50 = vld [vmem:[#allocation98_spill] sm:$0xff]  ;;  %v3810_v61 = vld [vmem:[#allocation2 + $0x5c8] sm:$0xff] }
 0x64a   :  { %3943 = vmatprep.mubr.bf16.mxu1 %v17787_v6  ;;  %4329 = vmatprep.mubr.bf16.mxu0 %v17787_v6  ;;  %v3812_v6 = vld [vmem:[#allocation2 + $0x5d8] sm:$0xff] }
 0x64b   :  { %4083 = vmatpush1.bf16.msra.mxu1 %v3785_v31  ;;  %4469 = vmatpush1.bf16.msra.mxu0 %v3787_v40  ;;  %v17789_v31 = vld [vmem:[#allocation95_spill] sm:$0xff]  ;;  %v3809_v40 = vld [vmem:[#allocation2 + $0x5c0] sm:$0xff] }
 0x64c   :  { %4084 = vmatprep.subr.bf16.mxu1 %v3794_v63  ;;  %4470 = vmatprep.subr.bf16.mxu0 %v3796_v55  ;;  %v3811_v63 = vld [vmem:[#allocation2 + $0x5d0] sm:$0xff]  ;;  %v3818_v55 = vld [vmem:[#allocation2 + $0x608] sm:$0xff] }
 0x64f   :  { %4085 = vmatpush1.bf16.msra.mxu1 %v3793_v22  ;;  %4471 = vmatpush1.bf16.msra.mxu0 %v3795_v15  ;;  %v3820_v22 = vld [vmem:[#allocation2 + $0x618] sm:$0xff]  ;;  %v3817_v15 = vld [vmem:[#allocation2 + $0x600] sm:$0xff] }
 0x650   :  { %4086 = vmatprep.subr.bf16.mxu1 %v3802_v16  ;;  %4472 = vmatprep.subr.bf16.mxu0 %v3804_v18  ;;  %v3819_v16 = vld [vmem:[#allocation2 + $0x610] sm:$0xff]  ;;  %v17790_v18 = vld [vmem:[#allocation99_spill] sm:$0xff] }
 0x651   :  { %3944 = vmatmul.mubr.bf16.gmra.mrb[124].mxu1 %v17788_v50  ;;  %4330 = vmatmul.mubr.bf16.gmra.mrb[156].mxu0 %v17788_v50  ;;  %v3826_v50 = vld [vmem:[#allocation2 + $0x648] sm:$0xff] }
 0x652   :  { %3953 = vmatprep.mubr.bf16.mxu1 %v17789_v31  ;;  %4339 = vmatprep.mubr.bf16.mxu0 %v17789_v31  ;;  %v3828_v31 = vld [vmem:[#allocation2 + $0x658] sm:$0xff] }
 0x653   :  { %4087 = vmatpush1.bf16.msra.mxu1 %v3801_v8  ;;  %4473 = vmatpush1.bf16.msra.mxu0 %v3803_v57  ;;  %v3834_v8 = vld [vmem:[#allocation2 + $0x688] sm:$0xff]  ;;  %v3836_v57 = vld [vmem:[#allocation2 + $0x698] sm:$0xff] }
 0x654   :  { %4088 = vmatprep.subr.bf16.mxu1 %v3810_v61  ;;  %4474 = vmatprep.subr.bf16.mxu0 %v3812_v6  ;;  %v3825_v61 = vld [vmem:[#allocation2 + $0x640] sm:$0xff]  ;;  %v3827_v6 = vld [vmem:[#allocation2 + $0x650] sm:$0xff] }
 0x657   :  { %4089 = vmatpush1.bf16.msra.mxu1 %v3809_v40  ;;  %4475 = vmatpush1.bf16.msra.mxu0 %v3811_v63  ;;  %v3833_v40 = vld [vmem:[#allocation2 + $0x680] sm:$0xff]  ;;  %v3835_v63 = vld [vmem:[#allocation2 + $0x690] sm:$0xff] }
 0x658   :  { %4090 = vmatprep.subr.bf16.mxu1 %v3818_v55  ;;  %4476 = vmatprep.subr.bf16.mxu0 %v3820_v22  ;;  %v3842_v55 = vld [vmem:[#allocation2 + $0x6c8] sm:$0xff]  ;;  %v3844_v22 = vld [vmem:[#allocation2 + $0x6d8] sm:$0xff] }
 0x659   :  { %3954 = vmatmul.mubr.bf16.gmra.mrb[128].mxu1 %v17790_v18  ;;  %4340 = vmatmul.mubr.bf16.gmra.mrb[160].mxu0 %v17790_v18 }
 0x65a   :  { %3963 = vmatprep.mubr.bf16.mxu1 %v12288_v36  ;;  %4349 = vmatprep.mubr.bf16.mxu0 %v12288_v36 }
 0x65b   :  { %4091 = vmatpush1.bf16.msra.mxu1 %v3817_v15  ;;  %4477 = vmatpush1.bf16.msra.mxu0 %v3819_v16  ;;  %v3850_v15 = vld [vmem:[#allocation2 + $0x708] sm:$0xff]  ;;  %v3852_v16 = vld [vmem:[#allocation2 + $0x718] sm:$0xff] }
 0x65c   :  { %4092 = vmatprep.subr.bf16.mxu1 %v3826_v50  ;;  %4478 = vmatprep.subr.bf16.mxu0 %v3828_v31  ;;  %v3841_v50 = vld [vmem:[#allocation2 + $0x6c0] sm:$0xff]  ;;  %v3843_v31 = vld [vmem:[#allocation2 + $0x6d0] sm:$0xff] }
 0x65f   :  { %4093 = vmatpush1.bf16.msra.mxu1 %v3825_v61  ;;  %4479 = vmatpush1.bf16.msra.mxu0 %v3827_v6  ;;  %v3849_v61 = vld [vmem:[#allocation2 + $0x700] sm:$0xff]  ;;  %v3851_v6 = vld [vmem:[#allocation2 + $0x710] sm:$0xff] }
 0x660   :  { %4094 = vmatprep.subr.bf16.mxu1 %v3834_v8  ;;  %4480 = vmatprep.subr.bf16.mxu0 %v3836_v57  ;;  %v3858_v8 = vld [vmem:[#allocation2 + $0x748] sm:$0xff]  ;;  %v3860_v57 = vld [vmem:[#allocation2 + $0x758] sm:$0xff] }
 0x661   :  { %3964 = vmatmul.mubr.bf16.gmra.mrb[132].mxu1 %v12285_v27  ;;  %4350 = vmatmul.mubr.bf16.gmra.mrb[164].mxu0 %v12285_v27 }
 0x662   :  { %3973 = vmatprep.mubr.bf16.mxu1 %v12300_v39  ;;  %4359 = vmatprep.mubr.bf16.mxu0 %v12300_v39 }
 0x663   :  { %4095 = vmatpush1.bf16.msra.mxu1 %v3833_v40  ;;  %4481 = vmatpush1.bf16.msra.mxu0 %v3835_v63  ;;  %v3857_v40 = vld [vmem:[#allocation2 + $0x740] sm:$0xff]  ;;  %v3859_v63 = vld [vmem:[#allocation2 + $0x750] sm:$0xff] }
 0x664   :  { %4096 = vmatprep.subr.bf16.mxu1 %v3842_v55  ;;  %4482 = vmatprep.subr.bf16.mxu0 %v3844_v22  ;;  %v3866_v55 = vld [vmem:[#allocation2 + $0x788] sm:$0xff]  ;;  %v3868_v22 = vld [vmem:[#allocation2 + $0x798] sm:$0xff] }
 0x667   :  { %4097 = vmatpush1.bf16.msra.mxu1 %v3841_v50  ;;  %4483 = vmatpush1.bf16.msra.mxu0 %v3843_v31  ;;  %v3865_v50 = vld [vmem:[#allocation2 + $0x780] sm:$0xff]  ;;  %v3867_v31 = vld [vmem:[#allocation2 + $0x790] sm:$0xff] }
 0x668   :  { %4098 = vmatprep.subr.bf16.mxu1 %v3850_v15  ;;  %4484 = vmatprep.subr.bf16.mxu0 %v3852_v16  ;;  %v3874_v15 = vld [vmem:[#allocation2 + $0x7c8] sm:$0xff]  ;;  %v3876_v16 = vld [vmem:[#allocation2 + $0x7d8] sm:$0xff] }
 0x669   :  { %3974 = vmatmul.mubr.bf16.gmra.mrb[136].mxu1 %v12297_v10  ;;  %4360 = vmatmul.mubr.bf16.gmra.mrb[168].mxu0 %v12297_v10 }
 0x66a   :  { %3983 = vmatprep.mubr.bf16.mxu1 %v12312_v44  ;;  %4369 = vmatprep.mubr.bf16.mxu0 %v12312_v44 }
 0x66b   :  { %4099 = vmatpush1.bf16.msra.mxu1 %v3849_v61  ;;  %4485 = vmatpush1.bf16.msra.mxu0 %v3851_v6  ;;  %v3873_v61 = vld [vmem:[#allocation2 + $0x7c0] sm:$0xff]  ;;  %v3875_v6 = vld [vmem:[#allocation2 + $0x7d0] sm:$0xff] }
 0x66c   :  { %4100 = vmatprep.subr.bf16.mxu1 %v3858_v8  ;;  %4486 = vmatprep.subr.bf16.mxu0 %v3860_v57  ;;  %v3630_v8 = vld [vmem:[#allocation2 + $0x28] sm:$0xff]  ;;  %v3632_v57 = vld [vmem:[#allocation2 + $0x38] sm:$0xff] }
 0x66f   :  { %4101 = vmatpush1.bf16.msra.mxu1 %v3857_v40  ;;  %4487 = vmatpush1.bf16.msra.mxu0 %v3859_v63  ;;  %v17791_v40 = vld [vmem:[#allocation84_spill] sm:$0xff] }
 0x670   :  { %4102 = vmatprep.subr.bf16.mxu1 %v3866_v55  ;;  %4488 = vmatprep.subr.bf16.mxu0 %v3868_v22  ;;  %v3629_v63 = vld [vmem:[#allocation2 + $0x20] sm:$0xff]  ;;  %v3631_v55 = vld [vmem:[#allocation2 + $0x30] sm:$0xff] }
 0x671   :  { %3984 = vmatmul.mubr.bf16.gmra.mrb[140].mxu1 %v12309_v7  ;;  %4370 = vmatmul.mubr.bf16.gmra.mrb[172].mxu0 %v12309_v7  ;;  %v17792_v22 = vld [vmem:[#allocation88_spill] sm:$0xff] }
 0x672   :  { %3993 = vmatprep.mubr.bf16.mxu1 %v12324_v60  ;;  %4379 = vmatprep.mubr.bf16.mxu0 %v12324_v60 }
 0x673   :  { %4103 = vmatpush1.bf16.msra.mxu1 %v3865_v50  ;;  %4489 = vmatpush1.bf16.msra.mxu0 %v3867_v31  ;;  %v3638_v50 = vld [vmem:[#allocation2 + $0x68] sm:$0xff]  ;;  %v3640_v31 = vld [vmem:[#allocation2 + $0x78] sm:$0xff] }
 0x674   :  { %4104 = vmatprep.subr.bf16.mxu1 %v3874_v15  ;;  %4490 = vmatprep.subr.bf16.mxu0 %v3876_v16  ;;  %v17793_v15 = vld [vmem:[#allocation85_spill] sm:$0xff]  ;;  %v3637_v16 = vld [vmem:[#allocation2 + $0x60] sm:$0xff] }
 0x677   :  { %4105 = vmatpush1.bf16.msra.mxu1 %v3873_v61  ;;  %4491 = vmatpush1.bf16.msra.mxu0 %v3875_v6  ;;  %v3639_v61 = vld [vmem:[#allocation2 + $0x70] sm:$0xff]  ;;  %v3646_v6 = vld [vmem:[#allocation2 + $0xa8] sm:$0xff] }
 0x678   :  { %4653 = vmatprep.subr.bf16.mxu1 %v3630_v8  ;;  %5039 = vmatprep.subr.bf16.mxu0 %v3632_v57  ;;  %v3648_v8 = vld [vmem:[#allocation2 + $0xb8] sm:$0xff]  ;;  %v3645_v57 = vld [vmem:[#allocation2 + $0xa0] sm:$0xff] }
 0x679   :  { %3994 = vmatmul.mubr.bf16.gmra.mrb[144].mxu1 %v12321_v49  ;;  %4380 = vmatmul.mubr.bf16.gmra.mrb[176].mxu0 %v12321_v49 }
 0x67a   :  { %4003 = vmatprep.mubr.bf16.mxu1 %v12336_v48  ;;  %4389 = vmatprep.mubr.bf16.mxu0 %v12336_v48 }
 0x681   :  { %4004 = vmatmul.mubr.bf16.gmra.mrb[148].mxu1 %v12333_v23  ;;  %4390 = vmatmul.mubr.bf16.gmra.mrb[180].mxu0 %v12333_v23 }
 0x682   :  { %4013 = vmatprep.mubr.bf16.mxu1 %v12348_v11  ;;  %4399 = vmatprep.mubr.bf16.mxu0 %v12348_v11 }
 0x689   :  { %4014 = vmatmul.mubr.bf16.gmra.mrb[152].mxu1 %v12345_v30  ;;  %4400 = vmatmul.mubr.bf16.gmra.mrb[184].mxu0 %v12345_v30 }
 0x68a   :  { %4023 = vmatprep.mubr.bf16.mxu1 %v12360_v43  ;;  %4409 = vmatprep.mubr.bf16.mxu0 %v12360_v43 }
 0x691   :  { %4024 = vmatmul.mubr.bf16.gmra.mrb[156].mxu1 %v12357_v2  ;;  %4410 = vmatmul.mubr.bf16.gmra.mrb[188].mxu0 %v12357_v2 }
 0x692   :  { %4033 = vmatprep.mubr.bf16.mxu1 %v12372_v4  ;;  %4419 = vmatprep.mubr.bf16.mxu0 %v12372_v4 }
 0x699   :  { %4034 = vmatmul.mubr.bf16.gmra.mrb[160].mxu1 %v12369_v59  ;;  %4420 = vmatmul.mubr.bf16.gmra.mrb[192].mxu0 %v12369_v59 }
 0x69a   :  { %4043 = vmatprep.mubr.bf16.mxu1 %v12384_v1  ;;  %4429 = vmatprep.mubr.bf16.mxu0 %v12384_v1 }
 0x6a1   :  { %4044 = vmatmul.mubr.bf16.gmra.mrb[164].mxu1 %v12381_v21  ;;  %4430 = vmatmul.mubr.bf16.gmra.mrb[196].mxu0 %v12381_v21 }
 0x6a2   :  { %4053 = vmatprep.mubr.bf16.mxu1 %v12396_v20  ;;  %4439 = vmatprep.mubr.bf16.mxu0 %v12396_v20 }
 0x6a9   :  { %4054 = vmatmul.mubr.bf16.gmra.mrb[168].mxu1 %v12393_v35  ;;  %4440 = vmatmul.mubr.bf16.gmra.mrb[200].mxu0 %v12393_v35 }
 0x6aa   :  { %4063 = vmatprep.mubr.bf16.mxu1 %v12408_v12  ;;  %4449 = vmatprep.mubr.bf16.mxu0 %v12408_v12 }
 0x6b1   :  { %4064 = vmatmul.mubr.bf16.gmra.mrb[172].mxu1 %v12405_v47  ;;  %4450 = vmatmul.mubr.bf16.gmra.mrb[204].mxu0 %v12405_v47  ;;  %v17795_v47 = vld [vmem:[#allocation92_spill] sm:$0xff] }
 0x6b2   :  { %4106 = vmatprep.mubr.bf16.mxu1 %v17791_v40  ;;  %4492 = vmatprep.mubr.bf16.mxu0 %v17791_v40  ;;  %v17794_v40 = vld [vmem:[#allocation89_spill] sm:$0xff] }
 0x6b9   :  { %4107 = vmatmul.mubr.bf16.vlgmr.msra.gmra.mrb[112].mxu1 %v17792_v22  ;;  %4493 = vmatmul.mubr.bf16.vlgmr.msra.gmra.mrb[144].mxu0 %v17792_v22  ;;  %v3647_v22 = vld [vmem:[#allocation2 + $0xb0] sm:$0xff] }
 0x6ba   :  { %4654 = vmatpush1.bf16.msra.mxu1 %v3629_v63  ;;  %5040 = vmatpush1.bf16.msra.mxu0 %v3631_v55  ;;  %v3654_v63 = vld [vmem:[#allocation2 + $0xe8] sm:$0xff]  ;;  %v3656_v55 = vld [vmem:[#allocation2 + $0xf8] sm:$0xff] }
 0x6bb   :  { %4116 = vmatprep.mubr.bf16.mxu1 %v17793_v15  ;;  %4502 = vmatprep.mubr.bf16.mxu0 %v17793_v15  ;;  %v3670_v15 = vld [vmem:[#allocation2 + $0x168] sm:$0xff] }
 0x6bc   :  { %4655 = vmatprep.subr.bf16.mxu1 %v3638_v50  ;;  %5041 = vmatprep.subr.bf16.mxu0 %v3640_v31  ;;  %v3653_v50 = vld [vmem:[#allocation2 + $0xe0] sm:$0xff]  ;;  %v3655_v31 = vld [vmem:[#allocation2 + $0xf0] sm:$0xff] }
 0x6be   :  { %4656 = vmatpush1.bf16.msra.mxu1 %v3637_v16  ;;  %5042 = vmatpush1.bf16.msra.mxu0 %v3639_v61  ;;  %v3662_v16 = vld [vmem:[#allocation2 + $0x128] sm:$0xff]  ;;  %v3664_v61 = vld [vmem:[#allocation2 + $0x138] sm:$0xff] }
 0x6bf   :  { %4657 = vmatprep.subr.bf16.mxu1 %v3646_v6  ;;  %5043 = vmatprep.subr.bf16.mxu0 %v3648_v8  ;;  %v3661_v6 = vld [vmem:[#allocation2 + $0x120] sm:$0xff]  ;;  %v3663_v8 = vld [vmem:[#allocation2 + $0x130] sm:$0xff] }
 0x6c1   :  { %4117 = vmatmul.mubr.bf16.gmra.mrb[116].mxu1 %v17794_v40  ;;  %4503 = vmatmul.mubr.bf16.gmra.mrb[148].mxu0 %v17794_v40  ;;  %v17796_v40 = vld [vmem:[#allocation96_spill] sm:$0xff] }
 0x6c2   :  { %4126 = vmatprep.mubr.bf16.mxu1 %v17795_v47  ;;  %4512 = vmatprep.mubr.bf16.mxu0 %v17795_v47  ;;  %v3672_v47 = vld [vmem:[#allocation2 + $0x178] sm:$0xff] }
 0x6c3   :  { %4658 = vmatpush1.bf16.msra.mxu1 %v3645_v57  ;;  %5044 = vmatpush1.bf16.msra.mxu0 %v3647_v22  ;;  %v17797_v57 = vld [vmem:[#allocation93_spill] sm:$0xff]  ;;  %v3669_v22 = vld [vmem:[#allocation2 + $0x160] sm:$0xff] }
 0x6c4   :  { %4659 = vmatprep.subr.bf16.mxu1 %v3654_v63  ;;  %5045 = vmatprep.subr.bf16.mxu0 %v3656_v55  ;;  %v3671_v63 = vld [vmem:[#allocation2 + $0x170] sm:$0xff]  ;;  %v3678_v55 = vld [vmem:[#allocation2 + $0x1a8] sm:$0xff] }
 0x6c7   :  { %4660 = vmatpush1.bf16.msra.mxu1 %v3653_v50  ;;  %5046 = vmatpush1.bf16.msra.mxu0 %v3655_v31  ;;  %v3680_v50 = vld [vmem:[#allocation2 + $0x1b8] sm:$0xff]  ;;  %v3677_v31 = vld [vmem:[#allocation2 + $0x1a0] sm:$0xff] }
 0x6c8   :  { %4661 = vmatprep.subr.bf16.mxu1 %v3662_v16  ;;  %5047 = vmatprep.subr.bf16.mxu0 %v3664_v61  ;;  %v3679_v16 = vld [vmem:[#allocation2 + $0x1b0] sm:$0xff]  ;;  %v17798_v61 = vld [vmem:[#allocation97_spill] sm:$0xff] }
 0x6c9   :  { %4127 = vmatmul.mubr.bf16.gmra.mrb[120].mxu1 %v17796_v40  ;;  %4513 = vmatmul.mubr.bf16.gmra.mrb[152].mxu0 %v17796_v40  ;;  %v3686_v40 = vld [vmem:[#allocation2 + $0x1e8] sm:$0xff] }
 0x6ca   :  { %4136 = vmatprep.mubr.bf16.mxu1 %v17797_v57  ;;  %4522 = vmatprep.mubr.bf16.mxu0 %v17797_v57  ;;  %v3688_v57 = vld [vmem:[#allocation2 + $0x1f8] sm:$0xff] }
 0x6cb   :  { %4662 = vmatpush1.bf16.msra.mxu1 %v3661_v6  ;;  %5048 = vmatpush1.bf16.msra.mxu0 %v3663_v8  ;;  %v3694_v6 = vld [vmem:[#allocation2 + $0x228] sm:$0xff]  ;;  %v3696_v8 = vld [vmem:[#allocation2 + $0x238] sm:$0xff] }
 0x6cc   :  { %4663 = vmatprep.subr.bf16.mxu1 %v3670_v15  ;;  %5049 = vmatprep.subr.bf16.mxu0 %v3672_v47  ;;  %v3685_v47 = vld [vmem:[#allocation2 + $0x1e0] sm:$0xff]  ;;  %v3687_v15 = vld [vmem:[#allocation2 + $0x1f0] sm:$0xff] }
 0x6cf   :  { %4664 = vmatpush1.bf16.msra.mxu1 %v3669_v22  ;;  %5050 = vmatpush1.bf16.msra.mxu0 %v3671_v63  ;;  %v3693_v22 = vld [vmem:[#allocation2 + $0x220] sm:$0xff]  ;;  %v3695_v63 = vld [vmem:[#allocation2 + $0x230] sm:$0xff] }
 0x6d0   :  { %4665 = vmatprep.subr.bf16.mxu1 %v3678_v55  ;;  %5051 = vmatprep.subr.bf16.mxu0 %v3680_v50  ;;  %v3702_v55 = vld [vmem:[#allocation2 + $0x268] sm:$0xff]  ;;  %v3704_v50 = vld [vmem:[#allocation2 + $0x278] sm:$0xff] }
 0x6d1   :  { %4137 = vmatmul.mubr.bf16.gmra.mrb[124].mxu1 %v17798_v61  ;;  %4523 = vmatmul.mubr.bf16.gmra.mrb[156].mxu0 %v17798_v61 }
 0x6d2   :  { %4146 = vmatprep.mubr.bf16.mxu1 %v12282_v32  ;;  %4532 = vmatprep.mubr.bf16.mxu0 %v12282_v32 }
 0x6d3   :  { %4666 = vmatpush1.bf16.msra.mxu1 %v3677_v31  ;;  %5052 = vmatpush1.bf16.msra.mxu0 %v3679_v16  ;;  %v3710_v31 = vld [vmem:[#allocation2 + $0x2a8] sm:$0xff]  ;;  %v3712_v16 = vld [vmem:[#allocation2 + $0x2b8] sm:$0xff] }
 0x6d4   :  { %4667 = vmatprep.subr.bf16.mxu1 %v3686_v40  ;;  %5053 = vmatprep.subr.bf16.mxu0 %v3688_v57  ;;  %v3701_v40 = vld [vmem:[#allocation2 + $0x260] sm:$0xff]  ;;  %v3703_v57 = vld [vmem:[#allocation2 + $0x270] sm:$0xff] }
 0x6d7   :  { %4668 = vmatpush1.bf16.msra.mxu1 %v3685_v47  ;;  %5054 = vmatpush1.bf16.msra.mxu0 %v3687_v15  ;;  %v3709_v47 = vld [vmem:[#allocation2 + $0x2a0] sm:$0xff]  ;;  %v3711_v15 = vld [vmem:[#allocation2 + $0x2b0] sm:$0xff] }
 0x6d8   :  { %4669 = vmatprep.subr.bf16.mxu1 %v3694_v6  ;;  %5055 = vmatprep.subr.bf16.mxu0 %v3696_v8  ;;  %v3718_v6 = vld [vmem:[#allocation2 + $0x2e8] sm:$0xff]  ;;  %v3720_v8 = vld [vmem:[#allocation2 + $0x2f8] sm:$0xff] }
 0x6d9   :  { %4147 = vmatmul.mubr.bf16.gmra.mrb[128].mxu1 %v12278_v41  ;;  %4533 = vmatmul.mubr.bf16.gmra.mrb[160].mxu0 %v12278_v41 }
 0x6da   :  { %4156 = vmatprep.mubr.bf16.mxu1 %v12294_v42  ;;  %4542 = vmatprep.mubr.bf16.mxu0 %v12294_v42 }
 0x6db   :  { %4670 = vmatpush1.bf16.msra.mxu1 %v3693_v22  ;;  %5056 = vmatpush1.bf16.msra.mxu0 %v3695_v63  ;;  %v3717_v22 = vld [vmem:[#allocation2 + $0x2e0] sm:$0xff]  ;;  %v3719_v63 = vld [vmem:[#allocation2 + $0x2f0] sm:$0xff] }
 0x6dc   :  { %4671 = vmatprep.subr.bf16.mxu1 %v3702_v55  ;;  %5057 = vmatprep.subr.bf16.mxu0 %v3704_v50  ;;  %v3726_v55 = vld [vmem:[#allocation2 + $0x328] sm:$0xff]  ;;  %v3728_v50 = vld [vmem:[#allocation2 + $0x338] sm:$0xff] }
 0x6df   :  { %4672 = vmatpush1.bf16.msra.mxu1 %v3701_v40  ;;  %5058 = vmatpush1.bf16.msra.mxu0 %v3703_v57  ;;  %v3725_v40 = vld [vmem:[#allocation2 + $0x320] sm:$0xff]  ;;  %v3727_v57 = vld [vmem:[#allocation2 + $0x330] sm:$0xff] }
 0x6e0   :  { %4673 = vmatprep.subr.bf16.mxu1 %v3710_v31  ;;  %5059 = vmatprep.subr.bf16.mxu0 %v3712_v16  ;;  %v3734_v31 = vld [vmem:[#allocation2 + $0x368] sm:$0xff]  ;;  %v3736_v16 = vld [vmem:[#allocation2 + $0x378] sm:$0xff] }
 0x6e1   :  { %4157 = vmatmul.mubr.bf16.gmra.mrb[132].mxu1 %v12291_v34  ;;  %4543 = vmatmul.mubr.bf16.gmra.mrb[164].mxu0 %v12291_v34 }
 0x6e2   :  { %4166 = vmatprep.mubr.bf16.mxu1 %v12306_v33  ;;  %4552 = vmatprep.mubr.bf16.mxu0 %v12306_v33 }
 0x6e3   :  { %4674 = vmatpush1.bf16.msra.mxu1 %v3709_v47  ;;  %5060 = vmatpush1.bf16.msra.mxu0 %v3711_v15  ;;  %v3733_v47 = vld [vmem:[#allocation2 + $0x360] sm:$0xff]  ;;  %v3735_v15 = vld [vmem:[#allocation2 + $0x370] sm:$0xff] }
 0x6e4   :  { %4675 = vmatprep.subr.bf16.mxu1 %v3718_v6  ;;  %5061 = vmatprep.subr.bf16.mxu0 %v3720_v8  ;;  %v3742_v6 = vld [vmem:[#allocation2 + $0x3a8] sm:$0xff]  ;;  %v3744_v8 = vld [vmem:[#allocation2 + $0x3b8] sm:$0xff] }
 0x6e7   :  { %4676 = vmatpush1.bf16.msra.mxu1 %v3717_v22  ;;  %5062 = vmatpush1.bf16.msra.mxu0 %v3719_v63  ;;  %v3741_v22 = vld [vmem:[#allocation2 + $0x3a0] sm:$0xff]  ;;  %v3743_v63 = vld [vmem:[#allocation2 + $0x3b0] sm:$0xff] }
 0x6e8   :  { %4677 = vmatprep.subr.bf16.mxu1 %v3726_v55  ;;  %5063 = vmatprep.subr.bf16.mxu0 %v3728_v50  ;;  %v3750_v55 = vld [vmem:[#allocation2 + $0x3e8] sm:$0xff]  ;;  %v3752_v50 = vld [vmem:[#allocation2 + $0x3f8] sm:$0xff] }
 0x6e9   :  { %4167 = vmatmul.mubr.bf16.gmra.mrb[136].mxu1 %v12303_v53  ;;  %4553 = vmatmul.mubr.bf16.gmra.mrb[168].mxu0 %v12303_v53 }
 0x6ea   :  { %4176 = vmatprep.mubr.bf16.mxu1 %v12318_v54  ;;  %4562 = vmatprep.mubr.bf16.mxu0 %v12318_v54 }
 0x6eb   :  { %4678 = vmatpush1.bf16.msra.mxu1 %v3725_v40  ;;  %5064 = vmatpush1.bf16.msra.mxu0 %v3727_v57  ;;  %v3749_v40 = vld [vmem:[#allocation2 + $0x3e0] sm:$0xff]  ;;  %v3751_v57 = vld [vmem:[#allocation2 + $0x3f0] sm:$0xff] }
 0x6ec   :  { %4679 = vmatprep.subr.bf16.mxu1 %v3734_v31  ;;  %5065 = vmatprep.subr.bf16.mxu0 %v3736_v16  ;;  %v3758_v31 = vld [vmem:[#allocation2 + $0x428] sm:$0xff]  ;;  %v3760_v16 = vld [vmem:[#allocation2 + $0x438] sm:$0xff] }
 0x6ef   :  { %4680 = vmatpush1.bf16.msra.mxu1 %v3733_v47  ;;  %5066 = vmatpush1.bf16.msra.mxu0 %v3735_v15  ;;  %v3757_v47 = vld [vmem:[#allocation2 + $0x420] sm:$0xff]  ;;  %v3759_v15 = vld [vmem:[#allocation2 + $0x430] sm:$0xff] }
 0x6f0   :  { %4681 = vmatprep.subr.bf16.mxu1 %v3742_v6  ;;  %5067 = vmatprep.subr.bf16.mxu0 %v3744_v8  ;;  %v3766_v6 = vld [vmem:[#allocation2 + $0x468] sm:$0xff]  ;;  %v3768_v8 = vld [vmem:[#allocation2 + $0x478] sm:$0xff] }
 0x6f1   :  { %4177 = vmatmul.mubr.bf16.gmra.mrb[140].mxu1 %v12315_v19  ;;  %4563 = vmatmul.mubr.bf16.gmra.mrb[172].mxu0 %v12315_v19 }
 0x6f2   :  { %4186 = vmatprep.mubr.bf16.mxu1 %v12330_v29  ;;  %4572 = vmatprep.mubr.bf16.mxu0 %v12330_v29 }
 0x6f3   :  { %4682 = vmatpush1.bf16.msra.mxu1 %v3741_v22  ;;  %5068 = vmatpush1.bf16.msra.mxu0 %v3743_v63  ;;  %v3765_v22 = vld [vmem:[#allocation2 + $0x460] sm:$0xff]  ;;  %v3767_v63 = vld [vmem:[#allocation2 + $0x470] sm:$0xff] }
 0x6f4   :  { %4683 = vmatprep.subr.bf16.mxu1 %v3750_v55  ;;  %5069 = vmatprep.subr.bf16.mxu0 %v3752_v50  ;;  %v3774_v55 = vld [vmem:[#allocation2 + $0x4a8] sm:$0xff]  ;;  %v3773_v50 = vld [vmem:[#allocation2 + $0x4a0] sm:$0xff] }
 0x6f7   :  { %4684 = vmatpush1.bf16.msra.mxu1 %v3749_v40  ;;  %5070 = vmatpush1.bf16.msra.mxu0 %v3751_v57  ;;  %v3782_v40 = vld [vmem:[#allocation2 + $0x4e8] sm:$0xff]  ;;  %v3784_v57 = vld [vmem:[#allocation2 + $0x4f8] sm:$0xff] }
 0x6f8   :  { %4846 = vmatprep.subr.bf16.mxu1 %v3758_v31  ;;  %5232 = vmatprep.subr.bf16.mxu0 %v3760_v16  ;;  %v3783_v31 = vld [vmem:[#allocation2 + $0x4f0] sm:$0xff]  ;;  %v3790_v16 = vld [vmem:[#allocation2 + $0x528] sm:$0xff] }
 0x6f9   :  { %4187 = vmatmul.mubr.bf16.gmra.mrb[144].mxu1 %v12327_v56  ;;  %4573 = vmatmul.mubr.bf16.gmra.mrb[176].mxu0 %v12327_v56 }
 0x6fa   :  { %4196 = vmatprep.mubr.bf16.mxu1 %v12342_v38  ;;  %4582 = vmatprep.mubr.bf16.mxu0 %v12342_v38 }
 0x701   :  { %4197 = vmatmul.mubr.bf16.gmra.mrb[148].mxu1 %v12339_v5  ;;  %4583 = vmatmul.mubr.bf16.gmra.mrb[180].mxu0 %v12339_v5 }
 0x702   :  { %4206 = vmatprep.mubr.bf16.mxu1 %v12354_v25  ;;  %4592 = vmatprep.mubr.bf16.mxu0 %v12354_v25 }
 0x709   :  { %4207 = vmatmul.mubr.bf16.gmra.mrb[152].mxu1 %v12351_v13  ;;  %4593 = vmatmul.mubr.bf16.gmra.mrb[184].mxu0 %v12351_v13 }
 0x70a   :  { %4216 = vmatprep.mubr.bf16.mxu1 %v12366_v62  ;;  %4602 = vmatprep.mubr.bf16.mxu0 %v12366_v62 }
 0x711   :  { %4217 = vmatmul.mubr.bf16.gmra.mrb[156].mxu1 %v12363_v26  ;;  %4603 = vmatmul.mubr.bf16.gmra.mrb[188].mxu0 %v12363_v26 }
 0x712   :  { %4226 = vmatprep.mubr.bf16.mxu1 %v12378_v14  ;;  %4612 = vmatprep.mubr.bf16.mxu0 %v12378_v14 }
 0x719   :  { %4227 = vmatmul.mubr.bf16.gmra.mrb[160].mxu1 %v12375_v9  ;;  %4613 = vmatmul.mubr.bf16.gmra.mrb[192].mxu0 %v12375_v9 }
 0x71a   :  { %4236 = vmatprep.mubr.bf16.mxu1 %v12390_v37  ;;  %4622 = vmatprep.mubr.bf16.mxu0 %v12390_v37 }
 0x721   :  { %4237 = vmatmul.mubr.bf16.gmra.mrb[164].mxu1 %v12387_v3  ;;  %4623 = vmatmul.mubr.bf16.gmra.mrb[196].mxu0 %v12387_v3 }
 0x722   :  { %4246 = vmatprep.mubr.bf16.mxu1 %v12402_v28  ;;  %4632 = vmatprep.mubr.bf16.mxu0 %v12402_v28 }
 0x729   :  { %4247 = vmatmul.mubr.bf16.gmra.mrb[168].mxu1 %v12399_v0  ;;  %4633 = vmatmul.mubr.bf16.gmra.mrb[200].mxu0 %v12399_v0 }
 0x72a   :  { %4256 = vmatprep.mubr.bf16.mxu1 %v12414_v24  ;;  %4642 = vmatprep.mubr.bf16.mxu0 %v12414_v24 }
 0x731   :  { %4257 = vmatmul.mubr.bf16.gmra.mrb[172].mxu1 %v12411_v46  ;;  %4643 = vmatmul.mubr.bf16.gmra.mrb[204].mxu0 %v12411_v46 }
 0x732   :  { %4685 = vmatprep.mubr.bf16.mxu1 %v17781_v17  ;;  %5071 = vmatprep.mubr.bf16.mxu0 %v17781_v17  ;;  %v3776_v17 = vld [vmem:[#allocation2 + $0x4b8] sm:$0xff] }
 0x739   :  { %4686 = vmatmul.mubr.bf16.vlgmr.msra.gmra.mrb[176].mxu1 %v17782_v45  ;;  %5072 = vmatmul.mubr.bf16.vlgmr.msra.gmra.mrb[208].mxu0 %v17782_v45  ;;  %v3775_v45 = vld [vmem:[#allocation2 + $0x4b0] sm:$0xff] }
 0x73a   :  { %4847 = vmatpush1.bf16.msra.mxu1 %v3757_v47  ;;  %5233 = vmatpush1.bf16.msra.mxu0 %v3759_v15  ;;  %v3792_v47 = vld [vmem:[#allocation2 + $0x538] sm:$0xff]  ;;  %v3789_v15 = vld [vmem:[#allocation2 + $0x520] sm:$0xff] }
 0x73b   :  { %4695 = vmatprep.mubr.bf16.mxu1 %v17783_v51  ;;  %5081 = vmatprep.mubr.bf16.mxu0 %v17783_v51  ;;  %v3781_v51 = vld [vmem:[#allocation2 + $0x4e0] sm:$0xff] }
 0x73c   :  { %4848 = vmatprep.subr.bf16.mxu1 %v3766_v6  ;;  %5234 = vmatprep.subr.bf16.mxu0 %v3768_v8  ;;  %v17799_v6 = vld [vmem:[#allocation91_spill] sm:$0xff]  ;;  %v3798_v8 = vld [vmem:[#allocation2 + $0x568] sm:$0xff] }
 0x73e   :  { %4849 = vmatpush1.bf16.msra.mxu1 %v3765_v22  ;;  %5235 = vmatpush1.bf16.msra.mxu0 %v3767_v63  ;;  %v17800_v22 = vld [vmem:[#allocation94_spill] sm:$0xff]  ;;  %v3797_v63 = vld [vmem:[#allocation2 + $0x560] sm:$0xff] }
 0x73f   :  { %4850 = vmatprep.subr.bf16.mxu1 %v3774_v55  ;;  %5236 = vmatprep.subr.bf16.mxu0 %v3776_v17  ;;  %v3799_v55 = vld [vmem:[#allocation2 + $0x570] sm:$0xff]  ;;  %v3806_v17 = vld [vmem:[#allocation2 + $0x5a8] sm:$0xff] }
 0x741   :  { %4696 = vmatmul.mubr.bf16.gmra.mrb[180].mxu1 %v17784_v52  ;;  %5082 = vmatmul.mubr.bf16.gmra.mrb[212].mxu0 %v17784_v52  ;;  %v3791_v52 = vld [vmem:[#allocation2 + $0x530] sm:$0xff] }
 0x742   :  { %4705 = vmatprep.mubr.bf16.mxu1 %v17785_v58  ;;  %5091 = vmatprep.mubr.bf16.mxu0 %v17785_v58  ;;  %v3800_v58 = vld [vmem:[#allocation2 + $0x578] sm:$0xff] }
 0x743   :  { %4851 = vmatpush1.bf16.msra.mxu1 %v3773_v50  ;;  %5237 = vmatpush1.bf16.msra.mxu0 %v3775_v45  ;;  %v3808_v50 = vld [vmem:[#allocation2 + $0x5b8] sm:$0xff]  ;;  %v3805_v45 = vld [vmem:[#allocation2 + $0x5a0] sm:$0xff] }
 0x744   :  { %4852 = vmatprep.subr.bf16.mxu1 %v3782_v40  ;;  %5238 = vmatprep.subr.bf16.mxu0 %v3784_v57  ;;  %v3807_v40 = vld [vmem:[#allocation2 + $0x5b0] sm:$0xff] }
 0x745   :  { %v17801_v57 = vld [vmem:[#allocation98_spill] sm:$0xff] }
 0x747   :  { %4853 = vmatpush1.bf16.msra.mxu1 %v3781_v51  ;;  %5239 = vmatpush1.bf16.msra.mxu0 %v3783_v31  ;;  %v3814_v51 = vld [vmem:[#allocation2 + $0x5e8] sm:$0xff]  ;;  %v3816_v31 = vld [vmem:[#allocation2 + $0x5f8] sm:$0xff] }
 0x748   :  { %4854 = vmatprep.subr.bf16.mxu1 %v3790_v16  ;;  %5240 = vmatprep.subr.bf16.mxu0 %v3792_v47  ;;  %v17802_v16 = vld [vmem:[#allocation95_spill] sm:$0xff]  ;;  %v3813_v47 = vld [vmem:[#allocation2 + $0x5e0] sm:$0xff] }
 0x749   :  { %4706 = vmatmul.mubr.bf16.gmra.mrb[184].mxu1 %v17799_v6  ;;  %5092 = vmatmul.mubr.bf16.gmra.mrb[216].mxu0 %v17799_v6  ;;  %v3824_v6 = vld [vmem:[#allocation2 + $0x638] sm:$0xff] }
 0x74a   :  { %4715 = vmatprep.mubr.bf16.mxu1 %v17800_v22  ;;  %5101 = vmatprep.mubr.bf16.mxu0 %v17800_v22  ;;  %v3830_v22 = vld [vmem:[#allocation2 + $0x668] sm:$0xff] }
 0x74b   :  { %4855 = vmatpush1.bf16.msra.mxu1 %v3789_v15  ;;  %5241 = vmatpush1.bf16.msra.mxu0 %v3791_v52  ;;  %v3815_v15 = vld [vmem:[#allocation2 + $0x5f0] sm:$0xff]  ;;  %v3822_v52 = vld [vmem:[#allocation2 + $0x628] sm:$0xff] }
 0x74c   :  { %4856 = vmatprep.subr.bf16.mxu1 %v3798_v8  ;;  %5242 = vmatprep.subr.bf16.mxu0 %v3800_v58  ;;  %v3821_v8 = vld [vmem:[#allocation2 + $0x620] sm:$0xff]  ;;  %v3823_v58 = vld [vmem:[#allocation2 + $0x630] sm:$0xff] }
 0x74f   :  { %4857 = vmatpush1.bf16.msra.mxu1 %v3797_v63  ;;  %5243 = vmatpush1.bf16.msra.mxu0 %v3799_v55  ;;  %v3832_v63 = vld [vmem:[#allocation2 + $0x678] sm:$0xff]  ;;  %v3829_v55 = vld [vmem:[#allocation2 + $0x660] sm:$0xff] }
 0x750   :  { %4858 = vmatprep.subr.bf16.mxu1 %v3806_v17  ;;  %5244 = vmatprep.subr.bf16.mxu0 %v3808_v50  ;;  %v3831_v17 = vld [vmem:[#allocation2 + $0x670] sm:$0xff]  ;;  %v3838_v50 = vld [vmem:[#allocation2 + $0x6a8] sm:$0xff] }
 0x751   :  { %4716 = vmatmul.mubr.bf16.gmra.mrb[188].mxu1 %v17801_v57  ;;  %5102 = vmatmul.mubr.bf16.gmra.mrb[220].mxu0 %v17801_v57  ;;  %v3846_v57 = vld [vmem:[#allocation2 + $0x6e8] sm:$0xff] }
 0x752   :  { %4725 = vmatprep.mubr.bf16.mxu1 %v17802_v16  ;;  %5111 = vmatprep.mubr.bf16.mxu0 %v17802_v16  ;;  %v3854_v16 = vld [vmem:[#allocation2 + $0x728] sm:$0xff] }
 0x753   :  { %4859 = vmatpush1.bf16.msra.mxu1 %v3805_v45  ;;  %5245 = vmatpush1.bf16.msra.mxu0 %v3807_v40  ;;  %v3840_v45 = vld [vmem:[#allocation2 + $0x6b8] sm:$0xff]  ;;  %v3837_v40 = vld [vmem:[#allocation2 + $0x6a0] sm:$0xff] }
 0x754   :  { %4860 = vmatprep.subr.bf16.mxu1 %v3814_v51  ;;  %5246 = vmatprep.subr.bf16.mxu0 %v3816_v31  ;;  %v3845_v51 = vld [vmem:[#allocation2 + $0x6e0] sm:$0xff]  ;;  %v3847_v31 = vld [vmem:[#allocation2 + $0x6f0] sm:$0xff] }
 0x757   :  { %4861 = vmatpush1.bf16.msra.mxu1 %v3813_v47  ;;  %5247 = vmatpush1.bf16.msra.mxu0 %v3815_v15  ;;  %v3856_v47 = vld [vmem:[#allocation2 + $0x738] sm:$0xff]  ;;  %v3853_v15 = vld [vmem:[#allocation2 + $0x720] sm:$0xff] }
 0x758   :  { %4862 = vmatprep.subr.bf16.mxu1 %v3822_v52  ;;  %5248 = vmatprep.subr.bf16.mxu0 %v3824_v6  ;;  %v3862_v52 = vld [vmem:[#allocation2 + $0x768] sm:$0xff]  ;;  %v3861_v6 = vld [vmem:[#allocation2 + $0x760] sm:$0xff] }
 0x759   :  { %4726 = vmatmul.mubr.bf16.gmra.mrb[192].mxu1 %v17790_v18  ;;  %5112 = vmatmul.mubr.bf16.gmra.mrb[224].mxu0 %v17790_v18  ;;  %v3839_v18 = vld [vmem:[#allocation2 + $0x6b0] sm:$0xff] }
 0x75a   :  { %4735 = vmatprep.mubr.bf16.mxu1 %v12288_v36  ;;  %5121 = vmatprep.mubr.bf16.mxu0 %v12288_v36  ;;  %v3848_v36 = vld [vmem:[#allocation2 + $0x6f8] sm:$0xff] }
 0x75b   :  { %4863 = vmatpush1.bf16.msra.mxu1 %v3821_v8  ;;  %5249 = vmatpush1.bf16.msra.mxu0 %v3823_v58  ;;  %v3863_v8 = vld [vmem:[#allocation2 + $0x770] sm:$0xff]  ;;  %v3870_v58 = vld [vmem:[#allocation2 + $0x7a8] sm:$0xff] }
 0x75c   :  { %4864 = vmatprep.subr.bf16.mxu1 %v3830_v22  ;;  %5250 = vmatprep.subr.bf16.mxu0 %v3832_v63  ;;  %v3872_v22 = vld [vmem:[#allocation2 + $0x7b8] sm:$0xff]  ;;  %v3869_v63 = vld [vmem:[#allocation2 + $0x7a0] sm:$0xff] }
 0x75f   :  { %4865 = vmatpush1.bf16.msra.mxu1 %v3829_v55  ;;  %5251 = vmatpush1.bf16.msra.mxu0 %v3831_v17  ;;  %v3878_v55 = vld [vmem:[#allocation2 + $0x7e8] sm:$0xff]  ;;  %v3877_v17 = vld [vmem:[#allocation2 + $0x7e0] sm:$0xff] }
 0x760   :  { %4866 = vmatprep.subr.bf16.mxu1 %v3838_v50  ;;  %5252 = vmatprep.subr.bf16.mxu0 %v3840_v45  ;;  %v3879_v50 = vld [vmem:[#allocation2 + $0x7f0] sm:$0xff] }
 0x761   :  { %4736 = vmatmul.mubr.bf16.gmra.mrb[196].mxu1 %v12285_v27  ;;  %5122 = vmatmul.mubr.bf16.gmra.mrb[228].mxu0 %v12285_v27  ;;  %v3855_v27 = vld [vmem:[#allocation2 + $0x730] sm:$0xff] }
 0x762   :  { %4745 = vmatprep.mubr.bf16.mxu1 %v12300_v39  ;;  %5131 = vmatprep.mubr.bf16.mxu0 %v12300_v39  ;;  %v3864_v39 = vld [vmem:[#allocation2 + $0x778] sm:$0xff] }
 0x763   :  { %4867 = vmatpush1.bf16.msra.mxu1 %v3837_v40  ;;  %5253 = vmatpush1.bf16.msra.mxu0 %v3839_v18 }
 0x764   :  { %4868 = vmatprep.subr.bf16.mxu1 %v3846_v57  ;;  %5254 = vmatprep.subr.bf16.mxu0 %v3848_v36 }
 0x767   :  { %4869 = vmatpush1.bf16.msra.mxu1 %v3845_v51  ;;  %5255 = vmatpush1.bf16.msra.mxu0 %v3847_v31 }
 0x768   :  { %4870 = vmatprep.subr.bf16.mxu1 %v3854_v16  ;;  %5256 = vmatprep.subr.bf16.mxu0 %v3856_v47 }
 0x769   :  { %4746 = vmatmul.mubr.bf16.gmra.mrb[200].mxu1 %v12297_v10  ;;  %5132 = vmatmul.mubr.bf16.gmra.mrb[232].mxu0 %v12297_v10  ;;  %v3871_v10 = vld [vmem:[#allocation2 + $0x7b0] sm:$0xff] }
 0x76a   :  { %4755 = vmatprep.mubr.bf16.mxu1 %v12312_v44  ;;  %5141 = vmatprep.mubr.bf16.mxu0 %v12312_v44  ;;  %v3880_v44 = vld [vmem:[#allocation2 + $0x7f8] sm:$0xff] }
 0x76b   :  { %4871 = vmatpush1.bf16.msra.mxu1 %v3853_v15  ;;  %5257 = vmatpush1.bf16.msra.mxu0 %v3855_v27 }
 0x76c   :  { %4872 = vmatprep.subr.bf16.mxu1 %v3862_v52  ;;  %5258 = vmatprep.subr.bf16.mxu0 %v3864_v39 }
 0x76f   :  { %4873 = vmatpush1.bf16.msra.mxu1 %v3861_v6  ;;  %5259 = vmatpush1.bf16.msra.mxu0 %v3863_v8 }
 0x770   :  { %4874 = vmatprep.subr.bf16.mxu1 %v3870_v58  ;;  %5260 = vmatprep.subr.bf16.mxu0 %v3872_v22 }
 0x771   :  { %4756 = vmatmul.mubr.bf16.gmra.mrb[204].mxu1 %v12309_v7  ;;  %5142 = vmatmul.mubr.bf16.gmra.mrb[236].mxu0 %v12309_v7 }
 0x772   :  { %4765 = vmatprep.mubr.bf16.mxu1 %v12324_v60  ;;  %5151 = vmatprep.mubr.bf16.mxu0 %v12324_v60 }
 0x773   :  { %4875 = vmatpush1.bf16.msra.mxu1 %v3869_v63  ;;  %5261 = vmatpush1.bf16.msra.mxu0 %v3871_v10 }
 0x774   :  { %4876 = vmatprep.subr.bf16.mxu1 %v3878_v55  ;;  %5262 = vmatprep.subr.bf16.mxu0 %v3880_v44 }
 0x777   :  { %4877 = vmatpush1.bf16.msra.mxu1 %v3877_v17  ;;  %5263 = vmatpush1.bf16.msra.mxu0 %v3879_v50 }
 0x779   :  { %4766 = vmatmul.mubr.bf16.gmra.mrb[208].mxu1 %v12321_v49  ;;  %5152 = vmatmul.mubr.bf16.gmra.mrb[240].mxu0 %v12321_v49 }
 0x77a   :  { %4775 = vmatprep.mubr.bf16.mxu1 %v12336_v48  ;;  %5161 = vmatprep.mubr.bf16.mxu0 %v12336_v48 }
 0x781   :  { %4776 = vmatmul.mubr.bf16.gmra.mrb[212].mxu1 %v12333_v23  ;;  %5162 = vmatmul.mubr.bf16.gmra.mrb[244].mxu0 %v12333_v23 }
 0x782   :  { %4785 = vmatprep.mubr.bf16.mxu1 %v12348_v11  ;;  %5171 = vmatprep.mubr.bf16.mxu0 %v12348_v11 }
 0x789   :  { %4786 = vmatmul.mubr.bf16.gmra.mrb[216].mxu1 %v12345_v30  ;;  %5172 = vmatmul.mubr.bf16.gmra.mrb[248].mxu0 %v12345_v30 }
 0x78a   :  { %4795 = vmatprep.mubr.bf16.mxu1 %v12360_v43  ;;  %5181 = vmatprep.mubr.bf16.mxu0 %v12360_v43 }
 0x78c   :  { %v12590_v7 = vpop.f32.mrb[112].mxu1  ;;  %v12592_v49 = vpop.f32.mrb[144].mxu0 }
 0x78d   :  { %17803 = vst [vmem:[#allocation100_spill] sm:$0xff] %v12592_v49  ;;  %v12594_v60 = vpop.f32.mrb[113].mxu1  ;;  %v12596_v48 = vpop.f32.mrb[145].mxu0  ;;  %v5731_v23 = vmul.f32 %v12590_v7, %v12590_v7  ;;  %v5733_v11 = vmul.f32 %v12592_v49, %v12592_v49 }
 0x78e   :  { %17804 = vst [vmem:[#allocation106_spill] sm:$0xff] %v12596_v48  ;;  %v5732_v30 = vmul.f32 %v12594_v60, %v12594_v60  ;;  %v5734_v43 = vmul.f32 %v12596_v48, %v12596_v48  ;;  %v12606_v45 = vpop.f32.mrb[114].mxu1  ;;  %v12608_v40 = vpop.f32.mrb[146].mxu0 }
 0x78f   :  { %17805 = vst [vmem:[#allocation102_spill] sm:$0xff] %v12608_v40  ;;  %v5427_v18 = vadd.f32 %v12606_v45, %v12590_v7  ;;  %v5739_v57 = vmul.f32 %v12606_v45, %v12606_v45  ;;  %v5501_v51 = vadd.f32 %v12608_v40, %v12592_v49  ;;  %v12618_v31 = vpop.f32.mrb[115].mxu1  ;;  %v12620_v16 = vpop.f32.mrb[147].mxu0  ;;  %v5741_v47 = vmul.f32 %v12608_v40, %v12608_v40 }
 0x790   :  { %17806 = vst [vmem:[#allocation105_spill] sm:$0xff] %v12620_v16  ;;  %v5464_v27 = vadd.f32 %v12618_v31, %v12594_v60  ;;  %v5740_v52 = vmul.f32 %v12618_v31, %v12618_v31  ;;  %v5538_v8 = vadd.f32 %v12620_v16, %v12596_v48  ;;  %v5742_v58 = vmul.f32 %v12620_v16, %v12620_v16 }
 0x791   :  { %v5987_v39 = vadd.f32 %v5739_v57, %v5731_v23  ;;  %4796 = vmatmul.mubr.bf16.gmra.mrb[220].mxu1 %v12357_v2  ;;  %v6061_v22 = vadd.f32 %v5741_v47, %v5733_v11  ;;  %5182 = vmatmul.mubr.bf16.gmra.mrb[252].mxu0 %v12357_v2 }
 0x792   :  { %v6024_v63 = vadd.f32 %v5740_v52, %v5732_v30  ;;  %4805 = vmatprep.mubr.bf16.mxu1 %v12372_v4  ;;  %v6098_v55 = vadd.f32 %v5742_v58, %v5734_v43  ;;  %5191 = vmatprep.mubr.bf16.mxu0 %v12372_v4 }
 0x794   :  { %v12642_v44 = vpop.f32.mrb[116].mxu1  ;;  %v12644_v17 = vpop.f32.mrb[148].mxu0 }
 0x795   :  { %17807 = vst [vmem:[#allocation101_spill] sm:$0xff] %v12644_v17  ;;  %v5428_v50 = vadd.f32 %v5427_v18, %v12642_v44  ;;  %v5747_v23 = vmul.f32 %v12642_v44, %v12642_v44  ;;  %v5502_v11 = vadd.f32 %v5501_v51, %v12644_v17  ;;  %v5749_v30 = vmul.f32 %v12644_v17, %v12644_v17  ;;  %v12652_v2 = vpop.f32.mrb[117].mxu1  ;;  %v12654_v57 = vpop.f32.mrb[149].mxu0 }
 0x796   :  { %17808 = vst [vmem:[#allocation107_spill] sm:$0xff] %v12652_v2  ;;  %17809 = vst [vmem:[#allocation103_spill] sm:$0xff] %v12654_v57  ;;  %v5465_v4 = vadd.f32 %v5464_v27, %v12652_v2  ;;  %v5748_v43 = vmul.f32 %v12652_v2, %v12652_v2  ;;  %v5539_v47 = vadd.f32 %v5538_v8, %v12654_v57  ;;  %v12662_v52 = vpop.f32.mrb[118].mxu1  ;;  %v12664_v51 = vpop.f32.mrb[150].mxu0 }
 0x797   :  { %v5750_v18 = vmul.f32 %v12654_v57, %v12654_v57  ;;  %17810 = vst [vmem:[#allocation112_spill] sm:$0xff] %v12664_v51  ;;  %v5988_v58 = vadd.f32 %v5987_v39, %v5747_v23  ;;  %v6062_v10 = vadd.f32 %v6061_v22, %v5749_v30  ;;  %v5429_v15 = vadd.f32 %v5428_v50, %v12662_v52  ;;  %v12669_v27 = vpop.f32.mrb[119].mxu1  ;;  %v12671_v36 = vpop.f32.mrb[151].mxu0 }
 0x798   :  { %v5755_v6 = vmul.f32 %v12662_v52, %v12662_v52  ;;  %17811 = vst [vmem:[#allocation108_spill] sm:$0xff] %v12669_v27  ;;  %17812 = vst [vmem:[#allocation114_spill] sm:$0xff] %v12671_v36  ;;  %v6025_v48 = vadd.f32 %v6024_v63, %v5748_v43  ;;  %v5503_v49 = vadd.f32 %v5502_v11, %v12664_v51 }
 0x799   :  { %v6099_v8 = vadd.f32 %v6098_v55, %v5750_v18  ;;  %v5757_v39 = vmul.f32 %v12664_v51, %v12664_v51  ;;  %v5466_v50 = vadd.f32 %v5465_v4, %v12669_v27  ;;  %4806 = vmatmul.mubr.bf16.gmra.mrb[224].mxu1 %v12369_v59  ;;  %v5756_v63 = vmul.f32 %v12669_v27, %v12669_v27 }
 0x79a   :  { %v5989_v40 = vadd.f32 %v5988_v58, %v5755_v6  ;;  %v5540_v23 = vadd.f32 %v5539_v47, %v12671_v36  ;;  %v5758_v6 = vmul.f32 %v12671_v36, %v12671_v36  ;;  %5192 = vmatmul.mubr.bf16.gmra.mrb[0].mxu0 %v12369_v59  ;;  %4815 = vmatprep.mubr.bf16.mxu1 %v12384_v1 }
 0x79b   :  { %v6063_v11 = vadd.f32 %v6062_v10, %v5757_v39  ;;  %5201 = vmatprep.mubr.bf16.mxu0 %v12384_v1  ;;  %v6026_v4 = vadd.f32 %v6025_v48, %v5756_v63 }
 0x79c   :  { %v6100_v43 = vadd.f32 %v6099_v8, %v5758_v6  ;;  %v12694_v18 = vpop.f32.mrb[120].mxu1  ;;  %v12696_v58 = vpop.f32.mrb[152].mxu0 }
 0x79d   :  { %17813 = vst [vmem:[#allocation110_spill] sm:$0xff] %v12694_v18  ;;  %17814 = vst [vmem:[#allocation113_spill] sm:$0xff] %v12696_v58  ;;  %v5430_v47 = vadd.f32 %v5429_v15, %v12694_v18  ;;  %v5763_v22 = vmul.f32 %v12694_v18, %v12694_v18  ;;  %v5504_v59 = vadd.f32 %v5503_v49, %v12696_v58  ;;  %v12704_v39 = vpop.f32.mrb[121].mxu1  ;;  %v12706_v30 = vpop.f32.mrb[153].mxu0 }
 0x79e   :  { %v5765_v10 = vmul.f32 %v12696_v58, %v12696_v58  ;;  %17815 = vst [vmem:[#allocation109_spill] sm:$0xff] %v12704_v39  ;;  %17816 = vst [vmem:[#allocation115_spill] sm:$0xff] %v12706_v30  ;;  %v5467_v1 = vadd.f32 %v5466_v50, %v12704_v39  ;;  %v5764_v48 = vmul.f32 %v12704_v39, %v12704_v39  ;;  %v12714_v63 = vpop.f32.mrb[122].mxu1  ;;  %v12716_v49 = vpop.f32.mrb[154].mxu0 }
 0x79f   :  { %v5541_v8 = vadd.f32 %v5540_v23, %v12706_v30  ;;  %v5766_v15 = vmul.f32 %v12706_v30, %v12706_v30  ;;  %17817 = vst [vmem:[#allocation111_spill] sm:$0xff] %v12714_v63  ;;  %17818 = vst [vmem:[#allocation119_spill] sm:$0xff] %v12716_v49  ;;  %v5990_v6 = vadd.f32 %v5989_v40, %v5763_v22  ;;  %v12721_v50 = vpop.f32.mrb[123].mxu1  ;;  %v12723_v36 = vpop.f32.mrb[155].mxu0 }
 0x7a0   :  { %v6064_v55 = vadd.f32 %v6063_v11, %v5765_v10  ;;  %v5431_v16 = vadd.f32 %v5430_v47, %v12714_v63  ;;  %v5771_v57 = vmul.f32 %v12714_v63, %v12714_v63  ;;  %17819 = vst [vmem:[#allocation116_spill] sm:$0xff] %v12721_v50  ;;  %17820 = vst [vmem:[#allocation121_spill] sm:$0xff] %v12723_v36 }
 0x7a1   :  { %v6027_v17 = vadd.f32 %v6026_v4, %v5764_v48  ;;  %v6101_v23 = vadd.f32 %v6100_v43, %v5766_v15  ;;  %v5505_v2 = vadd.f32 %v5504_v59, %v12716_v49  ;;  %v5773_v40 = vmul.f32 %v12716_v49, %v12716_v49  ;;  %4816 = vmatmul.mubr.bf16.gmra.mrb[228].mxu1 %v12381_v21 }
 0x7a2   :  { %v5991_v27 = vadd.f32 %v5990_v6, %v5771_v57  ;;  %v5468_v11 = vadd.f32 %v5467_v1, %v12721_v50  ;;  %v5772_v4 = vmul.f32 %v12721_v50, %v12721_v50  ;;  %v5542_v47 = vadd.f32 %v5541_v8, %v12723_v36  ;;  %5202 = vmatmul.mubr.bf16.gmra.mrb[4].mxu0 %v12381_v21 }
 0x7a3   :  { %v5774_v57 = vmul.f32 %v12723_v36, %v12723_v36  ;;  %v6065_v59 = vadd.f32 %v6064_v55, %v5773_v40  ;;  %4825 = vmatprep.mubr.bf16.mxu1 %v12396_v20  ;;  %5211 = vmatprep.mubr.bf16.mxu0 %v12396_v20 }
 0x7a4   :  { %v6028_v1 = vadd.f32 %v6027_v17, %v5772_v4  ;;  %v12746_v15 = vpop.f32.mrb[124].mxu1  ;;  %v12748_v6 = vpop.f32.mrb[156].mxu0 }
 0x7a5   :  { %v6102_v48 = vadd.f32 %v6101_v23, %v5774_v57  ;;  %17821 = vst [vmem:[#allocation118_spill] sm:$0xff] %v12746_v15  ;;  %17822 = vst [vmem:[#allocation120_spill] sm:$0xff] %v12748_v6  ;;  %v5432_v8 = vadd.f32 %v5431_v16, %v12746_v15  ;;  %v5779_v22 = vmul.f32 %v12746_v15, %v12746_v15  ;;  %v12756_v40 = vpop.f32.mrb[125].mxu1  ;;  %v12758_v10 = vpop.f32.mrb[157].mxu0 }
 0x7a6   :  { %v5506_v21 = vadd.f32 %v5505_v2, %v12748_v6  ;;  %v5781_v55 = vmul.f32 %v12748_v6, %v12748_v6  ;;  %17823 = vst [vmem:[#allocation117_spill] sm:$0xff] %v12756_v40  ;;  %17824 = vst [vmem:[#allocation17_spill] sm:$0xff] %v12758_v10  ;;  %v5469_v20 = vadd.f32 %v5468_v11, %v12756_v40  ;;  %v12766_v4 = vpop.f32.mrb[126].mxu1  ;;  %v12768_v2 = vpop.f32.mrb[158].mxu0 }
 0x7a7   :  { %v5780_v17 = vmul.f32 %v12756_v40, %v12756_v40  ;;  %v5543_v23 = vadd.f32 %v5542_v47, %v12758_v10  ;;  %v5782_v16 = vmul.f32 %v12758_v10, %v12758_v10  ;;  %17825 = vst [vmem:[#allocation16_spill] sm:$0xff] %v12766_v4  ;;  %17826 = vst [vmem:[#allocation22_spill] sm:$0xff] %v12768_v2  ;;  %v12773_v11 = vpop.f32.mrb[127].mxu1  ;;  %v12775_v36 = vpop.f32.mrb[159].mxu0 }
 0x7a8   :  { %v5992_v57 = vadd.f32 %v5991_v27, %v5779_v22  ;;  %v6066_v43 = vadd.f32 %v6065_v59, %v5781_v55  ;;  %v5433_v51 = vadd.f32 %v5432_v8, %v12766_v4  ;;  %v5787_v30 = vmul.f32 %v12766_v4, %v12766_v4  ;;  %17827 = vst [vmem:[#allocation18_spill] sm:$0xff] %v12773_v11 }
 0x7a9   :  { %17828 = vst [vmem:[#allocation24_spill] sm:$0xff] %v12775_v36  ;;  %v6029_v58 = vadd.f32 %v6028_v1, %v5780_v17  ;;  %v6103_v47 = vadd.f32 %v6102_v48, %v5782_v16  ;;  %v5507_v39 = vadd.f32 %v5506_v21, %v12768_v2  ;;  %v5789_v27 = vmul.f32 %v12768_v2, %v12768_v2 }
 0x7aa   :  { %v5993_v50 = vadd.f32 %v5992_v57, %v5787_v30  ;;  %v5470_v59 = vadd.f32 %v5469_v20, %v12773_v11  ;;  %4826 = vmatmul.mubr.bf16.gmra.mrb[232].mxu1 %v12393_v35  ;;  %v5788_v1 = vmul.f32 %v12773_v11, %v12773_v11  ;;  %v5544_v8 = vadd.f32 %v5543_v23, %v12775_v36 }
 0x7ab   :  { %v5790_v30 = vmul.f32 %v12775_v36, %v12775_v36  ;;  %5212 = vmatmul.mubr.bf16.gmra.mrb[8].mxu0 %v12393_v35  ;;  %v6067_v21 = vadd.f32 %v6066_v43, %v5789_v27  ;;  %4835 = vmatprep.mubr.bf16.mxu1 %v12408_v12 }
 0x7ac   :  { %5221 = vmatprep.mubr.bf16.mxu0 %v12408_v12  ;;  %v6030_v20 = vadd.f32 %v6029_v58, %v5788_v1  ;;  %v12798_v16 = vpop.f32.mrb[128].mxu1  ;;  %v12800_v57 = vpop.f32.mrb[160].mxu0 }
 0x7ad   :  { %v6104_v17 = vadd.f32 %v6103_v47, %v5790_v30  ;;  %17829 = vst [vmem:[#allocation20_spill] sm:$0xff] %v12798_v16  ;;  %17830 = vst [vmem:[#allocation23_spill] sm:$0xff] %v12800_v57  ;;  %v5434_v23 = vadd.f32 %v5433_v51, %v12798_v16  ;;  %v5795_v22 = vmul.f32 %v12798_v16, %v12798_v16  ;;  %v12808_v27 = vpop.f32.mrb[129].mxu1  ;;  %v12810_v55 = vpop.f32.mrb[161].mxu0 }
 0x7ae   :  { %v5508_v35 = vadd.f32 %v5507_v39, %v12800_v57  ;;  %v5797_v43 = vmul.f32 %v12800_v57, %v12800_v57  ;;  %17831 = vst [vmem:[#allocation19_spill] sm:$0xff] %v12808_v27  ;;  %17832 = vst [vmem:[#allocation25_spill] sm:$0xff] %v12810_v55  ;;  %v5471_v12 = vadd.f32 %v5470_v59, %v12808_v27  ;;  %v12818_v1 = vpop.f32.mrb[130].mxu1  ;;  %v12820_v39 = vpop.f32.mrb[162].mxu0 }
 0x7af   :  { %v5796_v58 = vmul.f32 %v12808_v27, %v12808_v27  ;;  %v5545_v47 = vadd.f32 %v5544_v8, %v12810_v55  ;;  %v5798_v51 = vmul.f32 %v12810_v55, %v12810_v55  ;;  %17833 = vst [vmem:[#allocation21_spill] sm:$0xff] %v12818_v1  ;;  %17834 = vst [vmem:[#allocation30_spill] sm:$0xff] %v12820_v39  ;;  %v12825_v59 = vpop.f32.mrb[131].mxu1  ;;  %v12827_v36 = vpop.f32.mrb[163].mxu0 }
 0x7b0   :  { %v5994_v30 = vadd.f32 %v5993_v50, %v5795_v22  ;;  %v6068_v48 = vadd.f32 %v6067_v21, %v5797_v43  ;;  %v5435_v49 = vadd.f32 %v5434_v23, %v12818_v1  ;;  %v5803_v10 = vmul.f32 %v12818_v1, %v12818_v1  ;;  %17835 = vst [vmem:[#allocation26_spill] sm:$0xff] %v12825_v59  ;;  %v17837_v23 = vld [vmem:[#allocation104_spill] sm:$0xff] }
 0x7b1   :  { %17836 = vst [vmem:[#allocation32_spill] sm:$0xff] %v12827_v36  ;;  %v6031_v6 = vadd.f32 %v6030_v20, %v5796_v58  ;;  %v6105_v8 = vadd.f32 %v6104_v17, %v5798_v51  ;;  %v5509_v40 = vadd.f32 %v5508_v35, %v12820_v39  ;;  %v5805_v50 = vmul.f32 %v12820_v39, %v12820_v39 }
 0x7b2   :  { %v5995_v11 = vadd.f32 %v5994_v30, %v5803_v10  ;;  %v5472_v21 = vadd.f32 %v5471_v12, %v12825_v59  ;;  %4836 = vmatmul.mubr.bf16.gmra.mrb[236].mxu1 %v17837_v23  ;;  %v5804_v20 = vmul.f32 %v12825_v59, %v12825_v59  ;;  %v5546_v43 = vadd.f32 %v5545_v47, %v12827_v36  ;;  %v17838_v12 = vld [vmem:[#allocation84_spill] sm:$0xff] }
 0x7b3   :  { %v5806_v10 = vmul.f32 %v12827_v36, %v12827_v36  ;;  %5222 = vmatmul.mubr.bf16.gmra.mrb[12].mxu0 %v17837_v23  ;;  %v6069_v35 = vadd.f32 %v6068_v48, %v5805_v50  ;;  %4878 = vmatprep.mubr.bf16.mxu1 %v17838_v12 }
 0x7b4   :  { %5264 = vmatprep.mubr.bf16.mxu0 %v17838_v12  ;;  %v6032_v51 = vadd.f32 %v6031_v6, %v5804_v20  ;;  %v12850_v22 = vpop.f32.mrb[132].mxu1  ;;  %v12852_v17 = vpop.f32.mrb[164].mxu0 }
 0x7b5   :  { %v6106_v30 = vadd.f32 %v6105_v8, %v5806_v10  ;;  %17839 = vst [vmem:[#allocation28_spill] sm:$0xff] %v12850_v22  ;;  %17840 = vst [vmem:[#allocation31_spill] sm:$0xff] %v12852_v17  ;;  %v5436_v47 = vadd.f32 %v5435_v49, %v12850_v22  ;;  %v5811_v2 = vmul.f32 %v12850_v22, %v12850_v22  ;;  %v12860_v23 = vpop.f32.mrb[133].mxu1  ;;  %v12862_v58 = vpop.f32.mrb[165].mxu0 }
 0x7b6   :  { %v5510_v48 = vadd.f32 %v5509_v40, %v12852_v17  ;;  %v5813_v50 = vmul.f32 %v12852_v17, %v12852_v17  ;;  %17841 = vst [vmem:[#allocation27_spill] sm:$0xff] %v12860_v23  ;;  %17842 = vst [vmem:[#allocation33_spill] sm:$0xff] %v12862_v58  ;;  %v5473_v6 = vadd.f32 %v5472_v21, %v12860_v23  ;;  %v12870_v10 = vpop.f32.mrb[134].mxu1  ;;  %v12872_v40 = vpop.f32.mrb[166].mxu0 }
 0x7b7   :  { %v5812_v8 = vmul.f32 %v12860_v23, %v12860_v23  ;;  %v5547_v20 = vadd.f32 %v5546_v43, %v12862_v58  ;;  %v5814_v49 = vmul.f32 %v12862_v58, %v12862_v58  ;;  %17843 = vst [vmem:[#allocation29_spill] sm:$0xff] %v12870_v10  ;;  %17844 = vst [vmem:[#allocation38_spill] sm:$0xff] %v12872_v40  ;;  %v12877_v21 = vpop.f32.mrb[135].mxu1  ;;  %v12879_v39 = vpop.f32.mrb[167].mxu0 }
 0x7b8   :  { %v5996_v12 = vadd.f32 %v5995_v11, %v5811_v2  ;;  %v6070_v55 = vadd.f32 %v6069_v35, %v5813_v50  ;;  %v5437_v36 = vadd.f32 %v5436_v47, %v12870_v10  ;;  %v5819_v57 = vmul.f32 %v12870_v10, %v12870_v10  ;;  %17845 = vst [vmem:[#allocation34_spill] sm:$0xff] %v12877_v21  ;;  %v17847_v47 = vld [vmem:[#allocation88_spill] sm:$0xff] }
 0x7b9   :  { %17846 = vst [vmem:[#allocation40_spill] sm:$0xff] %v12879_v39  ;;  %v6033_v27 = vadd.f32 %v6032_v51, %v5812_v8  ;;  %v6107_v43 = vadd.f32 %v6106_v30, %v5814_v49  ;;  %v5511_v16 = vadd.f32 %v5510_v48, %v12872_v40  ;;  %v5821_v2 = vmul.f32 %v12872_v40, %v12872_v40 }
 0x7ba   :  { %v5997_v1 = vadd.f32 %v5996_v12, %v5819_v57  ;;  %v5474_v35 = vadd.f32 %v5473_v6, %v12877_v21  ;;  %4879 = vmatmul.mubr.bf16.vlgmr.msra.gmra.mrb[176].mxu1 %v17847_v47  ;;  %v5820_v51 = vmul.f32 %v12877_v21, %v12877_v21  ;;  %v5548_v50 = vadd.f32 %v5547_v20, %v12879_v39  ;;  %v17848_v6 = vld [vmem:[#allocation85_spill] sm:$0xff] }
 0x7bb   :  { %v5822_v57 = vmul.f32 %v12879_v39, %v12879_v39  ;;  %5265 = vmatmul.mubr.bf16.vlgmr.msra.gmra.mrb[208].mxu0 %v17847_v47  ;;  %v6071_v48 = vadd.f32 %v6070_v55, %v5821_v2  ;;  %4888 = vmatprep.mubr.bf16.mxu1 %v17848_v6 }
 0x7bc   :  { %5274 = vmatprep.mubr.bf16.mxu0 %v17848_v6  ;;  %v6034_v49 = vadd.f32 %v6033_v27, %v5820_v51  ;;  %v12902_v11 = vpop.f32.mrb[136].mxu1  ;;  %v12904_v30 = vpop.f32.mrb[168].mxu0 }
 0x7bd   :  { %v6108_v12 = vadd.f32 %v6107_v43, %v5822_v57  ;;  %17849 = vst [vmem:[#allocation76_spill] sm:$0xff] %v12902_v11  ;;  %17850 = vst [vmem:[#allocation36_spill] sm:$0xff] %v12904_v30  ;;  %v5438_v20 = vadd.f32 %v5437_v36, %v12902_v11  ;;  %v5827_v59 = vmul.f32 %v12902_v11, %v12902_v11  ;;  %v12912_v47 = vpop.f32.mrb[137].mxu1  ;;  %v12914_v8 = vpop.f32.mrb[169].mxu0 }
 0x7be   :  { %v5512_v55 = vadd.f32 %v5511_v16, %v12904_v30  ;;  %v5829_v2 = vmul.f32 %v12904_v30, %v12904_v30  ;;  %17851 = vst [vmem:[#allocation82_spill] sm:$0xff] %v12912_v47  ;;  %17852 = vst [vmem:[#allocation81_spill] sm:$0xff] %v12914_v8  ;;  %v5475_v27 = vadd.f32 %v5474_v35, %v12912_v47  ;;  %v12922_v57 = vpop.f32.mrb[138].mxu1  ;;  %v12924_v16 = vpop.f32.mrb[170].mxu0 }
 0x7bf   :  { %v5828_v43 = vmul.f32 %v12912_v47, %v12912_v47  ;;  %v5549_v51 = vadd.f32 %v5548_v50, %v12914_v8  ;;  %v5830_v36 = vmul.f32 %v12914_v8, %v12914_v8  ;;  %17853 = vst [vmem:[#allocation77_spill] sm:$0xff] %v12922_v57  ;;  %17854 = vst [vmem:[#allocation39_spill] sm:$0xff] %v12924_v16  ;;  %v12929_v35 = vpop.f32.mrb[139].mxu1  ;;  %v12931_v40 = vpop.f32.mrb[171].mxu0 }
 0x7c0   :  { %v5998_v6 = vadd.f32 %v5997_v1, %v5827_v59  ;;  %v6072_v58 = vadd.f32 %v6071_v48, %v5829_v2  ;;  %v5439_v39 = vadd.f32 %v5438_v20, %v12922_v57  ;;  %v5835_v17 = vmul.f32 %v12922_v57, %v12922_v57  ;;  %17855 = vst [vmem:[#allocation35_spill] sm:$0xff] %v12929_v35  ;;  %v17857_v20 = vld [vmem:[#allocation89_spill] sm:$0xff] }
 0x7c1   :  { %17856 = vst [vmem:[#allocation48_spill] sm:$0xff] %v12931_v40  ;;  %v6035_v23 = vadd.f32 %v6034_v49, %v5828_v43  ;;  %v6109_v50 = vadd.f32 %v6108_v12, %v5830_v36  ;;  %v5513_v22 = vadd.f32 %v5512_v55, %v12924_v16  ;;  %v5837_v1 = vmul.f32 %v12924_v16, %v12924_v16 }
 0x7c2   :  { %v5999_v10 = vadd.f32 %v5998_v6, %v5835_v17  ;;  %v5476_v48 = vadd.f32 %v5475_v27, %v12929_v35  ;;  %4889 = vmatmul.mubr.bf16.gmra.mrb[180].mxu1 %v17857_v20  ;;  %v5836_v49 = vmul.f32 %v12929_v35, %v12929_v35  ;;  %v5550_v2 = vadd.f32 %v5549_v51, %v12931_v40  ;;  %v17858_v27 = vld [vmem:[#allocation92_spill] sm:$0xff] }
 0x7c3   :  { %v5838_v17 = vmul.f32 %v12931_v40, %v12931_v40  ;;  %5275 = vmatmul.mubr.bf16.gmra.mrb[212].mxu0 %v17857_v20  ;;  %v6073_v55 = vadd.f32 %v6072_v58, %v5837_v1  ;;  %4898 = vmatprep.mubr.bf16.mxu1 %v17858_v27 }
 0x7c4   :  { %5284 = vmatprep.mubr.bf16.mxu0 %v17858_v27  ;;  %v6036_v36 = vadd.f32 %v6035_v23, %v5836_v49  ;;  %v12954_v59 = vpop.f32.mrb[140].mxu1  ;;  %v12956_v12 = vpop.f32.mrb[172].mxu0 }
 0x7c5   :  { %v6110_v6 = vadd.f32 %v6109_v50, %v5838_v17  ;;  %17859 = vst [vmem:[#allocation37_spill] sm:$0xff] %v12954_v59  ;;  %17860 = vst [vmem:[#allocation50_spill] sm:$0xff] %v12956_v12  ;;  %v5440_v51 = vadd.f32 %v5439_v39, %v12954_v59  ;;  %v5843_v21 = vmul.f32 %v12954_v59, %v12954_v59  ;;  %v12964_v20 = vpop.f32.mrb[141].mxu1  ;;  %v12966_v43 = vpop.f32.mrb[173].mxu0 }
 0x7c6   :  { %v5514_v58 = vadd.f32 %v5513_v22, %v12956_v12  ;;  %v5845_v1 = vmul.f32 %v12956_v12, %v12956_v12  ;;  %17861 = vst [vmem:[#allocation41_spill] sm:$0xff] %v12964_v20  ;;  %17862 = vst [vmem:[#allocation49_spill] sm:$0xff] %v12966_v43  ;;  %v5477_v23 = vadd.f32 %v5476_v48, %v12964_v20  ;;  %v12974_v17 = vpop.f32.mrb[142].mxu1  ;;  %v12976_v22 = vpop.f32.mrb[174].mxu0 }
 0x7c7   :  { %v5844_v50 = vmul.f32 %v12964_v20, %v12964_v20  ;;  %v5551_v49 = vadd.f32 %v5550_v2, %v12966_v43  ;;  %v5846_v39 = vmul.f32 %v12966_v43, %v12966_v43  ;;  %17863 = vst [vmem:[#allocation42_spill] sm:$0xff] %v12974_v17  ;;  %17864 = vst [vmem:[#allocation51_spill] sm:$0xff] %v12976_v22  ;;  %v12981_v48 = vpop.f32.mrb[143].mxu1  ;;  %v12983_v16 = vpop.f32.mrb[175].mxu0 }
 0x7c8   :  { %v6000_v27 = vadd.f32 %v5999_v10, %v5843_v21  ;;  %v6074_v8 = vadd.f32 %v6073_v55, %v5845_v1  ;;  %v5441_v40 = vadd.f32 %v5440_v51, %v12974_v17  ;;  %v5851_v30 = vmul.f32 %v12974_v17, %v12974_v17  ;;  %17865 = vst [vmem:[#allocation47_spill] sm:$0xff] %v12981_v48  ;;  %v17867_v51 = vld [vmem:[#allocation96_spill] sm:$0xff] }
 0x7c9   :  { %17866 = vst [vmem:[#allocation56_spill] sm:$0xff] %v12983_v16  ;;  %v6037_v47 = vadd.f32 %v6036_v36, %v5844_v50  ;;  %v6111_v2 = vadd.f32 %v6110_v6, %v5846_v39  ;;  %v5515_v11 = vadd.f32 %v5514_v58, %v12976_v22  ;;  %v5853_v10 = vmul.f32 %v12976_v22, %v12976_v22 }
 0x7ca   :  { %v6001_v57 = vadd.f32 %v6000_v27, %v5851_v30  ;;  %v5478_v55 = vadd.f32 %v5477_v23, %v12981_v48  ;;  %4899 = vmatmul.mubr.bf16.gmra.mrb[184].mxu1 %v17867_v51  ;;  %v5852_v36 = vmul.f32 %v12981_v48, %v12981_v48  ;;  %v5552_v1 = vadd.f32 %v5551_v49, %v12983_v16  ;;  %v17868_v23 = vld [vmem:[#allocation93_spill] sm:$0xff] }
 0x7cb   :  { %v5854_v30 = vmul.f32 %v12983_v16, %v12983_v16  ;;  %5285 = vmatmul.mubr.bf16.gmra.mrb[216].mxu0 %v17867_v51  ;;  %v6075_v58 = vadd.f32 %v6074_v8, %v5853_v10  ;;  %4908 = vmatprep.mubr.bf16.mxu1 %v17868_v23 }
 0x7cc   :  { %5294 = vmatprep.mubr.bf16.mxu0 %v17868_v23  ;;  %v6038_v39 = vadd.f32 %v6037_v47, %v5852_v36  ;;  %v13006_v21 = vpop.f32.mrb[144].mxu1  ;;  %v13008_v6 = vpop.f32.mrb[176].mxu0 }
 0x7cd   :  { %v6112_v27 = vadd.f32 %v6111_v2, %v5854_v30  ;;  %17869 = vst [vmem:[#allocation52_spill] sm:$0xff] %v13006_v21  ;;  %17870 = vst [vmem:[#allocation58_spill] sm:$0xff] %v13008_v6  ;;  %v5442_v49 = vadd.f32 %v5441_v40, %v13006_v21  ;;  %v5859_v35 = vmul.f32 %v13006_v21, %v13006_v21  ;;  %v13016_v51 = vpop.f32.mrb[145].mxu1  ;;  %v13018_v50 = vpop.f32.mrb[177].mxu0 }
 0x7ce   :  { %v5516_v8 = vadd.f32 %v5515_v11, %v13008_v6  ;;  %v5861_v10 = vmul.f32 %v13008_v6, %v13008_v6  ;;  %17871 = vst [vmem:[#allocation54_spill] sm:$0xff] %v13016_v51  ;;  %17872 = vst [vmem:[#allocation57_spill] sm:$0xff] %v13018_v50  ;;  %v5479_v47 = vadd.f32 %v5478_v55, %v13016_v51  ;;  %v13026_v30 = vpop.f32.mrb[146].mxu1  ;;  %v13028_v11 = vpop.f32.mrb[178].mxu0 }
 0x7cf   :  { %v5860_v2 = vmul.f32 %v13016_v51, %v13016_v51  ;;  %v5553_v36 = vadd.f32 %v5552_v1, %v13018_v50  ;;  %v5862_v40 = vmul.f32 %v13018_v50, %v13018_v50  ;;  %17873 = vst [vmem:[#allocation53_spill] sm:$0xff] %v13026_v30  ;;  %17874 = vst [vmem:[#allocation59_spill] sm:$0xff] %v13028_v11  ;;  %v13033_v55 = vpop.f32.mrb[147].mxu1  ;;  %v13035_v22 = vpop.f32.mrb[179].mxu0 }
 0x7d0   :  { %v6002_v23 = vadd.f32 %v6001_v57, %v5859_v35  ;;  %v6076_v43 = vadd.f32 %v6075_v58, %v5861_v10  ;;  %v5443_v16 = vadd.f32 %v5442_v49, %v13026_v30  ;;  %v5867_v12 = vmul.f32 %v13026_v30, %v13026_v30  ;;  %17875 = vst [vmem:[#allocation55_spill] sm:$0xff] %v13033_v55 }
 0x7d1   :  { %17876 = vst [vmem:[#allocation64_spill] sm:$0xff] %v13035_v22  ;;  %v6039_v20 = vadd.f32 %v6038_v39, %v5860_v2  ;;  %v6113_v1 = vadd.f32 %v6112_v27, %v5862_v40  ;;  %v5517_v59 = vadd.f32 %v5516_v8, %v13028_v11  ;;  %v5869_v57 = vmul.f32 %v13028_v11, %v13028_v11 }
 0x7d2   :  { %v6003_v17 = vadd.f32 %v6002_v23, %v5867_v12  ;;  %v5480_v58 = vadd.f32 %v5479_v47, %v13033_v55  ;;  %4909 = vmatmul.mubr.bf16.gmra.mrb[188].mxu1 %v17798_v61  ;;  %v5868_v39 = vmul.f32 %v13033_v55, %v13033_v55  ;;  %v5554_v49 = vadd.f32 %v5553_v36, %v13035_v22 }
 0x7d3   :  { %v5870_v12 = vmul.f32 %v13035_v22, %v13035_v22  ;;  %5295 = vmatmul.mubr.bf16.gmra.mrb[220].mxu0 %v17798_v61  ;;  %v6077_v8 = vadd.f32 %v6076_v43, %v5869_v57  ;;  %4918 = vmatprep.mubr.bf16.mxu1 %v12282_v32 }
 0x7d4   :  { %5304 = vmatprep.mubr.bf16.mxu0 %v12282_v32  ;;  %v6040_v47 = vadd.f32 %v6039_v20, %v5868_v39  ;;  %v13058_v40 = vpop.f32.mrb[148].mxu1  ;;  %v13060_v23 = vpop.f32.mrb[180].mxu0 }
 0x7d5   :  { %v6114_v2 = vadd.f32 %v6113_v1, %v5870_v12  ;;  %17877 = vst [vmem:[#allocation60_spill] sm:$0xff] %v13058_v40  ;;  %17878 = vst [vmem:[#allocation66_spill] sm:$0xff] %v13060_v23  ;;  %v5444_v36 = vadd.f32 %v5443_v16, %v13058_v40  ;;  %v5875_v35 = vmul.f32 %v13058_v40, %v13058_v40  ;;  %v13068_v57 = vpop.f32.mrb[149].mxu1  ;;  %v13070_v10 = vpop.f32.mrb[181].mxu0 }
 0x7d6   :  { %v5518_v61 = vadd.f32 %v5517_v59, %v13060_v23  ;;  %v5877_v43 = vmul.f32 %v13060_v23, %v13060_v23  ;;  %17879 = vst [vmem:[#allocation62_spill] sm:$0xff] %v13068_v57  ;;  %17880 = vst [vmem:[#allocation65_spill] sm:$0xff] %v13070_v10  ;;  %v5481_v32 = vadd.f32 %v5480_v58, %v13068_v57  ;;  %v13078_v39 = vpop.f32.mrb[150].mxu1  ;;  %v13080_v59 = vpop.f32.mrb[182].mxu0 }
 0x7d7   :  { %v5876_v20 = vmul.f32 %v13068_v57, %v13068_v57  ;;  %v5555_v1 = vadd.f32 %v5554_v49, %v13070_v10  ;;  %v5878_v16 = vmul.f32 %v13070_v10, %v13070_v10  ;;  %17881 = vst [vmem:[#allocation61_spill] sm:$0xff] %v13078_v39  ;;  %17882 = vst [vmem:[#allocation67_spill] sm:$0xff] %v13080_v59  ;;  %v13085_v58 = vpop.f32.mrb[151].mxu1  ;;  %v13087_v22 = vpop.f32.mrb[183].mxu0 }
 0x7d8   :  { %v6004_v12 = vadd.f32 %v6003_v17, %v5875_v35  ;;  %v6078_v27 = vadd.f32 %v6077_v8, %v5877_v43  ;;  %v5445_v48 = vadd.f32 %v5444_v36, %v13078_v39  ;;  %v5883_v50 = vmul.f32 %v13078_v39, %v13078_v39  ;;  %17883 = vst [vmem:[#allocation63_spill] sm:$0xff] %v13085_v58 }
 0x7d9   :  { %17884 = vst [vmem:[#allocation72_spill] sm:$0xff] %v13087_v22  ;;  %v6041_v6 = vadd.f32 %v6040_v47, %v5876_v20  ;;  %v6115_v49 = vadd.f32 %v6114_v2, %v5878_v16  ;;  %v5519_v51 = vadd.f32 %v5518_v61, %v13080_v59  ;;  %v5885_v17 = vmul.f32 %v13080_v59, %v13080_v59 }
 0x7da   :  { %v6005_v55 = vadd.f32 %v6004_v12, %v5883_v50  ;;  %v5482_v8 = vadd.f32 %v5481_v32, %v13085_v58  ;;  %4919 = vmatmul.mubr.bf16.gmra.mrb[192].mxu1 %v12278_v41  ;;  %v5884_v47 = vmul.f32 %v13085_v58, %v13085_v58  ;;  %v5556_v36 = vadd.f32 %v5555_v1, %v13087_v22 }
 0x7db   :  { %v5886_v50 = vmul.f32 %v13087_v22, %v13087_v22  ;;  %5305 = vmatmul.mubr.bf16.gmra.mrb[224].mxu0 %v12278_v41  ;;  %v6079_v61 = vadd.f32 %v6078_v27, %v5885_v17  ;;  %4928 = vmatprep.mubr.bf16.mxu1 %v12294_v42 }
 0x7dc   :  { %5314 = vmatprep.mubr.bf16.mxu0 %v12294_v42  ;;  %v6042_v32 = vadd.f32 %v6041_v6, %v5884_v47  ;;  %v13110_v16 = vpop.f32.mrb[152].mxu1  ;;  %v13112_v12 = vpop.f32.mrb[184].mxu0 }
 0x7dd   :  { %v6116_v20 = vadd.f32 %v6115_v49, %v5886_v50  ;;  %17885 = vst [vmem:[#allocation68_spill] sm:$0xff] %v13110_v16  ;;  %17886 = vst [vmem:[#allocation74_spill] sm:$0xff] %v13112_v12  ;;  %v5446_v1 = vadd.f32 %v5445_v48, %v13110_v16  ;;  %v5891_v35 = vmul.f32 %v13110_v16, %v13110_v16  ;;  %v13120_v17 = vpop.f32.mrb[153].mxu1  ;;  %v13122_v43 = vpop.f32.mrb[185].mxu0 }
 0x7de   :  { %v5520_v41 = vadd.f32 %v5519_v51, %v13112_v12  ;;  %v5893_v27 = vmul.f32 %v13112_v12, %v13112_v12  ;;  %17887 = vst [vmem:[#allocation70_spill] sm:$0xff] %v13120_v17  ;;  %17888 = vst [vmem:[#allocation73_spill] sm:$0xff] %v13122_v43  ;;  %v5483_v42 = vadd.f32 %v5482_v8, %v13120_v17  ;;  %v13130_v47 = vpop.f32.mrb[154].mxu1  ;;  %v13132_v51 = vpop.f32.mrb[186].mxu0 }
 0x7df   :  { %v5892_v6 = vmul.f32 %v13120_v17, %v13120_v17  ;;  %v5557_v49 = vadd.f32 %v5556_v36, %v13122_v43  ;;  %v5894_v48 = vmul.f32 %v13122_v43, %v13122_v43  ;;  %17889 = vst [vmem:[#allocation69_spill] sm:$0xff] %v13130_v47  ;;  %17890 = vst [vmem:[#allocation75_spill] sm:$0xff] %v13132_v51  ;;  %v13137_v8 = vpop.f32.mrb[155].mxu1  ;;  %v13139_v22 = vpop.f32.mrb[187].mxu0 }
 0x7e0   :  { %v6006_v50 = vadd.f32 %v6005_v55, %v5891_v35  ;;  %v6080_v2 = vadd.f32 %v6079_v61, %v5893_v27  ;;  %v5447_v11 = vadd.f32 %v5446_v1, %v13130_v47  ;;  %v5899_v10 = vmul.f32 %v13130_v47, %v13130_v47  ;;  %17891 = vst [vmem:[#allocation71_spill] sm:$0xff] %v13137_v8 }
 0x7e1   :  { %17892 = vst [vmem:[#allocation80_spill] sm:$0xff] %v13139_v22  ;;  %v6043_v23 = vadd.f32 %v6042_v32, %v5892_v6  ;;  %v6117_v36 = vadd.f32 %v6116_v20, %v5894_v48  ;;  %v5521_v57 = vadd.f32 %v5520_v41, %v13132_v51  ;;  %v5901_v55 = vmul.f32 %v13132_v51, %v13132_v51 }
 0x7e2   :  { %v6007_v58 = vadd.f32 %v6006_v50, %v5899_v10  ;;  %v5484_v61 = vadd.f32 %v5483_v42, %v13137_v8  ;;  %4929 = vmatmul.mubr.bf16.gmra.mrb[196].mxu1 %v12291_v34  ;;  %v5900_v32 = vmul.f32 %v13137_v8, %v13137_v8  ;;  %v5558_v1 = vadd.f32 %v5557_v49, %v13139_v22 }
 0x7e3   :  { %v5902_v10 = vmul.f32 %v13139_v22, %v13139_v22  ;;  %5315 = vmatmul.mubr.bf16.gmra.mrb[228].mxu0 %v12291_v34  ;;  %v6081_v41 = vadd.f32 %v6080_v2, %v5901_v55  ;;  %4938 = vmatprep.mubr.bf16.mxu1 %v12306_v33 }
 0x7e4   :  { %5324 = vmatprep.mubr.bf16.mxu0 %v12306_v33  ;;  %v6044_v42 = vadd.f32 %v6043_v23, %v5900_v32  ;;  %v13162_v48 = vpop.f32.mrb[156].mxu1  ;;  %v13164_v50 = vpop.f32.mrb[188].mxu0 }
 0x7e5   :  { %v6118_v6 = vadd.f32 %v6117_v36, %v5902_v10  ;;  %17893 = vst [vmem:[#allocation78_spill] sm:$0xff] %v13162_v48  ;;  %17894 = vst [vmem:[#allocation79_spill] sm:$0xff] %v13164_v50  ;;  %v5448_v49 = vadd.f32 %v5447_v11, %v13162_v48  ;;  %v5907_v35 = vmul.f32 %v13162_v48, %v13162_v48  ;;  %v13172_v55 = vpop.f32.mrb[157].mxu1  ;;  %v13174_v27 = vpop.f32.mrb[189].mxu0 }
 0x7e6   :  { %v5522_v34 = vadd.f32 %v5521_v57, %v13164_v50  ;;  %v5909_v2 = vmul.f32 %v13164_v50, %v13164_v50  ;;  %17895 = vst [vmem:[#allocation83_spill] sm:$0xff] %v13172_v55  ;;  %17896 = vst [vmem:[#allocation86_spill] sm:$0xff] %v13174_v27  ;;  %v5485_v33 = vadd.f32 %v5484_v61, %v13172_v55  ;;  %v13182_v32 = vpop.f32.mrb[158].mxu1  ;;  %v13184_v57 = vpop.f32.mrb[190].mxu0 }
 0x7e7   :  { %v5908_v23 = vmul.f32 %v13172_v55, %v13172_v55  ;;  %v5559_v36 = vadd.f32 %v5558_v1, %v13174_v27  ;;  %v5910_v11 = vmul.f32 %v13174_v27, %v13174_v27  ;;  %17897 = vst [vmem:[#allocation90_spill] sm:$0xff] %v13182_v32  ;;  %17898 = vst [vmem:[#allocation87_spill] sm:$0xff] %v13184_v57  ;;  %v13189_v61 = vpop.f32.mrb[159].mxu1  ;;  %v13191_v22 = vpop.f32.mrb[191].mxu0 }
 0x7e8   :  { %v6008_v10 = vadd.f32 %v6007_v58, %v5907_v35  ;;  %v6082_v20 = vadd.f32 %v6081_v41, %v5909_v2  ;;  %v5449_v59 = vadd.f32 %v5448_v49, %v13182_v32  ;;  %v5915_v43 = vmul.f32 %v13182_v32, %v13182_v32  ;;  %17899 = vst [vmem:[#allocation99_spill] sm:$0xff] %v13189_v61 }
 0x7e9   :  { %17900 = vst [vmem:[#allocation97_spill] sm:$0xff] %v13191_v22  ;;  %v6045_v12 = vadd.f32 %v6044_v42, %v5908_v23  ;;  %v6119_v1 = vadd.f32 %v6118_v6, %v5910_v11  ;;  %v5523_v17 = vadd.f32 %v5522_v34, %v13184_v57  ;;  %v5917_v58 = vmul.f32 %v13184_v57, %v13184_v57 }
 0x7ea   :  { %v6009_v8 = vadd.f32 %v6008_v10, %v5915_v43  ;;  %v5486_v41 = vadd.f32 %v5485_v33, %v13189_v61  ;;  %4939 = vmatmul.mubr.bf16.gmra.mrb[200].mxu1 %v12303_v53  ;;  %v5916_v42 = vmul.f32 %v13189_v61, %v13189_v61  ;;  %v5560_v49 = vadd.f32 %v5559_v36, %v13191_v22 }
 0x7eb   :  { %v5918_v43 = vmul.f32 %v13191_v22, %v13191_v22  ;;  %5325 = vmatmul.mubr.bf16.gmra.mrb[232].mxu0 %v12303_v53  ;;  %v6083_v34 = vadd.f32 %v6082_v20, %v5917_v58  ;;  %4948 = vmatprep.mubr.bf16.mxu1 %v12318_v54 }
 0x7ec   :  { %5334 = vmatprep.mubr.bf16.mxu0 %v12318_v54  ;;  %v6046_v33 = vadd.f32 %v6045_v12, %v5916_v42  ;;  %v13214_v11 = vpop.f32.mrb[160].mxu1  ;;  %v13216_v10 = vpop.f32.mrb[192].mxu0 }
 0x7ed   :  { %v6120_v23 = vadd.f32 %v6119_v1, %v5918_v43  ;;  %17901 = vst [vmem:[#allocation91_spill] sm:$0xff] %v13214_v11  ;;  %17902 = vst [vmem:[#allocation94_spill] sm:$0xff] %v13216_v10  ;;  %v5450_v36 = vadd.f32 %v5449_v59, %v13214_v11  ;;  %v5923_v35 = vmul.f32 %v13214_v11, %v13214_v11  ;;  %v13224_v58 = vpop.f32.mrb[161].mxu1  ;;  %v13226_v2 = vpop.f32.mrb[193].mxu0 }
 0x7ee   :  { %v5524_v53 = vadd.f32 %v5523_v17, %v13216_v10  ;;  %v5925_v20 = vmul.f32 %v13216_v10, %v13216_v10  ;;  %17903 = vst [vmem:[#allocation98_spill] sm:$0xff] %v13224_v58  ;;  %17904 = vst [vmem:[#allocation95_spill] sm:$0xff] %v13226_v2  ;;  %v5487_v54 = vadd.f32 %v5486_v41, %v13224_v58  ;;  %v13234_v42 = vpop.f32.mrb[162].mxu1  ;;  %v13236_v17 = vpop.f32.mrb[194].mxu0 }
 0x7ef   :  { %v5924_v12 = vmul.f32 %v13224_v58, %v13224_v58  ;;  %v5561_v1 = vadd.f32 %v5560_v49, %v13226_v2  ;;  %v5926_v59 = vmul.f32 %v13226_v2, %v13226_v2  ;;  %17905 = vst [vmem:[#allocation104_spill] sm:$0xff] %v13234_v42  ;;  %17906 = vst [vmem:[#allocation84_spill] sm:$0xff] %v13236_v17  ;;  %v13241_v41 = vpop.f32.mrb[163].mxu1  ;;  %v13243_v22 = vpop.f32.mrb[195].mxu0 }
 0x7f0   :  { %v6010_v43 = vadd.f32 %v6009_v8, %v5923_v35  ;;  %v6084_v6 = vadd.f32 %v6083_v34, %v5925_v20  ;;  %v5451_v51 = vadd.f32 %v5450_v36, %v13234_v42  ;;  %v5931_v27 = vmul.f32 %v13234_v42, %v13234_v42  ;;  %17907 = vst [vmem:[#allocation88_spill] sm:$0xff] %v13241_v41 }
 0x7f1   :  { %17908 = vst [vmem:[#allocation85_spill] sm:$0xff] %v13243_v22  ;;  %v6047_v50 = vadd.f32 %v6046_v33, %v5924_v12  ;;  %v6121_v49 = vadd.f32 %v6120_v23, %v5926_v59  ;;  %v5525_v55 = vadd.f32 %v5524_v53, %v13236_v17  ;;  %v5933_v8 = vmul.f32 %v13236_v17, %v13236_v17 }
 0x7f2   :  { %v6011_v61 = vadd.f32 %v6010_v43, %v5931_v27  ;;  %v5488_v34 = vadd.f32 %v5487_v54, %v13241_v41  ;;  %4949 = vmatmul.mubr.bf16.gmra.mrb[204].mxu1 %v12315_v19  ;;  %v5932_v33 = vmul.f32 %v13241_v41, %v13241_v41  ;;  %v5562_v36 = vadd.f32 %v5561_v1, %v13243_v22 }
 0x7f3   :  { %v5934_v27 = vmul.f32 %v13243_v22, %v13243_v22  ;;  %5335 = vmatmul.mubr.bf16.gmra.mrb[236].mxu0 %v12315_v19  ;;  %v6085_v53 = vadd.f32 %v6084_v6, %v5933_v8  ;;  %4958 = vmatprep.mubr.bf16.mxu1 %v12330_v29 }
 0x7f4   :  { %5344 = vmatprep.mubr.bf16.mxu0 %v12330_v29  ;;  %v6048_v54 = vadd.f32 %v6047_v50, %v5932_v33  ;;  %v13266_v59 = vpop.f32.mrb[164].mxu1  ;;  %v13268_v43 = vpop.f32.mrb[196].mxu0 }
 0x7f5   :  { %v6122_v12 = vadd.f32 %v6121_v49, %v5934_v27  ;;  %17909 = vst [vmem:[#allocation89_spill] sm:$0xff] %v13266_v59  ;;  %17910 = vst [vmem:[#allocation92_spill] sm:$0xff] %v13268_v43  ;;  %v5452_v1 = vadd.f32 %v5451_v51, %v13266_v59  ;;  %v5939_v35 = vmul.f32 %v13266_v59, %v13266_v59  ;;  %v13276_v8 = vpop.f32.mrb[165].mxu1  ;;  %v13278_v20 = vpop.f32.mrb[197].mxu0 }
 0x7f6   :  { %v5526_v19 = vadd.f32 %v5525_v55, %v13268_v43  ;;  %v5941_v6 = vmul.f32 %v13268_v43, %v13268_v43  ;;  %17911 = vst [vmem:[#allocation96_spill] sm:$0xff] %v13276_v8  ;;  %17912 = vst [vmem:[#allocation93_spill] sm:$0xff] %v13278_v20  ;;  %v5489_v29 = vadd.f32 %v5488_v34, %v13276_v8  ;;  %v13286_v33 = vpop.f32.mrb[166].mxu1  ;;  %v13288_v55 = vpop.f32.mrb[198].mxu0 }
 0x7f7   :  { %v5940_v50 = vmul.f32 %v13276_v8, %v13276_v8  ;;  %v5563_v49 = vadd.f32 %v5562_v36, %v13278_v20  ;;  %v5942_v51 = vmul.f32 %v13278_v20, %v13278_v20  ;;  %17913 = vst [vmem:[#allocation124_spill] sm:$0xff] %v13286_v33  ;;  %17914 = vst [vmem:[#allocation125_spill] sm:$0xff] %v13288_v55  ;;  %v13293_v34 = vpop.f32.mrb[167].mxu1  ;;  %v13295_v22 = vpop.f32.mrb[199].mxu0 }
 0x7f8   :  { %v6012_v27 = vadd.f32 %v6011_v61, %v5939_v35  ;;  %v6086_v23 = vadd.f32 %v6085_v53, %v5941_v6  ;;  %v5453_v57 = vadd.f32 %v5452_v1, %v13286_v33  ;;  %v5947_v2 = vmul.f32 %v13286_v33, %v13286_v33  ;;  %17915 = vst [vmem:[#allocation126_spill] sm:$0xff] %v13293_v34 }
 0x7f9   :  { %17916 = vst [vmem:[#allocation127_spill] sm:$0xff] %v13295_v22  ;;  %v6049_v10 = vadd.f32 %v6048_v54, %v5940_v50  ;;  %v6123_v36 = vadd.f32 %v6122_v12, %v5942_v51  ;;  %v5527_v58 = vadd.f32 %v5526_v19, %v13288_v55  ;;  %v5949_v61 = vmul.f32 %v13288_v55, %v13288_v55 }
 0x7fa   :  { %v6013_v41 = vadd.f32 %v6012_v27, %v5947_v2  ;;  %v5490_v53 = vadd.f32 %v5489_v29, %v13293_v34  ;;  %4959 = vmatmul.mubr.bf16.gmra.mrb[208].mxu1 %v12327_v56  ;;  %v5948_v54 = vmul.f32 %v13293_v34, %v13293_v34  ;;  %v5564_v1 = vadd.f32 %v5563_v49, %v13295_v22 }
 0x7fb   :  { %v5950_v2 = vmul.f32 %v13295_v22, %v13295_v22  ;;  %5345 = vmatmul.mubr.bf16.gmra.mrb[240].mxu0 %v12327_v56  ;;  %v6087_v19 = vadd.f32 %v6086_v23, %v5949_v61  ;;  %4968 = vmatprep.mubr.bf16.mxu1 %v12342_v38 }
 0x7fc   :  { %5354 = vmatprep.mubr.bf16.mxu0 %v12342_v38  ;;  %v6050_v29 = vadd.f32 %v6049_v10, %v5948_v54  ;;  %v13318_v51 = vpop.f32.mrb[168].mxu1  ;;  %v13320_v27 = vpop.f32.mrb[200].mxu0 }
 0x7fd   :  { %v6124_v50 = vadd.f32 %v6123_v36, %v5950_v2  ;;  %17917 = vst [vmem:[#allocation128_spill] sm:$0xff] %v13318_v51  ;;  %17918 = vst [vmem:[#allocation129_spill] sm:$0xff] %v13320_v27  ;;  %v5454_v49 = vadd.f32 %v5453_v57, %v13318_v51  ;;  %v5955_v35 = vmul.f32 %v13318_v51, %v13318_v51  ;;  %v13328_v61 = vpop.f32.mrb[169].mxu1  ;;  %v13330_v6 = vpop.f32.mrb[201].mxu0 }
 0x7fe   :  { %v5528_v56 = vadd.f32 %v5527_v58, %v13320_v27  ;;  %v5957_v23 = vmul.f32 %v13320_v27, %v13320_v27  ;;  %17919 = vst [vmem:[#allocation130_spill] sm:$0xff] %v13328_v61  ;;  %17920 = vst [vmem:[#allocation131_spill] sm:$0xff] %v13330_v6  ;;  %v5491_v38 = vadd.f32 %v5490_v53, %v13328_v61  ;;  %v13338_v54 = vpop.f32.mrb[170].mxu1  ;;  %v13340_v58 = vpop.f32.mrb[202].mxu0 }
 0x7ff   :  { %v5956_v10 = vmul.f32 %v13328_v61, %v13328_v61  ;;  %v5565_v36 = vadd.f32 %v5564_v1, %v13330_v6  ;;  %v5958_v57 = vmul.f32 %v13330_v6, %v13330_v6  ;;  %17921 = vst [vmem:[#allocation132_spill] sm:$0xff] %v13338_v54  ;;  %17922 = vst [vmem:[#allocation133_spill] sm:$0xff] %v13340_v58  ;;  %v13345_v53 = vpop.f32.mrb[171].mxu1  ;;  %v13347_v22 = vpop.f32.mrb[203].mxu0 }
 0x800   :  { %v6014_v2 = vadd.f32 %v6013_v41, %v5955_v35  ;;  %v6088_v12 = vadd.f32 %v6087_v19, %v5957_v23  ;;  %v5455_v17 = vadd.f32 %v5454_v49, %v13338_v54  ;;  %v5963_v20 = vmul.f32 %v13338_v54, %v13338_v54  ;;  %17923 = vst [vmem:[#allocation134_spill] sm:$0xff] %v13345_v53 }
 0x801   :  { %17924 = vst [vmem:[#allocation135_spill] sm:$0xff] %v13347_v22  ;;  %v6051_v43 = vadd.f32 %v6050_v29, %v5956_v10  ;;  %v6125_v1 = vadd.f32 %v6124_v50, %v5958_v57  ;;  %v5529_v8 = vadd.f32 %v5528_v56, %v13340_v58  ;;  %v5965_v41 = vmul.f32 %v13340_v58, %v13340_v58 }
 0x802   :  { %v6015_v34 = vadd.f32 %v6014_v2, %v5963_v20  ;;  %v5492_v19 = vadd.f32 %v5491_v38, %v13345_v53  ;;  %4969 = vmatmul.mubr.bf16.gmra.mrb[212].mxu1 %v12339_v5  ;;  %v5964_v29 = vmul.f32 %v13345_v53, %v13345_v53  ;;  %v5566_v49 = vadd.f32 %v5565_v36, %v13347_v22 }
 0x803   :  { %v5966_v20 = vmul.f32 %v13347_v22, %v13347_v22  ;;  %5355 = vmatmul.mubr.bf16.gmra.mrb[244].mxu0 %v12339_v5  ;;  %v6089_v56 = vadd.f32 %v6088_v12, %v5965_v41  ;;  %4978 = vmatprep.mubr.bf16.mxu1 %v12354_v25 }
 0x804   :  { %5364 = vmatprep.mubr.bf16.mxu0 %v12354_v25  ;;  %v6052_v38 = vadd.f32 %v6051_v43, %v5964_v29  ;;  %v13370_v57 = vpop.f32.mrb[172].mxu1  ;;  %v13372_v2 = vpop.f32.mrb[204].mxu0 }
 0x805   :  { %v6126_v10 = vadd.f32 %v6125_v1, %v5966_v20  ;;  %17925 = vst [vmem:[#allocation136_spill] sm:$0xff] %v13370_v57  ;;  %17926 = vst [vmem:[#allocation137_spill] sm:$0xff] %v13372_v2  ;;  %v5456_v36 = vadd.f32 %v5455_v17, %v13370_v57  ;;  %v5971_v35 = vmul.f32 %v13370_v57, %v13370_v57  ;;  %v13380_v41 = vpop.f32.mrb[173].mxu1  ;;  %v13382_v23 = vpop.f32.mrb[205].mxu0 }
 0x806   :  { %v5530_v5 = vadd.f32 %v5529_v8, %v13372_v2  ;;  %v5973_v12 = vmul.f32 %v13372_v2, %v13372_v2  ;;  %17927 = vst [vmem:[#allocation138_spill] sm:$0xff] %v13380_v41  ;;  %17928 = vst [vmem:[#allocation139_spill] sm:$0xff] %v13382_v23  ;;  %v5493_v25 = vadd.f32 %v5492_v19, %v13380_v41  ;;  %v13390_v29 = vpop.f32.mrb[174].mxu1  ;;  %v13392_v8 = vpop.f32.mrb[206].mxu0 }
 0x807   :  { %v5972_v43 = vmul.f32 %v13380_v41, %v13380_v41  ;;  %v5567_v1 = vadd.f32 %v5566_v49, %v13382_v23  ;;  %v5974_v17 = vmul.f32 %v13382_v23, %v13382_v23  ;;  %17929 = vst [vmem:[#allocation140_spill] sm:$0xff] %v13390_v29  ;;  %17930 = vst [vmem:[#allocation141_spill] sm:$0xff] %v13392_v8  ;;  %v13397_v19 = vpop.f32.mrb[175].mxu1  ;;  %v13399_v22 = vpop.f32.mrb[207].mxu0 }
 0x808   :  { %v6016_v20 = vadd.f32 %v6015_v34, %v5971_v35  ;;  %v6090_v50 = vadd.f32 %v6089_v56, %v5973_v12  ;;  %v5457_v55 = vadd.f32 %v5456_v36, %v13390_v29  ;;  %v5979_v6 = vmul.f32 %v13390_v29, %v13390_v29  ;;  %17931 = vst [vmem:[#allocation142_spill] sm:$0xff] %v13397_v19 }
 0x809   :  { %17932 = vst [vmem:[#allocation143_spill] sm:$0xff] %v13399_v22  ;;  %v6053_v27 = vadd.f32 %v6052_v38, %v5972_v43  ;;  %v6127_v49 = vadd.f32 %v6126_v10, %v5974_v17  ;;  %v5531_v61 = vadd.f32 %v5530_v5, %v13392_v8  ;;  %v5981_v34 = vmul.f32 %v13392_v8, %v13392_v8 }
 0x80a   :  { %v5458_v53 = vrot.slane %v5457_v55, 4  ;;  %v6017_v51 = vadd.f32 %v6016_v20, %v5979_v6  ;;  %4979 = vmatmul.mubr.bf16.gmra.mrb[216].mxu1 %v12351_v13  ;;  %v5494_v36 = vadd.f32 %v5493_v25, %v13397_v19  ;;  %v5980_v38 = vmul.f32 %v13397_v19, %v13397_v19 }
 0x80b   :  { %v5532_v56 = vrot.slane %v5531_v61, 4  ;;  %5365 = vmatmul.mubr.bf16.gmra.mrb[248].mxu0 %v12351_v13  ;;  %4988 = vmatprep.mubr.bf16.mxu1 %v12366_v62  ;;  %v6091_v12 = vadd.f32 %v6090_v50, %v5981_v34  ;;  %v5568_v43 = vadd.f32 %v5567_v1, %v13399_v22  ;;  %v5982_v35 = vmul.f32 %v13399_v22, %v13399_v22 }
 0x80c   :  { %v5459_v6 = vadd.f32 %v5458_v53, %v5457_v55  ;;  %v6018_v5 = vrot.slane %v6017_v51, 4  ;;  %5374 = vmatprep.mubr.bf16.mxu0 %v12366_v62  ;;  %v5495_v20 = vrot.slane %v5494_v36, 4  ;;  %v6054_v25 = vadd.f32 %v6053_v27, %v5980_v38 }
 0x80d   :  { %v5533_v17 = vadd.f32 %v5532_v56, %v5531_v61  ;;  %v6092_v10 = vrot.slane %v6091_v12, 4  ;;  %v5569_v8 = vrot.slane %v5568_v43, 4  ;;  %v6128_v55 = vadd.f32 %v6127_v49, %v5982_v35 }
 0x80e   :  { %v5460_v58 = vrot.slane %v5459_v6, 2  ;;  %v6019_v2 = vadd.f32 %v6018_v5, %v6017_v51  ;;  %v5496_v41 = vadd.f32 %v5495_v20, %v5494_v36  ;;  %v6055_v19 = vrot.slane %v6054_v25, 4 }
 0x80f   :  { %v5534_v13 = vrot.slane %v5533_v17, 2  ;;  %v6093_v34 = vadd.f32 %v6092_v10, %v6091_v12  ;;  %v5570_v1 = vadd.f32 %v5569_v8, %v5568_v43  ;;  %v6129_v56 = vrot.slane %v6128_v55, 4 }
 0x810   :  { %v5461_v53 = vadd.f32 %v5460_v58, %v5459_v6  ;;  %v6020_v50 = vrot.slane %v6019_v2, 2  ;;  %v5497_v62 = vrot.slane %v5496_v41, 2  ;;  %v6056_v61 = vadd.f32 %v6055_v19, %v6054_v25 }
 0x811   :  { %v5535_v57 = vadd.f32 %v5534_v13, %v5533_v17  ;;  %v6094_v29 = vrot.slane %v6093_v34, 2  ;;  %v5571_v54 = vrot.slane %v5570_v1, 2  ;;  %v6130_v36 = vadd.f32 %v6129_v56, %v6128_v55 }
 0x812   :  { %v5462_v27 = vrot.slane %v5461_v53, 1  ;;  %v6021_v38 = vadd.f32 %v6020_v50, %v6019_v2  ;;  %4989 = vmatmul.mubr.bf16.gmra.mrb[220].mxu1 %v12363_v26  ;;  %v5498_v5 = vadd.f32 %v5497_v62, %v5496_v41  ;;  %v6057_v59 = vrot.slane %v6056_v61, 2 }
 0x813   :  { %v5536_v51 = vrot.slane %v5535_v57, 1  ;;  %5375 = vmatmul.mubr.bf16.gmra.mrb[252].mxu0 %v12363_v26  ;;  %4998 = vmatprep.mubr.bf16.mxu1 %v12378_v14  ;;  %v6095_v49 = vadd.f32 %v6094_v29, %v6093_v34  ;;  %v5572_v35 = vadd.f32 %v5571_v54, %v5570_v1  ;;  %v6131_v6 = vrot.slane %v6130_v36, 2 }
 0x814   :  { %v5463_v58 = vadd.f32 %v5462_v27, %v5461_v53  ;;  %v6022_v8 = vrot.slane %v6021_v38, 1  ;;  %5384 = vmatprep.mubr.bf16.mxu0 %v12378_v14  ;;  %v5499_v2 = vrot.slane %v5498_v5, 1  ;;  %v6058_v10 = vadd.f32 %v6057_v59, %v6056_v61 }
 0x815   :  { %v5537_v19 = vadd.f32 %v5536_v51, %v5535_v57  ;;  %v6096_v41 = vrot.slane %v6095_v49, 1  ;;  %v5573_v17 = vrot.slane %v5572_v35, 1  ;;  %v6132_v13 = vadd.f32 %v6131_v6, %v6130_v36 }
 0x816   :  { %v13424_v12 = vmul.f32 0.00390625, %v5463_v58  ;;  %v6023_v43 = vadd.f32 %v6022_v8, %v6021_v38  ;;  %v5500_v26 = vadd.f32 %v5499_v2, %v5498_v5  ;;  %v6059_v25 = vrot.slane %v6058_v10, 1 }
 0x817   :  { %v13426_v20 = vmul.f32 0.00390625, %v5537_v19  ;;  %v6097_v29 = vadd.f32 %v6096_v41, %v6095_v49  ;;  %v5574_v14 = vadd.f32 %v5573_v17, %v5572_v35  ;;  %v6133_v50 = vrot.slane %v6132_v13, 1  ;;  %v17933_v41 = vld [vmem:[#allocation44_spill] sm:$0xff] }
 0x818   :  { %v6283_v55 = vmul.f32 0.00390625, %v6023_v43  ;;  %v6291_v54 = vmul.f32 %v13424_v12, %v13424_v12  ;;  %v13432_v57 = vmul.f32 0.00390625, %v5500_v26  ;;  %v6060_v53 = vadd.f32 %v6059_v25, %v6058_v10 }
 0x819   :  { %v6293_v59 = vmul.f32 %v13426_v20, %v13426_v20  ;;  %v6285_v1 = vmul.f32 0.00390625, %v6097_v29  ;;  %v13434_v62 = vmul.f32 0.00390625, %v5574_v14  ;;  %v6134_v38 = vadd.f32 %v6133_v50, %v6132_v13 }
 0x81a   :  { %v6299_v34 = vsub.f32 %v6283_v55, %v6291_v54  ;;  %4999 = vmatmul.mubr.bf16.gmra.mrb[224].mxu1 %v12375_v9  ;;  %v6284_v56 = vmul.f32 0.00390625, %v6060_v53  ;;  %v6292_v27 = vmul.f32 %v13432_v57, %v13432_v57 }
 0x81b   :  { %5385 = vmatmul.mubr.bf16.gmra.mrb[0].mxu0 %v12375_v9  ;;  %5008 = vmatprep.mubr.bf16.mxu1 %v12390_v37  ;;  %v6301_v5 = vsub.f32 %v6285_v1, %v6293_v59  ;;  %v6294_v36 = vmul.f32 %v13434_v62, %v13434_v62  ;;  %v6286_v8 = vmul.f32 0.00390625, %v6134_v38 }
 0x81c   :  { %v6307_v51 = vadd.f32 0.8, %v6299_v34  ;;  %5394 = vmatprep.mubr.bf16.mxu0 %v12390_v37  ;;  %v6300_v58 = vsub.f32 %v6284_v56, %v6292_v27 }
 0x81d   :  { %v6309_v49 = vadd.f32 0.8, %v6301_v5  ;;  %v6302_v19 = vsub.f32 %v6286_v8, %v6294_v36 }
 0x81e   :  { %9317 = vrsqrt.f32 %v6307_v51  ;;  %v6308_v35 = vadd.f32 0.8, %v6300_v58 }
 0x81f   :  { %9319 = vrsqrt.f32 %v6309_v49  ;;  %v6310_v2 = vadd.f32 0.8, %v6302_v19 }
 0x820   :  { %9321 = vrsqrt.f32 %v6308_v35 }
 0x821   :  { %9323 = vrsqrt.f32 %v6310_v2 }
 0x822   :  { %5009 = vmatmul.mubr.bf16.gmra.mrb[228].mxu1 %v12387_v3 }
 0x823   :  { %5395 = vmatmul.mubr.bf16.gmra.mrb[4].mxu0 %v12387_v3  ;;  %5018 = vmatprep.mubr.bf16.mxu1 %v12402_v28 }
 0x824   :  { %5404 = vmatprep.mubr.bf16.mxu0 %v12402_v28 }
 0x828   :  { %v9318_v9 = vpop.eup %9317 }
 0x829   :  { %v9320_v37 = vpop.eup %9319 }
 0x82a   :  { %5019 = vmatmul.mubr.bf16.gmra.mrb[232].mxu1 %v12399_v0  ;;  %v9322_v10 = vpop.eup %9321 }
 0x82b   :  { %5405 = vmatmul.mubr.bf16.gmra.mrb[8].mxu0 %v12399_v0  ;;  %5028 = vmatprep.mubr.bf16.mxu1 %v12414_v24  ;;  %v6331_v6 = vcombine.low %v9318_v9, %v9322_v10  ;;  %v9324_v43 = vpop.eup %9323 }
 0x82c   :  { %5414 = vmatprep.mubr.bf16.mxu0 %v12414_v24  ;;  %v6332_v3 = vcombine.low %v9320_v37, %v9324_v43 }
 0x82d   :  { %v13455_v17 = vrot.slane %v6331_v6, %v17933_v41 }
 0x82e   :  { %v13458_v26 = vrot.slane %v6332_v3, %v17933_v41 }
 0x832   :  { %5029 = vmatmul.mubr.bf16.gmra.mrb[236].mxu1 %v12411_v46 }
 0x833   :  { %5415 = vmatmul.mubr.bf16.gmra.mrb[12].mxu0 %v12411_v46 }
 0x88d   :  { %v13464_v0 = vpop.f32.mrb[176].mxu1 }
 0x88e   :  { %v13466_v25 = vpop.f32.mrb[208].mxu0  ;;  %v13468_v24 = vpop.f32.mrb[177].mxu1  ;;  %v5735_v13 = vmul.f32 %v13464_v0, %v13464_v0 }
 0x88f   :  { %v5737_v55 = vmul.f32 %v13466_v25, %v13466_v25  ;;  %v13474_v54 = vpop.f32.mrb[209].mxu0  ;;  %v13476_v29 = vpop.f32.mrb[178].mxu1  ;;  %v5736_v14 = vmul.f32 %v13468_v24, %v13468_v24 }
 0x890   :  { %v5575_v46 = vadd.f32 %v13476_v29, %v13464_v0  ;;  %v5743_v59 = vmul.f32 %v13476_v29, %v13476_v29  ;;  %v13486_v50 = vpop.f32.mrb[210].mxu0  ;;  %v13488_v34 = vpop.f32.mrb[179].mxu1  ;;  %v5738_v49 = vmul.f32 %v13474_v54, %v13474_v54 }
 0x891   :  { %v5649_v1 = vadd.f32 %v13486_v50, %v13466_v25  ;;  %v5745_v56 = vmul.f32 %v13486_v50, %v13486_v50  ;;  %v5612_v38 = vadd.f32 %v13488_v34, %v13468_v24  ;;  %v13498_v51 = vpop.f32.mrb[211].mxu0  ;;  %v5744_v36 = vmul.f32 %v13488_v34, %v13488_v34 }
 0x892   :  { %v6135_v5 = vadd.f32 %v5743_v59, %v5735_v13  ;;  %v5686_v8 = vadd.f32 %v13498_v51, %v13474_v54  ;;  %v5746_v19 = vmul.f32 %v13498_v51, %v13498_v51 }
 0x893   :  { %v6209_v35 = vadd.f32 %v5745_v56, %v5737_v55  ;;  %v6172_v9 = vadd.f32 %v5744_v36, %v5736_v14 }
 0x894   :  { %v6246_v37 = vadd.f32 %v5746_v19, %v5738_v49 }
 0x895   :  { %v13512_v10 = vpop.f32.mrb[180].mxu1 }
 0x896   :  { %v5576_v6 = vadd.f32 %v5575_v46, %v13512_v10  ;;  %v5751_v43 = vmul.f32 %v13512_v10, %v13512_v10  ;;  %v13517_v3 = vpop.f32.mrb[212].mxu0  ;;  %v13519_v13 = vpop.f32.mrb[181].mxu1 }
 0x897   :  { %v5650_v55 = vadd.f32 %v5649_v1, %v13517_v3  ;;  %v5753_v59 = vmul.f32 %v13517_v3, %v13517_v3  ;;  %v5613_v56 = vadd.f32 %v5612_v38, %v13519_v13  ;;  %v5752_v14 = vmul.f32 %v13519_v13, %v13519_v13  ;;  %v13527_v36 = vpop.f32.mrb[213].mxu0  ;;  %v13529_v46 = vpop.f32.mrb[182].mxu1 }
 0x898   :  { %v6136_v49 = vadd.f32 %v6135_v5, %v5751_v43  ;;  %v5687_v19 = vadd.f32 %v5686_v8, %v13527_v36  ;;  %v5754_v61 = vmul.f32 %v13527_v36, %v13527_v36  ;;  %v5577_v1 = vadd.f32 %v5576_v6, %v13529_v46  ;;  %v13535_v2 = vpop.f32.mrb[214].mxu0  ;;  %v13537_v27 = vpop.f32.mrb[183].mxu1 }
 0x899   :  { %v6210_v38 = vadd.f32 %v6209_v35, %v5753_v59  ;;  %v6173_v58 = vadd.f32 %v6172_v9, %v5752_v14  ;;  %v5759_v53 = vmul.f32 %v13529_v46, %v13529_v46  ;;  %v13543_v5 = vpop.f32.mrb[215].mxu0  ;;  %v5651_v43 = vadd.f32 %v5650_v55, %v13535_v2 }
 0x89a   :  { %v6247_v8 = vadd.f32 %v6246_v37, %v5754_v61  ;;  %v5761_v6 = vmul.f32 %v13535_v2, %v13535_v2  ;;  %v5614_v35 = vadd.f32 %v5613_v56, %v13537_v27  ;;  %v5760_v9 = vmul.f32 %v13537_v27, %v13537_v27 }
 0x89b   :  { %v6137_v22 = vadd.f32 %v6136_v49, %v5759_v53  ;;  %v5688_v61 = vadd.f32 %v5687_v19, %v13543_v5  ;;  %v5762_v37 = vmul.f32 %v13543_v5, %v13543_v5 }
 0x89c   :  { %v6211_v14 = vadd.f32 %v6210_v38, %v5761_v6  ;;  %v6174_v28 = vadd.f32 %v6173_v58, %v5760_v9 }
 0x89d   :  { %v13560_v23 = vpop.f32.mrb[184].mxu1  ;;  %v6248_v53 = vadd.f32 %v6247_v8, %v5762_v37 }
 0x89e   :  { %17934 = vst [vmem:[#allocation44_spill] sm:$0xff] %v13560_v23  ;;  %v5578_v56 = vadd.f32 %v5577_v1, %v13560_v23  ;;  %v5767_v49 = vmul.f32 %v13560_v23, %v13560_v23  ;;  %v13565_v33 = vpop.f32.mrb[216].mxu0  ;;  %v13567_v38 = vpop.f32.mrb[185].mxu1 }
 0x89f   :  { %17935 = vst [vmem:[#allocation144_spill] sm:$0xff] %v13565_v33  ;;  %17936 = vst [vmem:[#allocation145_spill] sm:$0xff] %v13567_v38  ;;  %v5652_v19 = vadd.f32 %v5651_v43, %v13565_v33  ;;  %v5769_v6 = vmul.f32 %v13565_v33, %v13565_v33  ;;  %v5615_v55 = vadd.f32 %v5614_v35, %v13567_v38  ;;  %v13575_v8 = vpop.f32.mrb[217].mxu0  ;;  %v13577_v1 = vpop.f32.mrb[186].mxu1 }
 0x8a0   :  { %v5768_v58 = vmul.f32 %v13567_v38, %v13567_v38  ;;  %17937 = vst [vmem:[#allocation146_spill] sm:$0xff] %v13575_v8  ;;  %17938 = vst [vmem:[#allocation147_spill] sm:$0xff] %v13577_v1  ;;  %v6138_v9 = vadd.f32 %v6137_v22, %v5767_v49  ;;  %v5689_v37 = vadd.f32 %v5688_v61, %v13575_v8  ;;  %v13583_v11 = vpop.f32.mrb[218].mxu0  ;;  %v13585_v42 = vpop.f32.mrb[187].mxu1 }
 0x8a1   :  { %v5770_v59 = vmul.f32 %v13575_v8, %v13575_v8  ;;  %v5579_v43 = vadd.f32 %v5578_v56, %v13577_v1  ;;  %17939 = vst [vmem:[#allocation148_spill] sm:$0xff] %v13583_v11  ;;  %17940 = vst [vmem:[#allocation149_spill] sm:$0xff] %v13585_v42  ;;  %v6212_v35 = vadd.f32 %v6211_v14, %v5769_v6  ;;  %v13591_v22 = vpop.f32.mrb[219].mxu0 }
 0x8a2   :  { %v6175_v48 = vadd.f32 %v6174_v28, %v5768_v58  ;;  %v5775_v32 = vmul.f32 %v13577_v1, %v13577_v1  ;;  %17941 = vst [vmem:[#allocation150_spill] sm:$0xff] %v13591_v22  ;;  %v5653_v49 = vadd.f32 %v5652_v19, %v13583_v11  ;;  %v5777_v56 = vmul.f32 %v13583_v11, %v13583_v11 }
 0x8a3   :  { %v6249_v61 = vadd.f32 %v6248_v53, %v5770_v59  ;;  %v5616_v28 = vadd.f32 %v5615_v55, %v13585_v42  ;;  %v5776_v14 = vmul.f32 %v13585_v42, %v13585_v42  ;;  %v5690_v59 = vadd.f32 %v5689_v37, %v13591_v22 }
 0x8a4   :  { %v6139_v40 = vadd.f32 %v6138_v9, %v5775_v32  ;;  %v6213_v58 = vadd.f32 %v6212_v35, %v5777_v56  ;;  %v5778_v53 = vmul.f32 %v13591_v22, %v13591_v22 }
 0x8a5   :  { %v6176_v16 = vadd.f32 %v6175_v48, %v5776_v14  ;;  %v13608_v47 = vpop.f32.mrb[188].mxu1 }
 0x8a6   :  { %17942 = vst [vmem:[#allocation151_spill] sm:$0xff] %v13608_v47  ;;  %v6250_v32 = vadd.f32 %v6249_v61, %v5778_v53  ;;  %v5580_v55 = vadd.f32 %v5579_v43, %v13608_v47  ;;  %v5783_v9 = vmul.f32 %v13608_v47, %v13608_v47  ;;  %v13613_v39 = vpop.f32.mrb[220].mxu0  ;;  %v13615_v35 = vpop.f32.mrb[189].mxu1 }
 0x8a7   :  { %17943 = vst [vmem:[#allocation152_spill] sm:$0xff] %v13613_v39  ;;  %17944 = vst [vmem:[#allocation153_spill] sm:$0xff] %v13615_v35  ;;  %v5654_v37 = vadd.f32 %v5653_v49, %v13613_v39  ;;  %v5785_v56 = vmul.f32 %v13613_v39, %v13613_v39  ;;  %v5617_v19 = vadd.f32 %v5616_v28, %v13615_v35  ;;  %v13623_v61 = vpop.f32.mrb[221].mxu0  ;;  %v13625_v43 = vpop.f32.mrb[190].mxu1 }
 0x8a8   :  { %v5784_v48 = vmul.f32 %v13615_v35, %v13615_v35  ;;  %17945 = vst [vmem:[#allocation154_spill] sm:$0xff] %v13623_v61  ;;  %17946 = vst [vmem:[#allocation155_spill] sm:$0xff] %v13625_v43  ;;  %v6140_v14 = vadd.f32 %v6139_v40, %v5783_v9  ;;  %v5691_v53 = vadd.f32 %v5690_v59, %v13623_v61  ;;  %v13631_v21 = vpop.f32.mrb[222].mxu0  ;;  %v13633_v30 = vpop.f32.mrb[191].mxu1 }
 0x8a9   :  { %v5786_v6 = vmul.f32 %v13623_v61, %v13623_v61  ;;  %v5581_v49 = vadd.f32 %v5580_v55, %v13625_v43  ;;  %17947 = vst [vmem:[#allocation156_spill] sm:$0xff] %v13631_v21  ;;  %17948 = vst [vmem:[#allocation157_spill] sm:$0xff] %v13633_v30  ;;  %v6214_v28 = vadd.f32 %v6213_v58, %v5785_v56  ;;  %v13639_v40 = vpop.f32.mrb[223].mxu0 }
 0x8aa   :  { %v6177_v15 = vadd.f32 %v6176_v16, %v5784_v48  ;;  %v5791_v4 = vmul.f32 %v13625_v43, %v13625_v43  ;;  %17949 = vst [vmem:[#allocation158_spill] sm:$0xff] %v13639_v40  ;;  %v5655_v9 = vadd.f32 %v5654_v37, %v13631_v21  ;;  %v5793_v55 = vmul.f32 %v13631_v21, %v13631_v21 }
 0x8ab   :  { %v6251_v59 = vadd.f32 %v6250_v32, %v5786_v6  ;;  %v5618_v16 = vadd.f32 %v5617_v19, %v13633_v30  ;;  %v5792_v58 = vmul.f32 %v13633_v30, %v13633_v30  ;;  %v5692_v6 = vadd.f32 %v5691_v53, %v13639_v40 }
 0x8ac   :  { %v6141_v33 = vadd.f32 %v6140_v14, %v5791_v4  ;;  %v6215_v48 = vadd.f32 %v6214_v28, %v5793_v55  ;;  %v5794_v32 = vmul.f32 %v13639_v40, %v13639_v40 }
 0x8ad   :  { %v6178_v8 = vadd.f32 %v6177_v15, %v5792_v58  ;;  %v13656_v22 = vpop.f32.mrb[192].mxu1 }
 0x8ae   :  { %17950 = vst [vmem:[#allocation159_spill] sm:$0xff] %v13656_v22  ;;  %v6252_v4 = vadd.f32 %v6251_v59, %v5794_v32  ;;  %v5582_v19 = vadd.f32 %v5581_v49, %v13656_v22  ;;  %v5799_v14 = vmul.f32 %v13656_v22, %v13656_v22  ;;  %v13661_v39 = vpop.f32.mrb[224].mxu0  ;;  %v13663_v28 = vpop.f32.mrb[193].mxu1 }
 0x8af   :  { %17951 = vst [vmem:[#allocation160_spill] sm:$0xff] %v13661_v39  ;;  %17952 = vst [vmem:[#allocation161_spill] sm:$0xff] %v13663_v28  ;;  %v5656_v53 = vadd.f32 %v5655_v9, %v13661_v39  ;;  %v5801_v55 = vmul.f32 %v13661_v39, %v13661_v39  ;;  %v5619_v37 = vadd.f32 %v5618_v16, %v13663_v28  ;;  %v13671_v59 = vpop.f32.mrb[225].mxu0  ;;  %v13673_v49 = vpop.f32.mrb[194].mxu1 }
 0x8b0   :  { %v5800_v15 = vmul.f32 %v13663_v28, %v13663_v28  ;;  %17953 = vst [vmem:[#allocation162_spill] sm:$0xff] %v13671_v59  ;;  %17954 = vst [vmem:[#allocation163_spill] sm:$0xff] %v13673_v49  ;;  %v6142_v58 = vadd.f32 %v6141_v33, %v5799_v14  ;;  %v5693_v32 = vadd.f32 %v5692_v6, %v13671_v59  ;;  %v13679_v61 = vpop.f32.mrb[226].mxu0  ;;  %v13681_v40 = vpop.f32.mrb[195].mxu1 }
 0x8b1   :  { %v5802_v56 = vmul.f32 %v13671_v59, %v13671_v59  ;;  %v5583_v9 = vadd.f32 %v5582_v19, %v13673_v49  ;;  %17955 = vst [vmem:[#allocation164_spill] sm:$0xff] %v13679_v61  ;;  %17956 = vst [vmem:[#allocation165_spill] sm:$0xff] %v13681_v40  ;;  %v6216_v16 = vadd.f32 %v6215_v48, %v5801_v55  ;;  %v13687_v33 = vpop.f32.mrb[227].mxu0 }
 0x8b2   :  { %v6179_v21 = vadd.f32 %v6178_v8, %v5800_v15  ;;  %v5807_v35 = vmul.f32 %v13673_v49, %v13673_v49  ;;  %17957 = vst [vmem:[#allocation166_spill] sm:$0xff] %v13687_v33  ;;  %v5657_v14 = vadd.f32 %v5656_v53, %v13679_v61  ;;  %v5809_v19 = vmul.f32 %v13679_v61, %v13679_v61 }
 0x8b3   :  { %v6253_v6 = vadd.f32 %v6252_v4, %v5802_v56  ;;  %v5620_v8 = vadd.f32 %v5619_v37, %v13681_v40  ;;  %v5808_v48 = vmul.f32 %v13681_v40, %v13681_v40  ;;  %v5694_v56 = vadd.f32 %v5693_v32, %v13687_v33 }
 0x8b4   :  { %v6143_v43 = vadd.f32 %v6142_v58, %v5807_v35  ;;  %v6217_v15 = vadd.f32 %v6216_v16, %v5809_v19  ;;  %v5810_v4 = vmul.f32 %v13687_v33, %v13687_v33 }
 0x8b5   :  { %v6180_v30 = vadd.f32 %v6179_v21, %v5808_v48  ;;  %v13704_v47 = vpop.f32.mrb[196].mxu1 }
 0x8b6   :  { %17958 = vst [vmem:[#allocation167_spill] sm:$0xff] %v13704_v47  ;;  %v6254_v35 = vadd.f32 %v6253_v6, %v5810_v4  ;;  %v5584_v37 = vadd.f32 %v5583_v9, %v13704_v47  ;;  %v5815_v58 = vmul.f32 %v13704_v47, %v13704_v47  ;;  %v13709_v39 = vpop.f32.mrb[228].mxu0  ;;  %v13711_v16 = vpop.f32.mrb[197].mxu1 }
 0x8b7   :  { %17959 = vst [vmem:[#allocation168_spill] sm:$0xff] %v13709_v39  ;;  %17960 = vst [vmem:[#allocation169_spill] sm:$0xff] %v13711_v16  ;;  %v5658_v32 = vadd.f32 %v5657_v14, %v13709_v39  ;;  %v5817_v19 = vmul.f32 %v13709_v39, %v13709_v39  ;;  %v5621_v53 = vadd.f32 %v5620_v8, %v13711_v16  ;;  %v13719_v6 = vpop.f32.mrb[229].mxu0  ;;  %v13721_v9 = vpop.f32.mrb[198].mxu1 }
 0x8b8   :  { %v5816_v21 = vmul.f32 %v13711_v16, %v13711_v16  ;;  %17961 = vst [vmem:[#allocation170_spill] sm:$0xff] %v13719_v6  ;;  %17962 = vst [vmem:[#allocation171_spill] sm:$0xff] %v13721_v9  ;;  %v6144_v48 = vadd.f32 %v6143_v43, %v5815_v58  ;;  %v5695_v4 = vadd.f32 %v5694_v56, %v13719_v6  ;;  %v13727_v59 = vpop.f32.mrb[230].mxu0  ;;  %v13729_v33 = vpop.f32.mrb[199].mxu1 }
 0x8b9   :  { %v5818_v55 = vmul.f32 %v13719_v6, %v13719_v6  ;;  %v5585_v14 = vadd.f32 %v5584_v37, %v13721_v9  ;;  %17963 = vst [vmem:[#allocation172_spill] sm:$0xff] %v13727_v59  ;;  %17964 = vst [vmem:[#allocation173_spill] sm:$0xff] %v13729_v33  ;;  %v6218_v8 = vadd.f32 %v6217_v15, %v5817_v19  ;;  %v13735_v43 = vpop.f32.mrb[231].mxu0 }
 0x8ba   :  { %v6181_v61 = vadd.f32 %v6180_v30, %v5816_v21  ;;  %v5823_v28 = vmul.f32 %v13721_v9, %v13721_v9  ;;  %17965 = vst [vmem:[#allocation174_spill] sm:$0xff] %v13735_v43  ;;  %v5659_v58 = vadd.f32 %v5658_v32, %v13727_v59  ;;  %v5825_v37 = vmul.f32 %v13727_v59, %v13727_v59 }
 0x8bb   :  { %v6255_v56 = vadd.f32 %v6254_v35, %v5818_v55  ;;  %v5622_v30 = vadd.f32 %v5621_v53, %v13729_v33  ;;  %v5824_v15 = vmul.f32 %v13729_v33, %v13729_v33  ;;  %v5696_v55 = vadd.f32 %v5695_v4, %v13735_v43 }
 0x8bc   :  { %v6145_v49 = vadd.f32 %v6144_v48, %v5823_v28  ;;  %v6219_v21 = vadd.f32 %v6218_v8, %v5825_v37  ;;  %v5826_v35 = vmul.f32 %v13735_v43, %v13735_v43 }
 0x8bd   :  { %v6182_v40 = vadd.f32 %v6181_v61, %v5824_v15  ;;  %v13752_v22 = vpop.f32.mrb[200].mxu1 }
 0x8be   :  { %17966 = vst [vmem:[#allocation175_spill] sm:$0xff] %v13752_v22  ;;  %v6256_v28 = vadd.f32 %v6255_v56, %v5826_v35  ;;  %v5586_v53 = vadd.f32 %v5585_v14, %v13752_v22  ;;  %v5831_v48 = vmul.f32 %v13752_v22, %v13752_v22  ;;  %v13757_v39 = vpop.f32.mrb[232].mxu0  ;;  %v13759_v8 = vpop.f32.mrb[201].mxu1 }
 0x8bf   :  { %17967 = vst [vmem:[#allocation176_spill] sm:$0xff] %v13757_v39  ;;  %17968 = vst [vmem:[#allocation177_spill] sm:$0xff] %v13759_v8  ;;  %v5660_v4 = vadd.f32 %v5659_v58, %v13757_v39  ;;  %v5833_v37 = vmul.f32 %v13757_v39, %v13757_v39  ;;  %v5623_v32 = vadd.f32 %v5622_v30, %v13759_v8  ;;  %v13767_v56 = vpop.f32.mrb[233].mxu0  ;;  %v13769_v14 = vpop.f32.mrb[202].mxu1 }
 0x8c0   :  { %v5832_v61 = vmul.f32 %v13759_v8, %v13759_v8  ;;  %17969 = vst [vmem:[#allocation178_spill] sm:$0xff] %v13767_v56  ;;  %17970 = vst [vmem:[#allocation179_spill] sm:$0xff] %v13769_v14  ;;  %v6146_v15 = vadd.f32 %v6145_v49, %v5831_v48  ;;  %v5697_v35 = vadd.f32 %v5696_v55, %v13767_v56  ;;  %v13775_v6 = vpop.f32.mrb[234].mxu0  ;;  %v13777_v43 = vpop.f32.mrb[203].mxu1 }
 0x8c1   :  { %v5834_v19 = vmul.f32 %v13767_v56, %v13767_v56  ;;  %v5587_v58 = vadd.f32 %v5586_v53, %v13769_v14  ;;  %17971 = vst [vmem:[#allocation180_spill] sm:$0xff] %v13775_v6  ;;  %17972 = vst [vmem:[#allocation181_spill] sm:$0xff] %v13777_v43  ;;  %v6220_v30 = vadd.f32 %v6219_v21, %v5833_v37  ;;  %v13783_v49 = vpop.f32.mrb[235].mxu0 }
 0x8c2   :  { %v6183_v59 = vadd.f32 %v6182_v40, %v5832_v61  ;;  %v5839_v16 = vmul.f32 %v13769_v14, %v13769_v14  ;;  %17973 = vst [vmem:[#allocation182_spill] sm:$0xff] %v13783_v49  ;;  %v5661_v48 = vadd.f32 %v5660_v4, %v13775_v6  ;;  %v5841_v53 = vmul.f32 %v13775_v6, %v13775_v6 }
 0x8c3   :  { %v6257_v55 = vadd.f32 %v6256_v28, %v5834_v19  ;;  %v5624_v40 = vadd.f32 %v5623_v32, %v13777_v43  ;;  %v5840_v21 = vmul.f32 %v13777_v43, %v13777_v43  ;;  %v5698_v19 = vadd.f32 %v5697_v35, %v13783_v49 }
 0x8c4   :  { %v6147_v9 = vadd.f32 %v6146_v15, %v5839_v16  ;;  %v6221_v61 = vadd.f32 %v6220_v30, %v5841_v53  ;;  %v5842_v28 = vmul.f32 %v13783_v49, %v13783_v49 }
 0x8c5   :  { %v6184_v33 = vadd.f32 %v6183_v59, %v5840_v21  ;;  %v13800_v47 = vpop.f32.mrb[204].mxu1 }
 0x8c6   :  { %17974 = vst [vmem:[#allocation183_spill] sm:$0xff] %v13800_v47  ;;  %v6258_v16 = vadd.f32 %v6257_v55, %v5842_v28  ;;  %v5588_v32 = vadd.f32 %v5587_v58, %v13800_v47  ;;  %v5847_v15 = vmul.f32 %v13800_v47, %v13800_v47  ;;  %v13805_v39 = vpop.f32.mrb[236].mxu0  ;;  %v13807_v30 = vpop.f32.mrb[205].mxu1 }
 0x8c7   :  { %17975 = vst [vmem:[#allocation184_spill] sm:$0xff] %v13805_v39  ;;  %17976 = vst [vmem:[#allocation185_spill] sm:$0xff] %v13807_v30  ;;  %v5662_v35 = vadd.f32 %v5661_v48, %v13805_v39  ;;  %v5849_v53 = vmul.f32 %v13805_v39, %v13805_v39  ;;  %v5625_v4 = vadd.f32 %v5624_v40, %v13807_v30  ;;  %v13815_v55 = vpop.f32.mrb[237].mxu0  ;;  %v13817_v58 = vpop.f32.mrb[206].mxu1 }
 0x8c8   :  { %v5848_v59 = vmul.f32 %v13807_v30, %v13807_v30  ;;  %17977 = vst [vmem:[#allocation186_spill] sm:$0xff] %v13815_v55  ;;  %17978 = vst [vmem:[#allocation187_spill] sm:$0xff] %v13817_v58  ;;  %v6148_v21 = vadd.f32 %v6147_v9, %v5847_v15  ;;  %v5699_v28 = vadd.f32 %v5698_v19, %v13815_v55  ;;  %v13823_v56 = vpop.f32.mrb[238].mxu0  ;;  %v13825_v49 = vpop.f32.mrb[207].mxu1 }
 0x8c9   :  { %v5850_v37 = vmul.f32 %v13815_v55, %v13815_v55  ;;  %v5589_v48 = vadd.f32 %v5588_v32, %v13817_v58  ;;  %17979 = vst [vmem:[#allocation188_spill] sm:$0xff] %v13823_v56  ;;  %17980 = vst [vmem:[#allocation189_spill] sm:$0xff] %v13825_v49  ;;  %v6222_v40 = vadd.f32 %v6221_v61, %v5849_v53  ;;  %v13831_v9 = vpop.f32.mrb[239].mxu0 }
 0x8ca   :  { %v6185_v6 = vadd.f32 %v6184_v33, %v5848_v59  ;;  %v5855_v8 = vmul.f32 %v13817_v58, %v13817_v58  ;;  %17981 = vst [vmem:[#allocation190_spill] sm:$0xff] %v13831_v9  ;;  %v5663_v15 = vadd.f32 %v5662_v35, %v13823_v56  ;;  %v5857_v32 = vmul.f32 %v13823_v56, %v13823_v56 }
 0x8cb   :  { %v6259_v19 = vadd.f32 %v6258_v16, %v5850_v37  ;;  %v5626_v33 = vadd.f32 %v5625_v4, %v13825_v49  ;;  %v5856_v61 = vmul.f32 %v13825_v49, %v13825_v49  ;;  %v5700_v37 = vadd.f32 %v5699_v28, %v13831_v9 }
 0x8cc   :  { %v6149_v14 = vadd.f32 %v6148_v21, %v5855_v8  ;;  %v6223_v59 = vadd.f32 %v6222_v40, %v5857_v32  ;;  %v5858_v16 = vmul.f32 %v13831_v9, %v13831_v9 }
 0x8cd   :  { %v6186_v43 = vadd.f32 %v6185_v6, %v5856_v61  ;;  %v13848_v22 = vpop.f32.mrb[208].mxu1 }
 0x8ce   :  { %17982 = vst [vmem:[#allocation191_spill] sm:$0xff] %v13848_v22  ;;  %v6260_v8 = vadd.f32 %v6259_v19, %v5858_v16  ;;  %v5590_v4 = vadd.f32 %v5589_v48, %v13848_v22  ;;  %v5863_v21 = vmul.f32 %v13848_v22, %v13848_v22  ;;  %v13853_v39 = vpop.f32.mrb[240].mxu0  ;;  %v13855_v40 = vpop.f32.mrb[209].mxu1 }
 0x8cf   :  { %17983 = vst [vmem:[#allocation192_spill] sm:$0xff] %v13853_v39  ;;  %17984 = vst [vmem:[#allocation193_spill] sm:$0xff] %v13855_v40  ;;  %v5664_v28 = vadd.f32 %v5663_v15, %v13853_v39  ;;  %v5865_v32 = vmul.f32 %v13853_v39, %v13853_v39  ;;  %v5627_v35 = vadd.f32 %v5626_v33, %v13855_v40  ;;  %v13863_v19 = vpop.f32.mrb[241].mxu0  ;;  %v13865_v48 = vpop.f32.mrb[210].mxu1 }
 0x8d0   :  { %v5864_v6 = vmul.f32 %v13855_v40, %v13855_v40  ;;  %17985 = vst [vmem:[#allocation194_spill] sm:$0xff] %v13863_v19  ;;  %17986 = vst [vmem:[#allocation195_spill] sm:$0xff] %v13865_v48  ;;  %v6150_v61 = vadd.f32 %v6149_v14, %v5863_v21  ;;  %v5701_v16 = vadd.f32 %v5700_v37, %v13863_v19  ;;  %v13871_v55 = vpop.f32.mrb[242].mxu0  ;;  %v13873_v9 = vpop.f32.mrb[211].mxu1 }
 0x8d1   :  { %v5866_v53 = vmul.f32 %v13863_v19, %v13863_v19  ;;  %v5591_v15 = vadd.f32 %v5590_v4, %v13865_v48  ;;  %17987 = vst [vmem:[#allocation196_spill] sm:$0xff] %v13871_v55  ;;  %17988 = vst [vmem:[#allocation197_spill] sm:$0xff] %v13873_v9  ;;  %v6224_v33 = vadd.f32 %v6223_v59, %v5865_v32  ;;  %v13879_v14 = vpop.f32.mrb[243].mxu0 }
 0x8d2   :  { %v6187_v56 = vadd.f32 %v6186_v43, %v5864_v6  ;;  %v5871_v30 = vmul.f32 %v13865_v48, %v13865_v48  ;;  %17989 = vst [vmem:[#allocation198_spill] sm:$0xff] %v13879_v14  ;;  %v5665_v21 = vadd.f32 %v5664_v28, %v13871_v55  ;;  %v5873_v4 = vmul.f32 %v13871_v55, %v13871_v55 }
 0x8d3   :  { %v6261_v37 = vadd.f32 %v6260_v8, %v5866_v53  ;;  %v5628_v43 = vadd.f32 %v5627_v35, %v13873_v9  ;;  %v5872_v59 = vmul.f32 %v13873_v9, %v13873_v9  ;;  %v5702_v53 = vadd.f32 %v5701_v16, %v13879_v14 }
 0x8d4   :  { %v6151_v58 = vadd.f32 %v6150_v61, %v5871_v30  ;;  %v6225_v6 = vadd.f32 %v6224_v33, %v5873_v4  ;;  %v5874_v8 = vmul.f32 %v13879_v14, %v13879_v14 }
 0x8d5   :  { %v6188_v49 = vadd.f32 %v6187_v56, %v5872_v59  ;;  %v13896_v47 = vpop.f32.mrb[212].mxu1 }
 0x8d6   :  { %17990 = vst [vmem:[#allocation199_spill] sm:$0xff] %v13896_v47  ;;  %v6262_v30 = vadd.f32 %v6261_v37, %v5874_v8  ;;  %v5592_v35 = vadd.f32 %v5591_v15, %v13896_v47  ;;  %v5879_v61 = vmul.f32 %v13896_v47, %v13896_v47  ;;  %v13901_v39 = vpop.f32.mrb[244].mxu0  ;;  %v13903_v33 = vpop.f32.mrb[213].mxu1 }
 0x8d7   :  { %17991 = vst [vmem:[#allocation200_spill] sm:$0xff] %v13901_v39  ;;  %17992 = vst [vmem:[#allocation201_spill] sm:$0xff] %v13903_v33  ;;  %v5666_v16 = vadd.f32 %v5665_v21, %v13901_v39  ;;  %v5881_v4 = vmul.f32 %v13901_v39, %v13901_v39  ;;  %v5629_v28 = vadd.f32 %v5628_v43, %v13903_v33  ;;  %v13911_v37 = vpop.f32.mrb[245].mxu0  ;;  %v13913_v15 = vpop.f32.mrb[214].mxu1 }
 0x8d8   :  { %v5880_v56 = vmul.f32 %v13903_v33, %v13903_v33  ;;  %17993 = vst [vmem:[#allocation202_spill] sm:$0xff] %v13911_v37  ;;  %17994 = vst [vmem:[#allocation203_spill] sm:$0xff] %v13913_v15  ;;  %v6152_v59 = vadd.f32 %v6151_v58, %v5879_v61  ;;  %v5703_v8 = vadd.f32 %v5702_v53, %v13911_v37  ;;  %v13919_v19 = vpop.f32.mrb[246].mxu0  ;;  %v13921_v14 = vpop.f32.mrb[215].mxu1 }
 0x8d9   :  { %v5882_v32 = vmul.f32 %v13911_v37, %v13911_v37  ;;  %v5593_v21 = vadd.f32 %v5592_v35, %v13913_v15  ;;  %17995 = vst [vmem:[#allocation204_spill] sm:$0xff] %v13919_v19  ;;  %17996 = vst [vmem:[#allocation205_spill] sm:$0xff] %v13921_v14  ;;  %v6226_v43 = vadd.f32 %v6225_v6, %v5881_v4  ;;  %v13927_v58 = vpop.f32.mrb[247].mxu0 }
 0x8da   :  { %v6189_v55 = vadd.f32 %v6188_v49, %v5880_v56  ;;  %v5887_v40 = vmul.f32 %v13913_v15, %v13913_v15  ;;  %17997 = vst [vmem:[#allocation206_spill] sm:$0xff] %v13927_v58  ;;  %v5667_v61 = vadd.f32 %v5666_v16, %v13919_v19  ;;  %v5889_v35 = vmul.f32 %v13919_v19, %v13919_v19 }
 0x8db   :  { %v6263_v53 = vadd.f32 %v6262_v30, %v5882_v32  ;;  %v5630_v49 = vadd.f32 %v5629_v28, %v13921_v14  ;;  %v5888_v6 = vmul.f32 %v13921_v14, %v13921_v14  ;;  %v5704_v32 = vadd.f32 %v5703_v8, %v13927_v58 }
 0x8dc   :  { %v6153_v48 = vadd.f32 %v6152_v59, %v5887_v40  ;;  %v6227_v56 = vadd.f32 %v6226_v43, %v5889_v35  ;;  %v5890_v30 = vmul.f32 %v13927_v58, %v13927_v58 }
 0x8dd   :  { %v6190_v9 = vadd.f32 %v6189_v55, %v5888_v6  ;;  %v13944_v22 = vpop.f32.mrb[216].mxu1 }
 0x8de   :  { %17998 = vst [vmem:[#allocation207_spill] sm:$0xff] %v13944_v22  ;;  %v6264_v40 = vadd.f32 %v6263_v53, %v5890_v30  ;;  %v5594_v28 = vadd.f32 %v5593_v21, %v13944_v22  ;;  %v5895_v59 = vmul.f32 %v13944_v22, %v13944_v22  ;;  %v13949_v39 = vpop.f32.mrb[248].mxu0  ;;  %v13951_v43 = vpop.f32.mrb[217].mxu1 }
 0x8df   :  { %17999 = vst [vmem:[#allocation208_spill] sm:$0xff] %v13949_v39  ;;  %18000 = vst [vmem:[#allocation209_spill] sm:$0xff] %v13951_v43  ;;  %v5668_v8 = vadd.f32 %v5667_v61, %v13949_v39  ;;  %v5897_v35 = vmul.f32 %v13949_v39, %v13949_v39  ;;  %v5631_v16 = vadd.f32 %v5630_v49, %v13951_v43  ;;  %v13959_v53 = vpop.f32.mrb[249].mxu0  ;;  %v13961_v21 = vpop.f32.mrb[218].mxu1 }
 0x8e0   :  { %v5896_v55 = vmul.f32 %v13951_v43, %v13951_v43  ;;  %18001 = vst [vmem:[#allocation210_spill] sm:$0xff] %v13959_v53  ;;  %18002 = vst [vmem:[#allocation211_spill] sm:$0xff] %v13961_v21  ;;  %v6154_v6 = vadd.f32 %v6153_v48, %v5895_v59  ;;  %v5705_v30 = vadd.f32 %v5704_v32, %v13959_v53  ;;  %v13967_v37 = vpop.f32.mrb[250].mxu0  ;;  %v13969_v58 = vpop.f32.mrb[219].mxu1 }
 0x8e1   :  { %v5898_v4 = vmul.f32 %v13959_v53, %v13959_v53  ;;  %v5595_v61 = vadd.f32 %v5594_v28, %v13961_v21  ;;  %18003 = vst [vmem:[#allocation212_spill] sm:$0xff] %v13967_v37  ;;  %18004 = vst [vmem:[#allocation213_spill] sm:$0xff] %v13969_v58  ;;  %v6228_v49 = vadd.f32 %v6227_v56, %v5897_v35  ;;  %v13975_v48 = vpop.f32.mrb[251].mxu0 }
 0x8e2   :  { %v6191_v19 = vadd.f32 %v6190_v9, %v5896_v55  ;;  %v5903_v33 = vmul.f32 %v13961_v21, %v13961_v21  ;;  %18005 = vst [vmem:[#allocation214_spill] sm:$0xff] %v13975_v48  ;;  %v5669_v59 = vadd.f32 %v5668_v8, %v13967_v37  ;;  %v5905_v28 = vmul.f32 %v13967_v37, %v13967_v37 }
 0x8e3   :  { %v6265_v32 = vadd.f32 %v6264_v40, %v5898_v4  ;;  %v5632_v9 = vadd.f32 %v5631_v16, %v13969_v58  ;;  %v5904_v56 = vmul.f32 %v13969_v58, %v13969_v58  ;;  %v5706_v4 = vadd.f32 %v5705_v30, %v13975_v48 }
 0x8e4   :  { %v6155_v15 = vadd.f32 %v6154_v6, %v5903_v33  ;;  %v6229_v55 = vadd.f32 %v6228_v49, %v5905_v28  ;;  %v5906_v40 = vmul.f32 %v13975_v48, %v13975_v48 }
 0x8e5   :  { %v6192_v14 = vadd.f32 %v6191_v19, %v5904_v56  ;;  %v13992_v47 = vpop.f32.mrb[220].mxu1 }
 0x8e6   :  { %18006 = vst [vmem:[#allocation215_spill] sm:$0xff] %v13992_v47  ;;  %v6266_v33 = vadd.f32 %v6265_v32, %v5906_v40  ;;  %v5596_v16 = vadd.f32 %v5595_v61, %v13992_v47  ;;  %v5911_v6 = vmul.f32 %v13992_v47, %v13992_v47  ;;  %v13997_v39 = vpop.f32.mrb[252].mxu0  ;;  %v13999_v49 = vpop.f32.mrb[221].mxu1 }
 0x8e7   :  { %18007 = vst [vmem:[#allocation216_spill] sm:$0xff] %v13997_v39  ;;  %18008 = vst [vmem:[#allocation217_spill] sm:$0xff] %v13999_v49  ;;  %v5670_v30 = vadd.f32 %v5669_v59, %v13997_v39  ;;  %v5913_v28 = vmul.f32 %v13997_v39, %v13997_v39  ;;  %v5633_v8 = vadd.f32 %v5632_v9, %v13999_v49  ;;  %v14007_v32 = vpop.f32.mrb[253].mxu0  ;;  %v14009_v61 = vpop.f32.mrb[222].mxu1 }
 0x8e8   :  { %v5912_v19 = vmul.f32 %v13999_v49, %v13999_v49  ;;  %18009 = vst [vmem:[#allocation218_spill] sm:$0xff] %v14007_v32  ;;  %18010 = vst [vmem:[#allocation219_spill] sm:$0xff] %v14009_v61  ;;  %v6156_v56 = vadd.f32 %v6155_v15, %v5911_v6  ;;  %v5707_v40 = vadd.f32 %v5706_v4, %v14007_v32  ;;  %v14015_v53 = vpop.f32.mrb[254].mxu0  ;;  %v14017_v48 = vpop.f32.mrb[223].mxu1 }
 0x8e9   :  { %v5914_v35 = vmul.f32 %v14007_v32, %v14007_v32  ;;  %v5597_v59 = vadd.f32 %v5596_v16, %v14009_v61  ;;  %18011 = vst [vmem:[#allocation220_spill] sm:$0xff] %v14015_v53  ;;  %18012 = vst [vmem:[#allocation221_spill] sm:$0xff] %v14017_v48  ;;  %v6230_v9 = vadd.f32 %v6229_v55, %v5913_v28  ;;  %v14023_v15 = vpop.f32.mrb[255].mxu0 }
 0x8ea   :  { %v6193_v37 = vadd.f32 %v6192_v14, %v5912_v19  ;;  %v5919_v43 = vmul.f32 %v14009_v61, %v14009_v61  ;;  %18013 = vst [vmem:[#allocation222_spill] sm:$0xff] %v14023_v15  ;;  %v5671_v6 = vadd.f32 %v5670_v30, %v14015_v53  ;;  %v5921_v16 = vmul.f32 %v14015_v53, %v14015_v53 }
 0x8eb   :  { %v6267_v4 = vadd.f32 %v6266_v33, %v5914_v35  ;;  %v5634_v14 = vadd.f32 %v5633_v8, %v14017_v48  ;;  %v5920_v55 = vmul.f32 %v14017_v48, %v14017_v48  ;;  %v5708_v35 = vadd.f32 %v5707_v40, %v14023_v15 }
 0x8ec   :  { %v6157_v21 = vadd.f32 %v6156_v56, %v5919_v43  ;;  %v6231_v19 = vadd.f32 %v6230_v9, %v5921_v16  ;;  %v5922_v33 = vmul.f32 %v14023_v15, %v14023_v15 }
 0x8ed   :  { %v6194_v58 = vadd.f32 %v6193_v37, %v5920_v55  ;;  %v14040_v22 = vpop.f32.mrb[224].mxu1 }
 0x8ee   :  { %18014 = vst [vmem:[#allocation223_spill] sm:$0xff] %v14040_v22  ;;  %v6268_v43 = vadd.f32 %v6267_v4, %v5922_v33  ;;  %v5598_v8 = vadd.f32 %v5597_v59, %v14040_v22  ;;  %v5927_v56 = vmul.f32 %v14040_v22, %v14040_v22  ;;  %v14045_v39 = vpop.f32.mrb[0].mxu0  ;;  %v14047_v9 = vpop.f32.mrb[225].mxu1 }
 0x8ef   :  { %18015 = vst [vmem:[#allocation224_spill] sm:$0xff] %v14045_v39  ;;  %18016 = vst [vmem:[#allocation225_spill] sm:$0xff] %v14047_v9  ;;  %v5672_v40 = vadd.f32 %v5671_v6, %v14045_v39  ;;  %v5929_v16 = vmul.f32 %v14045_v39, %v14045_v39  ;;  %v5635_v30 = vadd.f32 %v5634_v14, %v14047_v9  ;;  %v14055_v4 = vpop.f32.mrb[1].mxu0  ;;  %v14057_v59 = vpop.f32.mrb[226].mxu1 }
 0x8f0   :  { %v5928_v37 = vmul.f32 %v14047_v9, %v14047_v9  ;;  %18017 = vst [vmem:[#allocation226_spill] sm:$0xff] %v14055_v4  ;;  %18018 = vst [vmem:[#allocation227_spill] sm:$0xff] %v14057_v59  ;;  %v6158_v55 = vadd.f32 %v6157_v21, %v5927_v56  ;;  %v5709_v33 = vadd.f32 %v5708_v35, %v14055_v4  ;;  %v14063_v32 = vpop.f32.mrb[2].mxu0  ;;  %v14065_v15 = vpop.f32.mrb[227].mxu1 }
 0x8f1   :  { %v5930_v28 = vmul.f32 %v14055_v4, %v14055_v4  ;;  %v5599_v6 = vadd.f32 %v5598_v8, %v14057_v59  ;;  %18019 = vst [vmem:[#allocation228_spill] sm:$0xff] %v14063_v32  ;;  %18020 = vst [vmem:[#allocation229_spill] sm:$0xff] %v14065_v15  ;;  %v6232_v14 = vadd.f32 %v6231_v19, %v5929_v16  ;;  %v14071_v21 = vpop.f32.mrb[3].mxu0 }
 0x8f2   :  { %v6195_v53 = vadd.f32 %v6194_v58, %v5928_v37  ;;  %v5935_v49 = vmul.f32 %v14057_v59, %v14057_v59  ;;  %18021 = vst [vmem:[#allocation230_spill] sm:$0xff] %v14071_v21  ;;  %v5673_v56 = vadd.f32 %v5672_v40, %v14063_v32  ;;  %v5937_v8 = vmul.f32 %v14063_v32, %v14063_v32 }
 0x8f3   :  { %v6269_v35 = vadd.f32 %v6268_v43, %v5930_v28  ;;  %v5636_v58 = vadd.f32 %v5635_v30, %v14065_v15  ;;  %v5936_v19 = vmul.f32 %v14065_v15, %v14065_v15  ;;  %v5710_v28 = vadd.f32 %v5709_v33, %v14071_v21 }
 0x8f4   :  { %v6159_v61 = vadd.f32 %v6158_v55, %v5935_v49  ;;  %v6233_v37 = vadd.f32 %v6232_v14, %v5937_v8  ;;  %v5938_v43 = vmul.f32 %v14071_v21, %v14071_v21 }
 0x8f5   :  { %v6196_v48 = vadd.f32 %v6195_v53, %v5936_v19  ;;  %v14088_v47 = vpop.f32.mrb[228].mxu1 }
 0x8f6   :  { %18022 = vst [vmem:[#allocation231_spill] sm:$0xff] %v14088_v47  ;;  %v6270_v49 = vadd.f32 %v6269_v35, %v5938_v43  ;;  %v5600_v30 = vadd.f32 %v5599_v6, %v14088_v47  ;;  %v5943_v55 = vmul.f32 %v14088_v47, %v14088_v47  ;;  %v14093_v39 = vpop.f32.mrb[4].mxu0  ;;  %v14095_v14 = vpop.f32.mrb[229].mxu1 }
 0x8f7   :  { %18023 = vst [vmem:[#allocation232_spill] sm:$0xff] %v14093_v39  ;;  %18024 = vst [vmem:[#allocation233_spill] sm:$0xff] %v14095_v14  ;;  %v5674_v33 = vadd.f32 %v5673_v56, %v14093_v39  ;;  %v5945_v8 = vmul.f32 %v14093_v39, %v14093_v39  ;;  %v5637_v40 = vadd.f32 %v5636_v58, %v14095_v14  ;;  %v14103_v35 = vpop.f32.mrb[5].mxu0  ;;  %v14105_v6 = vpop.f32.mrb[230].mxu1 }
 0x8f8   :  { %v5944_v53 = vmul.f32 %v14095_v14, %v14095_v14  ;;  %18025 = vst [vmem:[#allocation234_spill] sm:$0xff] %v14103_v35  ;;  %18026 = vst [vmem:[#allocation235_spill] sm:$0xff] %v14105_v6  ;;  %v6160_v19 = vadd.f32 %v6159_v61, %v5943_v55  ;;  %v5711_v43 = vadd.f32 %v5710_v28, %v14103_v35  ;;  %v14111_v4 = vpop.f32.mrb[6].mxu0  ;;  %v14113_v21 = vpop.f32.mrb[231].mxu1 }
 0x8f9   :  { %v5946_v16 = vmul.f32 %v14103_v35, %v14103_v35  ;;  %v5601_v56 = vadd.f32 %v5600_v30, %v14105_v6  ;;  %18027 = vst [vmem:[#allocation236_spill] sm:$0xff] %v14111_v4  ;;  %18028 = vst [vmem:[#allocation237_spill] sm:$0xff] %v14113_v21  ;;  %v6234_v58 = vadd.f32 %v6233_v37, %v5945_v8  ;;  %v14119_v61 = vpop.f32.mrb[7].mxu0 }
 0x8fa   :  { %v6197_v32 = vadd.f32 %v6196_v48, %v5944_v53  ;;  %v5951_v9 = vmul.f32 %v14105_v6, %v14105_v6  ;;  %18029 = vst [vmem:[#allocation238_spill] sm:$0xff] %v14119_v61  ;;  %v5675_v55 = vadd.f32 %v5674_v33, %v14111_v4  ;;  %v5953_v30 = vmul.f32 %v14111_v4, %v14111_v4 }
 0x8fb   :  { %v6271_v28 = vadd.f32 %v6270_v49, %v5946_v16  ;;  %v5638_v48 = vadd.f32 %v5637_v40, %v14113_v21  ;;  %v5952_v37 = vmul.f32 %v14113_v21, %v14113_v21  ;;  %v5712_v16 = vadd.f32 %v5711_v43, %v14119_v61 }
 0x8fc   :  { %v6161_v59 = vadd.f32 %v6160_v19, %v5951_v9  ;;  %v6235_v53 = vadd.f32 %v6234_v58, %v5953_v30  ;;  %v5954_v49 = vmul.f32 %v14119_v61, %v14119_v61 }
 0x8fd   :  { %v6198_v15 = vadd.f32 %v6197_v32, %v5952_v37  ;;  %v14136_v22 = vpop.f32.mrb[232].mxu1 }
 0x8fe   :  { %18030 = vst [vmem:[#allocation239_spill] sm:$0xff] %v14136_v22  ;;  %v6272_v9 = vadd.f32 %v6271_v28, %v5954_v49  ;;  %v5602_v40 = vadd.f32 %v5601_v56, %v14136_v22  ;;  %v5959_v19 = vmul.f32 %v14136_v22, %v14136_v22  ;;  %v14141_v39 = vpop.f32.mrb[8].mxu0  ;;  %v14143_v58 = vpop.f32.mrb[233].mxu1 }
 0x8ff   :  { %18031 = vst [vmem:[#allocation240_spill] sm:$0xff] %v14141_v39  ;;  %18032 = vst [vmem:[#allocation241_spill] sm:$0xff] %v14143_v58  ;;  %v5676_v43 = vadd.f32 %v5675_v55, %v14141_v39  ;;  %v5961_v30 = vmul.f32 %v14141_v39, %v14141_v39  ;;  %v5639_v33 = vadd.f32 %v5638_v48, %v14143_v58  ;;  %v14151_v28 = vpop.f32.mrb[9].mxu0  ;;  %v14153_v56 = vpop.f32.mrb[234].mxu1 }
 0x900   :  { %v5960_v32 = vmul.f32 %v14143_v58, %v14143_v58  ;;  %18033 = vst [vmem:[#allocation242_spill] sm:$0xff] %v14151_v28  ;;  %18034 = vst [vmem:[#allocation243_spill] sm:$0xff] %v14153_v56  ;;  %v6162_v37 = vadd.f32 %v6161_v59, %v5959_v19  ;;  %v5713_v49 = vadd.f32 %v5712_v16, %v14151_v28  ;;  %v14159_v35 = vpop.f32.mrb[10].mxu0  ;;  %v14161_v61 = vpop.f32.mrb[235].mxu1 }
 0x901   :  { %v5962_v8 = vmul.f32 %v14151_v28, %v14151_v28  ;;  %v5603_v55 = vadd.f32 %v5602_v40, %v14153_v56  ;;  %18035 = vst [vmem:[#allocation244_spill] sm:$0xff] %v14159_v35  ;;  %18036 = vst [vmem:[#allocation245_spill] sm:$0xff] %v14161_v61  ;;  %v6236_v48 = vadd.f32 %v6235_v53, %v5961_v30  ;;  %v14167_v59 = vpop.f32.mrb[11].mxu0 }
 0x902   :  { %v6199_v4 = vadd.f32 %v6198_v15, %v5960_v32  ;;  %v5967_v14 = vmul.f32 %v14153_v56, %v14153_v56  ;;  %18037 = vst [vmem:[#allocation246_spill] sm:$0xff] %v14167_v59  ;;  %v5677_v19 = vadd.f32 %v5676_v43, %v14159_v35  ;;  %v5969_v40 = vmul.f32 %v14159_v35, %v14159_v35 }
 0x903   :  { %v6273_v16 = vadd.f32 %v6272_v9, %v5962_v8  ;;  %v5640_v15 = vadd.f32 %v5639_v33, %v14161_v61  ;;  %v5968_v53 = vmul.f32 %v14161_v61, %v14161_v61  ;;  %v5714_v8 = vadd.f32 %v5713_v49, %v14167_v59 }
 0x904   :  { %v6163_v6 = vadd.f32 %v6162_v37, %v5967_v14  ;;  %v6237_v32 = vadd.f32 %v6236_v48, %v5969_v40  ;;  %v5970_v9 = vmul.f32 %v14167_v59, %v14167_v59 }
 0x905   :  { %v6200_v21 = vadd.f32 %v6199_v4, %v5968_v53  ;;  %v14184_v47 = vpop.f32.mrb[236].mxu1 }
 0x906   :  { %18038 = vst [vmem:[#allocation247_spill] sm:$0xff] %v14184_v47  ;;  %v6274_v14 = vadd.f32 %v6273_v16, %v5970_v9  ;;  %v5604_v33 = vadd.f32 %v5603_v55, %v14184_v47  ;;  %v5975_v37 = vmul.f32 %v14184_v47, %v14184_v47  ;;  %v14189_v39 = vpop.f32.mrb[12].mxu0  ;;  %v14191_v48 = vpop.f32.mrb[237].mxu1 }
 0x907   :  { %18039 = vst [vmem:[#allocation248_spill] sm:$0xff] %v14189_v39  ;;  %18040 = vst [vmem:[#allocation249_spill] sm:$0xff] %v14191_v48  ;;  %v5678_v49 = vadd.f32 %v5677_v19, %v14189_v39  ;;  %v5977_v40 = vmul.f32 %v14189_v39, %v14189_v39  ;;  %v5641_v43 = vadd.f32 %v5640_v15, %v14191_v48  ;;  %v14199_v16 = vpop.f32.mrb[13].mxu0  ;;  %v14201_v55 = vpop.f32.mrb[238].mxu1 }
 0x908   :  { %v5976_v4 = vmul.f32 %v14191_v48, %v14191_v48  ;;  %18041 = vst [vmem:[#allocation250_spill] sm:$0xff] %v14201_v55  ;;  %v6164_v53 = vadd.f32 %v6163_v6, %v5975_v37  ;;  %v5715_v9 = vadd.f32 %v5714_v8, %v14199_v16  ;;  %v5978_v30 = vmul.f32 %v14199_v16, %v14199_v16  ;;  %v14207_v28 = vpop.f32.mrb[14].mxu0  ;;  %v14209_v59 = vpop.f32.mrb[239].mxu1 }
 0x909   :  { %v5605_v19 = vadd.f32 %v5604_v33, %v14201_v55  ;;  %18042 = vst [vmem:[#allocation251_spill] sm:$0xff] %v14207_v28  ;;  %18043 = vst [vmem:[#allocation252_spill] sm:$0xff] %v14209_v59  ;;  %v6238_v15 = vadd.f32 %v6237_v32, %v5977_v40  ;;  %v5983_v58 = vmul.f32 %v14201_v55, %v14201_v55  ;;  %v14215_v6 = vpop.f32.mrb[15].mxu0 }
 0x90a   :  { %v6201_v35 = vadd.f32 %v6200_v21, %v5976_v4  ;;  %v6275_v8 = vadd.f32 %v6274_v14, %v5978_v30  ;;  %v5679_v22 = vadd.f32 %v5678_v49, %v14207_v28  ;;  %v5985_v33 = vmul.f32 %v14207_v28, %v14207_v28 }
 0x90b   :  { %v5606_v37 = vrot.slane %v5605_v19, 4  ;;  %v6165_v56 = vadd.f32 %v6164_v53, %v5983_v58  ;;  %v5642_v21 = vadd.f32 %v5641_v43, %v14209_v59  ;;  %v5984_v40 = vmul.f32 %v14209_v59, %v14209_v59 }
 0x90c   :  { %v5680_v61 = vrot.slane %v5679_v22, 4  ;;  %v6239_v47 = vadd.f32 %v6238_v15, %v5985_v33  ;;  %v5716_v11 = vadd.f32 %v5715_v9, %v14215_v6  ;;  %v5986_v43 = vmul.f32 %v14215_v6, %v14215_v6 }
 0x90d   :  { %v5607_v4 = vadd.f32 %v5606_v37, %v5605_v19  ;;  %v6166_v14 = vrot.slane %v6165_v56, 4  ;;  %v5643_v49 = vrot.slane %v5642_v21, 4  ;;  %v6202_v55 = vadd.f32 %v6201_v35, %v5984_v40 }
 0x90e   :  { %v5681_v53 = vadd.f32 %v5680_v61, %v5679_v22  ;;  %v6240_v38 = vrot.slane %v6239_v47, 4  ;;  %v5717_v19 = vrot.slane %v5716_v11, 4  ;;  %v6276_v42 = vadd.f32 %v6275_v8, %v5986_v43 }
 0x90f   :  { %v5608_v58 = vrot.slane %v5607_v4, 2  ;;  %v6167_v32 = vadd.f32 %v6166_v14, %v6165_v56  ;;  %v5644_v39 = vadd.f32 %v5643_v49, %v5642_v21  ;;  %v6203_v28 = vrot.slane %v6202_v55, 4 }
 0x910   :  { %v5682_v15 = vrot.slane %v5681_v53, 2  ;;  %v6241_v33 = vadd.f32 %v6240_v38, %v6239_v47  ;;  %v5718_v35 = vadd.f32 %v5717_v19, %v5716_v11  ;;  %v6277_v22 = vrot.slane %v6276_v42, 4 }
 0x911   :  { %v5609_v37 = vadd.f32 %v5608_v58, %v5607_v4  ;;  %v6168_v30 = vrot.slane %v6167_v32, 2  ;;  %v5645_v48 = vrot.slane %v5644_v39, 2  ;;  %v6204_v59 = vadd.f32 %v6203_v28, %v6202_v55 }
 0x912   :  { %v5683_v9 = vadd.f32 %v5682_v15, %v5681_v53  ;;  %v6242_v23 = vrot.slane %v6241_v33, 2  ;;  %v5719_v63 = vrot.slane %v5718_v35, 2  ;;  %v6278_v49 = vadd.f32 %v6277_v22, %v6276_v42 }
 0x913   :  { %v5610_v40 = vrot.slane %v5609_v37, 1  ;;  %v6169_v61 = vadd.f32 %v6168_v30, %v6167_v32  ;;  %v5646_v1 = vadd.f32 %v5645_v48, %v5644_v39  ;;  %v6205_v18 = vrot.slane %v6204_v59, 2 }
 0x914   :  { %v5684_v21 = vrot.slane %v5683_v9, 1  ;;  %v6243_v14 = vadd.f32 %v6242_v23, %v6241_v33  ;;  %v5720_v38 = vadd.f32 %v5719_v63, %v5718_v35  ;;  %v6279_v55 = vrot.slane %v6278_v49, 2 }
 0x915   :  { %v5611_v56 = vadd.f32 %v5610_v40, %v5609_v37  ;;  %v6170_v4 = vrot.slane %v6169_v61, 1  ;;  %v5647_v58 = vrot.slane %v5646_v1, 1  ;;  %v6206_v47 = vadd.f32 %v6205_v18, %v6204_v59 }
 0x916   :  { %v5685_v28 = vadd.f32 %v5684_v21, %v5683_v9  ;;  %v6244_v11 = vrot.slane %v6243_v14, 1  ;;  %v5721_v32 = vrot.slane %v5720_v38, 1  ;;  %v6280_v23 = vadd.f32 %v6279_v55, %v6278_v49 }
 0x917   :  { %v14230_v8 = vmul.f32 0.00390625, %v5611_v56  ;;  %v6171_v53 = vadd.f32 %v6170_v4, %v6169_v61  ;;  %v5648_v43 = vadd.f32 %v5647_v58, %v5646_v1  ;;  %v6207_v19 = vrot.slane %v6206_v47, 1 }
 0x918   :  { %v5729_v48 = vmul.f32 0.00390625, %v5685_v28  ;;  %v6245_v30 = vadd.f32 %v6244_v11, %v6243_v14  ;;  %v5722_v18 = vadd.f32 %v5721_v32, %v5720_v38  ;;  %v6281_v33 = vrot.slane %v6280_v23, 1 }
 0x919   :  { %v6295_v39 = vmul.f32 %v14230_v8, %v14230_v8  ;;  %v6287_v42 = vmul.f32 0.00390625, %v6171_v53  ;;  %v5728_v37 = vmul.f32 0.00390625, %v5648_v43  ;;  %v6208_v15 = vadd.f32 %v6207_v19, %v6206_v47 }
 0x91a   :  { %v6289_v63 = vmul.f32 0.00390625, %v6245_v30  ;;  %v6297_v59 = vmul.f32 %v5729_v48, %v5729_v48  ;;  %v5730_v22 = vmul.f32 0.00390625, %v5722_v18  ;;  %v6282_v56 = vadd.f32 %v6281_v33, %v6280_v23  ;;  %v18045_v33 = vld [vmem:[#allocation43_spill] sm:$0xff] }
 0x91b   :  { %v6303_v40 = vsub.f32 %v6287_v42, %v6295_v39  ;;  %v6288_v1 = vmul.f32 0.00390625, %v6208_v15  ;;  %v6296_v9 = vmul.f32 %v5728_v37, %v5728_v37  ;;  %v18044_v42 = vcombine.low %v13455_v17, %v13458_v26  ;;  %v18047_v17 = vld [vmem:[#allocation46_spill] sm:$0xff] }
 0x91c   :  { %v6305_v61 = vsub.f32 %v6289_v63, %v6297_v59  ;;  %v6298_v14 = vmul.f32 %v5730_v22, %v5730_v22  ;;  %v6290_v58 = vmul.f32 0.00390625, %v6282_v56  ;;  %v5425_v63 = vld [vmem:[%s16720_s9 + $0xd] sm:$0xff] }
 0x91d   :  { %v6311_v21 = vadd.f32 0.8, %v6303_v40  ;;  %v6304_v4 = vsub.f32 %v6288_v1, %v6296_v9  ;;  %v6371_v15 = vrot.slane %v18044_v42, %v17933_v41  ;;  %v17171_v40 = vsub.s32 4, %v18045_v33 }
 0x91e   :  { %v6313_v49 = vadd.f32 0.8, %v6305_v61  ;;  %v6306_v38 = vsub.f32 %v6290_v58, %v6298_v14  ;;  %v17169_v1 = vsub.s32 5, %v18045_v33  ;;  %v17168_v9 = vsub.s32 6, %v18045_v33  ;;  %v18048_v14 = vld [vmem:[#allocation122_spill] sm:$0xff]  ;;  %v18049_v58 = vld [vmem:[#allocation123_spill] sm:$0xff] }
 0x91f   :  { %9325 = vrsqrt.f32 %v6311_v21  ;;  %v6312_v47 = vadd.f32 0.8, %v6304_v4  ;;  %v17170_v61 = vsub.s32 7, %v18045_v33  ;;  %v18046_v21 = vld [vmem:[#allocation45_spill] sm:$0xff] }
 0x920   :  { %v6314_v28 = vadd.f32 0.8, %v6306_v38 }
 0x921   :  { %9327 = vrsqrt.f32 %v6312_v47 }
 0x922   :  { %9329 = vrsqrt.f32 %v6313_v49 }
 0x923   :  { %9331 = vrsqrt.f32 %v6314_v28 }
 0x929   :  { %v9326_v11 = vpop.eup %9325 }
 0x92b   :  { %v9328_v55 = vpop.eup %9327 }
 0x92c   :  { %v9330_v53 = vpop.eup %9329  ;;  %v6333_v43 = vcombine.low %v9326_v11, %v9328_v55 }
 0x92d   :  { %v9332_v19 = vpop.eup %9331 }
 0x92e   :  { %v6355_v32 = vrot.slane %v6333_v43, %v17933_v41  ;;  %v6334_v39 = vcombine.low %v9330_v53, %v9332_v19 }
 0x930   :  { %v6362_v30 = vrot.slane %v6334_v39, %v17933_v41 }
 0x932   :  { %v6364_v23 = vcombine.low %v6355_v32, %v6362_v30 }
 0x934   :  { %v6378_v18 = vrot.slane %v6364_v23, %v17933_v41 }
 0x936   :  { %v6379_v59 = vcombine.low %v6371_v15, %v6378_v18 }
 0x938   :  { %v6381_v56 = vmul.f32 %v6379_v59, %v5425_v63 }
 0x93a   :  { %v6386_v4 = vrot.slane %v6381_v56, %v18046_v21  ;;  %v6390_v26 = vrot.slane %v6381_v56, %v18047_v17  ;;  %v6394_v49 = vrot.slane %v6381_v56, %v18048_v14  ;;  %v6398_v47 = vrot.slane %v6381_v56, %v18049_v58 }
 0x93b   :  { %v6402_v38 = vrot.slane %v6381_v56, %v17171_v40  ;;  %v6406_v28 = vrot.slane %v6381_v56, %v17169_v1  ;;  %v6410_v11 = vrot.slane %v6381_v56, %v17168_v9  ;;  %v6414_v55 = vrot.slane %v6381_v56, %v17170_v61 }
 0x93c   :  { %v6423_v53 = vmul.f32 %v6386_v4, %v13424_v12  ;;  %v6424_v43 = vmul.f32 %v6390_v26, %v13432_v57  ;;  %v6425_v19 = vmul.f32 %v6394_v49, %v13426_v20  ;;  %v6426_v32 = vmul.f32 %v6398_v47, %v13434_v62 }
 0x93d   :  { %v6427_v39 = vmul.f32 %v6402_v38, %v14230_v8  ;;  %v6428_v30 = vmul.f32 %v6406_v28, %v5728_v37  ;;  %v6429_v23 = vmul.f32 %v6410_v11, %v5729_v48  ;;  %v6430_v42 = vmul.f32 %v6414_v55, %v5730_v22 }
 0x93e   :  { %v6439_v15 = vcombine.low %v6423_v53, %v6424_v43  ;;  %v6440_v18 = vcombine.low %v6425_v19, %v6426_v32  ;;  %v6618_v63 = vpack.c.bf16 %v6386_v4, %v6386_v4  ;;  %v6619_v59 = vpack.c.bf16 %v6390_v26, %v6390_v26 }
 0x93f   :  { %v6441_v9 = vcombine.low %v6427_v39, %v6428_v30  ;;  %v6442_v1 = vcombine.low %v6429_v23, %v6430_v42  ;;  %v6620_v56 = vpack.c.bf16 %v6394_v49, %v6394_v49  ;;  %v6621_v61 = vpack.c.bf16 %v6398_v47, %v6398_v47 }
 0x940   :  { %v6449_v12 = vrot.slane %v6439_v15, %v17933_v41  ;;  %v6456_v57 = vrot.slane %v6440_v18, %v17933_v41  ;;  %v6622_v20 = vpack.c.bf16 %v6402_v38, %v6402_v38  ;;  %v6623_v40 = vpack.c.bf16 %v6406_v28, %v6406_v28 }
 0x941   :  { %v6463_v62 = vrot.slane %v6441_v9, %v17933_v41  ;;  %v6470_v8 = vrot.slane %v6442_v1, %v17933_v41  ;;  %v6624_v48 = vpack.c.bf16 %v6410_v11, %v6410_v11  ;;  %v6625_v37 = vpack.c.bf16 %v6414_v55, %v6414_v55  ;;  %v5426_v11 = vld [vmem:[%s16720_s9 + $0x15] sm:$0xff] }
 0x942   :  { %v6471_v22 = vcombine.low %v6449_v12, %v6456_v57  ;;  %v6627_v53 = vpack.i.b16 %v6618_v63, %v6618_v63  ;;  %v6634_v4 = vpack.i.b16 %v6619_v59, %v6619_v59  ;;  %v6641_v26 = vpack.i.b16 %v6620_v56, %v6620_v56  ;;  %v18052_v63 = vld [vmem:[#allocation102_spill] sm:$0xff]  ;;  %v18053_v59 = vld [vmem:[#allocation100_spill] sm:$0xff]  ;;  %v18055_v57 = vld [vmem:[#allocation105_spill] sm:$0xff] }
 0x943   :  { %v6472_v43 = vcombine.low %v6463_v62, %v6470_v8  ;;  %v6648_v19 = vpack.i.b16 %v6621_v61, %v6621_v61  ;;  %v6655_v49 = vpack.i.b16 %v6622_v20, %v6622_v20  ;;  %v6662_v47 = vpack.i.b16 %v6623_v40, %v6623_v40  ;;  %v18056_v20 = vld [vmem:[#allocation106_spill] sm:$0xff] }
 0x944   :  { %v6479_v32 = vrot.slane %v6471_v22, %v17933_v41  ;;  %v14273_v39 = vrot.slane %v6627_v53, %v18046_v21  ;;  %v14276_v38 = vrot.slane %v6634_v4, %v18046_v21  ;;  %v14279_v1 = vrot.slane %v6641_v26, %v18046_v21  ;;  %v18061_v53 = vld [vmem:[#allocation108_spill] sm:$0xff]  ;;  %v18062_v4 = vld [vmem:[#allocation107_spill] sm:$0xff] }
 0x945   :  { %v6486_v9 = vrot.slane %v6472_v43, %v17933_v41  ;;  %v14283_v28 = vrot.slane %v6648_v19, %v18046_v21  ;;  %v14286_v61 = vrot.slane %v6655_v49, %v18046_v21  ;;  %v14289_v40 = vrot.slane %v6662_v47, %v18046_v21  ;;  %v18064_v19 = vld [vmem:[#allocation112_spill] sm:$0xff]  ;;  %v18065_v49 = vld [vmem:[#allocation101_spill] sm:$0xff]  ;;  %v18067_v47 = vld [vmem:[#allocation114_spill] sm:$0xff] }
 0x946   :  { %v6669_v55 = vpack.i.b16 %v6624_v48, %v6624_v48  ;;  %v6676_v30 = vpack.i.b16 %v6625_v37, %v6625_v37  ;;  %v18050_v23 = vpack.c.bf16 %v12606_v45, %v12590_v7  ;;  %v18051_v42 = vpack.c.bf16 %v12618_v31, %v12594_v60 }
 0x947   :  { %v6487_v18 = vcombine.low %v6479_v32, %v6486_v9  ;;  %v18054_v56 = vpack.c.bf16 %v18052_v63, %v18053_v59  ;;  %v18057_v62 = vpack.c.bf16 %v18055_v57, %v18056_v20  ;;  %v18058_v45 = vpack.c.bf16 %v13476_v29, %v13464_v0  ;;  %v18068_v32 = vld [vmem:[#allocation103_spill] sm:$0xff]  ;;  %v18077_v63 = vld [vmem:[#allocation110_spill] sm:$0xff]  ;;  %v18083_v20 = vld [vmem:[#allocation113_spill] sm:$0xff] }
 0x948   :  { %v14298_v41 = vmul.bf16 %v14273_v39, %v18050_v23  ;;  %v14304_v15 = vmul.bf16 %v14276_v38, %v18051_v42  ;;  %v14325_v31 = vrot.slane %v6669_v55, %v18046_v21  ;;  %v14328_v8 = vrot.slane %v6676_v30, %v18046_v21 }
 0x949   :  { %v14310_v12 = vmul.bf16 %v14279_v1, %v18054_v56  ;;  %v14316_v7 = vmul.bf16 %v14283_v28, %v18057_v62  ;;  %v14322_v60 = vmul.bf16 %v14286_v61, %v18058_v45  ;;  %v18059_v48 = vpack.c.bf16 %v13488_v34, %v13468_v24  ;;  %v18080_v56 = vld [vmem:[#allocation109_spill] sm:$0xff]  ;;  %v18086_v45 = vld [vmem:[#allocation115_spill] sm:$0xff] }
 0x94a   :  { %v18060_v22 = vpack.c.bf16 %v12662_v52, %v12642_v44  ;;  %v14342_v29 = vsub.f32 %v5426_v11, %v6487_v18  ;;  %v18063_v26 = vpack.c.bf16 %v18061_v53, %v18062_v4  ;;  %v18066_v24 = vpack.c.bf16 %v18064_v19, %v18065_v49  ;;  %v18088_v53 = vld [vmem:[#allocation147_spill] sm:$0xff]  ;;  %v18089_v4 = vld [vmem:[#allocation44_spill] sm:$0xff]  ;;  %v18091_v49 = vld [vmem:[#allocation149_spill] sm:$0xff] }
 0x94b   :  { %v14334_v37 = vmul.bf16 %v14289_v40, %v18059_v48  ;;  %v18069_v44 = vpack.c.bf16 %v18067_v47, %v18068_v32  ;;  %v18070_v9 = vpack.c.bf16 %v13486_v50, %v13466_v25  ;;  %v18071_v55 = vpack.c.bf16 %v13498_v51, %v13474_v54 }
 0x94c   :  { %v14340_v0 = vmul.bf16 %v14273_v39, %v18060_v22  ;;  %v14348_v43 = vmul.bf16 %v14276_v38, %v18063_v26  ;;  %v14354_v34 = vmul.bf16 %v14279_v1, %v18066_v24  ;;  %v18072_v23 = vpack.c.bf16 %v13529_v46, %v13512_v10  ;;  %v18076_v46 = vld [vmem:[#allocation111_spill] sm:$0xff]  ;;  %v18092_v24 = vld [vmem:[#allocation145_spill] sm:$0xff] }
 0x94d   :  { %v14360_v52 = vmul.bf16 %v14283_v28, %v18069_v44  ;;  %v14366_v11 = vmul.bf16 %v14325_v31, %v18070_v9  ;;  %v14372_v30 = vmul.bf16 %v14328_v8, %v18071_v55  ;;  %v18073_v18 = vpack.c.bf16 %v13537_v27, %v13519_v13  ;;  %v18079_v13 = vld [vmem:[#allocation116_spill] sm:$0xff] }
 0x94e   :  { %v14378_v42 = vmul.bf16 %v14286_v61, %v18072_v23  ;;  %v18074_v50 = vpack.c.bf16 %v13535_v2, %v13517_v3  ;;  %v18075_v51 = vpack.c.bf16 %v13543_v5, %v13527_v36  ;;  %v18078_v59 = vpack.c.bf16 %v18076_v46, %v18077_v63  ;;  %v18082_v3 = vld [vmem:[#allocation119_spill] sm:$0xff]  ;;  %v18085_v5 = vld [vmem:[#allocation121_spill] sm:$0xff]  ;;  %v18094_v44 = vld [vmem:[#allocation148_spill] sm:$0xff] }
 0x94f   :  { %v14384_v25 = vmul.bf16 %v14289_v40, %v18073_v18  ;;  %v18081_v57 = vpack.c.bf16 %v18079_v13, %v18080_v56  ;;  %v18084_v62 = vpack.c.bf16 %v18082_v3, %v18083_v20  ;;  %v18087_v48 = vpack.c.bf16 %v18085_v5, %v18086_v45  ;;  %v18095_v9 = vld [vmem:[#allocation144_spill] sm:$0xff]  ;;  %v18097_v18 = vld [vmem:[#allocation150_spill] sm:$0xff]  ;;  %v18104_v3 = vld [vmem:[#allocation117_spill] sm:$0xff] }
 0x950   :  { %v14390_v54 = vmul.bf16 %v14325_v31, %v18074_v50  ;;  %v14396_v10 = vmul.bf16 %v14328_v8, %v18075_v51  ;;  %v14402_v27 = vmul.bf16 %v14273_v39, %v18078_v59  ;;  %v18090_v26 = vpack.c.bf16 %v18088_v53, %v18089_v4  ;;  %v18098_v50 = vld [vmem:[#allocation146_spill] sm:$0xff]  ;;  %v18100_v63 = vld [vmem:[#allocation16_spill] sm:$0xff] }
 0x951   :  { %v14408_v2 = vmul.bf16 %v14276_v38, %v18081_v57  ;;  %v14414_v36 = vmul.bf16 %v14279_v1, %v18084_v62  ;;  %v14420_v22 = vmul.bf16 %v14283_v28, %v18087_v48  ;;  %v18093_v47 = vpack.c.bf16 %v18091_v49, %v18092_v24  ;;  %v18101_v59 = vld [vmem:[#allocation118_spill] sm:$0xff]  ;;  %v18107_v45 = vld [vmem:[#allocation120_spill] sm:$0xff] }
 0x952   :  { %v14426_v19 = vmul.bf16 %v14286_v61, %v18090_v26  ;;  %v18096_v55 = vpack.c.bf16 %v18094_v44, %v18095_v9  ;;  %v18099_v51 = vpack.c.bf16 %v18097_v18, %v18098_v50  ;;  %v18102_v13 = vpack.c.bf16 %v18100_v63, %v18101_v59  ;;  %v18103_v57 = vld [vmem:[#allocation18_spill] sm:$0xff]  ;;  %v18109_v4 = vld [vmem:[#allocation24_spill] sm:$0xff]  ;;  %v18110_v26 = vld [vmem:[#allocation17_spill] sm:$0xff] }
 0x953   :  { %v14432_v32 = vmul.bf16 %v14289_v40, %v18093_v47  ;;  %v18105_v20 = vpack.c.bf16 %v18103_v57, %v18104_v3  ;;  %v18106_v5 = vld [vmem:[#allocation22_spill] sm:$0xff]  ;;  %v18111_v49 = vpack.c.bf16 %v18109_v4, %v18110_v26  ;;  %v18112_v47 = vld [vmem:[#allocation155_spill] sm:$0xff]  ;;  %v18115_v18 = vld [vmem:[#allocation157_spill] sm:$0xff] }
 0x954   :  { %v14438_v23 = vmul.bf16 %v14325_v31, %v18096_v55  ;;  %v14444_v46 = vmul.bf16 %v14328_v8, %v18099_v51  ;;  %v14450_v56 = vmul.bf16 %v14273_v39, %v18102_v13  ;;  %v18108_v48 = vpack.c.bf16 %v18106_v5, %v18107_v45  ;;  %v18113_v44 = vld [vmem:[#allocation151_spill] sm:$0xff]  ;;  %v18116_v50 = vld [vmem:[#allocation153_spill] sm:$0xff]  ;;  %v18118_v59 = vld [vmem:[#allocation156_spill] sm:$0xff] }
 0x955   :  { %v14456_v62 = vmul.bf16 %v14276_v38, %v18105_v20  ;;  %v14468_v24 = vmul.bf16 %v14283_v28, %v18111_v49  ;;  %v18114_v9 = vpack.c.bf16 %v18112_v47, %v18113_v44  ;;  %v18117_v51 = vpack.c.bf16 %v18115_v18, %v18116_v50  ;;  %v18119_v13 = vld [vmem:[#allocation152_spill] sm:$0xff]  ;;  %v18121_v20 = vld [vmem:[#allocation158_spill] sm:$0xff]  ;;  %v18124_v4 = vld [vmem:[#allocation21_spill] sm:$0xff] }
 0x956   :  { %v14462_v53 = vmul.bf16 %v14279_v1, %v18108_v48  ;;  %v18120_v57 = vpack.c.bf16 %v18118_v59, %v18119_v13  ;;  %v18122_v5 = vld [vmem:[#allocation154_spill] sm:$0xff]  ;;  %v18125_v26 = vld [vmem:[#allocation20_spill] sm:$0xff]  ;;  %v18132_v59 = vld [vmem:[#allocation23_spill] sm:$0xff] }
 0x957   :  { %v14474_v55 = vmul.bf16 %v14286_v61, %v18114_v9  ;;  %v14480_v63 = vmul.bf16 %v14289_v40, %v18117_v51  ;;  %v18123_v45 = vpack.c.bf16 %v18121_v20, %v18122_v5  ;;  %v18126_v49 = vpack.c.bf16 %v18124_v4, %v18125_v26  ;;  %v18127_v44 = vld [vmem:[#allocation26_spill] sm:$0xff]  ;;  %v18128_v9 = vld [vmem:[#allocation19_spill] sm:$0xff]  ;;  %v18135_v20 = vld [vmem:[#allocation32_spill] sm:$0xff] }
 0x958   :  { %v14486_v3 = vmul.bf16 %v14325_v31, %v18120_v57  ;;  %v18129_v18 = vpack.c.bf16 %v18127_v44, %v18128_v9  ;;  %v18131_v51 = vld [vmem:[#allocation30_spill] sm:$0xff]  ;;  %v18136_v5 = vld [vmem:[#allocation25_spill] sm:$0xff]  ;;  %v18139_v26 = vld [vmem:[#allocation163_spill] sm:$0xff] }
 0x959   :  { %v14492_v48 = vmul.bf16 %v14328_v8, %v18123_v45  ;;  %v14498_v47 = vmul.bf16 %v14273_v39, %v18126_v49  ;;  %v18133_v13 = vpack.c.bf16 %v18131_v51, %v18132_v59  ;;  %v18137_v45 = vpack.c.bf16 %v18135_v20, %v18136_v5  ;;  %v18140_v49 = vld [vmem:[#allocation159_spill] sm:$0xff]  ;;  %v18143_v9 = vld [vmem:[#allocation165_spill] sm:$0xff]  ;;  %v18147_v59 = vld [vmem:[#allocation164_spill] sm:$0xff] }
 0x95a   :  { %v14504_v50 = vmul.bf16 %v14276_v38, %v18129_v18  ;;  %v18141_v35 = vpack.c.bf16 %v18139_v26, %v18140_v49  ;;  %v18144_v18 = vld [vmem:[#allocation161_spill] sm:$0xff]  ;;  %v18151_v5 = vld [vmem:[#allocation166_spill] sm:$0xff]  ;;  %v18156_v49 = vld [vmem:[#allocation28_spill] sm:$0xff] }
 0x95b   :  { %v14510_v57 = vmul.bf16 %v14279_v1, %v18133_v13  ;;  %v14516_v4 = vmul.bf16 %v14283_v28, %v18137_v45  ;;  %v18148_v13 = vld [vmem:[#allocation160_spill] sm:$0xff]  ;;  %v18152_v45 = vld [vmem:[#allocation162_spill] sm:$0xff] }
 0x95c   :  { %18130 = vst [vmem:[#allocation43_spill] sm:$0xff] %v14504_v50  ;;  %v14522_v44 = vmul.bf16 %v14286_v61, %v18141_v35  ;;  %v18145_v50 = vpack.c.bf16 %v18143_v9, %v18144_v18  ;;  %v18155_v35 = vld [vmem:[#allocation29_spill] sm:$0xff]  ;;  %v18160_v18 = vld [vmem:[#allocation27_spill] sm:$0xff] }
 0x95d   :  { %18134 = vst [vmem:[#allocation45_spill] sm:$0xff] %v14510_v57  ;;  %18138 = vst [vmem:[#allocation46_spill] sm:$0xff] %v14516_v4  ;;  %v18149_v57 = vpack.c.bf16 %v18147_v59, %v18148_v13  ;;  %v18153_v4 = vpack.c.bf16 %v18151_v5, %v18152_v45  ;;  %v18164_v13 = vld [vmem:[#allocation31_spill] sm:$0xff]  ;;  %v18168_v45 = vld [vmem:[#allocation33_spill] sm:$0xff] }
 0x95e   :  { %18142 = vst [vmem:[#allocation122_spill] sm:$0xff] %v14522_v44  ;;  %v14528_v51 = vmul.bf16 %v14289_v40, %v18145_v50  ;;  %v18157_v44 = vpack.c.bf16 %v18155_v35, %v18156_v49  ;;  %v18159_v50 = vld [vmem:[#allocation34_spill] sm:$0xff]  ;;  %v18172_v49 = vld [vmem:[#allocation167_spill] sm:$0xff] }
 0x95f   :  { %v14534_v20 = vmul.bf16 %v14325_v31, %v18149_v57  ;;  %v14540_v26 = vmul.bf16 %v14328_v8, %v18153_v4  ;;  %v18163_v57 = vld [vmem:[#allocation38_spill] sm:$0xff]  ;;  %v18167_v4 = vld [vmem:[#allocation40_spill] sm:$0xff] }
 0x960   :  { %18146 = vst [vmem:[#allocation123_spill] sm:$0xff] %v14528_v51  ;;  %v14546_v9 = vmul.bf16 %v14273_v39, %v18157_v44  ;;  %v18161_v51 = vpack.c.bf16 %v18159_v50, %v18160_v18  ;;  %v18171_v44 = vld [vmem:[#allocation171_spill] sm:$0xff]  ;;  %v18176_v18 = vld [vmem:[#allocation169_spill] sm:$0xff] }
 0x961   :  { %18150 = vst [vmem:[#allocation102_spill] sm:$0xff] %v14534_v20  ;;  %18154 = vst [vmem:[#allocation100_spill] sm:$0xff] %v14540_v26  ;;  %v18165_v20 = vpack.c.bf16 %v18163_v57, %v18164_v13  ;;  %v18169_v26 = vpack.c.bf16 %v18167_v4, %v18168_v45  ;;  %v18180_v13 = vld [vmem:[#allocation168_spill] sm:$0xff]  ;;  %v18184_v45 = vld [vmem:[#allocation170_spill] sm:$0xff] }
 0x962   :  { %18158 = vst [vmem:[#allocation105_spill] sm:$0xff] %v14546_v9  ;;  %v14552_v59 = vmul.bf16 %v14276_v38, %v18161_v51  ;;  %v18173_v9 = vpack.c.bf16 %v18171_v44, %v18172_v49  ;;  %v18175_v51 = vld [vmem:[#allocation173_spill] sm:$0xff]  ;;  %v18188_v49 = vld [vmem:[#allocation76_spill] sm:$0xff] }
 0x963   :  { %v14558_v5 = vmul.bf16 %v14279_v1, %v18165_v20  ;;  %v14564_v35 = vmul.bf16 %v14283_v28, %v18169_v26  ;;  %v18179_v20 = vld [vmem:[#allocation172_spill] sm:$0xff]  ;;  %v18183_v26 = vld [vmem:[#allocation174_spill] sm:$0xff] }
 0x964   :  { %18162 = vst [vmem:[#allocation106_spill] sm:$0xff] %v14552_v59  ;;  %v14570_v50 = vmul.bf16 %v14286_v61, %v18173_v9  ;;  %v18177_v59 = vpack.c.bf16 %v18175_v51, %v18176_v18  ;;  %v18187_v9 = vld [vmem:[#allocation77_spill] sm:$0xff]  ;;  %v18192_v18 = vld [vmem:[#allocation82_spill] sm:$0xff] }
 0x965   :  { %18166 = vst [vmem:[#allocation108_spill] sm:$0xff] %v14558_v5  ;;  %18170 = vst [vmem:[#allocation107_spill] sm:$0xff] %v14564_v35  ;;  %v18181_v5 = vpack.c.bf16 %v18179_v20, %v18180_v13  ;;  %v18185_v35 = vpack.c.bf16 %v18183_v26, %v18184_v45  ;;  %v18196_v13 = vld [vmem:[#allocation36_spill] sm:$0xff]  ;;  %v18200_v45 = vld [vmem:[#allocation81_spill] sm:$0xff] }
 0x966   :  { %18174 = vst [vmem:[#allocation112_spill] sm:$0xff] %v14570_v50  ;;  %v14576_v57 = vmul.bf16 %v14289_v40, %v18177_v59  ;;  %v18189_v50 = vpack.c.bf16 %v18187_v9, %v18188_v49  ;;  %v18191_v59 = vld [vmem:[#allocation35_spill] sm:$0xff] }
 0x967   :  { %v14582_v4 = vmul.bf16 %v14325_v31, %v18181_v5  ;;  %v14588_v44 = vmul.bf16 %v14328_v8, %v18185_v35  ;;  %v18195_v5 = vld [vmem:[#allocation39_spill] sm:$0xff]  ;;  %v18199_v35 = vld [vmem:[#allocation48_spill] sm:$0xff] }
 0x968   :  { %18178 = vst [vmem:[#allocation101_spill] sm:$0xff] %v14576_v57  ;;  %v14594_v51 = vmul.bf16 %v14273_v39, %v18189_v50  ;;  %v18193_v57 = vpack.c.bf16 %v18191_v59, %v18192_v18  ;;  %v18203_v50 = vld [vmem:[#allocation179_spill] sm:$0xff]  ;;  %v18208_v18 = vld [vmem:[#allocation177_spill] sm:$0xff] }
 0x969   :  { %18182 = vst [vmem:[#allocation114_spill] sm:$0xff] %v14582_v4  ;;  %18186 = vst [vmem:[#allocation103_spill] sm:$0xff] %v14588_v44  ;;  %v18197_v4 = vpack.c.bf16 %v18195_v5, %v18196_v13  ;;  %v18201_v44 = vpack.c.bf16 %v18199_v35, %v18200_v45  ;;  %v18204_v49 = vld [vmem:[#allocation175_spill] sm:$0xff]  ;;  %v18212_v13 = vld [vmem:[#allocation176_spill] sm:$0xff] }
 0x96a   :  { %18190 = vst [vmem:[#allocation111_spill] sm:$0xff] %v14594_v51  ;;  %v14600_v20 = vmul.bf16 %v14276_v38, %v18193_v57  ;;  %v18205_v51 = vpack.c.bf16 %v18203_v50, %v18204_v49  ;;  %v18207_v57 = vld [vmem:[#allocation181_spill] sm:$0xff]  ;;  %v18216_v45 = vld [vmem:[#allocation178_spill] sm:$0xff] }
 0x96b   :  { %v14606_v26 = vmul.bf16 %v14279_v1, %v18197_v4  ;;  %v14612_v9 = vmul.bf16 %v14283_v28, %v18201_v44  ;;  %v18211_v4 = vld [vmem:[#allocation180_spill] sm:$0xff]  ;;  %v18215_v44 = vld [vmem:[#allocation182_spill] sm:$0xff]  ;;  %v18220_v49 = vld [vmem:[#allocation37_spill] sm:$0xff] }
 0x96c   :  { %18194 = vst [vmem:[#allocation110_spill] sm:$0xff] %v14600_v20  ;;  %v14618_v59 = vmul.bf16 %v14286_v61, %v18205_v51  ;;  %v18209_v20 = vpack.c.bf16 %v18207_v57, %v18208_v18  ;;  %v18219_v51 = vld [vmem:[#allocation42_spill] sm:$0xff]  ;;  %v18224_v18 = vld [vmem:[#allocation41_spill] sm:$0xff] }
 0x96d   :  { %18198 = vst [vmem:[#allocation116_spill] sm:$0xff] %v14606_v26  ;;  %18202 = vst [vmem:[#allocation109_spill] sm:$0xff] %v14612_v9  ;;  %v18213_v26 = vpack.c.bf16 %v18211_v4, %v18212_v13  ;;  %v18217_v9 = vpack.c.bf16 %v18215_v44, %v18216_v45  ;;  %v18228_v13 = vld [vmem:[#allocation50_spill] sm:$0xff]  ;;  %v18232_v45 = vld [vmem:[#allocation49_spill] sm:$0xff] }
 0x96e   :  { %18206 = vst [vmem:[#allocation119_spill] sm:$0xff] %v14618_v59  ;;  %v14624_v5 = vmul.bf16 %v14289_v40, %v18209_v20  ;;  %v18221_v59 = vpack.c.bf16 %v18219_v51, %v18220_v49  ;;  %v18223_v20 = vld [vmem:[#allocation47_spill] sm:$0xff] }
 0x96f   :  { %v14630_v35 = vmul.bf16 %v14325_v31, %v18213_v26  ;;  %v14636_v50 = vmul.bf16 %v14328_v8, %v18217_v9  ;;  %v18227_v26 = vld [vmem:[#allocation51_spill] sm:$0xff]  ;;  %v18231_v9 = vld [vmem:[#allocation56_spill] sm:$0xff] }
 0x970   :  { %18210 = vst [vmem:[#allocation113_spill] sm:$0xff] %v14624_v5  ;;  %v14642_v57 = vmul.bf16 %v14273_v39, %v18221_v59  ;;  %v18225_v5 = vpack.c.bf16 %v18223_v20, %v18224_v18  ;;  %v18235_v59 = vld [vmem:[#allocation187_spill] sm:$0xff]  ;;  %v18240_v18 = vld [vmem:[#allocation185_spill] sm:$0xff] }
 0x971   :  { %18214 = vst [vmem:[#allocation121_spill] sm:$0xff] %v14630_v35  ;;  %18218 = vst [vmem:[#allocation115_spill] sm:$0xff] %v14636_v50  ;;  %v18229_v35 = vpack.c.bf16 %v18227_v26, %v18228_v13  ;;  %v18233_v50 = vpack.c.bf16 %v18231_v9, %v18232_v45  ;;  %v18236_v49 = vld [vmem:[#allocation183_spill] sm:$0xff]  ;;  %v18244_v13 = vld [vmem:[#allocation184_spill] sm:$0xff] }
 0x972   :  { %18222 = vst [vmem:[#allocation147_spill] sm:$0xff] %v14642_v57  ;;  %v14648_v4 = vmul.bf16 %v14276_v38, %v18225_v5  ;;  %v18237_v57 = vpack.c.bf16 %v18235_v59, %v18236_v49  ;;  %v18239_v5 = vld [vmem:[#allocation189_spill] sm:$0xff]  ;;  %v18248_v45 = vld [vmem:[#allocation186_spill] sm:$0xff]  ;;  %v18252_v49 = vld [vmem:[#allocation52_spill] sm:$0xff] }
 0x973   :  { %v14654_v44 = vmul.bf16 %v14279_v1, %v18229_v35  ;;  %v14660_v51 = vmul.bf16 %v14283_v28, %v18233_v50  ;;  %v18243_v35 = vld [vmem:[#allocation188_spill] sm:$0xff]  ;;  %v18247_v50 = vld [vmem:[#allocation190_spill] sm:$0xff] }
 0x974   :  { %18226 = vst [vmem:[#allocation44_spill] sm:$0xff] %v14648_v4  ;;  %v14666_v20 = vmul.bf16 %v14286_v61, %v18237_v57  ;;  %v18241_v4 = vpack.c.bf16 %v18239_v5, %v18240_v18  ;;  %v18251_v57 = vld [vmem:[#allocation53_spill] sm:$0xff]  ;;  %v18256_v18 = vld [vmem:[#allocation54_spill] sm:$0xff] }
 0x975   :  { %18230 = vst [vmem:[#allocation149_spill] sm:$0xff] %v14654_v44  ;;  %18234 = vst [vmem:[#allocation145_spill] sm:$0xff] %v14660_v51  ;;  %v18245_v44 = vpack.c.bf16 %v18243_v35, %v18244_v13  ;;  %v18249_v51 = vpack.c.bf16 %v18247_v50, %v18248_v45  ;;  %v18260_v13 = vld [vmem:[#allocation58_spill] sm:$0xff]  ;;  %v18264_v45 = vld [vmem:[#allocation57_spill] sm:$0xff] }
 0x976   :  { %18238 = vst [vmem:[#allocation148_spill] sm:$0xff] %v14666_v20  ;;  %v14672_v26 = vmul.bf16 %v14289_v40, %v18241_v4  ;;  %v18253_v20 = vpack.c.bf16 %v18251_v57, %v18252_v49  ;;  %v18255_v4 = vld [vmem:[#allocation55_spill] sm:$0xff] }
 0x977   :  { %v14678_v9 = vmul.bf16 %v14325_v31, %v18245_v44  ;;  %v14684_v59 = vmul.bf16 %v14328_v8, %v18249_v51  ;;  %v18259_v44 = vld [vmem:[#allocation59_spill] sm:$0xff]  ;;  %v18263_v51 = vld [vmem:[#allocation64_spill] sm:$0xff] }
 0x978   :  { %18242 = vst [vmem:[#allocation144_spill] sm:$0xff] %v14672_v26  ;;  %v14690_v5 = vmul.bf16 %v14273_v39, %v18253_v20  ;;  %v18257_v26 = vpack.c.bf16 %v18255_v4, %v18256_v18  ;;  %v18267_v20 = vld [vmem:[#allocation195_spill] sm:$0xff]  ;;  %v18272_v18 = vld [vmem:[#allocation193_spill] sm:$0xff] }
 0x979   :  { %18246 = vst [vmem:[#allocation150_spill] sm:$0xff] %v14678_v9  ;;  %18250 = vst [vmem:[#allocation146_spill] sm:$0xff] %v14684_v59  ;;  %v18261_v9 = vpack.c.bf16 %v18259_v44, %v18260_v13  ;;  %v18265_v59 = vpack.c.bf16 %v18263_v51, %v18264_v45  ;;  %v18268_v49 = vld [vmem:[#allocation191_spill] sm:$0xff]  ;;  %v18276_v13 = vld [vmem:[#allocation192_spill] sm:$0xff] }
 0x97a   :  { %18254 = vst [vmem:[#allocation16_spill] sm:$0xff] %v14690_v5  ;;  %v14696_v35 = vmul.bf16 %v14276_v38, %v18257_v26  ;;  %v18269_v5 = vpack.c.bf16 %v18267_v20, %v18268_v49  ;;  %v18271_v26 = vld [vmem:[#allocation197_spill] sm:$0xff]  ;;  %v18280_v45 = vld [vmem:[#allocation194_spill] sm:$0xff]  ;;  %v18284_v49 = vld [vmem:[#allocation60_spill] sm:$0xff] }
 0x97b   :  { %v14702_v50 = vmul.bf16 %v14279_v1, %v18261_v9  ;;  %v14708_v57 = vmul.bf16 %v14283_v28, %v18265_v59  ;;  %v18275_v9 = vld [vmem:[#allocation196_spill] sm:$0xff]  ;;  %v18279_v59 = vld [vmem:[#allocation198_spill] sm:$0xff] }
 0x97c   :  { %18258 = vst [vmem:[#allocation118_spill] sm:$0xff] %v14696_v35  ;;  %v14714_v4 = vmul.bf16 %v14286_v61, %v18269_v5  ;;  %v18273_v35 = vpack.c.bf16 %v18271_v26, %v18272_v18  ;;  %v18283_v5 = vld [vmem:[#allocation61_spill] sm:$0xff]  ;;  %v18288_v18 = vld [vmem:[#allocation62_spill] sm:$0xff] }
 0x97d   :  { %18262 = vst [vmem:[#allocation18_spill] sm:$0xff] %v14702_v50  ;;  %18266 = vst [vmem:[#allocation117_spill] sm:$0xff] %v14708_v57  ;;  %v18277_v50 = vpack.c.bf16 %v18275_v9, %v18276_v13  ;;  %v18281_v57 = vpack.c.bf16 %v18279_v59, %v18280_v45  ;;  %v18292_v13 = vld [vmem:[#allocation66_spill] sm:$0xff]  ;;  %v18296_v45 = vld [vmem:[#allocation65_spill] sm:$0xff] }
 0x97e   :  { %18270 = vst [vmem:[#allocation22_spill] sm:$0xff] %v14714_v4  ;;  %v14720_v44 = vmul.bf16 %v14289_v40, %v18273_v35  ;;  %v18285_v4 = vpack.c.bf16 %v18283_v5, %v18284_v49  ;;  %v18287_v35 = vld [vmem:[#allocation63_spill] sm:$0xff] }
 0x97f   :  { %v14726_v51 = vmul.bf16 %v14325_v31, %v18277_v50  ;;  %v14732_v20 = vmul.bf16 %v14328_v8, %v18281_v57  ;;  %v18291_v50 = vld [vmem:[#allocation67_spill] sm:$0xff]  ;;  %v18295_v57 = vld [vmem:[#allocation72_spill] sm:$0xff] }
 0x980   :  { %18274 = vst [vmem:[#allocation120_spill] sm:$0xff] %v14720_v44  ;;  %v14738_v26 = vmul.bf16 %v14273_v39, %v18285_v4  ;;  %v18289_v44 = vpack.c.bf16 %v18287_v35, %v18288_v18  ;;  %v18299_v4 = vld [vmem:[#allocation203_spill] sm:$0xff]  ;;  %v18304_v18 = vld [vmem:[#allocation201_spill] sm:$0xff] }
 0x981   :  { %18278 = vst [vmem:[#allocation24_spill] sm:$0xff] %v14726_v51  ;;  %18282 = vst [vmem:[#allocation17_spill] sm:$0xff] %v14732_v20  ;;  %v18293_v51 = vpack.c.bf16 %v18291_v50, %v18292_v13  ;;  %v18297_v20 = vpack.c.bf16 %v18295_v57, %v18296_v45  ;;  %v18300_v49 = vld [vmem:[#allocation199_spill] sm:$0xff]  ;;  %v18308_v13 = vld [vmem:[#allocation200_spill] sm:$0xff] }
 0x982   :  { %18286 = vst [vmem:[#allocation155_spill] sm:$0xff] %v14738_v26  ;;  %v14744_v9 = vmul.bf16 %v14276_v38, %v18289_v44  ;;  %v18301_v26 = vpack.c.bf16 %v18299_v4, %v18300_v49  ;;  %v18303_v44 = vld [vmem:[#allocation205_spill] sm:$0xff]  ;;  %v18312_v45 = vld [vmem:[#allocation202_spill] sm:$0xff]  ;;  %v18316_v49 = vld [vmem:[#allocation68_spill] sm:$0xff] }
 0x983   :  { %v14750_v59 = vmul.bf16 %v14279_v1, %v18293_v51  ;;  %v14756_v5 = vmul.bf16 %v14283_v28, %v18297_v20  ;;  %v18307_v51 = vld [vmem:[#allocation204_spill] sm:$0xff]  ;;  %v18311_v20 = vld [vmem:[#allocation206_spill] sm:$0xff] }
 0x984   :  { %18290 = vst [vmem:[#allocation151_spill] sm:$0xff] %v14744_v9  ;;  %v14762_v35 = vmul.bf16 %v14286_v61, %v18301_v26  ;;  %v18305_v9 = vpack.c.bf16 %v18303_v44, %v18304_v18  ;;  %v18315_v26 = vld [vmem:[#allocation69_spill] sm:$0xff]  ;;  %v18320_v18 = vld [vmem:[#allocation70_spill] sm:$0xff] }
 0x985   :  { %18294 = vst [vmem:[#allocation157_spill] sm:$0xff] %v14750_v59  ;;  %18298 = vst [vmem:[#allocation153_spill] sm:$0xff] %v14756_v5  ;;  %v18309_v59 = vpack.c.bf16 %v18307_v51, %v18308_v13  ;;  %v18313_v5 = vpack.c.bf16 %v18311_v20, %v18312_v45  ;;  %v18324_v13 = vld [vmem:[#allocation74_spill] sm:$0xff]  ;;  %v18328_v45 = vld [vmem:[#allocation73_spill] sm:$0xff] }
 0x986   :  { %18302 = vst [vmem:[#allocation156_spill] sm:$0xff] %v14762_v35  ;;  %v14768_v50 = vmul.bf16 %v14289_v40, %v18305_v9  ;;  %v18317_v35 = vpack.c.bf16 %v18315_v26, %v18316_v49  ;;  %v18319_v9 = vld [vmem:[#allocation71_spill] sm:$0xff] }
 0x987   :  { %v14774_v57 = vmul.bf16 %v14325_v31, %v18309_v59  ;;  %v14780_v4 = vmul.bf16 %v14328_v8, %v18313_v5  ;;  %v18323_v59 = vld [vmem:[#allocation75_spill] sm:$0xff]  ;;  %v18327_v5 = vld [vmem:[#allocation80_spill] sm:$0xff] }
 0x988   :  { %18306 = vst [vmem:[#allocation152_spill] sm:$0xff] %v14768_v50  ;;  %v14786_v44 = vmul.bf16 %v14273_v39, %v18317_v35  ;;  %v18321_v50 = vpack.c.bf16 %v18319_v9, %v18320_v18  ;;  %v18331_v35 = vld [vmem:[#allocation211_spill] sm:$0xff]  ;;  %v18336_v18 = vld [vmem:[#allocation209_spill] sm:$0xff] }
 0x989   :  { %18310 = vst [vmem:[#allocation158_spill] sm:$0xff] %v14774_v57  ;;  %18314 = vst [vmem:[#allocation154_spill] sm:$0xff] %v14780_v4  ;;  %v18325_v57 = vpack.c.bf16 %v18323_v59, %v18324_v13  ;;  %v18329_v4 = vpack.c.bf16 %v18327_v5, %v18328_v45  ;;  %v18332_v49 = vld [vmem:[#allocation207_spill] sm:$0xff]  ;;  %v18340_v13 = vld [vmem:[#allocation208_spill] sm:$0xff] }
 0x98a   :  { %18318 = vst [vmem:[#allocation21_spill] sm:$0xff] %v14786_v44  ;;  %v14792_v51 = vmul.bf16 %v14276_v38, %v18321_v50  ;;  %v18333_v44 = vpack.c.bf16 %v18331_v35, %v18332_v49  ;;  %v18335_v50 = vld [vmem:[#allocation213_spill] sm:$0xff]  ;;  %v18344_v45 = vld [vmem:[#allocation210_spill] sm:$0xff] }
 0x98b   :  { %v14798_v20 = vmul.bf16 %v14279_v1, %v18325_v57  ;;  %v14804_v26 = vmul.bf16 %v14283_v28, %v18329_v4  ;;  %v18339_v57 = vld [vmem:[#allocation212_spill] sm:$0xff]  ;;  %v18343_v4 = vld [vmem:[#allocation214_spill] sm:$0xff] }
 0x98c   :  { %18322 = vst [vmem:[#allocation20_spill] sm:$0xff] %v14792_v51  ;;  %v14810_v9 = vmul.bf16 %v14286_v61, %v18333_v44  ;;  %v18337_v51 = vpack.c.bf16 %v18335_v50, %v18336_v18  ;;  %v18347_v44 = vld [vmem:[#allocation90_spill] sm:$0xff]  ;;  %v18352_v18 = vld [vmem:[#allocation83_spill] sm:$0xff] }
 0x98d   :  { %18326 = vst [vmem:[#allocation26_spill] sm:$0xff] %v14798_v20  ;;  %18330 = vst [vmem:[#allocation19_spill] sm:$0xff] %v14804_v26  ;;  %v18341_v20 = vpack.c.bf16 %v18339_v57, %v18340_v13  ;;  %v18345_v26 = vpack.c.bf16 %v18343_v4, %v18344_v45  ;;  %v18348_v49 = vld [vmem:[#allocation78_spill] sm:$0xff]  ;;  %v18356_v13 = vld [vmem:[#allocation79_spill] sm:$0xff] }
 0x98e   :  { %18334 = vst [vmem:[#allocation30_spill] sm:$0xff] %v14810_v9  ;;  %v14816_v59 = vmul.bf16 %v14289_v40, %v18337_v51  ;;  %v18349_v9 = vpack.c.bf16 %v18347_v44, %v18348_v49  ;;  %v18351_v51 = vld [vmem:[#allocation99_spill] sm:$0xff]  ;;  %v18360_v45 = vld [vmem:[#allocation86_spill] sm:$0xff] }
 0x98f   :  { %v14822_v5 = vmul.bf16 %v14325_v31, %v18341_v20  ;;  %v14828_v35 = vmul.bf16 %v14328_v8, %v18345_v26  ;;  %v18355_v20 = vld [vmem:[#allocation87_spill] sm:$0xff]  ;;  %v18359_v26 = vld [vmem:[#allocation97_spill] sm:$0xff] }
 0x990   :  { %18338 = vst [vmem:[#allocation23_spill] sm:$0xff] %v14816_v59  ;;  %v14834_v50 = vmul.bf16 %v14273_v39, %v18349_v9  ;;  %v18353_v59 = vpack.c.bf16 %v18351_v51, %v18352_v18  ;;  %v18363_v9 = vld [vmem:[#allocation219_spill] sm:$0xff]  ;;  %v18368_v18 = vld [vmem:[#allocation217_spill] sm:$0xff] }
 0x991   :  { %18342 = vst [vmem:[#allocation32_spill] sm:$0xff] %v14822_v5  ;;  %18346 = vst [vmem:[#allocation25_spill] sm:$0xff] %v14828_v35  ;;  %v18357_v5 = vpack.c.bf16 %v18355_v20, %v18356_v13  ;;  %v18361_v35 = vpack.c.bf16 %v18359_v26, %v18360_v45  ;;  %v18364_v49 = vld [vmem:[#allocation215_spill] sm:$0xff]  ;;  %v18372_v13 = vld [vmem:[#allocation216_spill] sm:$0xff] }
 0x992   :  { %18350 = vst [vmem:[#allocation163_spill] sm:$0xff] %v14834_v50  ;;  %v14840_v57 = vmul.bf16 %v14276_v38, %v18353_v59  ;;  %v18365_v50 = vpack.c.bf16 %v18363_v9, %v18364_v49  ;;  %v18367_v59 = vld [vmem:[#allocation221_spill] sm:$0xff]  ;;  %v18376_v45 = vld [vmem:[#allocation218_spill] sm:$0xff]  ;;  %v18380_v49 = vld [vmem:[#allocation91_spill] sm:$0xff] }
 0x993   :  { %v14846_v4 = vmul.bf16 %v14279_v1, %v18357_v5  ;;  %v14852_v44 = vmul.bf16 %v14283_v28, %v18361_v35  ;;  %v18371_v5 = vld [vmem:[#allocation220_spill] sm:$0xff]  ;;  %v18375_v35 = vld [vmem:[#allocation222_spill] sm:$0xff] }
 0x994   :  { %18354 = vst [vmem:[#allocation159_spill] sm:$0xff] %v14840_v57  ;;  %v14858_v51 = vmul.bf16 %v14286_v61, %v18365_v50  ;;  %v18369_v57 = vpack.c.bf16 %v18367_v59, %v18368_v18  ;;  %v18379_v50 = vld [vmem:[#allocation104_spill] sm:$0xff]  ;;  %v18384_v18 = vld [vmem:[#allocation98_spill] sm:$0xff] }
 0x995   :  { %18358 = vst [vmem:[#allocation165_spill] sm:$0xff] %v14846_v4  ;;  %18362 = vst [vmem:[#allocation161_spill] sm:$0xff] %v14852_v44  ;;  %v18373_v4 = vpack.c.bf16 %v18371_v5, %v18372_v13  ;;  %v18377_v44 = vpack.c.bf16 %v18375_v35, %v18376_v45  ;;  %v18388_v13 = vld [vmem:[#allocation94_spill] sm:$0xff]  ;;  %v18392_v45 = vld [vmem:[#allocation95_spill] sm:$0xff] }
 0x996   :  { %18366 = vst [vmem:[#allocation164_spill] sm:$0xff] %v14858_v51  ;;  %v14864_v20 = vmul.bf16 %v14289_v40, %v18369_v57  ;;  %v18381_v51 = vpack.c.bf16 %v18379_v50, %v18380_v49  ;;  %v18383_v57 = vld [vmem:[#allocation88_spill] sm:$0xff]  ;;  %v18396_v49 = vld [vmem:[#allocation223_spill] sm:$0xff] }
 0x997   :  { %v14870_v26 = vmul.bf16 %v14325_v31, %v18373_v4  ;;  %v14876_v9 = vmul.bf16 %v14328_v8, %v18377_v44  ;;  %v18387_v4 = vld [vmem:[#allocation84_spill] sm:$0xff]  ;;  %v18391_v44 = vld [vmem:[#allocation85_spill] sm:$0xff] }
 0x998   :  { %18370 = vst [vmem:[#allocation160_spill] sm:$0xff] %v14864_v20  ;;  %v14882_v59 = vmul.bf16 %v14273_v39, %v18381_v51  ;;  %v18385_v20 = vpack.c.bf16 %v18383_v57, %v18384_v18  ;;  %v18395_v51 = vld [vmem:[#allocation227_spill] sm:$0xff]  ;;  %v18400_v18 = vld [vmem:[#allocation225_spill] sm:$0xff] }
 0x999   :  { %18374 = vst [vmem:[#allocation166_spill] sm:$0xff] %v14870_v26  ;;  %18378 = vst [vmem:[#allocation162_spill] sm:$0xff] %v14876_v9  ;;  %v18389_v26 = vpack.c.bf16 %v18387_v4, %v18388_v13  ;;  %v18393_v9 = vpack.c.bf16 %v18391_v44, %v18392_v45  ;;  %v18404_v13 = vld [vmem:[#allocation224_spill] sm:$0xff]  ;;  %v18408_v45 = vld [vmem:[#allocation226_spill] sm:$0xff] }
 0x99a   :  { %18382 = vst [vmem:[#allocation29_spill] sm:$0xff] %v14882_v59  ;;  %v14888_v5 = vmul.bf16 %v14276_v38, %v18385_v20  ;;  %v18397_v59 = vpack.c.bf16 %v18395_v51, %v18396_v49  ;;  %v18399_v20 = vld [vmem:[#allocation229_spill] sm:$0xff] }
 0x99b   :  { %v14894_v35 = vmul.bf16 %v14279_v1, %v18389_v26  ;;  %v14900_v50 = vmul.bf16 %v14283_v28, %v18393_v9  ;;  %v18403_v26 = vld [vmem:[#allocation228_spill] sm:$0xff]  ;;  %v18407_v9 = vld [vmem:[#allocation230_spill] sm:$0xff]  ;;  %v18412_v49 = vld [vmem:[#allocation89_spill] sm:$0xff] }
 0x99c   :  { %18386 = vst [vmem:[#allocation28_spill] sm:$0xff] %v14888_v5  ;;  %v14906_v57 = vmul.bf16 %v14286_v61, %v18397_v59  ;;  %v18401_v5 = vpack.c.bf16 %v18399_v20, %v18400_v18  ;;  %v18411_v59 = vld [vmem:[#allocation124_spill] sm:$0xff] }
 0x99d   :  { %18390 = vst [vmem:[#allocation34_spill] sm:$0xff] %v14894_v35  ;;  %18394 = vst [vmem:[#allocation27_spill] sm:$0xff] %v14900_v50  ;;  %v18405_v35 = vpack.c.bf16 %v18403_v26, %v18404_v13  ;;  %v18409_v50 = vpack.c.bf16 %v18407_v9, %v18408_v45  ;;  %v18416_v18 = vld [vmem:[#allocation96_spill] sm:$0xff]  ;;  %v18424_v45 = vld [vmem:[#allocation93_spill] sm:$0xff] }
 0x99e   :  { %18398 = vst [vmem:[#allocation38_spill] sm:$0xff] %v14906_v57  ;;  %v14912_v4 = vmul.bf16 %v14289_v40, %v18401_v5  ;;  %v18413_v57 = vpack.c.bf16 %v18411_v59, %v18412_v49  ;;  %v18415_v5 = vld [vmem:[#allocation126_spill] sm:$0xff]  ;;  %v18420_v13 = vld [vmem:[#allocation92_spill] sm:$0xff]  ;;  %v18428_v49 = vld [vmem:[#allocation231_spill] sm:$0xff] }
 0x99f   :  { %v14918_v44 = vmul.bf16 %v14325_v31, %v18405_v35  ;;  %v14924_v51 = vmul.bf16 %v14328_v8, %v18409_v50  ;;  %v18419_v35 = vld [vmem:[#allocation125_spill] sm:$0xff]  ;;  %v18423_v50 = vld [vmem:[#allocation127_spill] sm:$0xff] }
 0x9a0   :  { %18402 = vst [vmem:[#allocation31_spill] sm:$0xff] %v14912_v4  ;;  %v14930_v20 = vmul.bf16 %v14273_v39, %v18413_v57  ;;  %v18417_v4 = vpack.c.bf16 %v18415_v5, %v18416_v18  ;;  %v18427_v57 = vld [vmem:[#allocation235_spill] sm:$0xff]  ;;  %v18432_v18 = vld [vmem:[#allocation233_spill] sm:$0xff] }
 0x9a1   :  { %18406 = vst [vmem:[#allocation40_spill] sm:$0xff] %v14918_v44  ;;  %18410 = vst [vmem:[#allocation33_spill] sm:$0xff] %v14924_v51  ;;  %v18421_v44 = vpack.c.bf16 %v18419_v35, %v18420_v13  ;;  %v18425_v51 = vpack.c.bf16 %v18423_v50, %v18424_v45  ;;  %v18436_v13 = vld [vmem:[#allocation232_spill] sm:$0xff]  ;;  %v18440_v45 = vld [vmem:[#allocation234_spill] sm:$0xff] }
 0x9a2   :  { %18414 = vst [vmem:[#allocation171_spill] sm:$0xff] %v14930_v20  ;;  %v14936_v26 = vmul.bf16 %v14276_v38, %v18417_v4  ;;  %v18429_v20 = vpack.c.bf16 %v18427_v57, %v18428_v49  ;;  %v18431_v4 = vld [vmem:[#allocation237_spill] sm:$0xff]  ;;  %v18444_v49 = vld [vmem:[#allocation128_spill] sm:$0xff] }
 0x9a3   :  { %v14942_v9 = vmul.bf16 %v14279_v1, %v18421_v44  ;;  %v14948_v59 = vmul.bf16 %v14283_v28, %v18425_v51  ;;  %v18435_v44 = vld [vmem:[#allocation236_spill] sm:$0xff]  ;;  %v18439_v51 = vld [vmem:[#allocation238_spill] sm:$0xff] }
 0x9a4   :  { %18418 = vst [vmem:[#allocation167_spill] sm:$0xff] %v14936_v26  ;;  %v14954_v5 = vmul.bf16 %v14286_v61, %v18429_v20  ;;  %v18433_v26 = vpack.c.bf16 %v18431_v4, %v18432_v18  ;;  %v18443_v20 = vld [vmem:[#allocation132_spill] sm:$0xff]  ;;  %v18448_v18 = vld [vmem:[#allocation130_spill] sm:$0xff] }
 0x9a5   :  { %18422 = vst [vmem:[#allocation173_spill] sm:$0xff] %v14942_v9  ;;  %18426 = vst [vmem:[#allocation169_spill] sm:$0xff] %v14948_v59  ;;  %v18437_v9 = vpack.c.bf16 %v18435_v44, %v18436_v13  ;;  %v18441_v59 = vpack.c.bf16 %v18439_v51, %v18440_v45  ;;  %v18452_v13 = vld [vmem:[#allocation129_spill] sm:$0xff]  ;;  %v18456_v45 = vld [vmem:[#allocation131_spill] sm:$0xff] }
 0x9a6   :  { %18430 = vst [vmem:[#allocation172_spill] sm:$0xff] %v14954_v5  ;;  %v14960_v35 = vmul.bf16 %v14289_v40, %v18433_v26  ;;  %v18445_v5 = vpack.c.bf16 %v18443_v20, %v18444_v49  ;;  %v18447_v26 = vld [vmem:[#allocation134_spill] sm:$0xff]  ;;  %v18460_v49 = vld [vmem:[#allocation239_spill] sm:$0xff] }
 0x9a7   :  { %v14966_v50 = vmul.bf16 %v14325_v31, %v18437_v9  ;;  %v14972_v57 = vmul.bf16 %v14328_v8, %v18441_v59  ;;  %v18451_v9 = vld [vmem:[#allocation133_spill] sm:$0xff]  ;;  %v18455_v59 = vld [vmem:[#allocation135_spill] sm:$0xff] }
 0x9a8   :  { %18434 = vst [vmem:[#allocation168_spill] sm:$0xff] %v14960_v35  ;;  %v14978_v4 = vmul.bf16 %v14273_v39, %v18445_v5  ;;  %v18449_v35 = vpack.c.bf16 %v18447_v26, %v18448_v18  ;;  %v18459_v5 = vld [vmem:[#allocation243_spill] sm:$0xff]  ;;  %v18464_v18 = vld [vmem:[#allocation241_spill] sm:$0xff] }
 0x9a9   :  { %18438 = vst [vmem:[#allocation174_spill] sm:$0xff] %v14966_v50  ;;  %18442 = vst [vmem:[#allocation170_spill] sm:$0xff] %v14972_v57  ;;  %v18453_v50 = vpack.c.bf16 %v18451_v9, %v18452_v13  ;;  %v18457_v57 = vpack.c.bf16 %v18455_v59, %v18456_v45  ;;  %v18468_v13 = vld [vmem:[#allocation240_spill] sm:$0xff]  ;;  %v18472_v45 = vld [vmem:[#allocation242_spill] sm:$0xff] }
 0x9aa   :  { %18446 = vst [vmem:[#allocation77_spill] sm:$0xff] %v14978_v4  ;;  %v14984_v44 = vmul.bf16 %v14276_v38, %v18449_v35  ;;  %v18461_v4 = vpack.c.bf16 %v18459_v5, %v18460_v49  ;;  %v18463_v35 = vld [vmem:[#allocation245_spill] sm:$0xff]  ;;  %v18476_v49 = vld [vmem:[#allocation136_spill] sm:$0xff] }
 0x9ab   :  { %v14990_v51 = vmul.bf16 %v14279_v1, %v18453_v50  ;;  %v14996_v20 = vmul.bf16 %v14283_v28, %v18457_v57  ;;  %v18467_v50 = vld [vmem:[#allocation244_spill] sm:$0xff]  ;;  %v18471_v57 = vld [vmem:[#allocation246_spill] sm:$0xff] }
 0x9ac   :  { %18450 = vst [vmem:[#allocation76_spill] sm:$0xff] %v14984_v44  ;;  %v15002_v26 = vmul.bf16 %v14286_v61, %v18461_v4  ;;  %v18465_v44 = vpack.c.bf16 %v18463_v35, %v18464_v18  ;;  %v18475_v4 = vld [vmem:[#allocation140_spill] sm:$0xff]  ;;  %v18479_v18 = vld [vmem:[#allocation138_spill] sm:$0xff] }
 0x9ad   :  { %18454 = vst [vmem:[#allocation35_spill] sm:$0xff] %v14990_v51  ;;  %18458 = vst [vmem:[#allocation82_spill] sm:$0xff] %v14996_v20  ;;  %v18469_v51 = vpack.c.bf16 %v18467_v50, %v18468_v13  ;;  %v18473_v20 = vpack.c.bf16 %v18471_v57, %v18472_v45  ;;  %v18482_v13 = vld [vmem:[#allocation137_spill] sm:$0xff]  ;;  %v18485_v45 = vld [vmem:[#allocation139_spill] sm:$0xff] }
 0x9ae   :  { %18462 = vst [vmem:[#allocation39_spill] sm:$0xff] %v15002_v26  ;;  %v15008_v9 = vmul.bf16 %v14289_v40, %v18465_v44  ;;  %v18477_v26 = vpack.c.bf16 %v18475_v4, %v18476_v49  ;;  %v18478_v44 = vld [vmem:[#allocation142_spill] sm:$0xff] }
 0x9af   :  { %v15014_v59 = vmul.bf16 %v14325_v31, %v18469_v51  ;;  %v15020_v5 = vmul.bf16 %v14328_v8, %v18473_v20  ;;  %v18481_v51 = vld [vmem:[#allocation141_spill] sm:$0xff]  ;;  %v18484_v20 = vld [vmem:[#allocation143_spill] sm:$0xff] }
 0x9b0   :  { %18466 = vst [vmem:[#allocation36_spill] sm:$0xff] %v15008_v9  ;;  %v15026_v35 = vmul.bf16 %v14273_v39, %v18477_v26  ;;  %v18480_v9 = vpack.c.bf16 %v18478_v44, %v18479_v18  ;;  %v18487_v39 = vld [vmem:[#allocation250_spill] sm:$0xff]  ;;  %v18488_v26 = vld [vmem:[#allocation247_spill] sm:$0xff] }
 0x9b1   :  { %18470 = vst [vmem:[#allocation48_spill] sm:$0xff] %v15014_v59  ;;  %18474 = vst [vmem:[#allocation81_spill] sm:$0xff] %v15020_v5  ;;  %v18483_v59 = vpack.c.bf16 %v18481_v51, %v18482_v13  ;;  %v18486_v5 = vpack.c.bf16 %v18484_v20, %v18485_v45  ;;  %v18489_v49 = vpack.c.bf16 %v18487_v39, %v18488_v26 }
 0x9b2   :  { %v15032_v50 = vmul.bf16 %v14276_v38, %v18480_v9  ;;  %v18491_v38 = vld [vmem:[#allocation252_spill] sm:$0xff]  ;;  %v18492_v9 = vld [vmem:[#allocation249_spill] sm:$0xff]  ;;  %v6818_v45 = vrot.slane %v14342_v29, %v18047_v17  ;;  %v6826_v39 = vrot.slane %v14342_v29, %v18049_v58  ;;  %v18504_v17 = vsub.s32 7, %v18045_v33 }
 0x9b3   :  { %v15038_v57 = vmul.bf16 %v14279_v1, %v18483_v59  ;;  %v15044_v4 = vmul.bf16 %v14283_v28, %v18486_v5  ;;  %v15050_v44 = vmul.bf16 %v14286_v61, %v18489_v49  ;;  %v18493_v18 = vpack.c.bf16 %v18491_v38, %v18492_v9  ;;  %v18495_v1 = vld [vmem:[#allocation251_spill] sm:$0xff]  ;;  %v18496_v59 = vld [vmem:[#allocation248_spill] sm:$0xff] }
 0x9b4   :  { %v18497_v13 = vpack.c.bf16 %v18495_v1, %v18496_v59  ;;  %v18499_v28 = vpack.c.bf16 %v14215_v6, %v14199_v16  ;;  %v6814_v61 = vrot.slane %v14342_v29, %v18046_v21  ;;  %v18502_v16 = vsub.s32 5, %v18045_v33 }
 0x9b5   :  { %18490 = vst [vmem:[#allocation179_spill] sm:$0xff] %v15050_v44  ;;  %v15056_v51 = vmul.bf16 %v14289_v40, %v18493_v18  ;;  %v6822_v40 = vrot.slane %v14342_v29, %v18048_v14  ;;  %v6842_v38 = vrot.slane %v14342_v29, %v18504_v17  ;;  %v6852_v9 = vpack.c.bf16 %v6818_v45, %v6818_v45  ;;  %v18505_v17 = vld [vmem:[#allocation43_spill] sm:$0xff] }
 0x9b6   :  { %v15062_v20 = vmul.bf16 %v14325_v31, %v18497_v13  ;;  %v15068_v5 = vmul.bf16 %v14328_v8, %v18499_v28  ;;  %v18501_v31 = vsub.s32 4, %v18045_v33  ;;  %v6834_v6 = vrot.slane %v14342_v29, %v18502_v16 }
 0x9b7   :  { %18494 = vst [vmem:[#allocation175_spill] sm:$0xff] %v15056_v51  ;;  %v18503_v8 = vsub.s32 6, %v18045_v33  ;;  %v6851_v14 = vpack.c.bf16 %v6814_v61, %v6814_v61  ;;  %v6853_v18 = vpack.c.bf16 %v6822_v40, %v6822_v40  ;;  %v6854_v58 = vpack.c.bf16 %v6826_v39, %v6826_v39 }
 0x9b8   :  { %18498 = vst [vmem:[#allocation181_spill] sm:$0xff] %v15062_v20  ;;  %18500 = vst [vmem:[#allocation177_spill] sm:$0xff] %v15068_v5  ;;  %v6830_v26 = vrot.slane %v14342_v29, %v18501_v31  ;;  %v6856_v59 = vpack.c.bf16 %v6834_v6, %v6834_v6  ;;  %v6858_v28 = vpack.c.bf16 %v6842_v38, %v6842_v38  ;;  %v18506_v38 = vld [vmem:[#allocation45_spill] sm:$0xff] }
 0x9b9   :  { %v6838_v49 = vrot.slane %v14342_v29, %v18503_v8  ;;  %v6860_v31 = vpack.i.b16 %v6851_v14, %v6851_v14  ;;  %v6867_v5 = vpack.i.b16 %v6852_v9, %v6852_v9  ;;  %v6874_v20 = vpack.i.b16 %v6853_v18, %v6853_v18  ;;  %v18507_v14 = vld [vmem:[#allocation46_spill] sm:$0xff]  ;;  %v18509_v18 = vld [vmem:[#allocation123_spill] sm:$0xff] }
 0x9ba   :  { %v6855_v1 = vpack.c.bf16 %v6830_v26, %v6830_v26  ;;  %v6881_v16 = vpack.i.b16 %v6854_v58, %v6854_v58  ;;  %v6895_v44 = vpack.i.b16 %v6856_v59, %v6856_v59  ;;  %v6909_v61 = vpack.i.b16 %v6858_v28, %v6858_v28  ;;  %v18508_v9 = vld [vmem:[#allocation122_spill] sm:$0xff]  ;;  %v18511_v59 = vld [vmem:[#allocation100_spill] sm:$0xff]  ;;  %v18512_v28 = vld [vmem:[#allocation105_spill] sm:$0xff] }
 0x9bb   :  { %v6857_v13 = vpack.c.bf16 %v6838_v49, %v6838_v49  ;;  %v15091_v8 = vrot.slane %v6860_v31, %v18046_v21  ;;  %v15094_v33 = vrot.slane %v6867_v5, %v18046_v21  ;;  %v15097_v45 = vrot.slane %v6874_v20, %v18046_v21  ;;  %v18510_v58 = vld [vmem:[#allocation102_spill] sm:$0xff] }
 0x9bc   :  { %v6888_v51 = vpack.i.b16 %v6855_v1, %v6855_v1  ;;  %v15100_v40 = vrot.slane %v6881_v16, %v18046_v21  ;;  %v15106_v26 = vrot.slane %v6895_v44, %v18046_v21  ;;  %v15112_v5 = vrot.slane %v6909_v61, %v18046_v21  ;;  %v18513_v16 = vld [vmem:[#allocation106_spill] sm:$0xff]  ;;  %v18515_v61 = vld [vmem:[#allocation108_spill] sm:$0xff] }
 0x9bd   :  { %v6902_v29 = vpack.i.b16 %v6857_v13, %v6857_v13  ;;  %v15116_v49 = vadd.bf16 %v15091_v8, %v14298_v41  ;;  %v15120_v20 = vadd.bf16 %v15094_v33, %v14304_v15  ;;  %v15276_v31 = vadd.bf16 %v15091_v8, %v18512_v28  ;;  %v18523_v28 = vld [vmem:[#allocation114_spill] sm:$0xff] }
 0x9be   :  { %v15103_v39 = vrot.slane %v6888_v51, %v18046_v21  ;;  %v15124_v51 = vadd.bf16 %v15097_v45, %v14310_v12  ;;  %v15128_v44 = vadd.bf16 %v15100_v40, %v14316_v7  ;;  %v15136_v41 = vadd.bf16 %v15106_v26, %v14334_v37 }
 0x9bf   :  { %v15109_v6 = vrot.slane %v6902_v29, %v18046_v21  ;;  %v15144_v12 = vadd.bf16 %v15112_v5, %v14372_v30  ;;  %v15148_v7 = vadd.bf16 %v15091_v8, %v14340_v0  ;;  %v15156_v37 = vadd.bf16 %v15097_v45, %v14354_v34 }
 0x9c0   :  { %v15132_v21 = vadd.bf16 %v15103_v39, %v14322_v60  ;;  %v15152_v60 = vadd.bf16 %v15094_v33, %v14348_v43  ;;  %v15164_v30 = vadd.bf16 %v15103_v39, %v14378_v42  ;;  %v15168_v0 = vadd.bf16 %v15106_v26, %v14384_v25 }
 0x9c1   :  { %v15140_v15 = vadd.bf16 %v15109_v6, %v14366_v11  ;;  %v15160_v11 = vadd.bf16 %v15100_v40, %v14360_v52  ;;  %v15172_v43 = vadd.bf16 %v15109_v6, %v14390_v54  ;;  %v15176_v34 = vadd.bf16 %v15112_v5, %v14396_v10 }
 0x9c2   :  { %v15180_v52 = vadd.bf16 %v15091_v8, %v14402_v27  ;;  %v15184_v42 = vadd.bf16 %v15094_v33, %v14408_v2  ;;  %v15188_v25 = vadd.bf16 %v15097_v45, %v14414_v36  ;;  %v15192_v54 = vadd.bf16 %v15100_v40, %v14420_v22 }
 0x9c3   :  { %v15196_v10 = vadd.bf16 %v15103_v39, %v14426_v19  ;;  %v15200_v27 = vadd.bf16 %v15106_v26, %v14432_v32  ;;  %v15204_v2 = vadd.bf16 %v15109_v6, %v14438_v23  ;;  %v15208_v36 = vadd.bf16 %v15112_v5, %v14444_v46 }
 0x9c4   :  { %v15212_v22 = vadd.bf16 %v15091_v8, %v14450_v56  ;;  %v15216_v19 = vadd.bf16 %v15094_v33, %v14456_v62  ;;  %v15220_v32 = vadd.bf16 %v15097_v45, %v14462_v53  ;;  %v15224_v23 = vadd.bf16 %v15100_v40, %v14468_v24 }
 0x9c5   :  { %v15228_v46 = vadd.bf16 %v15103_v39, %v14474_v55  ;;  %v15232_v56 = vadd.bf16 %v15106_v26, %v14480_v63  ;;  %v15236_v62 = vadd.bf16 %v15109_v6, %v14486_v3  ;;  %v15240_v53 = vadd.bf16 %v15112_v5, %v14492_v48 }
 0x9c6   :  { %v15244_v24 = vadd.bf16 %v15091_v8, %v14498_v47  ;;  %v15248_v55 = vadd.bf16 %v15094_v33, %v18505_v17  ;;  %v15252_v63 = vadd.bf16 %v15097_v45, %v18506_v38  ;;  %v15256_v3 = vadd.bf16 %v15100_v40, %v18507_v14  ;;  %v18517_v38 = vld [vmem:[#allocation107_spill] sm:$0xff] }
 0x9c7   :  { %v15260_v48 = vadd.bf16 %v15103_v39, %v18508_v9  ;;  %v15264_v47 = vadd.bf16 %v15106_v26, %v18509_v18  ;;  %v15268_v1 = vadd.bf16 %v15109_v6, %v18510_v58  ;;  %v15272_v13 = vadd.bf16 %v15112_v5, %v18511_v59  ;;  %v18519_v9 = vld [vmem:[#allocation112_spill] sm:$0xff]  ;;  %v18521_v58 = vld [vmem:[#allocation101_spill] sm:$0xff] }
 0x9c8   :  { %v15280_v29 = vadd.bf16 %v15094_v33, %v18513_v16  ;;  %v15284_v17 = vadd.bf16 %v15097_v45, %v18515_v61  ;;  %v15288_v14 = vadd.bf16 %v15100_v40, %v18517_v38  ;;  %v15292_v18 = vadd.bf16 %v15103_v39, %v18519_v9 }
 0x9c9   :  { %v15296_v59 = vadd.bf16 %v15106_v26, %v18521_v58  ;;  %v15300_v16 = vadd.bf16 %v15109_v6, %v18523_v28 }
 0x9ca   :  { %18514 = vst [vmem:[#allocation180_spill] sm:$0xff] %v15280_v29  ;;  %18516 = vst [vmem:[#allocation176_spill] sm:$0xff] %v15284_v17  ;;  %v18525_v29 = vld [vmem:[#allocation103_spill] sm:$0xff] }
 0x9cb   :  { %18518 = vst [vmem:[#allocation182_spill] sm:$0xff] %v15288_v14  ;;  %18520 = vst [vmem:[#allocation178_spill] sm:$0xff] %v15292_v18  ;;  %v15304_v61 = vadd.bf16 %v15112_v5, %v18525_v29  ;;  %v18527_v17 = vld [vmem:[#allocation111_spill] sm:$0xff]  ;;  %v18529_v14 = vld [vmem:[#allocation110_spill] sm:$0xff] }
 0x9cc   :  { %18522 = vst [vmem:[#allocation42_spill] sm:$0xff] %v15296_v59  ;;  %18524 = vst [vmem:[#allocation37_spill] sm:$0xff] %v15300_v16  ;;  %v15308_v38 = vadd.bf16 %v15091_v8, %v18527_v17  ;;  %v15312_v9 = vadd.bf16 %v15094_v33, %v18529_v14  ;;  %v18531_v18 = vld [vmem:[#allocation116_spill] sm:$0xff]  ;;  %v18533_v59 = vld [vmem:[#allocation109_spill] sm:$0xff] }
 0x9cd   :  { %18526 = vst [vmem:[#allocation47_spill] sm:$0xff] %v15304_v61  ;;  %v15316_v58 = vadd.bf16 %v15097_v45, %v18531_v18  ;;  %v15320_v28 = vadd.bf16 %v15100_v40, %v18533_v59  ;;  %v18535_v16 = vld [vmem:[#allocation119_spill] sm:$0xff]  ;;  %v18537_v61 = vld [vmem:[#allocation113_spill] sm:$0xff] }
 0x9ce   :  { %18528 = vst [vmem:[#allocation41_spill] sm:$0xff] %v15308_v38  ;;  %18530 = vst [vmem:[#allocation51_spill] sm:$0xff] %v15312_v9  ;;  %v15324_v29 = vadd.bf16 %v15103_v39, %v18535_v16  ;;  %v15328_v17 = vadd.bf16 %v15106_v26, %v18537_v61  ;;  %v18539_v38 = vld [vmem:[#allocation121_spill] sm:$0xff]  ;;  %v18541_v9 = vld [vmem:[#allocation115_spill] sm:$0xff] }
 0x9cf   :  { %18532 = vst [vmem:[#allocation50_spill] sm:$0xff] %v15316_v58  ;;  %18534 = vst [vmem:[#allocation56_spill] sm:$0xff] %v15320_v28  ;;  %v15332_v14 = vadd.bf16 %v15109_v6, %v18539_v38  ;;  %v15336_v18 = vadd.bf16 %v15112_v5, %v18541_v9  ;;  %v18543_v58 = vld [vmem:[#allocation147_spill] sm:$0xff]  ;;  %v18545_v28 = vld [vmem:[#allocation44_spill] sm:$0xff] }
 0x9d0   :  { %18536 = vst [vmem:[#allocation49_spill] sm:$0xff] %v15324_v29  ;;  %18538 = vst [vmem:[#allocation187_spill] sm:$0xff] %v15328_v17  ;;  %v15340_v59 = vadd.bf16 %v15091_v8, %v18543_v58  ;;  %v15344_v16 = vadd.bf16 %v15094_v33, %v18545_v28  ;;  %v18547_v29 = vld [vmem:[#allocation149_spill] sm:$0xff] }
 0x9d1   :  { %18540 = vst [vmem:[#allocation183_spill] sm:$0xff] %v15332_v14  ;;  %18542 = vst [vmem:[#allocation189_spill] sm:$0xff] %v15336_v18  ;;  %v15348_v61 = vadd.bf16 %v15097_v45, %v18547_v29  ;;  %v18549_v17 = vld [vmem:[#allocation145_spill] sm:$0xff]  ;;  %v18551_v14 = vld [vmem:[#allocation148_spill] sm:$0xff] }
 0x9d2   :  { %18544 = vst [vmem:[#allocation185_spill] sm:$0xff] %v15340_v59  ;;  %18546 = vst [vmem:[#allocation188_spill] sm:$0xff] %v15344_v16  ;;  %v15352_v38 = vadd.bf16 %v15100_v40, %v18549_v17  ;;  %v15356_v9 = vadd.bf16 %v15103_v39, %v18551_v14  ;;  %v18553_v18 = vld [vmem:[#allocation144_spill] sm:$0xff]  ;;  %v18555_v59 = vld [vmem:[#allocation150_spill] sm:$0xff] }
 0x9d3   :  { %18548 = vst [vmem:[#allocation184_spill] sm:$0xff] %v15348_v61  ;;  %v15360_v58 = vadd.bf16 %v15106_v26, %v18553_v18  ;;  %v15364_v28 = vadd.bf16 %v15109_v6, %v18555_v59  ;;  %v18557_v16 = vld [vmem:[#allocation146_spill] sm:$0xff]  ;;  %v18559_v61 = vld [vmem:[#allocation16_spill] sm:$0xff] }
 0x9d4   :  { %18550 = vst [vmem:[#allocation190_spill] sm:$0xff] %v15352_v38  ;;  %18552 = vst [vmem:[#allocation186_spill] sm:$0xff] %v15356_v9  ;;  %v15368_v29 = vadd.bf16 %v15112_v5, %v18557_v16  ;;  %v15372_v17 = vadd.bf16 %v15091_v8, %v18559_v61  ;;  %v18561_v38 = vld [vmem:[#allocation118_spill] sm:$0xff] }
 0x9d5   :  { %18554 = vst [vmem:[#allocation53_spill] sm:$0xff] %v15360_v58  ;;  %18556 = vst [vmem:[#allocation52_spill] sm:$0xff] %v15364_v28  ;;  %v15376_v14 = vadd.bf16 %v15094_v33, %v18561_v38  ;;  %v18563_v9 = vld [vmem:[#allocation18_spill] sm:$0xff]  ;;  %v18565_v58 = vld [vmem:[#allocation117_spill] sm:$0xff] }
 0x9d6   :  { %18558 = vst [vmem:[#allocation55_spill] sm:$0xff] %v15368_v29  ;;  %18560 = vst [vmem:[#allocation54_spill] sm:$0xff] %v15372_v17  ;;  %v15380_v18 = vadd.bf16 %v15097_v45, %v18563_v9  ;;  %v15384_v59 = vadd.bf16 %v15100_v40, %v18565_v58  ;;  %v18567_v28 = vld [vmem:[#allocation22_spill] sm:$0xff]  ;;  %v18569_v29 = vld [vmem:[#allocation120_spill] sm:$0xff] }
 0x9d7   :  { %18562 = vst [vmem:[#allocation59_spill] sm:$0xff] %v15376_v14  ;;  %v15388_v16 = vadd.bf16 %v15103_v39, %v18567_v28  ;;  %v15392_v61 = vadd.bf16 %v15106_v26, %v18569_v29  ;;  %v18571_v17 = vld [vmem:[#allocation24_spill] sm:$0xff]  ;;  %v18573_v14 = vld [vmem:[#allocation17_spill] sm:$0xff] }
 0x9d8   :  { %18564 = vst [vmem:[#allocation58_spill] sm:$0xff] %v15380_v18  ;;  %18566 = vst [vmem:[#allocation64_spill] sm:$0xff] %v15384_v59  ;;  %v15396_v38 = vadd.bf16 %v15109_v6, %v18571_v17  ;;  %v15400_v9 = vadd.bf16 %v15112_v5, %v18573_v14  ;;  %v18575_v18 = vld [vmem:[#allocation155_spill] sm:$0xff] }
 0x9d9   :  { %18568 = vst [vmem:[#allocation57_spill] sm:$0xff] %v15388_v16  ;;  %18570 = vst [vmem:[#allocation195_spill] sm:$0xff] %v15392_v61  ;;  %v15404_v58 = vadd.bf16 %v15091_v8, %v18575_v18  ;;  %v18577_v59 = vld [vmem:[#allocation151_spill] sm:$0xff]  ;;  %v18579_v16 = vld [vmem:[#allocation157_spill] sm:$0xff] }
 0x9da   :  { %18572 = vst [vmem:[#allocation191_spill] sm:$0xff] %v15396_v38  ;;  %18574 = vst [vmem:[#allocation197_spill] sm:$0xff] %v15400_v9  ;;  %v15408_v28 = vadd.bf16 %v15094_v33, %v18577_v59  ;;  %v15412_v29 = vadd.bf16 %v15097_v45, %v18579_v16  ;;  %v18581_v61 = vld [vmem:[#allocation153_spill] sm:$0xff]  ;;  %v18583_v38 = vld [vmem:[#allocation156_spill] sm:$0xff] }
 0x9db   :  { %18576 = vst [vmem:[#allocation193_spill] sm:$0xff] %v15404_v58  ;;  %v15416_v17 = vadd.bf16 %v15100_v40, %v18581_v61  ;;  %v15420_v14 = vadd.bf16 %v15103_v39, %v18583_v38  ;;  %v18585_v9 = vld [vmem:[#allocation152_spill] sm:$0xff]  ;;  %v18587_v58 = vld [vmem:[#allocation158_spill] sm:$0xff] }
 0x9dc   :  { %18578 = vst [vmem:[#allocation196_spill] sm:$0xff] %v15408_v28  ;;  %18580 = vst [vmem:[#allocation192_spill] sm:$0xff] %v15412_v29  ;;  %v15424_v18 = vadd.bf16 %v15106_v26, %v18585_v9  ;;  %v15428_v59 = vadd.bf16 %v15109_v6, %v18587_v58  ;;  %v18589_v28 = vld [vmem:[#allocation154_spill] sm:$0xff]  ;;  %v18591_v29 = vld [vmem:[#allocation21_spill] sm:$0xff] }
 0x9dd   :  { %18582 = vst [vmem:[#allocation198_spill] sm:$0xff] %v15416_v17  ;;  %18584 = vst [vmem:[#allocation194_spill] sm:$0xff] %v15420_v14  ;;  %v15432_v16 = vadd.bf16 %v15112_v5, %v18589_v28  ;;  %v15436_v61 = vadd.bf16 %v15091_v8, %v18591_v29  ;;  %v18593_v17 = vld [vmem:[#allocation20_spill] sm:$0xff]  ;;  %v18595_v14 = vld [vmem:[#allocation26_spill] sm:$0xff] }
 0x9de   :  { %18586 = vst [vmem:[#allocation61_spill] sm:$0xff] %v15424_v18  ;;  %18588 = vst [vmem:[#allocation60_spill] sm:$0xff] %v15428_v59  ;;  %v15440_v38 = vadd.bf16 %v15094_v33, %v18593_v17  ;;  %v15444_v9 = vadd.bf16 %v15097_v45, %v18595_v14  ;;  %v18597_v18 = vld [vmem:[#allocation19_spill] sm:$0xff]  ;;  %v18599_v59 = vld [vmem:[#allocation30_spill] sm:$0xff] }
 0x9df   :  { %18590 = vst [vmem:[#allocation63_spill] sm:$0xff] %v15432_v16  ;;  %18592 = vst [vmem:[#allocation62_spill] sm:$0xff] %v15436_v61  ;;  %v15448_v58 = vadd.bf16 %v15100_v40, %v18597_v18  ;;  %v15452_v28 = vadd.bf16 %v15103_v39, %v18599_v59  ;;  %v18601_v16 = vld [vmem:[#allocation23_spill] sm:$0xff]  ;;  %v18603_v61 = vld [vmem:[#allocation32_spill] sm:$0xff] }
 0x9e0   :  { %18594 = vst [vmem:[#allocation67_spill] sm:$0xff] %v15440_v38  ;;  %18596 = vst [vmem:[#allocation66_spill] sm:$0xff] %v15444_v9  ;;  %v15456_v29 = vadd.bf16 %v15106_v26, %v18601_v16  ;;  %v15460_v17 = vadd.bf16 %v15109_v6, %v18603_v61  ;;  %v18605_v38 = vld [vmem:[#allocation25_spill] sm:$0xff]  ;;  %v18607_v9 = vld [vmem:[#allocation163_spill] sm:$0xff] }
 0x9e1   :  { %18598 = vst [vmem:[#allocation72_spill] sm:$0xff] %v15448_v58  ;;  %18600 = vst [vmem:[#allocation65_spill] sm:$0xff] %v15452_v28  ;;  %v15464_v14 = vadd.bf16 %v15112_v5, %v18605_v38  ;;  %v15468_v18 = vadd.bf16 %v15091_v8, %v18607_v9  ;;  %v18609_v58 = vld [vmem:[#allocation159_spill] sm:$0xff]  ;;  %v18611_v28 = vld [vmem:[#allocation165_spill] sm:$0xff] }
 0x9e2   :  { %18602 = vst [vmem:[#allocation203_spill] sm:$0xff] %v15456_v29  ;;  %18604 = vst [vmem:[#allocation199_spill] sm:$0xff] %v15460_v17  ;;  %v15472_v59 = vadd.bf16 %v15094_v33, %v18609_v58  ;;  %v15476_v16 = vadd.bf16 %v15097_v45, %v18611_v28  ;;  %v18613_v29 = vld [vmem:[#allocation161_spill] sm:$0xff]  ;;  %v18615_v17 = vld [vmem:[#allocation164_spill] sm:$0xff] }
 0x9e3   :  { %18606 = vst [vmem:[#allocation205_spill] sm:$0xff] %v15464_v14  ;;  %18608 = vst [vmem:[#allocation201_spill] sm:$0xff] %v15468_v18  ;;  %v15480_v61 = vadd.bf16 %v15100_v40, %v18613_v29  ;;  %v15484_v38 = vadd.bf16 %v15103_v39, %v18615_v17  ;;  %v18617_v14 = vld [vmem:[#allocation160_spill] sm:$0xff]  ;;  %v18619_v18 = vld [vmem:[#allocation166_spill] sm:$0xff] }
 0x9e4   :  { %18610 = vst [vmem:[#allocation204_spill] sm:$0xff] %v15472_v59  ;;  %18612 = vst [vmem:[#allocation200_spill] sm:$0xff] %v15476_v16  ;;  %v15488_v9 = vadd.bf16 %v15106_v26, %v18617_v14  ;;  %v15492_v58 = vadd.bf16 %v15109_v6, %v18619_v18  ;;  %v18621_v59 = vld [vmem:[#allocation162_spill] sm:$0xff]  ;;  %v18623_v16 = vld [vmem:[#allocation29_spill] sm:$0xff] }
 0x9e5   :  { %18614 = vst [vmem:[#allocation206_spill] sm:$0xff] %v15480_v61  ;;  %18616 = vst [vmem:[#allocation202_spill] sm:$0xff] %v15484_v38  ;;  %v15496_v28 = vadd.bf16 %v15112_v5, %v18621_v59  ;;  %v15500_v29 = vadd.bf16 %v15091_v8, %v18623_v16  ;;  %v18625_v61 = vld [vmem:[#allocation28_spill] sm:$0xff]  ;;  %v18627_v38 = vld [vmem:[#allocation34_spill] sm:$0xff] }
 0x9e6   :  { %18618 = vst [vmem:[#allocation69_spill] sm:$0xff] %v15488_v9  ;;  %18620 = vst [vmem:[#allocation68_spill] sm:$0xff] %v15492_v58  ;;  %v15504_v17 = vadd.bf16 %v15094_v33, %v18625_v61  ;;  %v15508_v14 = vadd.bf16 %v15097_v45, %v18627_v38  ;;  %v18629_v9 = vld [vmem:[#allocation27_spill] sm:$0xff]  ;;  %v18631_v58 = vld [vmem:[#allocation38_spill] sm:$0xff] }
 0x9e7   :  { %18622 = vst [vmem:[#allocation71_spill] sm:$0xff] %v15496_v28  ;;  %18624 = vst [vmem:[#allocation70_spill] sm:$0xff] %v15500_v29  ;;  %v15512_v18 = vadd.bf16 %v15100_v40, %v18629_v9  ;;  %v15516_v59 = vadd.bf16 %v15103_v39, %v18631_v58  ;;  %v18633_v28 = vld [vmem:[#allocation31_spill] sm:$0xff]  ;;  %v18635_v29 = vld [vmem:[#allocation40_spill] sm:$0xff] }
 0x9e8   :  { %18626 = vst [vmem:[#allocation75_spill] sm:$0xff] %v15504_v17  ;;  %18628 = vst [vmem:[#allocation74_spill] sm:$0xff] %v15508_v14  ;;  %v15520_v16 = vadd.bf16 %v15106_v26, %v18633_v28  ;;  %v15524_v61 = vadd.bf16 %v15109_v6, %v18635_v29  ;;  %v18637_v17 = vld [vmem:[#allocation33_spill] sm:$0xff]  ;;  %v18639_v14 = vld [vmem:[#allocation171_spill] sm:$0xff] }
 0x9e9   :  { %18630 = vst [vmem:[#allocation80_spill] sm:$0xff] %v15512_v18  ;;  %18632 = vst [vmem:[#allocation73_spill] sm:$0xff] %v15516_v59  ;;  %v15528_v38 = vadd.bf16 %v15112_v5, %v18637_v17  ;;  %v15532_v9 = vadd.bf16 %v15091_v8, %v18639_v14  ;;  %v18641_v18 = vld [vmem:[#allocation167_spill] sm:$0xff]  ;;  %v18643_v59 = vld [vmem:[#allocation173_spill] sm:$0xff] }
 0x9ea   :  { %18634 = vst [vmem:[#allocation211_spill] sm:$0xff] %v15520_v16  ;;  %18636 = vst [vmem:[#allocation207_spill] sm:$0xff] %v15524_v61  ;;  %v15536_v58 = vadd.bf16 %v15094_v33, %v18641_v18  ;;  %v15540_v28 = vadd.bf16 %v15097_v45, %v18643_v59  ;;  %v18645_v16 = vld [vmem:[#allocation169_spill] sm:$0xff]  ;;  %v18647_v61 = vld [vmem:[#allocation172_spill] sm:$0xff] }
 0x9eb   :  { %18638 = vst [vmem:[#allocation213_spill] sm:$0xff] %v15528_v38  ;;  %18640 = vst [vmem:[#allocation209_spill] sm:$0xff] %v15532_v9  ;;  %v15544_v29 = vadd.bf16 %v15100_v40, %v18645_v16  ;;  %v15548_v17 = vadd.bf16 %v15103_v39, %v18647_v61  ;;  %v18649_v38 = vld [vmem:[#allocation168_spill] sm:$0xff]  ;;  %v18651_v9 = vld [vmem:[#allocation174_spill] sm:$0xff] }
 0x9ec   :  { %18642 = vst [vmem:[#allocation212_spill] sm:$0xff] %v15536_v58  ;;  %18644 = vst [vmem:[#allocation208_spill] sm:$0xff] %v15540_v28  ;;  %v15552_v14 = vadd.bf16 %v15106_v26, %v18649_v38  ;;  %v15556_v18 = vadd.bf16 %v15109_v6, %v18651_v9  ;;  %v18653_v58 = vld [vmem:[#allocation170_spill] sm:$0xff]  ;;  %v18655_v28 = vld [vmem:[#allocation77_spill] sm:$0xff] }
 0x9ed   :  { %18646 = vst [vmem:[#allocation214_spill] sm:$0xff] %v15544_v29  ;;  %18648 = vst [vmem:[#allocation210_spill] sm:$0xff] %v15548_v17  ;;  %v15560_v59 = vadd.bf16 %v15112_v5, %v18653_v58  ;;  %v15564_v16 = vadd.bf16 %v15091_v8, %v18655_v28  ;;  %v18657_v29 = vld [vmem:[#allocation76_spill] sm:$0xff]  ;;  %v18659_v17 = vld [vmem:[#allocation35_spill] sm:$0xff] }
 0x9ee   :  { %18650 = vst [vmem:[#allocation90_spill] sm:$0xff] %v15552_v14  ;;  %18652 = vst [vmem:[#allocation78_spill] sm:$0xff] %v15556_v18  ;;  %v15568_v61 = vadd.bf16 %v15094_v33, %v18657_v29  ;;  %v15572_v38 = vadd.bf16 %v15097_v45, %v18659_v17  ;;  %v18661_v14 = vld [vmem:[#allocation82_spill] sm:$0xff]  ;;  %v18663_v18 = vld [vmem:[#allocation39_spill] sm:$0xff] }
 0x9ef   :  { %18654 = vst [vmem:[#allocation99_spill] sm:$0xff] %v15560_v59  ;;  %18656 = vst [vmem:[#allocation83_spill] sm:$0xff] %v15564_v16  ;;  %v15576_v9 = vadd.bf16 %v15100_v40, %v18661_v14  ;;  %v15580_v58 = vadd.bf16 %v15103_v39, %v18663_v18  ;;  %v18665_v59 = vld [vmem:[#allocation36_spill] sm:$0xff]  ;;  %v15596_v14 = vadd.bf16 %v15091_v8, %v15026_v35  ;;  %v18679_v8 = vld [vmem:[#allocation181_spill] sm:$0xff] }
 0x9f0   :  { %18658 = vst [vmem:[#allocation87_spill] sm:$0xff] %v15568_v61  ;;  %18660 = vst [vmem:[#allocation79_spill] sm:$0xff] %v15572_v38  ;;  %v15584_v28 = vadd.bf16 %v15106_v26, %v18665_v59  ;;  %v18667_v16 = vld [vmem:[#allocation48_spill] sm:$0xff]  ;;  %v18669_v61 = vld [vmem:[#allocation81_spill] sm:$0xff]  ;;  %v15600_v18 = vadd.bf16 %v15094_v33, %v15032_v50  ;;  %v15604_v59 = vadd.bf16 %v15097_v45, %v15038_v57  ;;  %v7043_v45 = vmul.bf16 1045249613, %v15116_v49 }
 0x9f1   :  { %18662 = vst [vmem:[#allocation97_spill] sm:$0xff] %v15576_v9  ;;  %18664 = vst [vmem:[#allocation86_spill] sm:$0xff] %v15580_v58  ;;  %v15588_v29 = vadd.bf16 %v15109_v6, %v18667_v16  ;;  %v15592_v17 = vadd.bf16 %v15112_v5, %v18669_v61  ;;  %v15608_v16 = vadd.bf16 %v15100_v40, %v15044_v4  ;;  %v18681_v33 = vld [vmem:[#allocation177_spill] sm:$0xff]  ;;  %v7044_v4 = vmul.bf16 1045249613, %v15120_v20 }
 0x9f2   :  { %18666 = vst [vmem:[#allocation219_spill] sm:$0xff] %v15584_v28  ;;  %18671 = vst [vmem:[#allocation217_spill] sm:$0xff] %v15596_v14  ;;  %v15620_v50 = vadd.bf16 %v15109_v6, %v18679_v8  ;;  %v15624_v57 = vadd.bf16 %v15112_v5, %v18681_v33  ;;  %v7045_v40 = vmul.bf16 1045249613, %v15124_v51  ;;  %v7050_v6 = vmul.bf16 1045249613, %v15144_v12 }
 0x9f3   :  { %18668 = vst [vmem:[#allocation215_spill] sm:$0xff] %v15588_v29  ;;  %18670 = vst [vmem:[#allocation221_spill] sm:$0xff] %v15592_v17  ;;  %v18675_v29 = vld [vmem:[#allocation179_spill] sm:$0xff]  ;;  %v15635_v8 = vmax.bf16 %v7043_v45, %v15116_v49  ;;  %v7051_v5 = vmul.bf16 1045249613, %v15148_v7 }
 0x9f4   :  { %18672 = vst [vmem:[#allocation220_spill] sm:$0xff] %v15600_v18  ;;  %18673 = vst [vmem:[#allocation216_spill] sm:$0xff] %v15604_v59  ;;  %v15612_v61 = vadd.bf16 %v15103_v39, %v18675_v29  ;;  %v18677_v17 = vld [vmem:[#allocation175_spill] sm:$0xff]  ;;  %v7046_v39 = vmul.bf16 1045249613, %v15128_v44  ;;  %v15647_v59 = vmax.bf16 %v7045_v40, %v15124_v51  ;;  %v18704_v51 = vld [vmem:[#allocation41_spill] sm:$0xff] }
 0x9f5   :  { %18674 = vst [vmem:[#allocation222_spill] sm:$0xff] %v15608_v16  ;;  %v15616_v35 = vadd.bf16 %v15106_v26, %v18677_v17  ;;  %18680 = vst [vmem:[#allocation91_spill] sm:$0xff] %v15620_v50  ;;  %v7047_v29 = vmul.bf16 1045249613, %v15132_v21  ;;  %v7048_v26 = vmul.bf16 1045249613, %v15136_v41  ;;  %v15641_v50 = vmax.bf16 %v7044_v4, %v15120_v20 }
 0x9f6   :  { %18676 = vst [vmem:[#allocation218_spill] sm:$0xff] %v15612_v61  ;;  %18682 = vst [vmem:[#allocation88_spill] sm:$0xff] %v15624_v57  ;;  %v7049_v17 = vmul.bf16 1045249613, %v15140_v15  ;;  %v7052_v33 = vmul.bf16 1045249613, %v15152_v60  ;;  %v15653_v18 = vmax.bf16 %v7046_v39, %v15128_v44 }
 0x9f7   :  { %18678 = vst [vmem:[#allocation104_spill] sm:$0xff] %v15616_v35  ;;  %18683 = vst [vmem:[#allocation98_spill] sm:$0xff] %v15635_v8  ;;  %v7053_v57 = vmul.bf16 1045249613, %v15156_v37  ;;  %v7054_v35 = vmul.bf16 1045249613, %v15160_v11  ;;  %v15659_v14 = vmax.bf16 %v7047_v29, %v15132_v21  ;;  %v15665_v28 = vmax.bf16 %v7048_v26, %v15136_v41 }
 0x9f8   :  { %18684 = vst [vmem:[#allocation84_spill] sm:$0xff] %v15641_v50  ;;  %v7055_v61 = vmul.bf16 1045249613, %v15164_v30  ;;  %v7056_v16 = vmul.bf16 1045249613, %v15168_v0  ;;  %18685 = vst [vmem:[#allocation94_spill] sm:$0xff] %v15647_v59  ;;  %v15671_v58 = vmax.bf16 %v7049_v17, %v15140_v15  ;;  %v15677_v59 = vmax.bf16 %v7050_v6, %v15144_v12 }
 0x9f9   :  { %v7057_v49 = vmul.bf16 1045249613, %v15172_v43  ;;  %v7058_v45 = vmul.bf16 1045249613, %v15176_v34  ;;  %v7059_v8 = vmul.bf16 1045249613, %v15180_v52  ;;  %v15689_v40 = vmax.bf16 %v7052_v33, %v15152_v60 }
 0x9fa   :  { %18686 = vst [vmem:[#allocation85_spill] sm:$0xff] %v15653_v18  ;;  %v7060_v20 = vmul.bf16 1045249613, %v15184_v42  ;;  %v7061_v4 = vmul.bf16 1045249613, %v15188_v25  ;;  %18687 = vst [vmem:[#allocation95_spill] sm:$0xff] %v15659_v14  ;;  %v15683_v18 = vmax.bf16 %v7051_v5, %v15148_v7  ;;  %v15695_v39 = vmax.bf16 %v7053_v57, %v15156_v37 }
 0x9fb   :  { %v7062_v50 = vmul.bf16 1045249613, %v15192_v54  ;;  %18688 = vst [vmem:[#allocation227_spill] sm:$0xff] %v15665_v28  ;;  %18689 = vst [vmem:[#allocation223_spill] sm:$0xff] %v15671_v58  ;;  %v15701_v29 = vmax.bf16 %v7054_v35, %v15160_v11  ;;  %v18695_v60 = vld [vmem:[#allocation180_spill] sm:$0xff]  ;;  %v18697_v41 = vld [vmem:[#allocation182_spill] sm:$0xff]  ;;  %v15707_v26 = vmax.bf16 %v7055_v61, %v15164_v30  ;;  %v15713_v17 = vmax.bf16 %v7056_v16, %v15168_v0 }
 0x9fc   :  { %18690 = vst [vmem:[#allocation229_spill] sm:$0xff] %v15677_v59  ;;  %18691 = vst [vmem:[#allocation225_spill] sm:$0xff] %v15683_v18  ;;  %v18696_v15 = vld [vmem:[#allocation176_spill] sm:$0xff]  ;;  %v18699_v37 = vld [vmem:[#allocation178_spill] sm:$0xff]  ;;  %v15719_v6 = vmax.bf16 %v7057_v49, %v15172_v43  ;;  %v15725_v5 = vmax.bf16 %v7058_v45, %v15176_v34  ;;  %v15731_v12 = vmax.bf16 %v7059_v8, %v15180_v52  ;;  %v18730_v35 = vmul.bf16 1045249613, %v15196_v10 }
 0x9fd   :  { %18692 = vst [vmem:[#allocation228_spill] sm:$0xff] %v15689_v40  ;;  %18693 = vst [vmem:[#allocation224_spill] sm:$0xff] %v15695_v39  ;;  %v18700_v21 = vld [vmem:[#allocation42_spill] sm:$0xff]  ;;  %v18701_v44 = vld [vmem:[#allocation37_spill] sm:$0xff]  ;;  %v15737_v7 = vmax.bf16 %v7060_v20, %v15184_v42  ;;  %v15743_v33 = vmax.bf16 %v7061_v4, %v15188_v25  ;;  %v15749_v57 = vmax.bf16 %v7062_v50, %v15192_v54  ;;  %v18735_v54 = vmul.bf16 1045249613, %v15200_v27 }
 0x9fe   :  { %18694 = vst [vmem:[#allocation230_spill] sm:$0xff] %v15701_v29  ;;  %18698 = vst [vmem:[#allocation226_spill] sm:$0xff] %v15707_v26  ;;  %v18703_v11 = vld [vmem:[#allocation47_spill] sm:$0xff]  ;;  %v18707_v30 = vld [vmem:[#allocation50_spill] sm:$0xff]  ;;  %v15757_v25 = vmax.bf16 %v18730_v35, %v15196_v10  ;;  %v18740_v10 = vmul.bf16 1045249613, %v15204_v2 }
 0x9ff   :  { %18702 = vst [vmem:[#allocation124_spill] sm:$0xff] %v15713_v17  ;;  %v18705_v58 = vld [vmem:[#allocation51_spill] sm:$0xff]  ;;  %18706 = vst [vmem:[#allocation89_spill] sm:$0xff] %v15719_v6  ;;  %v18708_v26 = vld [vmem:[#allocation56_spill] sm:$0xff]  ;;  %v15765_v50 = vmax.bf16 %v18735_v54, %v15200_v27  ;;  %v18745_v27 = vmul.bf16 1045249613, %v15208_v36 }
 0xa00   :  { %v18709_v14 = vld [vmem:[#allocation49_spill] sm:$0xff]  ;;  %18710 = vst [vmem:[#allocation126_spill] sm:$0xff] %v15725_v5  ;;  %v18711_v0 = vld [vmem:[#allocation187_spill] sm:$0xff]  ;;  %18714 = vst [vmem:[#allocation96_spill] sm:$0xff] %v15731_v12  ;;  %v15773_v35 = vmax.bf16 %v18740_v10, %v15204_v2  ;;  %v18750_v2 = vmul.bf16 1045249613, %v15212_v22 }
 0xa01   :  { %v18712_v17 = vld [vmem:[#allocation183_spill] sm:$0xff]  ;;  %v18713_v59 = vld [vmem:[#allocation189_spill] sm:$0xff]  ;;  %v18716_v6 = vld [vmem:[#allocation188_spill] sm:$0xff]  ;;  %18718 = vst [vmem:[#allocation125_spill] sm:$0xff] %v15737_v7  ;;  %v15781_v54 = vmax.bf16 %v18745_v27, %v15208_v36  ;;  %v18755_v36 = vmul.bf16 1045249613, %v15216_v19 }
 0xa02   :  { %v18715_v43 = vld [vmem:[#allocation185_spill] sm:$0xff]  ;;  %v18717_v28 = vld [vmem:[#allocation184_spill] sm:$0xff]  ;;  %v18719_v34 = vld [vmem:[#allocation190_spill] sm:$0xff]  ;;  %18722 = vst [vmem:[#allocation92_spill] sm:$0xff] %v15743_v33  ;;  %v15789_v10 = vmax.bf16 %v18750_v2, %v15212_v22  ;;  %v18760_v22 = vmul.bf16 1045249613, %v15220_v32 }
 0xa03   :  { %v18720_v5 = vld [vmem:[#allocation186_spill] sm:$0xff]  ;;  %v18721_v39 = vld [vmem:[#allocation53_spill] sm:$0xff]  ;;  %v18723_v52 = vld [vmem:[#allocation52_spill] sm:$0xff]  ;;  %18726 = vst [vmem:[#allocation127_spill] sm:$0xff] %v15749_v57  ;;  %v15797_v27 = vmax.bf16 %v18755_v36, %v15216_v19  ;;  %v18765_v19 = vmul.bf16 1045249613, %v15224_v23 }
 0xa04   :  { %v18724_v12 = vld [vmem:[#allocation55_spill] sm:$0xff]  ;;  %v18725_v18 = vld [vmem:[#allocation54_spill] sm:$0xff]  ;;  %18731 = vst [vmem:[#allocation93_spill] sm:$0xff] %v15757_v25  ;;  %v18732_v4 = vld [vmem:[#allocation57_spill] sm:$0xff]  ;;  %v15805_v2 = vmax.bf16 %v18760_v22, %v15220_v32  ;;  %v18770_v32 = vmul.bf16 1045249613, %v15228_v46 }
 0xa05   :  { %v18727_v42 = vld [vmem:[#allocation59_spill] sm:$0xff]  ;;  %18736 = vst [vmem:[#allocation235_spill] sm:$0xff] %v15765_v50  ;;  %v18737_v20 = vld [vmem:[#allocation197_spill] sm:$0xff]  ;;  %18741 = vst [vmem:[#allocation231_spill] sm:$0xff] %v15773_v35  ;;  %v15813_v36 = vmax.bf16 %v18765_v19, %v15224_v23  ;;  %v18775_v23 = vmul.bf16 1045249613, %v15232_v56 }
 0xa06   :  { %v18742_v8 = vld [vmem:[#allocation192_spill] sm:$0xff]  ;;  %18746 = vst [vmem:[#allocation237_spill] sm:$0xff] %v15781_v54  ;;  %v18747_v45 = vld [vmem:[#allocation61_spill] sm:$0xff]  ;;  %18751 = vst [vmem:[#allocation233_spill] sm:$0xff] %v15789_v10  ;;  %v15821_v22 = vmax.bf16 %v18770_v32, %v15228_v46  ;;  %v18780_v46 = vmul.bf16 1045249613, %v15236_v62 }
 0xa07   :  { %v18752_v49 = vld [vmem:[#allocation62_spill] sm:$0xff]  ;;  %18756 = vst [vmem:[#allocation236_spill] sm:$0xff] %v15797_v27  ;;  %v18757_v16 = vld [vmem:[#allocation72_spill] sm:$0xff]  ;;  %18761 = vst [vmem:[#allocation232_spill] sm:$0xff] %v15805_v2  ;;  %v15829_v19 = vmax.bf16 %v18775_v23, %v15232_v56  ;;  %v18785_v56 = vmul.bf16 1045249613, %v15240_v53 }
 0xa08   :  { %v18762_v61 = vld [vmem:[#allocation199_spill] sm:$0xff]  ;;  %18766 = vst [vmem:[#allocation238_spill] sm:$0xff] %v15813_v36  ;;  %v18767_v7 = vld [vmem:[#allocation204_spill] sm:$0xff]  ;;  %18771 = vst [vmem:[#allocation234_spill] sm:$0xff] %v15821_v22  ;;  %v15837_v32 = vmax.bf16 %v18780_v46, %v15236_v62  ;;  %v18790_v62 = vmul.bf16 1045249613, %v15244_v24 }
 0xa09   :  { %v18772_v33 = vld [vmem:[#allocation202_spill] sm:$0xff]  ;;  %18776 = vst [vmem:[#allocation132_spill] sm:$0xff] %v15829_v19  ;;  %v18777_v57 = vld [vmem:[#allocation71_spill] sm:$0xff]  ;;  %v15845_v23 = vmax.bf16 %v18785_v56, %v15240_v53  ;;  %v18792_v35 = vld [vmem:[#allocation209_spill] sm:$0xff]  ;;  %v18795_v53 = vmul.bf16 1045249613, %v15248_v55 }
 0xa0a   :  { %18781 = vst [vmem:[#allocation128_spill] sm:$0xff] %v15837_v32  ;;  %v18782_v25 = vld [vmem:[#allocation74_spill] sm:$0xff]  ;;  %v18787_v50 = vld [vmem:[#allocation211_spill] sm:$0xff]  ;;  %v15853_v46 = vmax.bf16 %v18790_v62, %v15244_v24  ;;  %v18800_v24 = vmul.bf16 1045249613, %v15252_v63  ;;  %v18815_v36 = vld [vmem:[#allocation221_spill] sm:$0xff] }
 0xa0b   :  { %18786 = vst [vmem:[#allocation134_spill] sm:$0xff] %v15845_v23  ;;  %v15861_v56 = vmax.bf16 %v18795_v53, %v15248_v55  ;;  %v18797_v54 = vld [vmem:[#allocation214_spill] sm:$0xff]  ;;  %v18805_v55 = vmul.bf16 1045249613, %v15256_v3  ;;  %v18807_v27 = vld [vmem:[#allocation87_spill] sm:$0xff]  ;;  %v18819_v22 = vld [vmem:[#allocation216_spill] sm:$0xff] }
 0xa0c   :  { %18791 = vst [vmem:[#allocation130_spill] sm:$0xff] %v15853_v46  ;;  %v18798_v23 = vld [vmem:[#allocation210_spill] sm:$0xff]  ;;  %v15869_v62 = vmax.bf16 %v18800_v24, %v15252_v63  ;;  %v18808_v63 = vmul.bf16 1045249613, %v15260_v48  ;;  %v18823_v19 = vld [vmem:[#allocation104_spill] sm:$0xff] }
 0xa0d   :  { %18796 = vst [vmem:[#allocation133_spill] sm:$0xff] %v15861_v56  ;;  %v18799_v29 = vld [vmem:[#allocation90_spill] sm:$0xff]  ;;  %v15877_v53 = vmax.bf16 %v18805_v55, %v15256_v3  ;;  %v18813_v3 = vmul.bf16 1045249613, %v15264_v47  ;;  %v18825_v9 = vld [vmem:[#allocation88_spill] sm:$0xff] }
 0xa0e   :  { %18801 = vst [vmem:[#allocation129_spill] sm:$0xff] %v15869_v62  ;;  %v18802_v10 = vld [vmem:[#allocation78_spill] sm:$0xff]  ;;  %v15885_v24 = vmax.bf16 %v18808_v63, %v15260_v48  ;;  %v18818_v48 = vmul.bf16 1045249613, %v15268_v1  ;;  %v18827_v46 = vmul.bf16 1045249613, %v18695_v60 }
 0xa0f   :  { %18806 = vst [vmem:[#allocation135_spill] sm:$0xff] %v15877_v53  ;;  %v18810_v2 = vld [vmem:[#allocation86_spill] sm:$0xff]  ;;  %v15893_v55 = vmax.bf16 %v18813_v3, %v15264_v47  ;;  %v18822_v47 = vmul.bf16 1045249613, %v15272_v13  ;;  %v18829_v38 = vmul.bf16 1045249613, %v18697_v41 }
 0xa10   :  { %18809 = vst [vmem:[#allocation131_spill] sm:$0xff] %v15885_v24  ;;  %v15901_v63 = vmax.bf16 %v18818_v48, %v15268_v1  ;;  %v18820_v24 = vld [vmem:[#allocation222_spill] sm:$0xff]  ;;  %v18826_v1 = vmul.bf16 1045249613, %v15276_v31  ;;  %v15922_v62 = vmax.bf16 %v18827_v46, %v18695_v60  ;;  %v18830_v53 = vmul.bf16 1045249613, %v18699_v37 }
 0xa11   :  { %18814 = vst [vmem:[#allocation243_spill] sm:$0xff] %v15893_v55  ;;  %v18821_v40 = vld [vmem:[#allocation218_spill] sm:$0xff]  ;;  %v15909_v3 = vmax.bf16 %v18822_v47, %v15272_v13  ;;  %v18824_v55 = vld [vmem:[#allocation91_spill] sm:$0xff]  ;;  %v18828_v13 = vmul.bf16 1045249613, %v18696_v15  ;;  %v15932_v56 = vmax.bf16 %v18829_v38, %v18697_v41 }
 0xa12   :  { %v15917_v48 = vmax.bf16 %v18826_v1, %v15276_v31  ;;  %v15937_v31 = vmax.bf16 %v18830_v53, %v18699_v37  ;;  %v18832_v1 = vmul.bf16 1045249613, %v18700_v21  ;;  %v18833_v46 = vmul.bf16 1045249613, %v18701_v44 }
 0xa13   :  { %v15927_v47 = vmax.bf16 %v18828_v13, %v18696_v15  ;;  %v18835_v13 = vmul.bf16 1045249613, %v18703_v11  ;;  %v18836_v41 = vmul.bf16 1045249613, %v18704_v51  ;;  %v18837_v53 = vmul.bf16 1045249613, %v18705_v58 }
 0xa14   :  { %18831 = vst [vmem:[#allocation239_spill] sm:$0xff] %v15937_v31  ;;  %v15942_v60 = vmax.bf16 %v18832_v1, %v18700_v21  ;;  %v15947_v15 = vmax.bf16 %v18833_v46, %v18701_v44  ;;  %v18838_v1 = vmul.bf16 1045249613, %v18707_v30  ;;  %v18839_v46 = vmul.bf16 1045249613, %v18708_v26 }
 0xa15   :  { %v15952_v38 = vmax.bf16 %v18835_v13, %v18703_v11  ;;  %v15957_v37 = vmax.bf16 %v18836_v41, %v18704_v51  ;;  %v15962_v21 = vmax.bf16 %v18837_v53, %v18705_v58  ;;  %v18840_v13 = vmul.bf16 1045249613, %v18709_v14 }
 0xa16   :  { %18834 = vst [vmem:[#allocation245_spill] sm:$0xff] %v15947_v15  ;;  %v15967_v44 = vmax.bf16 %v18838_v1, %v18707_v30  ;;  %v15972_v11 = vmax.bf16 %v18839_v46, %v18708_v26  ;;  %v18842_v41 = vmul.bf16 1045249613, %v18711_v0  ;;  %v18844_v53 = vmul.bf16 1045249613, %v18712_v17 }
 0xa17   :  { %v15977_v51 = vmax.bf16 %v18840_v13, %v18709_v14  ;;  %v18846_v1 = vmul.bf16 1045249613, %v18713_v59  ;;  %v18848_v46 = vmul.bf16 1045249613, %v18715_v43  ;;  %v18849_v13 = vmul.bf16 1045249613, %v18716_v6 }
 0xa18   :  { %v15982_v58 = vmax.bf16 %v18842_v41, %v18711_v0  ;;  %v15987_v30 = vmax.bf16 %v18844_v53, %v18712_v17  ;;  %v18850_v41 = vmul.bf16 1045249613, %v18717_v28  ;;  %v18851_v53 = vmul.bf16 1045249613, %v18719_v34 }
 0xa19   :  { %18841 = vst [vmem:[#allocation241_spill] sm:$0xff] %v15977_v51  ;;  %v15992_v26 = vmax.bf16 %v18846_v1, %v18713_v59  ;;  %v15997_v14 = vmax.bf16 %v18848_v46, %v18715_v43  ;;  %v16002_v0 = vmax.bf16 %v18849_v13, %v18716_v6  ;;  %v18852_v1 = vmul.bf16 1045249613, %v18720_v5 }
 0xa1a   :  { %18843 = vst [vmem:[#allocation244_spill] sm:$0xff] %v15982_v58  ;;  %18845 = vst [vmem:[#allocation240_spill] sm:$0xff] %v15987_v30  ;;  %v16007_v17 = vmax.bf16 %v18850_v41, %v18717_v28  ;;  %v16012_v59 = vmax.bf16 %v18851_v53, %v18719_v34  ;;  %v18854_v46 = vmul.bf16 1045249613, %v18721_v39  ;;  %v18856_v13 = vmul.bf16 1045249613, %v18723_v52 }
 0xa1b   :  { %18847 = vst [vmem:[#allocation246_spill] sm:$0xff] %v15992_v26  ;;  %v16017_v43 = vmax.bf16 %v18852_v1, %v18720_v5  ;;  %v18858_v41 = vmul.bf16 1045249613, %v18724_v12  ;;  %v18860_v53 = vmul.bf16 1045249613, %v18725_v18 }
 0xa1c   :  { %v16022_v6 = vmax.bf16 %v18854_v46, %v18721_v39  ;;  %v16027_v28 = vmax.bf16 %v18856_v13, %v18723_v52  ;;  %v18861_v1 = vmul.bf16 1045249613, %v18727_v42  ;;  %v18862_v46 = vld [vmem:[#allocation58_spill] sm:$0xff]  ;;  %v18864_v13 = vld [vmem:[#allocation64_spill] sm:$0xff] }
 0xa1d   :  { %18853 = vst [vmem:[#allocation242_spill] sm:$0xff] %v16017_v43  ;;  %v16032_v34 = vmax.bf16 %v18858_v41, %v18724_v12  ;;  %v16037_v5 = vmax.bf16 %v18860_v53, %v18725_v18  ;;  %v18863_v32 = vmul.bf16 1045249613, %v18862_v46  ;;  %v18866_v41 = vmul.bf16 1045249613, %v18732_v4  ;;  %v18868_v53 = vld [vmem:[#allocation195_spill] sm:$0xff] }
 0xa1e   :  { %18855 = vst [vmem:[#allocation140_spill] sm:$0xff] %v16022_v6  ;;  %18857 = vst [vmem:[#allocation136_spill] sm:$0xff] %v16027_v28  ;;  %v16042_v39 = vmax.bf16 %v18861_v1, %v18727_v42  ;;  %v18865_v28 = vmul.bf16 1045249613, %v18864_v13  ;;  %v18869_v43 = vmul.bf16 1045249613, %v18868_v53 }
 0xa1f   :  { %18859 = vst [vmem:[#allocation142_spill] sm:$0xff] %v16032_v34  ;;  %v16047_v52 = vmax.bf16 %v18863_v32, %v18862_v46  ;;  %v16057_v18 = vmax.bf16 %v18866_v41, %v18732_v4  ;;  %v18871_v1 = vld [vmem:[#allocation191_spill] sm:$0xff]  ;;  %v18874_v46 = vmul.bf16 1045249613, %v18737_v20  ;;  %v18878_v41 = vld [vmem:[#allocation196_spill] sm:$0xff] }
 0xa20   :  { %v16052_v12 = vmax.bf16 %v18865_v28, %v18864_v13  ;;  %v16062_v42 = vmax.bf16 %v18869_v43, %v18868_v53  ;;  %v18872_v34 = vmul.bf16 1045249613, %v18871_v1  ;;  %v18876_v13 = vld [vmem:[#allocation193_spill] sm:$0xff]  ;;  %v18880_v53 = vmul.bf16 1045249613, %v18742_v8 }
 0xa21   :  { %18867 = vst [vmem:[#allocation138_spill] sm:$0xff] %v16057_v18  ;;  %v16072_v28 = vmax.bf16 %v18874_v46, %v18737_v20  ;;  %v18877_v6 = vmul.bf16 1045249613, %v18876_v13  ;;  %v18879_v18 = vmul.bf16 1045249613, %v18878_v41  ;;  %v18883_v46 = vld [vmem:[#allocation194_spill] sm:$0xff] }
 0xa22   :  { %18870 = vst [vmem:[#allocation141_spill] sm:$0xff] %v16062_v42  ;;  %v16067_v32 = vmax.bf16 %v18872_v34, %v18871_v1  ;;  %v16087_v34 = vmax.bf16 %v18880_v53, %v18742_v8  ;;  %v18881_v1 = vld [vmem:[#allocation198_spill] sm:$0xff]  ;;  %v18891_v53 = vld [vmem:[#allocation63_spill] sm:$0xff] }
 0xa23   :  { %18875 = vst [vmem:[#allocation143_spill] sm:$0xff] %v16072_v28  ;;  %v16077_v4 = vmax.bf16 %v18877_v6, %v18876_v13  ;;  %v16082_v43 = vmax.bf16 %v18879_v18, %v18878_v41  ;;  %v18884_v28 = vmul.bf16 1045249613, %v18883_v46  ;;  %v18886_v13 = vmul.bf16 1045249613, %v18747_v45  ;;  %v18888_v41 = vld [vmem:[#allocation60_spill] sm:$0xff] }
 0xa24   :  { %18873 = vst [vmem:[#allocation137_spill] sm:$0xff] %v16067_v32  ;;  %v18882_v32 = vmul.bf16 1045249613, %v18881_v1  ;;  %v18889_v42 = vmul.bf16 1045249613, %v18888_v41 }
 0xa25   :  { %v16097_v6 = vmax.bf16 %v18884_v28, %v18883_v46  ;;  %v16102_v18 = vmax.bf16 %v18886_v13, %v18747_v45  ;;  %v18892_v30 = vmul.bf16 1045249613, %v18891_v53  ;;  %v18895_v46 = vld [vmem:[#allocation67_spill] sm:$0xff]  ;;  %v18897_v13 = vld [vmem:[#allocation66_spill] sm:$0xff] }
 0xa26   :  { %v16092_v20 = vmax.bf16 %v18882_v32, %v18881_v1  ;;  %v16107_v8 = vmax.bf16 %v18889_v42, %v18888_v41  ;;  %v18894_v1 = vmul.bf16 1045249613, %v18752_v49  ;;  %v18899_v41 = vmul.bf16 1045249613, %v18757_v16 }
 0xa27   :  { %18885 = vst [vmem:[#allocation139_spill] sm:$0xff] %v16097_v6  ;;  %18887 = vst [vmem:[#allocation250_spill] sm:$0xff] %v16102_v18  ;;  %v16112_v32 = vmax.bf16 %v18892_v30, %v18891_v53  ;;  %v18896_v6 = vmul.bf16 1045249613, %v18895_v46  ;;  %v18898_v18 = vmul.bf16 1045249613, %v18897_v13 }
 0xa28   :  { %18890 = vst [vmem:[#allocation247_spill] sm:$0xff] %v16107_v8  ;;  %v16117_v28 = vmax.bf16 %v18894_v1, %v18752_v49  ;;  %v16132_v30 = vmax.bf16 %v18899_v41, %v18757_v16  ;;  %v18900_v53 = vld [vmem:[#allocation65_spill] sm:$0xff]  ;;  %v18903_v1 = vld [vmem:[#allocation203_spill] sm:$0xff] }
 0xa29   :  { %18893 = vst [vmem:[#allocation252_spill] sm:$0xff] %v16112_v32  ;;  %v16122_v45 = vmax.bf16 %v18896_v6, %v18895_v46  ;;  %v16127_v42 = vmax.bf16 %v18898_v18, %v18897_v13  ;;  %v18901_v8 = vmul.bf16 1045249613, %v18900_v53  ;;  %v18904_v32 = vmul.bf16 1045249613, %v18903_v1  ;;  %v18908_v13 = vld [vmem:[#allocation205_spill] sm:$0xff] }
 0xa2a   :  { %v18906_v46 = vmul.bf16 1045249613, %v18762_v61  ;;  %v18909_v51 = vmul.bf16 1045249613, %v18908_v13  ;;  %v18911_v41 = vld [vmem:[#allocation201_spill] sm:$0xff] }
 0xa2b   :  { %v16137_v49 = vmax.bf16 %v18901_v8, %v18900_v53  ;;  %v16142_v6 = vmax.bf16 %v18904_v32, %v18903_v1  ;;  %v18912_v26 = vmul.bf16 1045249613, %v18911_v41  ;;  %v18913_v53 = vmul.bf16 1045249613, %v18767_v7  ;;  %v18914_v1 = vld [vmem:[#allocation200_spill] sm:$0xff] }
 0xa2c   :  { %v16147_v18 = vmax.bf16 %v18906_v46, %v18762_v61  ;;  %v16152_v16 = vmax.bf16 %v18909_v51, %v18908_v13  ;;  %v18916_v46 = vld [vmem:[#allocation206_spill] sm:$0xff]  ;;  %v18918_v13 = vmul.bf16 1045249613, %v18772_v33 }
 0xa2d   :  { %18902 = vst [vmem:[#allocation249_spill] sm:$0xff] %v16137_v49  ;;  %18905 = vst [vmem:[#allocation251_spill] sm:$0xff] %v16142_v6  ;;  %v16157_v8 = vmax.bf16 %v18912_v26, %v18911_v41  ;;  %v16162_v32 = vmax.bf16 %v18913_v53, %v18767_v7  ;;  %v18915_v49 = vmul.bf16 1045249613, %v18914_v1  ;;  %v18920_v41 = vld [vmem:[#allocation69_spill] sm:$0xff]  ;;  %v18923_v53 = vld [vmem:[#allocation68_spill] sm:$0xff] }
 0xa2e   :  { %18907 = vst [vmem:[#allocation248_spill] sm:$0xff] %v16147_v18  ;;  %18910 = vst [vmem:[#allocation43_spill] sm:$0xff] %v16152_v16  ;;  %v18917_v18 = vmul.bf16 1045249613, %v18916_v46  ;;  %v16177_v26 = vmax.bf16 %v18918_v13, %v18772_v33  ;;  %v18921_v16 = vmul.bf16 1045249613, %v18920_v41 }
 0xa2f   :  { %v16167_v61 = vmax.bf16 %v18915_v49, %v18914_v1  ;;  %v18924_v6 = vmul.bf16 1045249613, %v18923_v53  ;;  %v18926_v1 = vmul.bf16 1045249613, %v18777_v57  ;;  %v18930_v13 = vld [vmem:[#allocation75_spill] sm:$0xff] }
 0xa30   :  { %v16172_v51 = vmax.bf16 %v18917_v18, %v18916_v46  ;;  %18919 = vst [vmem:[#allocation45_spill] sm:$0xff] %v16177_v26  ;;  %v16182_v7 = vmax.bf16 %v18921_v16, %v18920_v41  ;;  %v18928_v46 = vld [vmem:[#allocation70_spill] sm:$0xff]  ;;  %v18931_v26 = vmul.bf16 1045249613, %v18930_v13  ;;  %v18932_v41 = vmul.bf16 1045249613, %v18782_v25 }
 0xa31   :  { %v16187_v49 = vmax.bf16 %v18924_v6, %v18923_v53  ;;  %v16192_v18 = vmax.bf16 %v18926_v1, %v18777_v57  ;;  %v18929_v58 = vmul.bf16 1045249613, %v18928_v46  ;;  %v18933_v53 = vld [vmem:[#allocation80_spill] sm:$0xff]  ;;  %v18935_v1 = vld [vmem:[#allocation73_spill] sm:$0xff] }
 0xa32   :  { %18922 = vst [vmem:[#allocation46_spill] sm:$0xff] %v16182_v7  ;;  %v16202_v16 = vmax.bf16 %v18931_v26, %v18930_v13  ;;  %v16207_v6 = vmax.bf16 %v18932_v41, %v18782_v25  ;;  %v18940_v13 = vld [vmem:[#allocation207_spill] sm:$0xff]  ;;  %v18943_v41 = vld [vmem:[#allocation213_spill] sm:$0xff] }
 0xa33   :  { %18925 = vst [vmem:[#allocation122_spill] sm:$0xff] %v16187_v49  ;;  %18927 = vst [vmem:[#allocation123_spill] sm:$0xff] %v16192_v18  ;;  %v16197_v33 = vmax.bf16 %v18929_v58, %v18928_v46  ;;  %v18934_v49 = vmul.bf16 1045249613, %v18933_v53  ;;  %v18936_v18 = vmul.bf16 1045249613, %v18935_v1 }
 0xa34   :  { %v18938_v46 = vmul.bf16 1045249613, %v18787_v50  ;;  %v18941_v7 = vmul.bf16 1045249613, %v18940_v13  ;;  %v18944_v15 = vmul.bf16 1045249613, %v18943_v41 }
 0xa35   :  { %v16212_v57 = vmax.bf16 %v18934_v49, %v18933_v53  ;;  %v16217_v58 = vmax.bf16 %v18936_v18, %v18935_v1  ;;  %v18946_v53 = vmul.bf16 1045249613, %v18792_v35  ;;  %v18947_v1 = vld [vmem:[#allocation212_spill] sm:$0xff] }
 0xa36   :  { %v16222_v26 = vmax.bf16 %v18938_v46, %v18787_v50  ;;  %v16227_v25 = vmax.bf16 %v18941_v7, %v18940_v13  ;;  %v16232_v49 = vmax.bf16 %v18944_v15, %v18943_v41  ;;  %v18949_v46 = vld [vmem:[#allocation208_spill] sm:$0xff]  ;;  %v18951_v13 = vmul.bf16 1045249613, %v18797_v54 }
 0xa37   :  { %18937 = vst [vmem:[#allocation102_spill] sm:$0xff] %v16217_v58  ;;  %v16237_v18 = vmax.bf16 %v18946_v53, %v18792_v35  ;;  %v18948_v58 = vmul.bf16 1045249613, %v18947_v1  ;;  %v18952_v41 = vmul.bf16 1045249613, %v18798_v23 }
 0xa38   :  { %18939 = vst [vmem:[#allocation100_spill] sm:$0xff] %v16222_v26  ;;  %18942 = vst [vmem:[#allocation105_spill] sm:$0xff] %v16227_v25  ;;  %v18950_v26 = vmul.bf16 1045249613, %v18949_v46  ;;  %v16252_v15 = vmax.bf16 %v18951_v13, %v18797_v54  ;;  %v18954_v53 = vmul.bf16 1045249613, %v18799_v29 }
 0xa39   :  { %18945 = vst [vmem:[#allocation106_spill] sm:$0xff] %v16232_v49  ;;  %v16242_v50 = vmax.bf16 %v18948_v58, %v18947_v1  ;;  %v16257_v35 = vmax.bf16 %v18952_v41, %v18798_v23  ;;  %v18956_v1 = vmul.bf16 1045249613, %v18802_v10  ;;  %v18961_v13 = vld [vmem:[#allocation83_spill] sm:$0xff]  ;;  %v18963_v41 = vmul.bf16 1045249613, %v18807_v27 }
 0xa3a   :  { %v16247_v7 = vmax.bf16 %v18950_v26, %v18949_v46  ;;  %v16262_v58 = vmax.bf16 %v18954_v53, %v18799_v29  ;;  %v18958_v46 = vld [vmem:[#allocation99_spill] sm:$0xff]  ;;  %v18962_v49 = vmul.bf16 1045249613, %v18961_v13 }
 0xa3b   :  { %18953 = vst [vmem:[#allocation108_spill] sm:$0xff] %v16257_v35  ;;  %v16267_v26 = vmax.bf16 %v18956_v1, %v18802_v10  ;;  %v18959_v25 = vmul.bf16 1045249613, %v18958_v46  ;;  %v16282_v29 = vmax.bf16 %v18963_v41, %v18807_v27  ;;  %v18964_v53 = vld [vmem:[#allocation79_spill] sm:$0xff]  ;;  %v18966_v1 = vld [vmem:[#allocation97_spill] sm:$0xff] }
 0xa3c   :  { %18955 = vst [vmem:[#allocation107_spill] sm:$0xff] %v16262_v58  ;;  %v16277_v23 = vmax.bf16 %v18962_v49, %v18961_v13  ;;  %v18965_v35 = vmul.bf16 1045249613, %v18964_v53  ;;  %v18970_v13 = vld [vmem:[#allocation219_spill] sm:$0xff] }
 0xa3d   :  { %18957 = vst [vmem:[#allocation112_spill] sm:$0xff] %v16267_v26  ;;  %v16272_v54 = vmax.bf16 %v18959_v25, %v18958_v46  ;;  %v18967_v26 = vmul.bf16 1045249613, %v18966_v1  ;;  %v18968_v46 = vmul.bf16 1045249613, %v18810_v2  ;;  %v18972_v41 = vld [vmem:[#allocation215_spill] sm:$0xff] }
 0xa3e   :  { %v16287_v10 = vmax.bf16 %v18965_v35, %v18964_v53  ;;  %v18973_v58 = vmul.bf16 1045249613, %v18972_v41  ;;  %v18975_v53 = vmul.bf16 1045249613, %v18815_v36 }
 0xa3f   :  { %18960 = vst [vmem:[#allocation101_spill] sm:$0xff] %v16272_v54  ;;  %v16292_v25 = vmax.bf16 %v18967_v26, %v18966_v1  ;;  %v16297_v49 = vmax.bf16 %v18968_v46, %v18810_v2  ;;  %v18971_v54 = vmul.bf16 1045249613, %v18970_v13  ;;  %v18976_v1 = vld [vmem:[#allocation217_spill] sm:$0xff]  ;;  %v18978_v46 = vld [vmem:[#allocation220_spill] sm:$0xff] }
 0xa40   :  { %v16307_v35 = vmax.bf16 %v18973_v58, %v18972_v41  ;;  %v16312_v26 = vmax.bf16 %v18975_v53, %v18815_v36  ;;  %v18977_v31 = vmul.bf16 1045249613, %v18976_v1  ;;  %v18981_v41 = vmul.bf16 1045249613, %v18820_v24 }
 0xa41   :  { %18969 = vst [vmem:[#allocation114_spill] sm:$0xff] %v16297_v49  ;;  %v16302_v27 = vmax.bf16 %v18971_v54, %v18970_v13  ;;  %v18979_v49 = vmul.bf16 1045249613, %v18978_v46  ;;  %v18980_v13 = vmul.bf16 1045249613, %v18819_v22 }
 0xa42   :  { %18974 = vst [vmem:[#allocation103_spill] sm:$0xff] %v16307_v35  ;;  %v16317_v2 = vmax.bf16 %v18977_v31, %v18976_v1  ;;  %v16332_v36 = vmax.bf16 %v18981_v41, %v18820_v24  ;;  %v18982_v53 = vmul.bf16 1045249613, %v18821_v40  ;;  %v18984_v1 = vmul.bf16 1045249613, %v18823_v19 }
 0xa43   :  { %v16322_v54 = vmax.bf16 %v18979_v49, %v18978_v46  ;;  %v16327_v58 = vmax.bf16 %v18980_v13, %v18819_v22  ;;  %v18986_v46 = vmul.bf16 1045249613, %v18824_v55  ;;  %v18988_v13 = vmul.bf16 1045249613, %v18825_v9 }
 0xa44   :  { %v16337_v31 = vmax.bf16 %v18982_v53, %v18821_v40  ;;  %v16342_v49 = vmax.bf16 %v18984_v1, %v18823_v19 }
 0xa45   :  { %v16347_v22 = vmax.bf16 %v18986_v46, %v18824_v55  ;;  %v16352_v24 = vmax.bf16 %v18988_v13, %v18825_v9 }
 0xa46   :  { %18983 = vst [vmem:[#allocation111_spill] sm:$0xff] %v16337_v31  ;;  %18985 = vst [vmem:[#allocation110_spill] sm:$0xff] %v16342_v49 }
 0xa47   :  { %18987 = vst [vmem:[#allocation116_spill] sm:$0xff] %v16347_v22  ;;  %18989 = vst [vmem:[#allocation109_spill] sm:$0xff] %v16352_v24 }
 0xa48   :  { %9445 = dma.done.wait [#allocation4 + $0x1], 8192 }
 0xa49   :  { %9446 = vsyncadd [#allocation4 + $0x1], 4294959104  ;;  %v18990_v41 = vld [vmem:[#allocation84_spill] sm:$0xff]  ;;  %v18991_v40 = vld [vmem:[#allocation85_spill] sm:$0xff] }
 0xa4a   :  { %7406 = vmatprep.mubr.bf16.mxu1 %v18990_v41  ;;  %7567 = vmatprep.mubr.bf16.mxu0 %v18991_v40  ;;  %v7311_v53 = vld [vmem:[#allocation3 + $0x40] sm:$0xff]  ;;  %v7312_v49 = vld [vmem:[#allocation3 + $0x48] sm:$0xff]  ;;  %v7313_v13 = vld [vmem:[#allocation3 + $0x50] sm:$0xff] }
 0xa4b   :  { %v7327_v31 = vld [vmem:[#allocation3 + $0xc0] sm:$0xff]  ;;  %8320 = vmatprep.subr.bf16.mxu1 %v7311_v53  ;;  %v7328_v55 = vld [vmem:[#allocation3 + $0xc8] sm:$0xff]  ;;  %v7329_v22 = vld [vmem:[#allocation3 + $0xd0] sm:$0xff] }
 0xa4c   :  { %v7303_v19 = vld [vmem:[#allocation3] sm:$0xff]  ;;  %8432 = vmatprep.subr.bf16.mxu0 %v7327_v31  ;;  %v7304_v9 = vld [vmem:[#allocation3 + $0x8] sm:$0xff]  ;;  %v7305_v41 = vld [vmem:[#allocation3 + $0x10] sm:$0xff] }
 0xa4d   :  { %v7319_v1 = vld [vmem:[#allocation3 + $0x80] sm:$0xff]  ;;  %8321 = vmatpush3.bf16.msra.mxu1 %v7303_v19  ;;  %v7320_v46 = vld [vmem:[#allocation3 + $0x88] sm:$0xff]  ;;  %v7321_v40 = vld [vmem:[#allocation3 + $0x90] sm:$0xff] }
 0xa4e   :  { %8433 = vmatpush3.bf16.msra.mxu0 %v7319_v1  ;;  %8322 = vmatprep.subr.bf16.mxu1 %v7312_v49  ;;  %v7314_v24 = vld [vmem:[#allocation3 + $0x58] sm:$0xff]  ;;  %v7315_v49 = vld [vmem:[#allocation3 + $0x60] sm:$0xff]  ;;  %v7360_v35 = vld [vmem:[#allocation3 + $0x1c8] sm:$0xff] }
 0xa4f   :  { %8434 = vmatprep.subr.bf16.mxu0 %v7328_v55  ;;  %v7330_v53 = vld [vmem:[#allocation3 + $0xd8] sm:$0xff]  ;;  %v7331_v1 = vld [vmem:[#allocation3 + $0xe0] sm:$0xff] }
 0xa50   :  { %v7306_v31 = vld [vmem:[#allocation3 + $0x18] sm:$0xff]  ;;  %v7307_v55 = vld [vmem:[#allocation3 + $0x20] sm:$0xff] }
 0xa51   :  { %8323 = vmatpush3.bf16.msra.mxu1 %v7304_v9  ;;  %v7322_v19 = vld [vmem:[#allocation3 + $0x98] sm:$0xff]  ;;  %v7323_v9 = vld [vmem:[#allocation3 + $0xa0] sm:$0xff] }
 0xa52   :  { %8435 = vmatpush3.bf16.msra.mxu0 %v7320_v46  ;;  %8324 = vmatprep.subr.bf16.mxu1 %v7313_v13  ;;  %v7316_v46 = vld [vmem:[#allocation3 + $0x68] sm:$0xff] }
 0xa53   :  { %8436 = vmatprep.subr.bf16.mxu0 %v7329_v22  ;;  %v7332_v22 = vld [vmem:[#allocation3 + $0xe8] sm:$0xff] }
 0xa54   :  { %v7308_v13 = vld [vmem:[#allocation3 + $0x28] sm:$0xff] }
 0xa55   :  { %8325 = vmatpush3.bf16.msra.mxu1 %v7305_v41  ;;  %v7324_v41 = vld [vmem:[#allocation3 + $0xa8] sm:$0xff] }
 0xa56   :  { %8437 = vmatpush3.bf16.msra.mxu0 %v7321_v40  ;;  %8326 = vmatprep.subr.bf16.mxu1 %v7314_v24  ;;  %v7317_v24 = vld [vmem:[#allocation3 + $0x70] sm:$0xff] }
 0xa57   :  { %8438 = vmatprep.subr.bf16.mxu0 %v7330_v53  ;;  %v7333_v40 = vld [vmem:[#allocation3 + $0xf0] sm:$0xff] }
 0xa58   :  { %v7309_v53 = vld [vmem:[#allocation3 + $0x30] sm:$0xff] }
 0xa59   :  { %8327 = vmatpush3.bf16.msra.mxu1 %v7306_v31  ;;  %v7325_v31 = vld [vmem:[#allocation3 + $0xb0] sm:$0xff] }
 0xa5a   :  { %8439 = vmatpush3.bf16.msra.mxu0 %v7322_v19  ;;  %8328 = vmatprep.subr.bf16.mxu1 %v7315_v49  ;;  %v7318_v19 = vld [vmem:[#allocation3 + $0x78] sm:$0xff] }
 0xa5b   :  { %8440 = vmatprep.subr.bf16.mxu0 %v7331_v1  ;;  %v7334_v49 = vld [vmem:[#allocation3 + $0xf8] sm:$0xff] }
 0xa5c   :  { %v7310_v1 = vld [vmem:[#allocation3 + $0x38] sm:$0xff] }
 0xa5d   :  { %8329 = vmatpush3.bf16.msra.mxu1 %v7307_v55  ;;  %v7326_v55 = vld [vmem:[#allocation3 + $0xb8] sm:$0xff] }
 0xa5e   :  { %8441 = vmatpush3.bf16.msra.mxu0 %v7323_v9  ;;  %8330 = vmatprep.subr.bf16.mxu1 %v7316_v46  ;;  %v7343_v9 = vld [vmem:[#allocation3 + $0x140] sm:$0xff] }
 0xa5f   :  { %8442 = vmatprep.subr.bf16.mxu0 %v7332_v22  ;;  %v7359_v46 = vld [vmem:[#allocation3 + $0x1c0] sm:$0xff] }
 0xa60   :  { %v7335_v22 = vld [vmem:[#allocation3 + $0x100] sm:$0xff] }
 0xa61   :  { %8331 = vmatpush3.bf16.msra.mxu1 %v7308_v13  ;;  %v7351_v13 = vld [vmem:[#allocation3 + $0x180] sm:$0xff] }
 0xa62   :  { %8443 = vmatpush3.bf16.msra.mxu0 %v7324_v41  ;;  %8332 = vmatprep.subr.bf16.mxu1 %v7317_v24  ;;  %v18992_v41 = vld [vmem:[#allocation98_spill] sm:$0xff] }
 0xa63   :  { %8444 = vmatprep.subr.bf16.mxu0 %v7333_v40  ;;  %v18993_v24 = vld [vmem:[#allocation94_spill] sm:$0xff]  ;;  %v7344_v40 = vld [vmem:[#allocation3 + $0x148] sm:$0xff] }
 0xa65   :  { %8333 = vmatpush3.bf16.msra.mxu1 %v7309_v53  ;;  %v18994_v53 = vld [vmem:[#allocation228_spill] sm:$0xff] }
 0xa66   :  { %8445 = vmatpush3.bf16.msra.mxu0 %v7325_v31  ;;  %8334 = vmatprep.subr.bf16.mxu1 %v7318_v19  ;;  %v18995_v31 = vld [vmem:[#allocation230_spill] sm:$0xff]  ;;  %v7336_v19 = vld [vmem:[#allocation3 + $0x108] sm:$0xff] }
 0xa67   :  { %8446 = vmatprep.subr.bf16.mxu0 %v7334_v49  ;;  %v7352_v49 = vld [vmem:[#allocation3 + $0x188] sm:$0xff] }
 0xa69   :  { %8335 = vmatpush3.bf16.msra.mxu1 %v7310_v1  ;;  %v7345_v1 = vld [vmem:[#allocation3 + $0x150] sm:$0xff] }
 0xa6a   :  { %8447 = vmatpush3.bf16.msra.mxu0 %v7326_v55  ;;  %8544 = vmatprep.subr.bf16.mxu1 %v7343_v9  ;;  %v7361_v55 = vld [vmem:[#allocation3 + $0x1d0] sm:$0xff] }
 0xa6b   :  { %8656 = vmatprep.subr.bf16.mxu0 %v7359_v46  ;;  %v7337_v9 = vld [vmem:[#allocation3 + $0x110] sm:$0xff] }
 0xa6c   :  { %7407 = vmatmul.mubr.bf16.vlgmr.msra.gmra.mrb[240].mxu1 %v18992_v41  ;;  %v7353_v46 = vld [vmem:[#allocation3 + $0x190] sm:$0xff]  ;;  %v18996_v41 = vld [vmem:[#allocation225_spill] sm:$0xff] }
 0xa6d   :  { %7568 = vmatmul.mubr.bf16.vlgmr.msra.gmra.mrb[16].mxu0 %v18993_v24  ;;  %8545 = vmatpush3.bf16.msra.mxu1 %v7335_v22  ;;  %v18997_v22 = vld [vmem:[#allocation224_spill] sm:$0xff]  ;;  %v7362_v24 = vld [vmem:[#allocation3 + $0x1d8] sm:$0xff] }
 0xa6e   :  { %8657 = vmatpush3.bf16.msra.mxu0 %v7351_v13  ;;  %7414 = vmatprep.mubr.bf16.mxu1 %v18994_v53  ;;  %v7346_v13 = vld [vmem:[#allocation3 + $0x158] sm:$0xff]  ;;  %v18998_v53 = vld [vmem:[#allocation125_spill] sm:$0xff] }
 0xa6f   :  { %7575 = vmatprep.mubr.bf16.mxu0 %v18995_v31  ;;  %8546 = vmatprep.subr.bf16.mxu1 %v7344_v40  ;;  %v18999_v31 = vld [vmem:[#allocation127_spill] sm:$0xff] }
 0xa70   :  { %8658 = vmatprep.subr.bf16.mxu0 %v7360_v35  ;;  %v7338_v35 = vld [vmem:[#allocation3 + $0x118] sm:$0xff] }
 0xa71   :  { %8547 = vmatpush3.bf16.msra.mxu1 %v7336_v19  ;;  %v7354_v40 = vld [vmem:[#allocation3 + $0x198] sm:$0xff]  ;;  %v7347_v19 = vld [vmem:[#allocation3 + $0x160] sm:$0xff] }
 0xa72   :  { %8659 = vmatpush3.bf16.msra.mxu0 %v7352_v49  ;;  %8548 = vmatprep.subr.bf16.mxu1 %v7345_v1  ;;  %v7363_v49 = vld [vmem:[#allocation3 + $0x1e0] sm:$0xff] }
 0xa73   :  { %8660 = vmatprep.subr.bf16.mxu0 %v7361_v55  ;;  %v7339_v1 = vld [vmem:[#allocation3 + $0x120] sm:$0xff] }
 0xa74   :  { %7415 = vmatmul.mubr.bf16.gmra.mrb[244].mxu1 %v18996_v41  ;;  %v7355_v55 = vld [vmem:[#allocation3 + $0x1a0] sm:$0xff] }
 0xa75   :  { %7576 = vmatmul.mubr.bf16.gmra.mrb[20].mxu0 %v18997_v22  ;;  %7422 = vmatprep.mubr.bf16.mxu1 %v18998_v53  ;;  %v19000_v41 = vld [vmem:[#allocation96_spill] sm:$0xff]  ;;  %v7348_v53 = vld [vmem:[#allocation3 + $0x168] sm:$0xff] }
 0xa76   :  { %7583 = vmatprep.mubr.bf16.mxu0 %v18999_v31  ;;  %8549 = vmatpush3.bf16.msra.mxu1 %v7337_v9  ;;  %v19001_v22 = vld [vmem:[#allocation92_spill] sm:$0xff]  ;;  %v7364_v31 = vld [vmem:[#allocation3 + $0x1e8] sm:$0xff] }
 0xa77   :  { %8661 = vmatpush3.bf16.msra.mxu0 %v7353_v46  ;;  %8550 = vmatprep.subr.bf16.mxu1 %v7346_v13  ;;  %v19002_v9 = vld [vmem:[#allocation236_spill] sm:$0xff]  ;;  %v19003_v46 = vld [vmem:[#allocation238_spill] sm:$0xff]  ;;  %v7340_v13 = vld [vmem:[#allocation3 + $0x128] sm:$0xff] }
 0xa78   :  { %8662 = vmatprep.subr.bf16.mxu0 %v7362_v24  ;;  %v7356_v24 = vld [vmem:[#allocation3 + $0x1a8] sm:$0xff] }
 0xa7a   :  { %8551 = vmatpush3.bf16.msra.mxu1 %v7338_v35  ;;  %v7349_v35 = vld [vmem:[#allocation3 + $0x170] sm:$0xff] }
 0xa7b   :  { %8663 = vmatpush3.bf16.msra.mxu0 %v7354_v40  ;;  %8552 = vmatprep.subr.bf16.mxu1 %v7347_v19  ;;  %v7365_v40 = vld [vmem:[#allocation3 + $0x1f0] sm:$0xff] }
 0xa7c   :  { %8664 = vmatprep.subr.bf16.mxu0 %v7363_v49  ;;  %7423 = vmatmul.mubr.bf16.gmra.mrb[248].mxu1 %v19000_v41  ;;  %v7341_v19 = vld [vmem:[#allocation3 + $0x130] sm:$0xff]  ;;  %v19004_v41 = vld [vmem:[#allocation233_spill] sm:$0xff] }
 0xa7d   :  { %7584 = vmatmul.mubr.bf16.gmra.mrb[24].mxu0 %v19001_v22  ;;  %7430 = vmatprep.mubr.bf16.mxu1 %v19002_v9  ;;  %v7357_v49 = vld [vmem:[#allocation3 + $0x1b0] sm:$0xff]  ;;  %v19005_v22 = vld [vmem:[#allocation232_spill] sm:$0xff]  ;;  %v7350_v9 = vld [vmem:[#allocation3 + $0x178] sm:$0xff] }
 0xa7e   :  { %7591 = vmatprep.mubr.bf16.mxu0 %v19003_v46  ;;  %8553 = vmatpush3.bf16.msra.mxu1 %v7339_v1  ;;  %v7366_v46 = vld [vmem:[#allocation3 + $0x1f8] sm:$0xff]  ;;  %v19006_v1 = vld [vmem:[#allocation133_spill] sm:$0xff] }
 0xa7f   :  { %8665 = vmatpush3.bf16.msra.mxu0 %v7355_v55  ;;  %8554 = vmatprep.subr.bf16.mxu1 %v7348_v53  ;;  %v19007_v55 = vld [vmem:[#allocation135_spill] sm:$0xff] }
 0xa80   :  { %8666 = vmatprep.subr.bf16.mxu0 %v7364_v31  ;;  %v7342_v53 = vld [vmem:[#allocation3 + $0x138] sm:$0xff] }
 0xa81   :  { %v7358_v31 = vld [vmem:[#allocation3 + $0x1b8] sm:$0xff] }
 0xa82   :  { %8555 = vmatpush3.bf16.msra.mxu1 %v7340_v13  ;;  %v19008_v13 = vld [vmem:[#allocation130_spill] sm:$0xff] }
 0xa83   :  { %8667 = vmatpush3.bf16.msra.mxu0 %v7356_v24  ;;  %8556 = vmatprep.subr.bf16.mxu1 %v7349_v35  ;;  %v19009_v24 = vld [vmem:[#allocation129_spill] sm:$0xff] }
 0xa84   :  { %8668 = vmatprep.subr.bf16.mxu0 %v7365_v40  ;;  %7431 = vmatmul.mubr.bf16.gmra.mrb[252].mxu1 %v19004_v41 }
 0xa85   :  { %7592 = vmatmul.mubr.bf16.gmra.mrb[28].mxu0 %v19005_v22  ;;  %7438 = vmatprep.mubr.bf16.mxu1 %v19006_v1  ;;  %v19052_v1 = vld [vmem:[#allocation45_spill] sm:$0xff] }
 0xa86   :  { %7599 = vmatprep.mubr.bf16.mxu0 %v19007_v55  ;;  %8557 = vmatpush3.bf16.msra.mxu1 %v7341_v19  ;;  %v19053_v55 = vld [vmem:[#allocation122_spill] sm:$0xff] }
 0xa87   :  { %8669 = vmatpush3.bf16.msra.mxu0 %v7357_v49  ;;  %8558 = vmatprep.subr.bf16.mxu1 %v7350_v9 }
 0xa88   :  { %8670 = vmatprep.subr.bf16.mxu0 %v7366_v46 }
 0xa8a   :  { %8559 = vmatpush3.bf16.msra.mxu1 %v7342_v53 }
 0xa8b   :  { %8671 = vmatpush3.bf16.msra.mxu0 %v7358_v31 }
 0xa8c   :  { %7439 = vmatmul.mubr.bf16.gmra.mrb[0].mxu1 %v19008_v13  ;;  %v19054_v13 = vld [vmem:[#allocation100_spill] sm:$0xff] }
 0xa8d   :  { %7600 = vmatmul.mubr.bf16.gmra.mrb[32].mxu0 %v19009_v24  ;;  %7446 = vmatprep.mubr.bf16.mxu1 %v15922_v62  ;;  %v19011_v62 = vld [vmem:[#allocation229_spill] sm:$0xff]  ;;  %v19055_v24 = vld [vmem:[#allocation106_spill] sm:$0xff] }
 0xa8e   :  { %7607 = vmatprep.mubr.bf16.mxu0 %v15932_v56  ;;  %v19010_v56 = vld [vmem:[#allocation227_spill] sm:$0xff] }
 0xa94   :  { %7447 = vmatmul.mubr.bf16.gmra.mrb[4].mxu1 %v15917_v48  ;;  %v19012_v48 = vld [vmem:[#allocation95_spill] sm:$0xff] }
 0xa95   :  { %7608 = vmatmul.mubr.bf16.gmra.mrb[36].mxu0 %v15927_v47  ;;  %7454 = vmatprep.mubr.bf16.mxu1 %v15962_v21  ;;  %v19013_v47 = vld [vmem:[#allocation223_spill] sm:$0xff]  ;;  %v19015_v21 = vld [vmem:[#allocation126_spill] sm:$0xff] }
 0xa96   :  { %7615 = vmatprep.mubr.bf16.mxu0 %v15972_v11  ;;  %v19017_v11 = vld [vmem:[#allocation89_spill] sm:$0xff] }
 0xa9c   :  { %7455 = vmatmul.mubr.bf16.gmra.mrb[8].mxu1 %v15957_v37  ;;  %v19014_v37 = vld [vmem:[#allocation124_spill] sm:$0xff] }
 0xa9d   :  { %7616 = vmatmul.mubr.bf16.gmra.mrb[40].mxu0 %v15967_v44  ;;  %7462 = vmatprep.mubr.bf16.mxu1 %v16002_v0  ;;  %v19016_v44 = vld [vmem:[#allocation226_spill] sm:$0xff]  ;;  %v19019_v0 = vld [vmem:[#allocation237_spill] sm:$0xff] }
 0xa9e   :  { %7623 = vmatprep.mubr.bf16.mxu0 %v16012_v59  ;;  %v19021_v59 = vld [vmem:[#allocation231_spill] sm:$0xff] }
 0xaa4   :  { %7463 = vmatmul.mubr.bf16.gmra.mrb[12].mxu1 %v15997_v14  ;;  %v19018_v14 = vld [vmem:[#allocation235_spill] sm:$0xff] }
 0xaa5   :  { %7624 = vmatmul.mubr.bf16.gmra.mrb[44].mxu0 %v16007_v17  ;;  %7470 = vmatprep.mubr.bf16.mxu1 %v16042_v39  ;;  %v19020_v17 = vld [vmem:[#allocation93_spill] sm:$0xff]  ;;  %v19023_v39 = vld [vmem:[#allocation134_spill] sm:$0xff] }
 0xaa6   :  { %7631 = vmatprep.mubr.bf16.mxu0 %v16052_v12  ;;  %v19025_v12 = vld [vmem:[#allocation128_spill] sm:$0xff] }
 0xaac   :  { %7471 = vmatmul.mubr.bf16.gmra.mrb[16].mxu1 %v16037_v5  ;;  %v19022_v5 = vld [vmem:[#allocation132_spill] sm:$0xff] }
 0xaad   :  { %7632 = vmatmul.mubr.bf16.gmra.mrb[48].mxu0 %v16047_v52  ;;  %7478 = vmatprep.mubr.bf16.mxu1 %v16082_v43  ;;  %v19024_v52 = vld [vmem:[#allocation234_spill] sm:$0xff]  ;;  %v19027_v43 = vld [vmem:[#allocation131_spill] sm:$0xff] }
 0xaae   :  { %7639 = vmatprep.mubr.bf16.mxu0 %v16092_v20  ;;  %v19029_v20 = vld [vmem:[#allocation245_spill] sm:$0xff] }
 0xab4   :  { %7479 = vmatmul.mubr.bf16.gmra.mrb[20].mxu1 %v16077_v4  ;;  %v19026_v4 = vld [vmem:[#allocation243_spill] sm:$0xff] }
 0xab5   :  { %7640 = vmatmul.mubr.bf16.gmra.mrb[52].mxu0 %v16087_v34  ;;  %7486 = vmatprep.mubr.bf16.mxu1 %v16122_v45  ;;  %v19028_v34 = vld [vmem:[#allocation239_spill] sm:$0xff]  ;;  %v19031_v45 = vld [vmem:[#allocation246_spill] sm:$0xff] }
 0xab6   :  { %7647 = vmatprep.mubr.bf16.mxu0 %v16132_v30  ;;  %v19033_v30 = vld [vmem:[#allocation240_spill] sm:$0xff] }
 0xabc   :  { %7487 = vmatmul.mubr.bf16.gmra.mrb[24].mxu1 %v16117_v28  ;;  %v19030_v28 = vld [vmem:[#allocation244_spill] sm:$0xff] }
 0xabd   :  { %7648 = vmatmul.mubr.bf16.gmra.mrb[56].mxu0 %v16127_v42  ;;  %7494 = vmatprep.mubr.bf16.mxu1 %v16162_v32  ;;  %v19032_v42 = vld [vmem:[#allocation241_spill] sm:$0xff]  ;;  %v19039_v32 = vld [vmem:[#allocation143_spill] sm:$0xff] }
 0xabe   :  { %7655 = vmatprep.mubr.bf16.mxu0 %v16172_v51  ;;  %v19041_v51 = vld [vmem:[#allocation137_spill] sm:$0xff] }
 0xac4   :  { %7495 = vmatmul.mubr.bf16.gmra.mrb[28].mxu1 %v16157_v8  ;;  %v19035_v8 = vld [vmem:[#allocation142_spill] sm:$0xff] }
 0xac5   :  { %7656 = vmatmul.mubr.bf16.gmra.mrb[60].mxu0 %v16167_v61  ;;  %7502 = vmatprep.mubr.bf16.mxu1 %v16202_v16  ;;  %v19040_v61 = vld [vmem:[#allocation138_spill] sm:$0xff]  ;;  %v19043_v16 = vld [vmem:[#allocation252_spill] sm:$0xff] }
 0xac6   :  { %7663 = vmatprep.mubr.bf16.mxu0 %v16212_v57  ;;  %v19045_v57 = vld [vmem:[#allocation247_spill] sm:$0xff] }
 0xacc   :  { %7503 = vmatmul.mubr.bf16.gmra.mrb[32].mxu1 %v16197_v33  ;;  %v19042_v33 = vld [vmem:[#allocation250_spill] sm:$0xff] }
 0xacd   :  { %7664 = vmatmul.mubr.bf16.gmra.mrb[64].mxu0 %v16207_v6  ;;  %7510 = vmatprep.mubr.bf16.mxu1 %v16242_v50  ;;  %v19044_v6 = vld [vmem:[#allocation139_spill] sm:$0xff] }
 0xace   :  { %7671 = vmatprep.mubr.bf16.mxu0 %v16252_v15  ;;  %v19047_v50 = vld [vmem:[#allocation43_spill] sm:$0xff]  ;;  %v19049_v15 = vld [vmem:[#allocation248_spill] sm:$0xff] }
 0xad4   :  { %7511 = vmatmul.mubr.bf16.gmra.mrb[36].mxu1 %v16237_v18  ;;  %v19046_v18 = vld [vmem:[#allocation251_spill] sm:$0xff] }
 0xad5   :  { %7672 = vmatmul.mubr.bf16.gmra.mrb[68].mxu0 %v16247_v7  ;;  %7518 = vmatprep.mubr.bf16.mxu1 %v16282_v29  ;;  %v19048_v7 = vld [vmem:[#allocation249_spill] sm:$0xff]  ;;  %v19051_v29 = vld [vmem:[#allocation123_spill] sm:$0xff] }
 0xad6   :  { %7679 = vmatprep.mubr.bf16.mxu0 %v16292_v25 }
 0xadc   :  { %7519 = vmatmul.mubr.bf16.gmra.mrb[40].mxu1 %v16277_v23  ;;  %v19050_v23 = vld [vmem:[#allocation46_spill] sm:$0xff] }
 0xadd   :  { %7680 = vmatmul.mubr.bf16.gmra.mrb[72].mxu0 %v16287_v10  ;;  %7526 = vmatprep.mubr.bf16.mxu1 %v16322_v54 }
 0xade   :  { %7687 = vmatprep.mubr.bf16.mxu0 %v16332_v36 }
 0xae4   :  { %7527 = vmatmul.mubr.bf16.gmra.mrb[44].mxu1 %v16317_v2  ;;  %v16467_v2 = vld [vmem:[%s16720_s9 + $0x1d] ss:$0 sm:$0xff] }
 0xae5   :  { %7688 = vmatmul.mubr.bf16.gmra.mrb[76].mxu0 %v16327_v58  ;;  %7728 = vmatprep.mubr.bf16.mxu1 %v19010_v56 }
 0xae6   :  { %7889 = vmatprep.mubr.bf16.mxu0 %v19011_v62 }
 0xaec   :  { %7729 = vmatmul.mubr.bf16.vlgmr.msra.gmra.mrb[48].mxu1 %v19012_v48 }
 0xaed   :  { %7890 = vmatmul.mubr.bf16.vlgmr.msra.gmra.mrb[80].mxu0 %v19013_v47  ;;  %7736 = vmatprep.mubr.bf16.mxu1 %v19014_v37 }
 0xaee   :  { %7897 = vmatprep.mubr.bf16.mxu0 %v19015_v21 }
 0xaf4   :  { %7737 = vmatmul.mubr.bf16.gmra.mrb[52].mxu1 %v19016_v44 }
 0xaf5   :  { %7898 = vmatmul.mubr.bf16.gmra.mrb[84].mxu0 %v19017_v11  ;;  %7744 = vmatprep.mubr.bf16.mxu1 %v19018_v14 }
 0xaf6   :  { %7905 = vmatprep.mubr.bf16.mxu0 %v19019_v0 }
 0xafc   :  { %7745 = vmatmul.mubr.bf16.gmra.mrb[56].mxu1 %v19020_v17 }
 0xafd   :  { %7906 = vmatmul.mubr.bf16.gmra.mrb[88].mxu0 %v19021_v59  ;;  %7752 = vmatprep.mubr.bf16.mxu1 %v19022_v5 }
 0xafe   :  { %7913 = vmatprep.mubr.bf16.mxu0 %v19023_v39 }
 0xb04   :  { %7753 = vmatmul.mubr.bf16.gmra.mrb[60].mxu1 %v19024_v52  ;;  %v19056_v52 = vld [vmem:[#allocation102_spill] sm:$0xff] }
 0xb05   :  { %7914 = vmatmul.mubr.bf16.gmra.mrb[92].mxu0 %v19025_v12  ;;  %7760 = vmatprep.mubr.bf16.mxu1 %v19026_v4  ;;  %v19057_v12 = vld [vmem:[#allocation105_spill] sm:$0xff] }
 0xb06   :  { %7921 = vmatprep.mubr.bf16.mxu0 %v15909_v3  ;;  %v19034_v3 = vld [vmem:[#allocation140_spill] sm:$0xff] }
 0xb0c   :  { %7761 = vmatmul.mubr.bf16.gmra.mrb[64].mxu1 %v19027_v43 }
 0xb0d   :  { %7922 = vmatmul.mubr.bf16.gmra.mrb[96].mxu0 %v15901_v63  ;;  %7768 = vmatprep.mubr.bf16.mxu1 %v15942_v60  ;;  %v19036_v63 = vld [vmem:[#allocation242_spill] sm:$0xff]  ;;  %v19037_v60 = vld [vmem:[#allocation136_spill] sm:$0xff] }
 0xb0e   :  { %7929 = vmatprep.mubr.bf16.mxu0 %v15952_v38  ;;  %v19038_v38 = vld [vmem:[#allocation141_spill] sm:$0xff] }
 0xb14   :  { %7769 = vmatmul.mubr.bf16.gmra.mrb[68].mxu1 %v19028_v34  ;;  %v19058_v34 = vld [vmem:[#allocation107_spill] sm:$0xff] }
 0xb15   :  { %7930 = vmatmul.mubr.bf16.gmra.mrb[100].mxu0 %v19029_v20  ;;  %7776 = vmatprep.mubr.bf16.mxu1 %v19030_v28  ;;  %v19059_v20 = vld [vmem:[#allocation101_spill] sm:$0xff] }
 0xb16   :  { %7937 = vmatprep.mubr.bf16.mxu0 %v19031_v45 }
 0xb1c   :  { %7777 = vmatmul.mubr.bf16.gmra.mrb[72].mxu1 %v19032_v42 }
 0xb1d   :  { %7938 = vmatmul.mubr.bf16.gmra.mrb[104].mxu0 %v19033_v30  ;;  %7784 = vmatprep.mubr.bf16.mxu1 %v19034_v3 }
 0xb1e   :  { %7945 = vmatprep.mubr.bf16.mxu0 %v19035_v8 }
 0xb24   :  { %7785 = vmatmul.mubr.bf16.gmra.mrb[76].mxu1 %v19036_v63 }
 0xb25   :  { %7946 = vmatmul.mubr.bf16.gmra.mrb[108].mxu0 %v19037_v60  ;;  %7792 = vmatprep.mubr.bf16.mxu1 %v19038_v38 }
 0xb26   :  { %7953 = vmatprep.mubr.bf16.mxu0 %v19039_v32 }
 0xb2c   :  { %7793 = vmatmul.mubr.bf16.gmra.mrb[80].mxu1 %v19040_v61 }
 0xb2d   :  { %7954 = vmatmul.mubr.bf16.gmra.mrb[112].mxu0 %v19041_v51  ;;  %7800 = vmatprep.mubr.bf16.mxu1 %v19042_v33 }
 0xb2e   :  { %7961 = vmatprep.mubr.bf16.mxu0 %v19043_v16 }
 0xb34   :  { %7801 = vmatmul.mubr.bf16.gmra.mrb[84].mxu1 %v19044_v6  ;;  %v19060_v6 = vld [vmem:[#allocation108_spill] sm:$0xff] }
 0xb35   :  { %7962 = vmatmul.mubr.bf16.gmra.mrb[116].mxu0 %v19045_v57  ;;  %7808 = vmatprep.mubr.bf16.mxu1 %v19046_v18  ;;  %v19061_v57 = vld [vmem:[#allocation112_spill] sm:$0xff] }
 0xb36   :  { %7969 = vmatprep.mubr.bf16.mxu0 %v19047_v50 }
 0xb3c   :  { %7809 = vmatmul.mubr.bf16.gmra.mrb[88].mxu1 %v19048_v7 }
 0xb3d   :  { %7970 = vmatmul.mubr.bf16.gmra.mrb[120].mxu0 %v19049_v15  ;;  %7816 = vmatprep.mubr.bf16.mxu1 %v19050_v23 }
 0xb3e   :  { %7977 = vmatprep.mubr.bf16.mxu0 %v19051_v29 }
 0xb3f   :  { %v8336_v10 = vpop.f32.mrb[240].mxu1 }
 0xb40   :  { %v8448_v25 = vpop.f32.mrb[16].mxu0  ;;  %v8337_v54 = vpop.f32.mrb[241].mxu1 }
 0xb41   :  { %v8449_v58 = vpop.f32.mrb[17].mxu0  ;;  %v8338_v36 = vadd.f32 %v8337_v54, %v8336_v10  ;;  %v8339_v40 = vpop.f32.mrb[242].mxu1 }
 0xb42   :  { %v8450_v35 = vadd.f32 %v8449_v58, %v8448_v25  ;;  %v8451_v19 = vpop.f32.mrb[18].mxu0  ;;  %v8340_v49 = vpop.f32.mrb[243].mxu1 }
 0xb43   :  { %v8452_v41 = vpop.f32.mrb[19].mxu0  ;;  %v7409_v22 = vadd.f32 %v8338_v36, %v16467_v2  ;;  %v8341_v9 = vadd.f32 %v8340_v49, %v8339_v40 }
 0xb44   :  { %v8453_v46 = vadd.f32 %v8452_v41, %v8451_v19  ;;  %7817 = vmatmul.mubr.bf16.gmra.mrb[92].mxu1 %v19052_v1  ;;  %v19065_v1 = vld [vmem:[#allocation109_spill] sm:$0xff] }
 0xb45   :  { %7978 = vmatmul.mubr.bf16.gmra.mrb[124].mxu0 %v19053_v55  ;;  %v16472_v53 = vadd.f32 %v8450_v35, %v7409_v22  ;;  %v7412_v31 = vadd.f32 %v8341_v9, %v16467_v2  ;;  %7824 = vmatprep.mubr.bf16.mxu1 %v19054_v13  ;;  %v19062_v22 = vld [vmem:[#allocation114_spill] sm:$0xff] }
 0xb46   :  { %7985 = vmatprep.mubr.bf16.mxu0 %v19055_v24 }
 0xb47   :  { %v16477_v56 = vadd.f32 %v8453_v46, %v7412_v31  ;;  %v8342_v62 = vpop.f32.mrb[244].mxu1  ;;  %v19064_v46 = vld [vmem:[#allocation110_spill] sm:$0xff] }
 0xb48   :  { %v8454_v48 = vpop.f32.mrb[20].mxu0  ;;  %v8343_v47 = vpop.f32.mrb[245].mxu1 }
 0xb49   :  { %v8455_v37 = vpop.f32.mrb[21].mxu0  ;;  %v8344_v21 = vadd.f32 %v8343_v47, %v8342_v62  ;;  %v8345_v11 = vpop.f32.mrb[246].mxu1 }
 0xb4a   :  { %v8456_v44 = vadd.f32 %v8455_v37, %v8454_v48  ;;  %v8457_v14 = vpop.f32.mrb[22].mxu0  ;;  %v8346_v0 = vpop.f32.mrb[247].mxu1 }
 0xb4b   :  { %v8458_v17 = vpop.f32.mrb[23].mxu0  ;;  %v7417_v59 = vadd.f32 %v8344_v21, %v16467_v2  ;;  %v8347_v5 = vadd.f32 %v8346_v0, %v8345_v11 }
 0xb4c   :  { %v8459_v39 = vadd.f32 %v8458_v17, %v8457_v14  ;;  %7825 = vmatmul.mubr.bf16.gmra.mrb[96].mxu1 %v19056_v52 }
 0xb4d   :  { %7986 = vmatmul.mubr.bf16.gmra.mrb[128].mxu0 %v19057_v12  ;;  %v16482_v4 = vadd.f32 %v8456_v44, %v7417_v59  ;;  %v7420_v43 = vadd.f32 %v8347_v5, %v16467_v2  ;;  %7832 = vmatprep.mubr.bf16.mxu1 %v19058_v34  ;;  %v19066_v59 = vld [vmem:[#allocation111_spill] sm:$0xff]  ;;  %v19067_v5 = vld [vmem:[#allocation116_spill] sm:$0xff] }
 0xb4e   :  { %7993 = vmatprep.mubr.bf16.mxu0 %v19059_v20 }
 0xb4f   :  { %v16487_v28 = vadd.f32 %v8459_v39, %v7420_v43  ;;  %v8348_v45 = vpop.f32.mrb[248].mxu1 }
 0xb50   :  { %v8460_v42 = vpop.f32.mrb[24].mxu0  ;;  %v8349_v30 = vpop.f32.mrb[249].mxu1 }
 0xb51   :  { %v8461_v3 = vpop.f32.mrb[25].mxu0  ;;  %v8350_v8 = vadd.f32 %v8349_v30, %v8348_v45  ;;  %v8351_v60 = vpop.f32.mrb[250].mxu1 }
 0xb52   :  { %v8462_v63 = vadd.f32 %v8461_v3, %v8460_v42  ;;  %v8463_v38 = vpop.f32.mrb[26].mxu0  ;;  %v8352_v32 = vpop.f32.mrb[251].mxu1 }
 0xb53   :  { %v8464_v61 = vpop.f32.mrb[27].mxu0  ;;  %v7425_v51 = vadd.f32 %v8350_v8, %v16467_v2  ;;  %v8353_v33 = vadd.f32 %v8352_v32, %v8351_v60 }
 0xb54   :  { %v8465_v16 = vadd.f32 %v8464_v61, %v8463_v38  ;;  %7833 = vmatmul.mubr.bf16.gmra.mrb[100].mxu1 %v19060_v6 }
 0xb55   :  { %7994 = vmatmul.mubr.bf16.gmra.mrb[132].mxu0 %v19061_v57  ;;  %v16492_v18 = vadd.f32 %v8462_v63, %v7425_v51  ;;  %v7428_v50 = vadd.f32 %v8353_v33, %v16467_v2  ;;  %7840 = vmatprep.mubr.bf16.mxu1 %v16302_v27  ;;  %v19063_v27 = vld [vmem:[#allocation103_spill] sm:$0xff] }
 0xb56   :  { %8001 = vmatprep.mubr.bf16.mxu0 %v16312_v26 }
 0xb57   :  { %v16497_v7 = vadd.f32 %v8465_v16, %v7428_v50  ;;  %v8354_v15 = vpop.f32.mrb[252].mxu1 }
 0xb58   :  { %v8466_v23 = vpop.f32.mrb[28].mxu0  ;;  %v8355_v29 = vpop.f32.mrb[253].mxu1 }
 0xb59   :  { %v8467_v10 = vpop.f32.mrb[29].mxu0  ;;  %v8356_v25 = vadd.f32 %v8355_v29, %v8354_v15  ;;  %v8357_v58 = vpop.f32.mrb[254].mxu1 }
 0xb5a   :  { %v8468_v54 = vadd.f32 %v8467_v10, %v8466_v23  ;;  %v8469_v36 = vpop.f32.mrb[30].mxu0  ;;  %v8358_v35 = vpop.f32.mrb[255].mxu1 }
 0xb5b   :  { %v8470_v40 = vpop.f32.mrb[31].mxu0  ;;  %v7433_v19 = vadd.f32 %v8356_v25, %v16467_v2  ;;  %v8359_v49 = vadd.f32 %v8358_v35, %v8357_v58 }
 0xb5c   :  { %v8471_v41 = vadd.f32 %v8470_v40, %v8469_v36  ;;  %7841 = vmatmul.mubr.bf16.gmra.mrb[104].mxu1 %v19062_v22 }
 0xb5d   :  { %8002 = vmatmul.mubr.bf16.gmra.mrb[136].mxu0 %v19063_v27  ;;  %v16502_v26 = vadd.f32 %v8468_v54, %v7433_v19  ;;  %v7436_v9 = vadd.f32 %v8359_v49, %v16467_v2  ;;  %7848 = vmatprep.mubr.bf16.mxu1 %v19064_v46 }
 0xb5e   :  { %8009 = vmatprep.mubr.bf16.mxu0 %v19065_v1 }
 0xb5f   :  { %v16507_v55 = vadd.f32 %v8471_v41, %v7436_v9  ;;  %v8360_v31 = vpop.f32.mrb[0].mxu1 }
 0xb60   :  { %v8472_v13 = vpop.f32.mrb[32].mxu0  ;;  %v8361_v24 = vpop.f32.mrb[1].mxu1 }
 0xb61   :  { %v8473_v62 = vpop.f32.mrb[33].mxu0  ;;  %v8362_v48 = vadd.f32 %v8361_v24, %v8360_v31  ;;  %v8363_v37 = vpop.f32.mrb[2].mxu1 }
 0xb62   :  { %v8474_v47 = vadd.f32 %v8473_v62, %v8472_v13  ;;  %v8475_v21 = vpop.f32.mrb[34].mxu0  ;;  %v8364_v44 = vpop.f32.mrb[3].mxu1 }
 0xb63   :  { %v8476_v11 = vpop.f32.mrb[35].mxu0  ;;  %v7441_v14 = vadd.f32 %v8362_v48, %v16467_v2  ;;  %v8365_v0 = vadd.f32 %v8364_v44, %v8363_v37 }
 0xb64   :  { %v8477_v17 = vadd.f32 %v8476_v11, %v8475_v21  ;;  %7849 = vmatmul.mubr.bf16.gmra.mrb[108].mxu1 %v19066_v59 }
 0xb65   :  { %8010 = vmatmul.mubr.bf16.gmra.mrb[140].mxu0 %v19067_v5  ;;  %v16512_v39 = vadd.f32 %v8474_v47, %v7441_v14  ;;  %v7444_v52 = vadd.f32 %v8365_v0, %v16467_v2 }
 0xb67   :  { %v16515_v12 = vadd.f32 %v8477_v17, %v7444_v52  ;;  %v8366_v43 = vpop.f32.mrb[4].mxu1 }
 0xb68   :  { %v8478_v34 = vpop.f32.mrb[36].mxu0  ;;  %v8367_v20 = vpop.f32.mrb[5].mxu1 }
 0xb69   :  { %v8479_v45 = vpop.f32.mrb[37].mxu0  ;;  %v8368_v42 = vadd.f32 %v8367_v20, %v8366_v43  ;;  %v8369_v3 = vpop.f32.mrb[6].mxu1 }
 0xb6a   :  { %v8480_v30 = vadd.f32 %v8479_v45, %v8478_v34  ;;  %v8481_v8 = vpop.f32.mrb[38].mxu0  ;;  %v8370_v63 = vpop.f32.mrb[7].mxu1 }
 0xb6b   :  { %v8482_v60 = vpop.f32.mrb[39].mxu0  ;;  %v7449_v38 = vadd.f32 %v8368_v42, %v16467_v2  ;;  %v8371_v32 = vadd.f32 %v8370_v63, %v8369_v3 }
 0xb6c   :  { %v8483_v61 = vadd.f32 %v8482_v60, %v8481_v8 }
 0xb6d   :  { %v16518_v51 = vadd.f32 %v8480_v30, %v7449_v38  ;;  %v7452_v33 = vadd.f32 %v8371_v32, %v16467_v2 }
 0xb6f   :  { %v16521_v16 = vadd.f32 %v8483_v61, %v7452_v33  ;;  %v8372_v6 = vpop.f32.mrb[8].mxu1 }
 0xb70   :  { %v8484_v57 = vpop.f32.mrb[40].mxu0  ;;  %v8373_v50 = vpop.f32.mrb[9].mxu1 }
 0xb71   :  { %v8485_v15 = vpop.f32.mrb[41].mxu0  ;;  %v8374_v23 = vadd.f32 %v8373_v50, %v8372_v6  ;;  %v8375_v10 = vpop.f32.mrb[10].mxu1 }
 0xb72   :  { %v8486_v29 = vadd.f32 %v8485_v15, %v8484_v57  ;;  %v8487_v25 = vpop.f32.mrb[42].mxu0  ;;  %v8376_v54 = vpop.f32.mrb[11].mxu1 }
 0xb73   :  { %v8488_v58 = vpop.f32.mrb[43].mxu0  ;;  %v7457_v36 = vadd.f32 %v8374_v23, %v16467_v2  ;;  %v8377_v35 = vadd.f32 %v8376_v54, %v8375_v10 }
 0xb74   :  { %v8489_v40 = vadd.f32 %v8488_v58, %v8487_v25 }
 0xb75   :  { %v16524_v19 = vadd.f32 %v8486_v29, %v7457_v36  ;;  %v7460_v49 = vadd.f32 %v8377_v35, %v16467_v2 }
 0xb77   :  { %v16527_v41 = vadd.f32 %v8489_v40, %v7460_v49  ;;  %v8378_v22 = vpop.f32.mrb[12].mxu1 }
 0xb78   :  { %v8490_v27 = vpop.f32.mrb[44].mxu0  ;;  %v8379_v9 = vpop.f32.mrb[13].mxu1 }
 0xb79   :  { %v8491_v46 = vpop.f32.mrb[45].mxu0  ;;  %v8380_v1 = vadd.f32 %v8379_v9, %v8378_v22  ;;  %v8381_v13 = vpop.f32.mrb[14].mxu1 }
 0xb7a   :  { %v8492_v31 = vadd.f32 %v8491_v46, %v8490_v27  ;;  %v8493_v24 = vpop.f32.mrb[46].mxu0  ;;  %v8382_v62 = vpop.f32.mrb[15].mxu1 }
 0xb7b   :  { %v8494_v48 = vpop.f32.mrb[47].mxu0  ;;  %v7465_v47 = vadd.f32 %v8380_v1, %v16467_v2  ;;  %v8383_v37 = vadd.f32 %v8382_v62, %v8381_v13 }
 0xb7c   :  { %v8495_v21 = vadd.f32 %v8494_v48, %v8493_v24 }
 0xb7d   :  { %v16530_v44 = vadd.f32 %v8492_v31, %v7465_v47  ;;  %v7468_v11 = vadd.f32 %v8383_v37, %v16467_v2 }
 0xb7f   :  { %v16533_v14 = vadd.f32 %v8495_v21, %v7468_v11  ;;  %v8384_v0 = vpop.f32.mrb[16].mxu1 }
 0xb80   :  { %v8496_v17 = vpop.f32.mrb[48].mxu0  ;;  %v8385_v59 = vpop.f32.mrb[17].mxu1 }
 0xb81   :  { %v8497_v5 = vpop.f32.mrb[49].mxu0  ;;  %v8386_v52 = vadd.f32 %v8385_v59, %v8384_v0  ;;  %v8387_v34 = vpop.f32.mrb[18].mxu1 }
 0xb82   :  { %v8498_v43 = vadd.f32 %v8497_v5, %v8496_v17  ;;  %v8499_v20 = vpop.f32.mrb[50].mxu0  ;;  %v8388_v45 = vpop.f32.mrb[19].mxu1 }
 0xb83   :  { %v8500_v42 = vpop.f32.mrb[51].mxu0  ;;  %v7473_v30 = vadd.f32 %v8386_v52, %v16467_v2  ;;  %v8389_v3 = vadd.f32 %v8388_v45, %v8387_v34 }
 0xb84   :  { %v8501_v8 = vadd.f32 %v8500_v42, %v8499_v20 }
 0xb85   :  { %v16536_v63 = vadd.f32 %v8498_v43, %v7473_v30  ;;  %v7476_v60 = vadd.f32 %v8389_v3, %v16467_v2 }
 0xb87   :  { %v16539_v38 = vadd.f32 %v8501_v8, %v7476_v60  ;;  %v8390_v32 = vpop.f32.mrb[20].mxu1 }
 0xb88   :  { %v8502_v61 = vpop.f32.mrb[52].mxu0  ;;  %v8391_v33 = vpop.f32.mrb[21].mxu1 }
 0xb89   :  { %v8503_v6 = vpop.f32.mrb[53].mxu0  ;;  %v8392_v57 = vadd.f32 %v8391_v33, %v8390_v32  ;;  %v8393_v15 = vpop.f32.mrb[22].mxu1 }
 0xb8a   :  { %v8504_v50 = vadd.f32 %v8503_v6, %v8502_v61  ;;  %v8505_v23 = vpop.f32.mrb[54].mxu0  ;;  %v8394_v29 = vpop.f32.mrb[23].mxu1 }
 0xb8b   :  { %v8506_v10 = vpop.f32.mrb[55].mxu0  ;;  %v7481_v25 = vadd.f32 %v8392_v57, %v16467_v2  ;;  %v8395_v54 = vadd.f32 %v8394_v29, %v8393_v15 }
 0xb8c   :  { %v8507_v58 = vadd.f32 %v8506_v10, %v8505_v23 }
 0xb8d   :  { %v16542_v36 = vadd.f32 %v8504_v50, %v7481_v25  ;;  %v7484_v35 = vadd.f32 %v8395_v54, %v16467_v2 }
 0xb8f   :  { %v16545_v40 = vadd.f32 %v8507_v58, %v7484_v35  ;;  %v8396_v49 = vpop.f32.mrb[24].mxu1 }
 0xb90   :  { %v8508_v22 = vpop.f32.mrb[56].mxu0  ;;  %v8397_v27 = vpop.f32.mrb[25].mxu1 }
 0xb91   :  { %v8509_v9 = vpop.f32.mrb[57].mxu0  ;;  %v8398_v46 = vadd.f32 %v8397_v27, %v8396_v49  ;;  %v8399_v31 = vpop.f32.mrb[26].mxu1 }
 0xb92   :  { %v8510_v1 = vadd.f32 %v8509_v9, %v8508_v22  ;;  %v8511_v13 = vpop.f32.mrb[58].mxu0  ;;  %v8400_v24 = vpop.f32.mrb[27].mxu1 }
 0xb93   :  { %v8512_v62 = vpop.f32.mrb[59].mxu0  ;;  %v7489_v48 = vadd.f32 %v8398_v46, %v16467_v2  ;;  %v8401_v47 = vadd.f32 %v8400_v24, %v8399_v31 }
 0xb94   :  { %v8513_v37 = vadd.f32 %v8512_v62, %v8511_v13 }
 0xb95   :  { %v16548_v21 = vadd.f32 %v8510_v1, %v7489_v48  ;;  %v7492_v11 = vadd.f32 %v8401_v47, %v16467_v2 }
 0xb97   :  { %v16551_v0 = vadd.f32 %v8513_v37, %v7492_v11  ;;  %v8402_v17 = vpop.f32.mrb[28].mxu1 }
 0xb98   :  { %v8514_v59 = vpop.f32.mrb[60].mxu0  ;;  %v8403_v5 = vpop.f32.mrb[29].mxu1 }
 0xb99   :  { %v8515_v52 = vpop.f32.mrb[61].mxu0  ;;  %v8404_v43 = vadd.f32 %v8403_v5, %v8402_v17  ;;  %v8405_v20 = vpop.f32.mrb[30].mxu1 }
 0xb9a   :  { %v8516_v34 = vadd.f32 %v8515_v52, %v8514_v59  ;;  %v8517_v45 = vpop.f32.mrb[62].mxu0  ;;  %v8406_v42 = vpop.f32.mrb[31].mxu1 }
 0xb9b   :  { %v8518_v30 = vpop.f32.mrb[63].mxu0  ;;  %v7497_v3 = vadd.f32 %v8404_v43, %v16467_v2  ;;  %v8407_v8 = vadd.f32 %v8406_v42, %v8405_v20 }
 0xb9c   :  { %v8519_v60 = vadd.f32 %v8518_v30, %v8517_v45 }
 0xb9d   :  { %v16554_v32 = vadd.f32 %v8516_v34, %v7497_v3  ;;  %v7500_v61 = vadd.f32 %v8407_v8, %v16467_v2 }
 0xb9f   :  { %v16557_v33 = vadd.f32 %v8519_v60, %v7500_v61  ;;  %v8408_v6 = vpop.f32.mrb[32].mxu1 }
 0xba0   :  { %v8520_v57 = vpop.f32.mrb[64].mxu0  ;;  %v8409_v50 = vpop.f32.mrb[33].mxu1 }
 0xba1   :  { %v8521_v15 = vpop.f32.mrb[65].mxu0  ;;  %v8410_v23 = vadd.f32 %v8409_v50, %v8408_v6  ;;  %v8411_v10 = vpop.f32.mrb[34].mxu1 }
 0xba2   :  { %v8522_v29 = vadd.f32 %v8521_v15, %v8520_v57  ;;  %v8523_v25 = vpop.f32.mrb[66].mxu0  ;;  %v8412_v54 = vpop.f32.mrb[35].mxu1 }
 0xba3   :  { %v8524_v58 = vpop.f32.mrb[67].mxu0  ;;  %v7505_v35 = vadd.f32 %v8410_v23, %v16467_v2  ;;  %v8413_v49 = vadd.f32 %v8412_v54, %v8411_v10 }
 0xba4   :  { %v8525_v22 = vadd.f32 %v8524_v58, %v8523_v25 }
 0xba5   :  { %v16560_v27 = vadd.f32 %v8522_v29, %v7505_v35  ;;  %v7508_v9 = vadd.f32 %v8413_v49, %v16467_v2 }
 0xba7   :  { %v16563_v46 = vadd.f32 %v8525_v22, %v7508_v9  ;;  %v8414_v1 = vpop.f32.mrb[36].mxu1 }
 0xba8   :  { %v8526_v31 = vpop.f32.mrb[68].mxu0  ;;  %v8415_v13 = vpop.f32.mrb[37].mxu1 }
 0xba9   :  { %v8527_v24 = vpop.f32.mrb[69].mxu0  ;;  %v8416_v62 = vadd.f32 %v8415_v13, %v8414_v1  ;;  %v8417_v47 = vpop.f32.mrb[38].mxu1 }
 0xbaa   :  { %v8528_v48 = vadd.f32 %v8527_v24, %v8526_v31  ;;  %v8529_v37 = vpop.f32.mrb[70].mxu0  ;;  %v8418_v11 = vpop.f32.mrb[39].mxu1 }
 0xbab   :  { %v8530_v17 = vpop.f32.mrb[71].mxu0  ;;  %v7513_v59 = vadd.f32 %v8416_v62, %v16467_v2  ;;  %v8419_v5 = vadd.f32 %v8418_v11, %v8417_v47 }
 0xbac   :  { %v8531_v52 = vadd.f32 %v8530_v17, %v8529_v37 }
 0xbad   :  { %v16566_v43 = vadd.f32 %v8528_v48, %v7513_v59  ;;  %v7516_v34 = vadd.f32 %v8419_v5, %v16467_v2 }
 0xbaf   :  { %v16569_v20 = vadd.f32 %v8531_v52, %v7516_v34  ;;  %v8420_v45 = vpop.f32.mrb[40].mxu1 }
 0xbb0   :  { %v8532_v42 = vpop.f32.mrb[72].mxu0  ;;  %v8421_v30 = vpop.f32.mrb[41].mxu1 }
 0xbb1   :  { %v8533_v3 = vpop.f32.mrb[73].mxu0  ;;  %v8422_v8 = vadd.f32 %v8421_v30, %v8420_v45  ;;  %v8423_v61 = vpop.f32.mrb[42].mxu1 }
 0xbb2   :  { %v8534_v60 = vadd.f32 %v8533_v3, %v8532_v42  ;;  %v8535_v6 = vpop.f32.mrb[74].mxu0  ;;  %v8424_v57 = vpop.f32.mrb[43].mxu1 }
 0xbb3   :  { %v8536_v50 = vpop.f32.mrb[75].mxu0  ;;  %v7521_v15 = vadd.f32 %v8422_v8, %v16467_v2  ;;  %v8425_v23 = vadd.f32 %v8424_v57, %v8423_v61 }
 0xbb4   :  { %v8537_v29 = vadd.f32 %v8536_v50, %v8535_v6 }
 0xbb5   :  { %v16572_v10 = vadd.f32 %v8534_v60, %v7521_v15  ;;  %v7524_v25 = vadd.f32 %v8425_v23, %v16467_v2 }
 0xbb7   :  { %v16575_v54 = vadd.f32 %v8537_v29, %v7524_v25  ;;  %v8426_v58 = vpop.f32.mrb[44].mxu1 }
 0xbb8   :  { %v8538_v35 = vpop.f32.mrb[76].mxu0  ;;  %v8427_v49 = vpop.f32.mrb[45].mxu1 }
 0xbb9   :  { %v8539_v22 = vpop.f32.mrb[77].mxu0  ;;  %v8428_v9 = vadd.f32 %v8427_v49, %v8426_v58  ;;  %v8429_v31 = vpop.f32.mrb[46].mxu1 }
 0xbba   :  { %v8540_v1 = vadd.f32 %v8539_v22, %v8538_v35  ;;  %v8541_v13 = vpop.f32.mrb[78].mxu0  ;;  %v8430_v24 = vpop.f32.mrb[47].mxu1 }
 0xbbb   :  { %v8542_v62 = vpop.f32.mrb[79].mxu0  ;;  %v7529_v48 = vadd.f32 %v8428_v9, %v16467_v2  ;;  %v8431_v47 = vadd.f32 %v8430_v24, %v8429_v31 }
 0xbbc   :  { %v8543_v37 = vadd.f32 %v8542_v62, %v8541_v13 }
 0xbbd   :  { %v16578_v11 = vadd.f32 %v8540_v1, %v7529_v48  ;;  %v7532_v17 = vadd.f32 %v8431_v47, %v16467_v2 }
 0xbbf   :  { %v16581_v59 = vadd.f32 %v8543_v37, %v7532_v17  ;;  %v8560_v5 = vpop.f32.mrb[48].mxu1 }
 0xbc0   :  { %v8672_v52 = vpop.f32.mrb[80].mxu0  ;;  %v8561_v34 = vpop.f32.mrb[49].mxu1 }
 0xbc1   :  { %v8673_v45 = vpop.f32.mrb[81].mxu0  ;;  %v8562_v42 = vadd.f32 %v8561_v34, %v8560_v5  ;;  %v8563_v3 = vpop.f32.mrb[50].mxu1 }
 0xbc2   :  { %v8674_v30 = vadd.f32 %v8673_v45, %v8672_v52  ;;  %v8675_v8 = vpop.f32.mrb[82].mxu0  ;;  %v8564_v60 = vpop.f32.mrb[51].mxu1 }
 0xbc3   :  { %v8676_v61 = vpop.f32.mrb[83].mxu0  ;;  %v7731_v6 = vadd.f32 %v8562_v42, %v16472_v53  ;;  %v8565_v57 = vadd.f32 %v8564_v60, %v8563_v3 }
 0xbc4   :  { %v8677_v50 = vadd.f32 %v8676_v61, %v8675_v8 }
 0xbc5   :  { %v7892_v15 = vadd.f32 %v8674_v30, %v7731_v6  ;;  %v7734_v23 = vadd.f32 %v8565_v57, %v16477_v56 }
 0xbc7   :  { %9333 = vtanh.f32 %v7892_v15  ;;  %v7895_v2 = vadd.f32 %v8677_v50, %v7734_v23  ;;  %v8566_v29 = vpop.f32.mrb[52].mxu1 }
 0xbc8   :  { %v8678_v25 = vpop.f32.mrb[84].mxu0  ;;  %v8567_v58 = vpop.f32.mrb[53].mxu1 }
 0xbc9   :  { %v8679_v35 = vpop.f32.mrb[85].mxu0  ;;  %9335 = vtanh.f32 %v7895_v2  ;;  %v8568_v49 = vadd.f32 %v8567_v58, %v8566_v29  ;;  %v8569_v9 = vpop.f32.mrb[54].mxu1 }
 0xbca   :  { %v8680_v22 = vadd.f32 %v8679_v35, %v8678_v25  ;;  %v8681_v1 = vpop.f32.mrb[86].mxu0  ;;  %v8570_v31 = vpop.f32.mrb[55].mxu1 }
 0xbcb   :  { %v8682_v13 = vpop.f32.mrb[87].mxu0  ;;  %v7739_v53 = vadd.f32 %v8568_v49, %v16482_v4  ;;  %v8571_v24 = vadd.f32 %v8570_v31, %v8569_v9 }
 0xbcc   :  { %v8683_v62 = vadd.f32 %v8682_v13, %v8681_v1 }
 0xbcd   :  { %v7900_v48 = vadd.f32 %v8680_v22, %v7739_v53  ;;  %v7742_v56 = vadd.f32 %v8571_v24, %v16487_v28 }
 0xbcf   :  { %9337 = vtanh.f32 %v7900_v48  ;;  %v7903_v47 = vadd.f32 %v8683_v62, %v7742_v56  ;;  %v8572_v37 = vpop.f32.mrb[56].mxu1 }
 0xbd0   :  { %v8684_v17 = vpop.f32.mrb[88].mxu0  ;;  %v8573_v5 = vpop.f32.mrb[57].mxu1 }
 0xbd1   :  { %v8685_v52 = vpop.f32.mrb[89].mxu0  ;;  %v9334_v34 = vpop.eup %9333  ;;  %9339 = vtanh.f32 %v7903_v47  ;;  %v8574_v45 = vadd.f32 %v8573_v5, %v8572_v37 }
 0xbd2   :  { %v8686_v42 = vadd.f32 %v8685_v52, %v8684_v17  ;;  %v8575_v30 = vpop.f32.mrb[58].mxu1  ;;  %v8687_v3 = vpop.f32.mrb[90].mxu0  ;;  %8050 = vst [vmem:[%s16721_s10] sm:$0xff] %v9334_v34 }
 0xbd3   :  { %v8576_v4 = vpop.f32.mrb[59].mxu1  ;;  %v8688_v8 = vpop.f32.mrb[91].mxu0  ;;  %v7747_v28 = vadd.f32 %v8574_v45, %v16492_v18 }
 0xbd4   :  { %v9336_v60 = vpop.eup %9335  ;;  %v8577_v61 = vadd.f32 %v8576_v4, %v8575_v30  ;;  %v8689_v6 = vadd.f32 %v8688_v8, %v8687_v3 }
 0xbd5   :  { %8051 = vst [vmem:[%s16721_s10 + $0x8] sm:$0xff] %v9336_v60  ;;  %v7908_v57 = vadd.f32 %v8686_v42, %v7747_v28 }
 0xbd6   :  { %v7750_v50 = vadd.f32 %v8577_v61, %v16497_v7 }
 0xbd7   :  { %9341 = vtanh.f32 %v7908_v57  ;;  %v8578_v23 = vpop.f32.mrb[60].mxu1 }
 0xbd8   :  { %v7911_v15 = vadd.f32 %v8689_v6, %v7750_v50  ;;  %v8690_v2 = vpop.f32.mrb[92].mxu0  ;;  %v8579_v29 = vpop.f32.mrb[61].mxu1 }
 0xbd9   :  { %v8691_v25 = vpop.f32.mrb[93].mxu0  ;;  %v9338_v58 = vpop.eup %9337  ;;  %v8580_v35 = vadd.f32 %v8579_v29, %v8578_v23 }
 0xbda   :  { %9343 = vtanh.f32 %v7911_v15  ;;  %v8692_v49 = vadd.f32 %v8691_v25, %v8690_v2  ;;  %v8581_v18 = vpop.f32.mrb[62].mxu1  ;;  %v8693_v22 = vpop.f32.mrb[94].mxu0  ;;  %8052 = vst [vmem:[%s16721_s10 + $0x10] sm:$0xff] %v9338_v58 }
 0xbdb   :  { %v8582_v9 = vpop.f32.mrb[63].mxu1  ;;  %v8694_v1 = vpop.f32.mrb[95].mxu0  ;;  %v7755_v7 = vadd.f32 %v8580_v35, %v16502_v26 }
 0xbdc   :  { %v9340_v31 = vpop.eup %9339  ;;  %v8583_v13 = vadd.f32 %v8582_v9, %v8581_v18  ;;  %v8695_v53 = vadd.f32 %v8694_v1, %v8693_v22 }
 0xbdd   :  { %8053 = vst [vmem:[%s16721_s10 + $0x18] sm:$0xff] %v9340_v31  ;;  %v7916_v24 = vadd.f32 %v8692_v49, %v7755_v7 }
 0xbde   :  { %v7758_v62 = vadd.f32 %v8583_v13, %v16507_v55 }
 0xbdf   :  { %9345 = vtanh.f32 %v7916_v24  ;;  %v8584_v56 = vpop.f32.mrb[64].mxu1 }
 0xbe0   :  { %v7919_v48 = vadd.f32 %v8695_v53, %v7758_v62  ;;  %v8696_v47 = vpop.f32.mrb[96].mxu0  ;;  %v8585_v37 = vpop.f32.mrb[65].mxu1 }
 0xbe1   :  { %v8697_v17 = vpop.f32.mrb[97].mxu0  ;;  %v9342_v5 = vpop.eup %9341  ;;  %v8586_v52 = vadd.f32 %v8585_v37, %v8584_v56 }
 0xbe2   :  { %9347 = vtanh.f32 %v7919_v48  ;;  %v8698_v34 = vadd.f32 %v8697_v17, %v8696_v47  ;;  %v8587_v26 = vpop.f32.mrb[66].mxu1  ;;  %v8699_v45 = vpop.f32.mrb[98].mxu0  ;;  %8054 = vst [vmem:[%s16721_s10 + $0x20] sm:$0xff] %v9342_v5 }
 0xbe3   :  { %v8588_v42 = vpop.f32.mrb[67].mxu1  ;;  %v8700_v30 = vpop.f32.mrb[99].mxu0  ;;  %v7763_v55 = vadd.f32 %v8586_v52, %v16512_v39 }
 0xbe4   :  { %v9344_v3 = vpop.eup %9343  ;;  %v8589_v4 = vadd.f32 %v8588_v42, %v8587_v26  ;;  %v8701_v8 = vadd.f32 %v8700_v30, %v8699_v45 }
 0xbe5   :  { %8055 = vst [vmem:[%s16721_s10 + $0x28] sm:$0xff] %v9344_v3  ;;  %v7924_v60 = vadd.f32 %v8698_v34, %v7763_v55 }
 0xbe6   :  { %v7766_v28 = vadd.f32 %v8589_v4, %v16515_v12 }
 0xbe7   :  { %9349 = vtanh.f32 %v7924_v60  ;;  %v8590_v6 = vpop.f32.mrb[68].mxu1 }
 0xbe8   :  { %v7927_v61 = vadd.f32 %v8701_v8, %v7766_v28  ;;  %v8702_v57 = vpop.f32.mrb[100].mxu0  ;;  %v8591_v50 = vpop.f32.mrb[69].mxu1 }
 0xbe9   :  { %v8703_v15 = vpop.f32.mrb[101].mxu0  ;;  %v9346_v23 = vpop.eup %9345  ;;  %v8592_v2 = vadd.f32 %v8591_v50, %v8590_v6 }
 0xbea   :  { %9351 = vtanh.f32 %v7927_v61  ;;  %v8704_v29 = vadd.f32 %v8703_v15, %v8702_v57  ;;  %v8593_v39 = vpop.f32.mrb[70].mxu1  ;;  %v8705_v25 = vpop.f32.mrb[102].mxu0  ;;  %8056 = vst [vmem:[%s16721_s10 + $0x30] sm:$0xff] %v9346_v23 }
 0xbeb   :  { %v8594_v58 = vpop.f32.mrb[71].mxu1  ;;  %v8706_v35 = vpop.f32.mrb[103].mxu0  ;;  %v7771_v12 = vadd.f32 %v8592_v2, %v16518_v51 }
 0xbec   :  { %v9348_v49 = vpop.eup %9347  ;;  %v8595_v18 = vadd.f32 %v8594_v58, %v8593_v39  ;;  %v8707_v22 = vadd.f32 %v8706_v35, %v8705_v25 }
 0xbed   :  { %8057 = vst [vmem:[%s16721_s10 + $0x38] sm:$0xff] %v9348_v49  ;;  %v7932_v9 = vadd.f32 %v8704_v29, %v7771_v12 }
 0xbee   :  { %v7774_v1 = vadd.f32 %v8595_v18, %v16521_v16 }
 0xbef   :  { %9353 = vtanh.f32 %v7932_v9  ;;  %v8596_v7 = vpop.f32.mrb[72].mxu1 }
 0xbf0   :  { %v7935_v31 = vadd.f32 %v8707_v22, %v7774_v1  ;;  %v8708_v13 = vpop.f32.mrb[104].mxu0  ;;  %v8597_v53 = vpop.f32.mrb[73].mxu1 }
 0xbf1   :  { %v8709_v24 = vpop.f32.mrb[105].mxu0  ;;  %v9350_v62 = vpop.eup %9349  ;;  %v8598_v48 = vadd.f32 %v8597_v53, %v8596_v7 }
 0xbf2   :  { %9355 = vtanh.f32 %v7935_v31  ;;  %v8710_v56 = vadd.f32 %v8709_v24, %v8708_v13  ;;  %v8599_v51 = vpop.f32.mrb[74].mxu1  ;;  %v8711_v47 = vpop.f32.mrb[106].mxu0  ;;  %8058 = vst [vmem:[%s16721_s10 + $0x40] sm:$0xff] %v9350_v62 }
 0xbf3   :  { %v8600_v37 = vpop.f32.mrb[75].mxu1  ;;  %v8712_v17 = vpop.f32.mrb[107].mxu0  ;;  %v7779_v16 = vadd.f32 %v8598_v48, %v16524_v19 }
 0xbf4   :  { %v9352_v5 = vpop.eup %9351  ;;  %v8601_v52 = vadd.f32 %v8600_v37, %v8599_v51  ;;  %v8713_v34 = vadd.f32 %v8712_v17, %v8711_v47 }
 0xbf5   :  { %8059 = vst [vmem:[%s16721_s10 + $0x48] sm:$0xff] %v9352_v5  ;;  %v7940_v26 = vadd.f32 %v8710_v56, %v7779_v16 }
 0xbf6   :  { %v7782_v45 = vadd.f32 %v8601_v52, %v16527_v41 }
 0xbf7   :  { %9357 = vtanh.f32 %v7940_v26  ;;  %v8602_v30 = vpop.f32.mrb[76].mxu1 }
 0xbf8   :  { %v7943_v42 = vadd.f32 %v8713_v34, %v7782_v45  ;;  %v8714_v3 = vpop.f32.mrb[108].mxu0  ;;  %v8603_v55 = vpop.f32.mrb[77].mxu1 }
 0xbf9   :  { %v8715_v4 = vpop.f32.mrb[109].mxu0  ;;  %v9354_v8 = vpop.eup %9353  ;;  %v8604_v60 = vadd.f32 %v8603_v55, %v8602_v30 }
 0xbfa   :  { %9359 = vtanh.f32 %v7943_v42  ;;  %v8716_v28 = vadd.f32 %v8715_v4, %v8714_v3  ;;  %v8605_v19 = vpop.f32.mrb[78].mxu1  ;;  %v8717_v61 = vpop.f32.mrb[110].mxu0  ;;  %8060 = vst [vmem:[%s16721_s10 + $0x50] sm:$0xff] %v9354_v8 }
 0xbfb   :  { %v8606_v6 = vpop.f32.mrb[79].mxu1  ;;  %v8718_v57 = vpop.f32.mrb[111].mxu0  ;;  %v7787_v41 = vadd.f32 %v8604_v60, %v16530_v44 }
 0xbfc   :  { %v9356_v50 = vpop.eup %9355  ;;  %v8607_v15 = vadd.f32 %v8606_v6, %v8605_v19  ;;  %v8719_v23 = vadd.f32 %v8718_v57, %v8717_v61 }
 0xbfd   :  { %8061 = vst [vmem:[%s16721_s10 + $0x58] sm:$0xff] %v9356_v50  ;;  %v7948_v2 = vadd.f32 %v8716_v28, %v7787_v41 }
 0xbfe   :  { %v7790_v29 = vadd.f32 %v8607_v15, %v16533_v14 }
 0xbff   :  { %9361 = vtanh.f32 %v7948_v2  ;;  %v8608_v25 = vpop.f32.mrb[80].mxu1 }
 0xc00   :  { %v7951_v39 = vadd.f32 %v8719_v23, %v7790_v29  ;;  %v8720_v58 = vpop.f32.mrb[112].mxu0  ;;  %v8609_v35 = vpop.f32.mrb[81].mxu1 }
 0xc01   :  { %v8721_v49 = vpop.f32.mrb[113].mxu0  ;;  %v9358_v12 = vpop.eup %9357  ;;  %v8610_v18 = vadd.f32 %v8609_v35, %v8608_v25 }
 0xc02   :  { %9363 = vtanh.f32 %v7951_v39  ;;  %v8722_v22 = vadd.f32 %v8721_v49, %v8720_v58  ;;  %v8611_v44 = vpop.f32.mrb[82].mxu1  ;;  %v8723_v9 = vpop.f32.mrb[114].mxu0  ;;  %8062 = vst [vmem:[%s16721_s10 + $0x60] sm:$0xff] %v9358_v12 }
 0xc03   :  { %v8612_v1 = vpop.f32.mrb[83].mxu1  ;;  %v8724_v31 = vpop.f32.mrb[115].mxu0  ;;  %v7795_v14 = vadd.f32 %v8610_v18, %v16536_v63 }
 0xc04   :  { %v9360_v7 = vpop.eup %9359  ;;  %v8613_v13 = vadd.f32 %v8612_v1, %v8611_v44  ;;  %v8725_v53 = vadd.f32 %v8724_v31, %v8723_v9 }
 0xc05   :  { %8063 = vst [vmem:[%s16721_s10 + $0x68] sm:$0xff] %v9360_v7  ;;  %v7956_v24 = vadd.f32 %v8722_v22, %v7795_v14 }
 0xc06   :  { %v7798_v62 = vadd.f32 %v8613_v13, %v16539_v38 }
 0xc07   :  { %9365 = vtanh.f32 %v7956_v24  ;;  %v8614_v56 = vpop.f32.mrb[84].mxu1 }
 0xc08   :  { %v7959_v48 = vadd.f32 %v8725_v53, %v7798_v62  ;;  %v8726_v51 = vpop.f32.mrb[116].mxu0  ;;  %v8615_v47 = vpop.f32.mrb[85].mxu1 }
 0xc09   :  { %v8727_v37 = vpop.f32.mrb[117].mxu0  ;;  %v9362_v17 = vpop.eup %9361  ;;  %v8616_v5 = vadd.f32 %v8615_v47, %v8614_v56 }
 0xc0a   :  { %9367 = vtanh.f32 %v7959_v48  ;;  %v8728_v16 = vadd.f32 %v8727_v37, %v8726_v51  ;;  %v8617_v63 = vpop.f32.mrb[86].mxu1  ;;  %v8729_v52 = vpop.f32.mrb[118].mxu0  ;;  %8064 = vst [vmem:[%s16721_s10 + $0x70] sm:$0xff] %v9362_v17 }
 0xc0b   :  { %v8618_v34 = vpop.f32.mrb[87].mxu1  ;;  %v8730_v26 = vpop.f32.mrb[119].mxu0  ;;  %v7803_v38 = vadd.f32 %v8616_v5, %v16542_v36 }
 0xc0c   :  { %v9364_v45 = vpop.eup %9363  ;;  %v8619_v42 = vadd.f32 %v8618_v34, %v8617_v63  ;;  %v8731_v30 = vadd.f32 %v8730_v26, %v8729_v52 }
 0xc0d   :  { %8065 = vst [vmem:[%s16721_s10 + $0x78] sm:$0xff] %v9364_v45  ;;  %v7964_v3 = vadd.f32 %v8728_v16, %v7803_v38 }
 0xc0e   :  { %v7806_v55 = vadd.f32 %v8619_v42, %v16545_v40 }
 0xc0f   :  { %9369 = vtanh.f32 %v7964_v3  ;;  %v8620_v8 = vpop.f32.mrb[88].mxu1 }
 0xc10   :  { %v7967_v4 = vadd.f32 %v8731_v30, %v7806_v55  ;;  %v8732_v60 = vpop.f32.mrb[120].mxu0  ;;  %v8621_v28 = vpop.f32.mrb[89].mxu1 }
 0xc11   :  { %v8733_v19 = vpop.f32.mrb[121].mxu0  ;;  %v9366_v61 = vpop.eup %9365  ;;  %v8622_v6 = vadd.f32 %v8621_v28, %v8620_v8 }
 0xc12   :  { %9371 = vtanh.f32 %v7967_v4  ;;  %v8734_v57 = vadd.f32 %v8733_v19, %v8732_v60  ;;  %v8623_v36 = vpop.f32.mrb[90].mxu1  ;;  %v8735_v50 = vpop.f32.mrb[122].mxu0  ;;  %8066 = vst [vmem:[%s16721_s10 + $0x80] sm:$0xff] %v9366_v61 }
 0xc13   :  { %v8624_v41 = vpop.f32.mrb[91].mxu1  ;;  %v8736_v15 = vpop.f32.mrb[123].mxu0  ;;  %v7811_v40 = vadd.f32 %v8622_v6, %v16548_v21 }
 0xc14   :  { %v9368_v23 = vpop.eup %9367  ;;  %v8625_v2 = vadd.f32 %v8624_v41, %v8623_v36  ;;  %v8737_v29 = vadd.f32 %v8736_v15, %v8735_v50 }
 0xc15   :  { %8067 = vst [vmem:[%s16721_s10 + $0x88] sm:$0xff] %v9368_v23  ;;  %v7972_v39 = vadd.f32 %v8734_v57, %v7811_v40 }
 0xc16   :  { %v7814_v25 = vadd.f32 %v8625_v2, %v16551_v0 }
 0xc17   :  { %9373 = vtanh.f32 %v7972_v39  ;;  %v8626_v35 = vpop.f32.mrb[92].mxu1 }
 0xc18   :  { %v7975_v58 = vadd.f32 %v8737_v29, %v7814_v25  ;;  %v8738_v49 = vpop.f32.mrb[124].mxu0  ;;  %v8627_v12 = vpop.f32.mrb[93].mxu1 }
 0xc19   :  { %v8739_v18 = vpop.f32.mrb[125].mxu0  ;;  %v9370_v22 = vpop.eup %9369  ;;  %v8628_v44 = vadd.f32 %v8627_v12, %v8626_v35 }
 0xc1a   :  { %9375 = vtanh.f32 %v7975_v58  ;;  %v8740_v9 = vadd.f32 %v8739_v18, %v8738_v49  ;;  %v8629_v21 = vpop.f32.mrb[94].mxu1  ;;  %v8741_v1 = vpop.f32.mrb[126].mxu0  ;;  %8068 = vst [vmem:[%s16721_s10 + $0x90] sm:$0xff] %v9370_v22 }
 0xc1b   :  { %v8630_v31 = vpop.f32.mrb[95].mxu1  ;;  %v8742_v7 = vpop.f32.mrb[127].mxu0  ;;  %v7819_v0 = vadd.f32 %v8628_v44, %v16554_v32 }
 0xc1c   :  { %v9372_v14 = vpop.eup %9371  ;;  %v8631_v13 = vadd.f32 %v8630_v31, %v8629_v21  ;;  %v8743_v53 = vadd.f32 %v8742_v7, %v8741_v1 }
 0xc1d   :  { %8069 = vst [vmem:[%s16721_s10 + $0x98] sm:$0xff] %v9372_v14  ;;  %v7980_v24 = vadd.f32 %v8740_v9, %v7819_v0 }
 0xc1e   :  { %v7822_v62 = vadd.f32 %v8631_v13, %v16557_v33 }
 0xc1f   :  { %9377 = vtanh.f32 %v7980_v24  ;;  %v8632_v56 = vpop.f32.mrb[96].mxu1 }
 0xc20   :  { %v7983_v48 = vadd.f32 %v8743_v53, %v7822_v62  ;;  %v8744_v51 = vpop.f32.mrb[128].mxu0  ;;  %v8633_v47 = vpop.f32.mrb[97].mxu1 }
 0xc21   :  { %v8745_v37 = vpop.f32.mrb[129].mxu0  ;;  %v9374_v17 = vpop.eup %9373  ;;  %v8634_v5 = vadd.f32 %v8633_v47, %v8632_v56 }
 0xc22   :  { %9379 = vtanh.f32 %v7983_v48  ;;  %v8746_v16 = vadd.f32 %v8745_v37, %v8744_v51  ;;  %v8635_v32 = vpop.f32.mrb[98].mxu1  ;;  %v8747_v63 = vpop.f32.mrb[130].mxu0  ;;  %8070 = vst [vmem:[%s16721_s10 + $0xa0] sm:$0xff] %v9374_v17 }
 0xc23   :  { %v8636_v52 = vpop.f32.mrb[99].mxu1  ;;  %v8748_v34 = vpop.f32.mrb[131].mxu0  ;;  %v7827_v33 = vadd.f32 %v8634_v5, %v16560_v27 }
 0xc24   :  { %v9376_v26 = vpop.eup %9375  ;;  %v8637_v45 = vadd.f32 %v8636_v52, %v8635_v32  ;;  %v8749_v38 = vadd.f32 %v8748_v34, %v8747_v63 }
 0xc25   :  { %8071 = vst [vmem:[%s16721_s10 + $0xa8] sm:$0xff] %v9376_v26  ;;  %v7988_v42 = vadd.f32 %v8746_v16, %v7827_v33 }
 0xc26   :  { %v7830_v30 = vadd.f32 %v8637_v45, %v16563_v46 }
 0xc27   :  { %9381 = vtanh.f32 %v7988_v42  ;;  %v8638_v55 = vpop.f32.mrb[100].mxu1 }
 0xc28   :  { %v7991_v3 = vadd.f32 %v8749_v38, %v7830_v30  ;;  %v8750_v4 = vpop.f32.mrb[132].mxu0  ;;  %v8639_v8 = vpop.f32.mrb[101].mxu1 }
 0xc29   :  { %v8751_v60 = vpop.f32.mrb[133].mxu0  ;;  %v9378_v28 = vpop.eup %9377  ;;  %v8640_v19 = vadd.f32 %v8639_v8, %v8638_v55 }
 0xc2a   :  { %9383 = vtanh.f32 %v7991_v3  ;;  %v8752_v61 = vadd.f32 %v8751_v60, %v8750_v4  ;;  %v8641_v27 = vpop.f32.mrb[102].mxu1  ;;  %v8753_v6 = vpop.f32.mrb[134].mxu0  ;;  %8072 = vst [vmem:[%s16721_s10 + $0xb0] sm:$0xff] %v9378_v28 }
 0xc2b   :  { %v8642_v57 = vpop.f32.mrb[103].mxu1  ;;  %v8754_v36 = vpop.f32.mrb[135].mxu0  ;;  %v7835_v46 = vadd.f32 %v8640_v19, %v16566_v43 }
 0xc2c   :  { %v9380_v50 = vpop.eup %9379  ;;  %v8643_v41 = vadd.f32 %v8642_v57, %v8641_v27  ;;  %v8755_v15 = vadd.f32 %v8754_v36, %v8753_v6 }
 0xc2d   :  { %8073 = vst [vmem:[%s16721_s10 + $0xb8] sm:$0xff] %v9380_v50  ;;  %v7996_v23 = vadd.f32 %v8752_v61, %v7835_v46 }
 0xc2e   :  { %v7838_v40 = vadd.f32 %v8643_v41, %v16569_v20 }
 0xc2f   :  { %9385 = vtanh.f32 %v7996_v23  ;;  %v8644_v29 = vpop.f32.mrb[104].mxu1 }
 0xc30   :  { %v7999_v2 = vadd.f32 %v8755_v15, %v7838_v40  ;;  %v8756_v39 = vpop.f32.mrb[136].mxu0  ;;  %v8645_v25 = vpop.f32.mrb[105].mxu1 }
 0xc31   :  { %v8757_v58 = vpop.f32.mrb[137].mxu0  ;;  %v9382_v35 = vpop.eup %9381  ;;  %v8646_v49 = vadd.f32 %v8645_v25, %v8644_v29 }
 0xc32   :  { %9387 = vtanh.f32 %v7999_v2  ;;  %v8758_v12 = vadd.f32 %v8757_v58, %v8756_v39  ;;  %v8647_v43 = vpop.f32.mrb[106].mxu1  ;;  %v8759_v18 = vpop.f32.mrb[138].mxu0  ;;  %8074 = vst [vmem:[%s16721_s10 + $0xc0] sm:$0xff] %v9382_v35 }
 0xc33   :  { %v8648_v22 = vpop.f32.mrb[107].mxu1  ;;  %v8760_v44 = vpop.f32.mrb[139].mxu0  ;;  %v7843_v20 = vadd.f32 %v8646_v49, %v16572_v10 }
 0xc34   :  { %v9384_v9 = vpop.eup %9383  ;;  %v8649_v21 = vadd.f32 %v8648_v22, %v8647_v43  ;;  %v8761_v1 = vadd.f32 %v8760_v44, %v8759_v18 }
 0xc35   :  { %8075 = vst [vmem:[%s16721_s10 + $0xc8] sm:$0xff] %v9384_v9  ;;  %v8004_v31 = vadd.f32 %v8758_v12, %v7843_v20 }
 0xc36   :  { %v7846_v7 = vadd.f32 %v8649_v21, %v16575_v54 }
 0xc37   :  { %9389 = vtanh.f32 %v8004_v31  ;;  %v8650_v0 = vpop.f32.mrb[108].mxu1 }
 0xc38   :  { %v8007_v14 = vadd.f32 %v8761_v1, %v7846_v7  ;;  %v8762_v13 = vpop.f32.mrb[140].mxu0  ;;  %v8651_v53 = vpop.f32.mrb[109].mxu1 }
 0xc39   :  { %v8763_v24 = vpop.f32.mrb[141].mxu0  ;;  %v9386_v62 = vpop.eup %9385  ;;  %v8652_v48 = vadd.f32 %v8651_v53, %v8650_v0 }
 0xc3a   :  { %9391 = vtanh.f32 %v8007_v14  ;;  %v8764_v56 = vadd.f32 %v8763_v24, %v8762_v13  ;;  %v8653_v10 = vpop.f32.mrb[110].mxu1  ;;  %v8765_v51 = vpop.f32.mrb[142].mxu0  ;;  %8076 = vst [vmem:[%s16721_s10 + $0xd0] sm:$0xff] %v9386_v62 }
 0xc3b   :  { %v8654_v47 = vpop.f32.mrb[111].mxu1  ;;  %v8766_v37 = vpop.f32.mrb[143].mxu0  ;;  %v7851_v54 = vadd.f32 %v8652_v48, %v16578_v11 }
 0xc3c   :  { %v9388_v17 = vpop.eup %9387  ;;  %v8655_v5 = vadd.f32 %v8654_v47, %v8653_v10  ;;  %v8767_v16 = vadd.f32 %v8766_v37, %v8765_v51 }
 0xc3d   :  { %8077 = vst [vmem:[%s16721_s10 + $0xd8] sm:$0xff] %v9388_v17  ;;  %v8012_v32 = vadd.f32 %v8764_v56, %v7851_v54 }
 0xc3e   :  { %v7854_v63 = vadd.f32 %v8655_v5, %v16581_v59 }
 0xc3f   :  { %9393 = vtanh.f32 %v8012_v32 }
 0xc40   :  { %v8015_v52 = vadd.f32 %v8767_v16, %v7854_v63 }
 0xc41   :  { %v9390_v34 = vpop.eup %9389 }
 0xc42   :  { %9395 = vtanh.f32 %v8015_v52  ;;  %8078 = vst [vmem:[%s16721_s10 + $0xe0] sm:$0xff] %v9390_v34 }
 0xc44   :  { %v9392_v26 = vpop.eup %9391 }
 0xc45   :  { %8079 = vst [vmem:[%s16721_s10 + $0xe8] sm:$0xff] %v9392_v26 }
 0xc49   :  { %v9394_v11 = vpop.eup %9393 }
 0xc4a   :  { %8080 = vst [vmem:[%s16721_s10 + $0xf0] sm:$0xff] %v9394_v11 }
 0xc4c   :  { %v9396_v33 = vpop.eup %9395 }
 0xc4d   :  { %8081 = vst [vmem:[%s16721_s10 + $0xf8] sm:$0xff] %v9396_v33 }
 0xc4e   :  { %8086 = vsyncpa [#allocation6], 1 }
 0xc4f   :  { %8087 = vsyncmov [#allocation4] }
 0xc52   :  { %s8088_s6 = vpop.sfrf %8087 }
 0xc53   :  { %p8266_p2 = scmp.ne.s32.totalorder %s8088_s6, 0 }
 0xc55   :  { %8092 = shalt.err (%p8266_p2)  }
 0xc56   :  { %8094 = vsyncmov [#allocation4 + $0x1] }
 0xc59   :  { %s8095_s27 = vpop.sfrf %8094 }
 0xc5a   :  { %p8267_p3 = scmp.ne.s32.totalorder %s8095_s27, 0 }
 0xc5c   :  { %8099 = shalt.err (%p8267_p3)  }

</bundles_post_ra>
